<compile_context>
chip_gen: v7x
topology: tpu7x:2x2x1
jax: 0.10.0
libtpu: 0.0.40
codegen_flags: <defaults>
</compile_context>

<pallas_src>
import functools

import numpy as np
import jax
import jax.numpy as jnp
from jax.experimental import pallas as pl
from jax.experimental.pallas import tpu as pltpu

MAX_DISP = 4
NEIGH = 2 * MAX_DISP + 1      # 9
NDISP = NEIGH * NEIGH         # 81
_ROW_GROUP = 8                # sublane-aligned grouped stores of correlation rows
_SOFTMAX_CHUNK = 32           # sublane-aligned (multiple of 8) softmax chunks


def _round_up(x, m):
    return ((x + m - 1) // m) * m


def _pick_lane_tile(n):
    """Largest 128-multiple tile (<=1024) that divides N; else the full N."""
    for t in (1024, 512, 256, 128):
        if n % t == 0:
            return t
    return n


def local_atten_kernel(xcoord_ref, x_ref, y_ref, wk_ref, bk_ref, wq_ref, bq_ref,
                       out_ref, kbuf_ref, *, H, W, lane_tile):
    # xcoord_ref : (1, N) int32   x coordinate (i mod W) per flattened pixel
    # x_ref      : (1, C, N)      key feature map, channel-first, N = H*W on lanes
    # y_ref      : (1, C, N)      nonkey feature map
    # wk/wq      : (C4, C)        1x1 conv weights;  bk/bq: (C4, 1)
    # out_ref    : (1, 81, N)     softmaxed local attention (lane-dense)
    # kbuf_ref   : (C4, N+2*MARG) VMEM scratch: flat key projection with zero margins
    C4 = wk_ref.shape[0]
    N = x_ref.shape[2]
    NK = kbuf_ref.shape[1]
    MARG = (NK - N) // 2            # 128-aligned zero margin on each side
    T = lane_tile
    n_tiles = N // T                # lane_tile always divides N (wrapper guarantees)

    # Zero only the two margins (scratch persists; center is fully overwritten below).
    kbuf_ref[:, 0:MARG] = jnp.zeros((C4, MARG), jnp.float32)
    kbuf_ref[:, MARG + N:NK] = jnp.zeros((C4, MARG), jnp.float32)

    # Key projection: (C4, C) @ (C, T) MXU matmuls, straight into the padded buffer.
    for ti in range(n_tiles):
        t0 = ti * T
        k = jnp.dot(wk_ref[...], x_ref[0, :, t0:t0 + T],
                    preferred_element_type=jnp.float32) + bk_ref[...]
        kbuf_ref[:, MARG + t0:MARG + t0 + T] = k

    inv_c4 = 1.0 / C4

    for ti in range(n_tiles):
        t0 = ti * T

        # Query projection for this lane tile only; fold 1/C4 normalization into q.
        q = jnp.dot(wq_ref[...], y_ref[0, :, t0:t0 + T],
                    preferred_element_type=jnp.float32) + bq_ref[...]
        q = q * inv_c4

        # Validity masks built in-kernel (replace the old (81, N) f32 mask input):
        #   y bounds -> compare of global flat index (iota), x bounds -> xcoord row.
        xc = xcoord_ref[:, t0:t0 + T]                                   # (1, T) int32
        gi = jax.lax.broadcasted_iota(jnp.int32, (1, T), 1) + t0        # flat index
        xmasks, ymasks = {}, {}
        for dx in range(-MAX_DISP, MAX_DISP + 1):
            if dx < 0:
                xmasks[dx] = xc >= -dx
            elif dx > 0:
                xmasks[dx] = xc < (W - dx)
            else:
                xmasks[dx] = None
        for dy in range(-MAX_DISP, MAX_DISP + 1):
            if dy < 0:
                ymasks[dy] = gi >= (-dy) * W
            elif dy > 0:
                ymasks[dy] = gi < (H - dy) * W
            else:
                ymasks[dy] = None

        # Correlation: one wide (C4, T+8) key slab load per dy; the 9 dx taps are
        # static lane slices of the register-resident slab (no per-tap VMEM load).
        m = jnp.full((1, T), -jnp.inf, dtype=jnp.float32)
        pending = []
        d_base = 0
        for dy in range(-MAX_DISP, MAX_DISP + 1):
            w0 = MARG + dy * W + t0 - MAX_DISP
            slab = kbuf_ref[:, w0:w0 + T + 2 * MAX_DISP]                # (C4, T+8)
            ym = ymasks[dy]
            for dx in range(-MAX_DISP, MAX_DISP + 1):
                shifted = slab[:, MAX_DISP + dx:MAX_DISP + dx + T]      # (C4, T)
                row = jnp.sum(q * shifted, axis=0, keepdims=True)       # (1, T)
                xm = xmasks[dx]
                if ym is not None and xm is not None:
                    valid = jnp.logical_and(ym, xm)
                elif ym is not None:
                    valid = ym
                else:
                    valid = xm
                if valid is not None:
                    row = jnp.where(valid, row, 0.0)                    # zero padding
                m = jnp.maximum(m, row)
                pending.append(row)
                if len(pending) == _ROW_GROUP:                          # 8-row store
                    blk = jnp.concatenate(pending, axis=0)              # (8, T)
                    out_ref[0, d_base:d_base + _ROW_GROUP, t0:t0 + T] = blk
                    d_base += _ROW_GROUP
                    pending = []
        if pending:                                                     # last row (81st)
            blk = pending[0] if len(pending) == 1 else jnp.concatenate(pending, axis=0)
            out_ref[0, d_base:d_base + len(pending), t0:t0 + T] = blk

        # Softmax over the 81 displacement rows, in place, sublane-aligned chunks.
        s = jnp.zeros((1, T), dtype=jnp.float32)
        for c0 in range(0, NDISP, _SOFTMAX_CHUNK):
            csz = min(_SOFTMAX_CHUNK, NDISP - c0)
            e = jnp.exp(out_ref[0, c0:c0 + csz, t0:t0 + T] - m)
            out_ref[0, c0:c0 + csz, t0:t0 + T] = e
            s = s + jnp.sum(e, axis=0, keepdims=True)
        inv = pl.reciprocal(s, approx=True)       # EUP approx reciprocal ...
        inv = inv * (2.0 - s * inv)               # ... + two Newton steps -> f32 accurate
        inv = inv * (2.0 - s * inv)
        for c0 in range(0, NDISP, _SOFTMAX_CHUNK):
            csz = min(_SOFTMAX_CHUNK, NDISP - c0)
            out_ref[0, c0:c0 + csz, t0:t0 + T] = (
                out_ref[0, c0:c0 + csz, t0:t0 + T] * inv)


@functools.partial(jax.jit, static_argnames=("channels_last",))
def local_atten(key_feat, nonkey_feat, wk, bk, wq, bq, *, channels_last=True):
    """key_feat/nonkey_feat: (B, C, H, W) NCHW (as in the PyTorch module).
    wk/wq: (C4, C) = torch Conv2d weight[:, :, 0, 0];  bk/bq: (C4,).
    channels_last=True  -> (B, H, W, 81), matching Local_Module.forward.
    channels_last=False -> (B, 81, H, W) kernel-native layout (skips one full HBM
    read+write pass; use when the consumer accepts channel-first)."""
    B, C, H, W = key_feat.shape
    C4 = wk.shape[0]
    N = H * W
    MARG = _round_up(MAX_DISP * W + MAX_DISP, 128)
    NK = N + 2 * MARG
    T = _pick_lane_tile(N)

    x = key_feat.reshape(B, C, N)        # channel-first, spatial flattened (lane-dense)
    y = nonkey_feat.reshape(B, C, N)
    xcoord = jnp.asarray(np.tile(np.arange(W, dtype=np.int32), H).reshape(1, N))

    # Scoped-VMEM budget from the real footprint (double-buffered blocks + scratch),
    # with headroom, capped at 64 MiB so it also fits v7x physical VMEM.
    block_elems = 2 * (2 * C * N + N + 2 * C4 * C + 2 * C4 + NDISP * N)
    footprint = 4 * (block_elems + C4 * NK)
    vmem_limit = int(min(64 * 1024 * 1024, max(2 * footprint, 32 * 1024 * 1024)))

    grid_spec = pltpu.PrefetchScalarGridSpec(
        num_scalar_prefetch=0,
        grid=(B,),
        in_specs=[
            pl.BlockSpec((1, N), lambda b: (0, 0)),         # x-coordinate row (int32)
            pl.BlockSpec((1, C, N), lambda b: (b, 0, 0)),   # key (x)
            pl.BlockSpec((1, C, N), lambda b: (b, 0, 0)),   # nonkey (y)
            pl.BlockSpec((C4, C), lambda b: (0, 0)),        # Wk
            pl.BlockSpec((C4, 1), lambda b: (0, 0)),        # bk
            pl.BlockSpec((C4, C), lambda b: (0, 0)),        # Wq
            pl.BlockSpec((C4, 1), lambda b: (0, 0)),        # bq
        ],
        out_specs=pl.BlockSpec((1, NDISP, N), lambda b: (b, 0, 0)),
        scratch_shapes=[pltpu.VMEM((C4, NK), jnp.float32)],
    )
    out = pl.pallas_call(
        functools.partial(local_atten_kernel, H=H, W=W, lane_tile=T),
        out_shape=jax.ShapeDtypeStruct((B, NDISP, N), jnp.float32),
        grid_spec=grid_spec,
        compiler_params=pltpu.CompilerParams(
            dimension_semantics=("parallel",),
            vmem_limit_bytes=vmem_limit),
    )(xcoord, x, y, wk, bk.reshape(C4, 1), wq, bq.reshape(C4, 1))

    out = out.reshape(B, NDISP, H, W)
    if channels_last:
        # Module interface layout (B, H, W, 81); costs one extra HBM pass.
        out = jnp.transpose(out, (0, 2, 3, 1))
    return out


def local_atten_reference(key_feat, nonkey_feat, wk, bk, wq, bq):
    """Plain-JAX reference mirroring the PyTorch forward (for the sanity check)."""
    k = jnp.einsum("bchw,dc->bdhw", key_feat, wk) + bk[None, :, None, None]
    q = jnp.einsum("bchw,dc->bdhw", nonkey_feat, wq) + bq[None, :, None, None]
    B, C4, H, W = k.shape
    kpad = jnp.pad(k, ((0, 0), (0, 0), (MAX_DISP, MAX_DISP), (MAX_DISP, MAX_DISP)))
    outs = []
    for d in range(NDISP):
        dy = d // NEIGH - MAX_DISP
        dx = d % NEIGH - MAX_DISP
        shifted = kpad[:, :, MAX_DISP + dy:MAX_DISP + dy + H,
                       MAX_DISP + dx:MAX_DISP + dx + W]
        outs.append(jnp.sum(q * shifted, axis=1) / C4)
    corr = jnp.stack(outs, axis=-1)          # (B, H, W, 81)
    return jax.nn.softmax(corr, axis=-1)


if __name__ == "__main__":
    # Small shapes consistent with the module: C = fc_dim (small demo), C4 = C // 4.
    B, C, H, W = 2, 32, 16, 16
    C4 = C // 4

    rng = jax.random.PRNGKey(0)
    k0, k1, k2, k3, k4, k5 = jax.random.split(rng, 6)

    key_feat = jax.random.normal(k0, (B, C, H, W), dtype=jnp.float32)
    nonkey_feat = jax.random.normal(k1, (B, C, H, W), dtype=jnp.float32)

    wk = 0.1 * jax.random.normal(k2, (C4, C), dtype=jnp.float32)
    bk = 0.1 * jax.random.normal(k3, (C4,), dtype=jnp.float32)
    wq = 0.1 * jax.random.normal(k4, (C4, C), dtype=jnp.float32)
    bq = 0.1 * jax.random.normal(k5, (C4,), dtype=jnp.float32)

    out = jax.block_until_ready(local_atten(key_feat, nonkey_feat, wk, bk, wq, bq))
    out_cf = jax.block_until_ready(
        local_atten(key_feat, nonkey_feat, wk, bk, wq, bq, channels_last=False))

    ref = local_atten_reference(key_feat, nonkey_feat, wk, bk, wq, bq)
    assert out.shape == (B, H, W, NDISP)
    assert out_cf.shape == (B, NDISP, H, W)
    assert bool(jnp.allclose(out, ref, atol=2e-5, rtol=2e-5)), "mismatch vs reference"
    assert bool(jnp.allclose(out_cf, jnp.transpose(ref, (0, 3, 1, 2)),
                             atol=2e-5, rtol=2e-5)), "channel-first mismatch"

    print("KERNEL_OK")
</pallas_src>

<mosaic_0001>
module attributes {stable_mosaic.version = 11 : i64} {
  func.func @local_atten_kernel(%arg0: i32, %arg1: memref<1x256xi32, #tpu.memory_space<vmem>>, %arg2: memref<1x32x256xf32, #tpu.memory_space<vmem>>, %arg3: memref<1x32x256xf32, #tpu.memory_space<vmem>>, %arg4: memref<8x32xf32, #tpu.memory_space<vmem>>, %arg5: memref<8x1xf32, #tpu.memory_space<vmem>>, %arg6: memref<8x32xf32, #tpu.memory_space<vmem>>, %arg7: memref<8x1xf32, #tpu.memory_space<vmem>>, %arg8: memref<1x81x256xf32, #tpu.memory_space<vmem>>, %arg9: memref<8x512xf32, #tpu.memory_space<vmem>>) attributes {dimension_semantics = [#tpu.dimension_semantics<parallel>], iteration_bounds = array<i64: 2>, scalar_prefetch = 0 : i64, scratch_operands = 1 : i64, tpu.core_type = #tpu.core_type<tc>, window_params = [{pipeline_mode = #tpu.pipeline_mode<synchronous>, transform_indices = @transform_0, window_bounds = array<i64: 1, 256>}, {transform_indices = @transform_1, window_bounds = array<i64: 1, 32, 256>}, {transform_indices = @transform_2, window_bounds = array<i64: 1, 32, 256>}, {pipeline_mode = #tpu.pipeline_mode<synchronous>, transform_indices = @transform_3, window_bounds = array<i64: 8, 32>}, {pipeline_mode = #tpu.pipeline_mode<synchronous>, transform_indices = @transform_4, window_bounds = array<i64: 8, 1>}, {pipeline_mode = #tpu.pipeline_mode<synchronous>, transform_indices = @transform_5, window_bounds = array<i64: 8, 32>}, {pipeline_mode = #tpu.pipeline_mode<synchronous>, transform_indices = @transform_6, window_bounds = array<i64: 8, 1>}, {transform_indices = @transform_7, window_bounds = array<i64: 1, 81, 256>}]} {
    %cst = arith.constant 0.000000e+00 : f32
    %0 = vector.broadcast %cst : f32 to vector<8x128xf32>
    %c0 = arith.constant 0 : index
    %c0_0 = arith.constant 0 : index
    %1 = vector.load %arg9[%c0, %c0_0] : memref<8x512xf32, #tpu.memory_space<vmem>>, vector<8x128xf32>
    tpu.vector_store %arg9[%c0, %c0_0], %0 {strides = array<i32>} : memref<8x512xf32, #tpu.memory_space<vmem>>, vector<8x128xf32>,
    %cst_1 = arith.constant 0.000000e+00 : f32
    %2 = vector.broadcast %cst_1 : f32 to vector<8x128xf32>
    %c0_2 = arith.constant 0 : index
    %c384 = arith.constant 384 : index
    %3 = vector.load %arg9[%c0_2, %c384] : memref<8x512xf32, #tpu.memory_space<vmem>>, vector<8x128xf32>
    tpu.vector_store %arg9[%c0_2, %c384], %2 {strides = array<i32>} : memref<8x512xf32, #tpu.memory_space<vmem>>, vector<8x128xf32>,
    %c0_3 = arith.constant 0 : index
    %c0_4 = arith.constant 0 : index
    %4 = vector.load %arg4[%c0_3, %c0_4] : memref<8x32xf32, #tpu.memory_space<vmem>>, vector<8x32xf32>
    %c0_5 = arith.constant 0 : index
    %c0_6 = arith.constant 0 : index
    %c0_7 = arith.constant 0 : index
    %5 = vector.load %arg2[%c0_5, %c0_6, %c0_7] : memref<1x32x256xf32, #tpu.memory_space<vmem>>, vector<1x32x256xf32>
    %6 = vector.shape_cast %5 : vector<1x32x256xf32> to vector<32x256xf32>
    %cst_8 = arith.constant dense<0.000000e+00> : vector<8x256xf32>
    %7 = tpu.matmul %4, %6, %cst_8 {dimension_numbers = #tpu.dot_dimension_numbers<[1], [0], [0], [1], [0, 0, 1, 1], [], []>} : vector<8x32xf32>, vector<32x256xf32>, vector<8x256xf32> -> vector<8x256xf32>
    %c0_9 = arith.constant 0 : index
    %c0_10 = arith.constant 0 : index
    %8 = vector.load %arg5[%c0_9, %c0_10] : memref<8x1xf32, #tpu.memory_space<vmem>>, vector<8x1xf32>
    %9 = vector.broadcast %8 : vector<8x1xf32> to vector<8x256xf32>
    %10 = arith.addf %7, %9 : vector<8x256xf32>
    %c0_11 = arith.constant 0 : index
    %c128 = arith.constant 128 : index
    %11 = vector.load %arg9[%c0_11, %c128] : memref<8x512xf32, #tpu.memory_space<vmem>>, vector<8x256xf32>
    tpu.vector_store %arg9[%c0_11, %c128], %10 {strides = array<i32>} : memref<8x512xf32, #tpu.memory_space<vmem>>, vector<8x256xf32>,
    %c0_12 = arith.constant 0 : index
    %c0_13 = arith.constant 0 : index
    %12 = vector.load %arg6[%c0_12, %c0_13] : memref<8x32xf32, #tpu.memory_space<vmem>>, vector<8x32xf32>
    %c0_14 = arith.constant 0 : index
    %c0_15 = arith.constant 0 : index
    %c0_16 = arith.constant 0 : index
    %13 = vector.load %arg3[%c0_14, %c0_15, %c0_16] : memref<1x32x256xf32, #tpu.memory_space<vmem>>, vector<1x32x256xf32>
    %14 = vector.shape_cast %13 : vector<1x32x256xf32> to vector<32x256xf32>
    %cst_17 = arith.constant dense<0.000000e+00> : vector<8x256xf32>
    %15 = tpu.matmul %12, %14, %cst_17 {dimension_numbers = #tpu.dot_dimension_numbers<[1], [0], [0], [1], [0, 0, 1, 1], [], []>} : vector<8x32xf32>, vector<32x256xf32>, vector<8x256xf32> -> vector<8x256xf32>
    %c0_18 = arith.constant 0 : index
    %c0_19 = arith.constant 0 : index
    %16 = vector.load %arg7[%c0_18, %c0_19] : memref<8x1xf32, #tpu.memory_space<vmem>>, vector<8x1xf32>
    %17 = vector.broadcast %16 : vector<8x1xf32> to vector<8x256xf32>
    %18 = arith.addf %15, %17 : vector<8x256xf32>
    %cst_20 = arith.constant 1.250000e-01 : f32
    %19 = vector.broadcast %cst_20 : f32 to vector<8x256xf32>
    %20 = arith.mulf %18, %19 : vector<8x256xf32>
    %c0_21 = arith.constant 0 : index
    %c0_22 = arith.constant 0 : index
    %21 = vector.load %arg1[%c0_21, %c0_22] : memref<1x256xi32, #tpu.memory_space<vmem>>, vector<1x256xi32>
    %22 = tpu.iota {dimensions = array<i32: 1>} : vector<1x256xi32>
    %c0_i32 = arith.constant 0 : i32
    %23 = vector.broadcast %c0_i32 : i32 to vector<1x256xi32>
    %24 = arith.addi %22, %23 : vector<1x256xi32>
    %c4_i32 = arith.constant 4 : i32
    %25 = vector.broadcast %c4_i32 : i32 to vector<1x256xi32>
    %26 = arith.cmpi sge, %21, %25 : vector<1x256xi32>
    %c3_i32 = arith.constant 3 : i32
    %27 = vector.broadcast %c3_i32 : i32 to vector<1x256xi32>
    %28 = arith.cmpi sge, %21, %27 : vector<1x256xi32>
    %c2_i32 = arith.constant 2 : i32
    %29 = vector.broadcast %c2_i32 : i32 to vector<1x256xi32>
    %30 = arith.cmpi sge, %21, %29 : vector<1x256xi32>
    %c1_i32 = arith.constant 1 : i32
    %31 = vector.broadcast %c1_i32 : i32 to vector<1x256xi32>
    %32 = arith.cmpi sge, %21, %31 : vector<1x256xi32>
    %c15_i32 = arith.constant 15 : i32
    %33 = vector.broadcast %c15_i32 : i32 to vector<1x256xi32>
    %34 = arith.cmpi slt, %21, %33 : vector<1x256xi32>
    %c14_i32 = arith.constant 14 : i32
    %35 = vector.broadcast %c14_i32 : i32 to vector<1x256xi32>
    %36 = arith.cmpi slt, %21, %35 : vector<1x256xi32>
    %c13_i32 = arith.constant 13 : i32
    %37 = vector.broadcast %c13_i32 : i32 to vector<1x256xi32>
    %38 = arith.cmpi slt, %21, %37 : vector<1x256xi32>
    %c12_i32 = arith.constant 12 : i32
    %39 = vector.broadcast %c12_i32 : i32 to vector<1x256xi32>
    %40 = arith.cmpi slt, %21, %39 : vector<1x256xi32>
    %c64_i32 = arith.constant 64 : i32
    %41 = vector.broadcast %c64_i32 : i32 to vector<1x256xi32>
    %42 = arith.cmpi sge, %24, %41 : vector<1x256xi32>
    %c48_i32 = arith.constant 48 : i32
    %43 = vector.broadcast %c48_i32 : i32 to vector<1x256xi32>
    %44 = arith.cmpi sge, %24, %43 : vector<1x256xi32>
    %c32_i32 = arith.constant 32 : i32
    %45 = vector.broadcast %c32_i32 : i32 to vector<1x256xi32>
    %46 = arith.cmpi sge, %24, %45 : vector<1x256xi32>
    %c16_i32 = arith.constant 16 : i32
    %47 = vector.broadcast %c16_i32 : i32 to vector<1x256xi32>
    %48 = arith.cmpi sge, %24, %47 : vector<1x256xi32>
    %c240_i32 = arith.constant 240 : i32
    %49 = vector.broadcast %c240_i32 : i32 to vector<1x256xi32>
    %50 = arith.cmpi slt, %24, %49 : vector<1x256xi32>
    %c224_i32 = arith.constant 224 : i32
    %51 = vector.broadcast %c224_i32 : i32 to vector<1x256xi32>
    %52 = arith.cmpi slt, %24, %51 : vector<1x256xi32>
    %c208_i32 = arith.constant 208 : i32
    %53 = vector.broadcast %c208_i32 : i32 to vector<1x256xi32>
    %54 = arith.cmpi slt, %24, %53 : vector<1x256xi32>
    %c192_i32 = arith.constant 192 : i32
    %55 = vector.broadcast %c192_i32 : i32 to vector<1x256xi32>
    %56 = arith.cmpi slt, %24, %55 : vector<1x256xi32>
    %cst_23 = arith.constant 0xFF800000 : f32
    %57 = vector.broadcast %cst_23 : f32 to vector<1x256xf32>
    %c0_24 = arith.constant 0 : index
    %c60 = arith.constant 60 : index
    %58 = vector.load %arg9[%c0_24, %c60] : memref<8x512xf32, #tpu.memory_space<vmem>>, vector<8x264xf32>
    %59 = vector.extract_strided_slice %58 {offsets = [0, 0], sizes = [8, 256], strides = [1, 1]} : vector<8x264xf32> to vector<8x256xf32>
    %60 = arith.mulf %20, %59 : vector<8x256xf32>
    %cst_25 = arith.constant dense<0.000000e+00> : vector<256xf32>
    %61 = vector.multi_reduction <add>, %60, %cst_25 [0] : vector<8x256xf32> to vector<256xf32>
    %62 = vector.shape_cast %61 : vector<256xf32> to vector<1x256xf32>
    %63 = arith.andi %42, %26 : vector<1x256xi1>
    %cst_26 = arith.constant 0.000000e+00 : f32
    %64 = vector.broadcast %cst_26 : f32 to vector<1x256xf32>
    %65 = arith.select %63, %62, %64 : vector<1x256xi1>, vector<1x256xf32>
    %66 = arith.maximumf %57, %65 : vector<1x256xf32>
    %67 = vector.extract_strided_slice %58 {offsets = [0, 1], sizes = [8, 256], strides = [1, 1]} : vector<8x264xf32> to vector<8x256xf32>
    %68 = arith.mulf %20, %67 : vector<8x256xf32>
    %cst_27 = arith.constant dense<0.000000e+00> : vector<256xf32>
    %69 = vector.multi_reduction <add>, %68, %cst_27 [0] : vector<8x256xf32> to vector<256xf32>
    %70 = vector.shape_cast %69 : vector<256xf32> to vector<1x256xf32>
    %71 = arith.andi %42, %28 : vector<1x256xi1>
    %cst_28 = arith.constant 0.000000e+00 : f32
    %72 = vector.broadcast %cst_28 : f32 to vector<1x256xf32>
    %73 = arith.select %71, %70, %72 : vector<1x256xi1>, vector<1x256xf32>
    %74 = arith.maximumf %66, %73 : vector<1x256xf32>
    %75 = vector.extract_strided_slice %58 {offsets = [0, 2], sizes = [8, 256], strides = [1, 1]} : vector<8x264xf32> to vector<8x256xf32>
    %76 = arith.mulf %20, %75 : vector<8x256xf32>
    %cst_29 = arith.constant dense<0.000000e+00> : vector<256xf32>
    %77 = vector.multi_reduction <add>, %76, %cst_29 [0] : vector<8x256xf32> to vector<256xf32>
    %78 = vector.shape_cast %77 : vector<256xf32> to vector<1x256xf32>
    %79 = arith.andi %42, %30 : vector<1x256xi1>
    %cst_30 = arith.constant 0.000000e+00 : f32
    %80 = vector.broadcast %cst_30 : f32 to vector<1x256xf32>
    %81 = arith.select %79, %78, %80 : vector<1x256xi1>, vector<1x256xf32>
    %82 = arith.maximumf %74, %81 : vector<1x256xf32>
    %83 = vector.extract_strided_slice %58 {offsets = [0, 3], sizes = [8, 256], strides = [1, 1]} : vector<8x264xf32> to vector<8x256xf32>
    %84 = arith.mulf %20, %83 : vector<8x256xf32>
    %cst_31 = arith.constant dense<0.000000e+00> : vector<256xf32>
    %85 = vector.multi_reduction <add>, %84, %cst_31 [0] : vector<8x256xf32> to vector<256xf32>
    %86 = vector.shape_cast %85 : vector<256xf32> to vector<1x256xf32>
    %87 = arith.andi %42, %32 : vector<1x256xi1>
    %cst_32 = arith.constant 0.000000e+00 : f32
    %88 = vector.broadcast %cst_32 : f32 to vector<1x256xf32>
    %89 = arith.select %87, %86, %88 : vector<1x256xi1>, vector<1x256xf32>
    %90 = arith.maximumf %82, %89 : vector<1x256xf32>
    %91 = vector.extract_strided_slice %58 {offsets = [0, 4], sizes = [8, 256], strides = [1, 1]} : vector<8x264xf32> to vector<8x256xf32>
    %92 = arith.mulf %20, %91 : vector<8x256xf32>
    %cst_33 = arith.constant dense<0.000000e+00> : vector<256xf32>
    %93 = vector.multi_reduction <add>, %92, %cst_33 [0] : vector<8x256xf32> to vector<256xf32>
    %94 = vector.shape_cast %93 : vector<256xf32> to vector<1x256xf32>
    %cst_34 = arith.constant 0.000000e+00 : f32
    %95 = vector.broadcast %cst_34 : f32 to vector<1x256xf32>
    %96 = arith.select %42, %94, %95 : vector<1x256xi1>, vector<1x256xf32>
    %97 = arith.maximumf %90, %96 : vector<1x256xf32>
    %98 = vector.extract_strided_slice %58 {offsets = [0, 5], sizes = [8, 256], strides = [1, 1]} : vector<8x264xf32> to vector<8x256xf32>
    %99 = arith.mulf %20, %98 : vector<8x256xf32>
    %cst_35 = arith.constant dense<0.000000e+00> : vector<256xf32>
    %100 = vector.multi_reduction <add>, %99, %cst_35 [0] : vector<8x256xf32> to vector<256xf32>
    %101 = vector.shape_cast %100 : vector<256xf32> to vector<1x256xf32>
    %102 = arith.andi %42, %34 : vector<1x256xi1>
    %cst_36 = arith.constant 0.000000e+00 : f32
    %103 = vector.broadcast %cst_36 : f32 to vector<1x256xf32>
    %104 = arith.select %102, %101, %103 : vector<1x256xi1>, vector<1x256xf32>
    %105 = arith.maximumf %97, %104 : vector<1x256xf32>
    %106 = vector.extract_strided_slice %58 {offsets = [0, 6], sizes = [8, 256], strides = [1, 1]} : vector<8x264xf32> to vector<8x256xf32>
    %107 = arith.mulf %20, %106 : vector<8x256xf32>
    %cst_37 = arith.constant dense<0.000000e+00> : vector<256xf32>
    %108 = vector.multi_reduction <add>, %107, %cst_37 [0] : vector<8x256xf32> to vector<256xf32>
    %109 = vector.shape_cast %108 : vector<256xf32> to vector<1x256xf32>
    %110 = arith.andi %42, %36 : vector<1x256xi1>
    %cst_38 = arith.constant 0.000000e+00 : f32
    %111 = vector.broadcast %cst_38 : f32 to vector<1x256xf32>
    %112 = arith.select %110, %109, %111 : vector<1x256xi1>, vector<1x256xf32>
    %113 = arith.maximumf %105, %112 : vector<1x256xf32>
    %114 = vector.extract_strided_slice %58 {offsets = [0, 7], sizes = [8, 256], strides = [1, 1]} : vector<8x264xf32> to vector<8x256xf32>
    %115 = arith.mulf %20, %114 : vector<8x256xf32>
    %cst_39 = arith.constant dense<0.000000e+00> : vector<256xf32>
    %116 = vector.multi_reduction <add>, %115, %cst_39 [0] : vector<8x256xf32> to vector<256xf32>
    %117 = vector.shape_cast %116 : vector<256xf32> to vector<1x256xf32>
    %118 = arith.andi %42, %38 : vector<1x256xi1>
    %cst_40 = arith.constant 0.000000e+00 : f32
    %119 = vector.broadcast %cst_40 : f32 to vector<1x256xf32>
    %120 = arith.select %118, %117, %119 : vector<1x256xi1>, vector<1x256xf32>
    %121 = arith.maximumf %113, %120 : vector<1x256xf32>
    %122 = tpu.concatenate %65, %73, %81, %89, %96, %104, %112, %120 in 0 : vector<1x256xf32>, vector<1x256xf32>, vector<1x256xf32>, vector<1x256xf32>, vector<1x256xf32>, vector<1x256xf32>, vector<1x256xf32>, vector<1x256xf32> -> vector<8x256xf32>
    %c0_41 = arith.constant 0 : index
    %c0_42 = arith.constant 0 : index
    %c0_43 = arith.constant 0 : index
    %123 = vector.load %arg8[%c0_41, %c0_42, %c0_43] : memref<1x81x256xf32, #tpu.memory_space<vmem>>, vector<1x8x256xf32>
    %124 = vector.shape_cast %123 : vector<1x8x256xf32> to vector<8x256xf32>
    %125 = vector.shape_cast %122 : vector<8x256xf32> to vector<1x8x256xf32>
    tpu.vector_store %arg8[%c0_41, %c0_42, %c0_43], %125 {strides = array<i32>} : memref<1x81x256xf32, #tpu.memory_space<vmem>>, vector<1x8x256xf32>,
    %126 = vector.extract_strided_slice %58 {offsets = [0, 8], sizes = [8, 256], strides = [1, 1]} : vector<8x264xf32> to vector<8x256xf32>
    %127 = arith.mulf %20, %126 : vector<8x256xf32>
    %cst_44 = arith.constant dense<0.000000e+00> : vector<256xf32>
    %128 = vector.multi_reduction <add>, %127, %cst_44 [0] : vector<8x256xf32> to vector<256xf32>
    %129 = vector.shape_cast %128 : vector<256xf32> to vector<1x256xf32>
    %130 = arith.andi %42, %40 : vector<1x256xi1>
    %cst_45 = arith.constant 0.000000e+00 : f32
    %131 = vector.broadcast %cst_45 : f32 to vector<1x256xf32>
    %132 = arith.select %130, %129, %131 : vector<1x256xi1>, vector<1x256xf32>
    %133 = arith.maximumf %121, %132 : vector<1x256xf32>
    %c0_46 = arith.constant 0 : index
    %c76 = arith.constant 76 : index
    %134 = vector.load %arg9[%c0_46, %c76] : memref<8x512xf32, #tpu.memory_space<vmem>>, vector<8x264xf32>
    %135 = vector.extract_strided_slice %134 {offsets = [0, 0], sizes = [8, 256], strides = [1, 1]} : vector<8x264xf32> to vector<8x256xf32>
    %136 = arith.mulf %20, %135 : vector<8x256xf32>
    %cst_47 = arith.constant dense<0.000000e+00> : vector<256xf32>
    %137 = vector.multi_reduction <add>, %136, %cst_47 [0] : vector<8x256xf32> to vector<256xf32>
    %138 = vector.shape_cast %137 : vector<256xf32> to vector<1x256xf32>
    %139 = arith.andi %44, %26 : vector<1x256xi1>
    %cst_48 = arith.constant 0.000000e+00 : f32
    %140 = vector.broadcast %cst_48 : f32 to vector<1x256xf32>
    %141 = arith.select %139, %138, %140 : vector<1x256xi1>, vector<1x256xf32>
    %142 = arith.maximumf %133, %141 : vector<1x256xf32>
    %143 = vector.extract_strided_slice %134 {offsets = [0, 1], sizes = [8, 256], strides = [1, 1]} : vector<8x264xf32> to vector<8x256xf32>
    %144 = arith.mulf %20, %143 : vector<8x256xf32>
    %cst_49 = arith.constant dense<0.000000e+00> : vector<256xf32>
    %145 = vector.multi_reduction <add>, %144, %cst_49 [0] : vector<8x256xf32> to vector<256xf32>
    %146 = vector.shape_cast %145 : vector<256xf32> to vector<1x256xf32>
    %147 = arith.andi %44, %28 : vector<1x256xi1>
    %cst_50 = arith.constant 0.000000e+00 : f32
    %148 = vector.broadcast %cst_50 : f32 to vector<1x256xf32>
    %149 = arith.select %147, %146, %148 : vector<1x256xi1>, vector<1x256xf32>
    %150 = arith.maximumf %142, %149 : vector<1x256xf32>
    %151 = vector.extract_strided_slice %134 {offsets = [0, 2], sizes = [8, 256], strides = [1, 1]} : vector<8x264xf32> to vector<8x256xf32>
    %152 = arith.mulf %20, %151 : vector<8x256xf32>
    %cst_51 = arith.constant dense<0.000000e+00> : vector<256xf32>
    %153 = vector.multi_reduction <add>, %152, %cst_51 [0] : vector<8x256xf32> to vector<256xf32>
    %154 = vector.shape_cast %153 : vector<256xf32> to vector<1x256xf32>
    %155 = arith.andi %44, %30 : vector<1x256xi1>
    %cst_52 = arith.constant 0.000000e+00 : f32
    %156 = vector.broadcast %cst_52 : f32 to vector<1x256xf32>
    %157 = arith.select %155, %154, %156 : vector<1x256xi1>, vector<1x256xf32>
    %158 = arith.maximumf %150, %157 : vector<1x256xf32>
    %159 = vector.extract_strided_slice %134 {offsets = [0, 3], sizes = [8, 256], strides = [1, 1]} : vector<8x264xf32> to vector<8x256xf32>
    %160 = arith.mulf %20, %159 : vector<8x256xf32>
    %cst_53 = arith.constant dense<0.000000e+00> : vector<256xf32>
    %161 = vector.multi_reduction <add>, %160, %cst_53 [0] : vector<8x256xf32> to vector<256xf32>
    %162 = vector.shape_cast %161 : vector<256xf32> to vector<1x256xf32>
    %163 = arith.andi %44, %32 : vector<1x256xi1>
    %cst_54 = arith.constant 0.000000e+00 : f32
    %164 = vector.broadcast %cst_54 : f32 to vector<1x256xf32>
    %165 = arith.select %163, %162, %164 : vector<1x256xi1>, vector<1x256xf32>
    %166 = arith.maximumf %158, %165 : vector<1x256xf32>
    %167 = vector.extract_strided_slice %134 {offsets = [0, 4], sizes = [8, 256], strides = [1, 1]} : vector<8x264xf32> to vector<8x256xf32>
    %168 = arith.mulf %20, %167 : vector<8x256xf32>
    %cst_55 = arith.constant dense<0.000000e+00> : vector<256xf32>
    %169 = vector.multi_reduction <add>, %168, %cst_55 [0] : vector<8x256xf32> to vector<256xf32>
    %170 = vector.shape_cast %169 : vector<256xf32> to vector<1x256xf32>
    %cst_56 = arith.constant 0.000000e+00 : f32
    %171 = vector.broadcast %cst_56 : f32 to vector<1x256xf32>
    %172 = arith.select %44, %170, %171 : vector<1x256xi1>, vector<1x256xf32>
    %173 = arith.maximumf %166, %172 : vector<1x256xf32>
    %174 = vector.extract_strided_slice %134 {offsets = [0, 5], sizes = [8, 256], strides = [1, 1]} : vector<8x264xf32> to vector<8x256xf32>
    %175 = arith.mulf %20, %174 : vector<8x256xf32>
    %cst_57 = arith.constant dense<0.000000e+00> : vector<256xf32>
    %176 = vector.multi_reduction <add>, %175, %cst_57 [0] : vector<8x256xf32> to vector<256xf32>
    %177 = vector.shape_cast %176 : vector<256xf32> to vector<1x256xf32>
    %178 = arith.andi %44, %34 : vector<1x256xi1>
    %cst_58 = arith.constant 0.000000e+00 : f32
    %179 = vector.broadcast %cst_58 : f32 to vector<1x256xf32>
    %180 = arith.select %178, %177, %179 : vector<1x256xi1>, vector<1x256xf32>
    %181 = arith.maximumf %173, %180 : vector<1x256xf32>
    %182 = vector.extract_strided_slice %134 {offsets = [0, 6], sizes = [8, 256], strides = [1, 1]} : vector<8x264xf32> to vector<8x256xf32>
    %183 = arith.mulf %20, %182 : vector<8x256xf32>
    %cst_59 = arith.constant dense<0.000000e+00> : vector<256xf32>
    %184 = vector.multi_reduction <add>, %183, %cst_59 [0] : vector<8x256xf32> to vector<256xf32>
    %185 = vector.shape_cast %184 : vector<256xf32> to vector<1x256xf32>
    %186 = arith.andi %44, %36 : vector<1x256xi1>
    %cst_60 = arith.constant 0.000000e+00 : f32
    %187 = vector.broadcast %cst_60 : f32 to vector<1x256xf32>
    %188 = arith.select %186, %185, %187 : vector<1x256xi1>, vector<1x256xf32>
    %189 = arith.maximumf %181, %188 : vector<1x256xf32>
    %190 = tpu.concatenate %132, %141, %149, %157, %165, %172, %180, %188 in 0 : vector<1x256xf32>, vector<1x256xf32>, vector<1x256xf32>, vector<1x256xf32>, vector<1x256xf32>, vector<1x256xf32>, vector<1x256xf32>, vector<1x256xf32> -> vector<8x256xf32>
    %c0_61 = arith.constant 0 : index
    %c8 = arith.constant 8 : index
    %c0_62 = arith.constant 0 : index
    %191 = vector.load %arg8[%c0_61, %c8, %c0_62] : memref<1x81x256xf32, #tpu.memory_space<vmem>>, vector<1x8x256xf32>
    %192 = vector.shape_cast %191 : vector<1x8x256xf32> to vector<8x256xf32>
    %193 = vector.shape_cast %190 : vector<8x256xf32> to vector<1x8x256xf32>
    tpu.vector_store %arg8[%c0_61, %c8, %c0_62], %193 {strides = array<i32>} : memref<1x81x256xf32, #tpu.memory_space<vmem>>, vector<1x8x256xf32>,
    %194 = vector.extract_strided_slice %134 {offsets = [0, 7], sizes = [8, 256], strides = [1, 1]} : vector<8x264xf32> to vector<8x256xf32>
    %195 = arith.mulf %20, %194 : vector<8x256xf32>
    %cst_63 = arith.constant dense<0.000000e+00> : vector<256xf32>
    %196 = vector.multi_reduction <add>, %195, %cst_63 [0] : vector<8x256xf32> to vector<256xf32>
    %197 = vector.shape_cast %196 : vector<256xf32> to vector<1x256xf32>
    %198 = arith.andi %44, %38 : vector<1x256xi1>
    %cst_64 = arith.constant 0.000000e+00 : f32
    %199 = vector.broadcast %cst_64 : f32 to vector<1x256xf32>
    %200 = arith.select %198, %197, %199 : vector<1x256xi1>, vector<1x256xf32>
    %201 = arith.maximumf %189, %200 : vector<1x256xf32>
    %202 = vector.extract_strided_slice %134 {offsets = [0, 8], sizes = [8, 256], strides = [1, 1]} : vector<8x264xf32> to vector<8x256xf32>
    %203 = arith.mulf %20, %202 : vector<8x256xf32>
    %cst_65 = arith.constant dense<0.000000e+00> : vector<256xf32>
    %204 = vector.multi_reduction <add>, %203, %cst_65 [0] : vector<8x256xf32> to vector<256xf32>
    %205 = vector.shape_cast %204 : vector<256xf32> to vector<1x256xf32>
    %206 = arith.andi %44, %40 : vector<1x256xi1>
    %cst_66 = arith.constant 0.000000e+00 : f32
    %207 = vector.broadcast %cst_66 : f32 to vector<1x256xf32>
    %208 = arith.select %206, %205, %207 : vector<1x256xi1>, vector<1x256xf32>
    %209 = arith.maximumf %201, %208 : vector<1x256xf32>
    %c0_67 = arith.constant 0 : index
    %c92 = arith.constant 92 : index
    %210 = vector.load %arg9[%c0_67, %c92] : memref<8x512xf32, #tpu.memory_space<vmem>>, vector<8x264xf32>
    %211 = vector.extract_strided_slice %210 {offsets = [0, 0], sizes = [8, 256], strides = [1, 1]} : vector<8x264xf32> to vector<8x256xf32>
    %212 = arith.mulf %20, %211 : vector<8x256xf32>
    %cst_68 = arith.constant dense<0.000000e+00> : vector<256xf32>
    %213 = vector.multi_reduction <add>, %212, %cst_68 [0] : vector<8x256xf32> to vector<256xf32>
    %214 = vector.shape_cast %213 : vector<256xf32> to vector<1x256xf32>
    %215 = arith.andi %46, %26 : vector<1x256xi1>
    %cst_69 = arith.constant 0.000000e+00 : f32
    %216 = vector.broadcast %cst_69 : f32 to vector<1x256xf32>
    %217 = arith.select %215, %214, %216 : vector<1x256xi1>, vector<1x256xf32>
    %218 = arith.maximumf %209, %217 : vector<1x256xf32>
    %219 = vector.extract_strided_slice %210 {offsets = [0, 1], sizes = [8, 256], strides = [1, 1]} : vector<8x264xf32> to vector<8x256xf32>
    %220 = arith.mulf %20, %219 : vector<8x256xf32>
    %cst_70 = arith.constant dense<0.000000e+00> : vector<256xf32>
    %221 = vector.multi_reduction <add>, %220, %cst_70 [0] : vector<8x256xf32> to vector<256xf32>
    %222 = vector.shape_cast %221 : vector<256xf32> to vector<1x256xf32>
    %223 = arith.andi %46, %28 : vector<1x256xi1>
    %cst_71 = arith.constant 0.000000e+00 : f32
    %224 = vector.broadcast %cst_71 : f32 to vector<1x256xf32>
    %225 = arith.select %223, %222, %224 : vector<1x256xi1>, vector<1x256xf32>
    %226 = arith.maximumf %218, %225 : vector<1x256xf32>
    %227 = vector.extract_strided_slice %210 {offsets = [0, 2], sizes = [8, 256], strides = [1, 1]} : vector<8x264xf32> to vector<8x256xf32>
    %228 = arith.mulf %20, %227 : vector<8x256xf32>
    %cst_72 = arith.constant dense<0.000000e+00> : vector<256xf32>
    %229 = vector.multi_reduction <add>, %228, %cst_72 [0] : vector<8x256xf32> to vector<256xf32>
    %230 = vector.shape_cast %229 : vector<256xf32> to vector<1x256xf32>
    %231 = arith.andi %46, %30 : vector<1x256xi1>
    %cst_73 = arith.constant 0.000000e+00 : f32
    %232 = vector.broadcast %cst_73 : f32 to vector<1x256xf32>
    %233 = arith.select %231, %230, %232 : vector<1x256xi1>, vector<1x256xf32>
    %234 = arith.maximumf %226, %233 : vector<1x256xf32>
    %235 = vector.extract_strided_slice %210 {offsets = [0, 3], sizes = [8, 256], strides = [1, 1]} : vector<8x264xf32> to vector<8x256xf32>
    %236 = arith.mulf %20, %235 : vector<8x256xf32>
    %cst_74 = arith.constant dense<0.000000e+00> : vector<256xf32>
    %237 = vector.multi_reduction <add>, %236, %cst_74 [0] : vector<8x256xf32> to vector<256xf32>
    %238 = vector.shape_cast %237 : vector<256xf32> to vector<1x256xf32>
    %239 = arith.andi %46, %32 : vector<1x256xi1>
    %cst_75 = arith.constant 0.000000e+00 : f32
    %240 = vector.broadcast %cst_75 : f32 to vector<1x256xf32>
    %241 = arith.select %239, %238, %240 : vector<1x256xi1>, vector<1x256xf32>
    %242 = arith.maximumf %234, %241 : vector<1x256xf32>
    %243 = vector.extract_strided_slice %210 {offsets = [0, 4], sizes = [8, 256], strides = [1, 1]} : vector<8x264xf32> to vector<8x256xf32>
    %244 = arith.mulf %20, %243 : vector<8x256xf32>
    %cst_76 = arith.constant dense<0.000000e+00> : vector<256xf32>
    %245 = vector.multi_reduction <add>, %244, %cst_76 [0] : vector<8x256xf32> to vector<256xf32>
    %246 = vector.shape_cast %245 : vector<256xf32> to vector<1x256xf32>
    %cst_77 = arith.constant 0.000000e+00 : f32
    %247 = vector.broadcast %cst_77 : f32 to vector<1x256xf32>
    %248 = arith.select %46, %246, %247 : vector<1x256xi1>, vector<1x256xf32>
    %249 = arith.maximumf %242, %248 : vector<1x256xf32>
    %250 = vector.extract_strided_slice %210 {offsets = [0, 5], sizes = [8, 256], strides = [1, 1]} : vector<8x264xf32> to vector<8x256xf32>
    %251 = arith.mulf %20, %250 : vector<8x256xf32>
    %cst_78 = arith.constant dense<0.000000e+00> : vector<256xf32>
    %252 = vector.multi_reduction <add>, %251, %cst_78 [0] : vector<8x256xf32> to vector<256xf32>
    %253 = vector.shape_cast %252 : vector<256xf32> to vector<1x256xf32>
    %254 = arith.andi %46, %34 : vector<1x256xi1>
    %cst_79 = arith.constant 0.000000e+00 : f32
    %255 = vector.broadcast %cst_79 : f32 to vector<1x256xf32>
    %256 = arith.select %254, %253, %255 : vector<1x256xi1>, vector<1x256xf32>
    %257 = arith.maximumf %249, %256 : vector<1x256xf32>
    %258 = tpu.concatenate %200, %208, %217, %225, %233, %241, %248, %256 in 0 : vector<1x256xf32>, vector<1x256xf32>, vector<1x256xf32>, vector<1x256xf32>, vector<1x256xf32>, vector<1x256xf32>, vector<1x256xf32>, vector<1x256xf32> -> vector<8x256xf32>
    %c0_80 = arith.constant 0 : index
    %c16 = arith.constant 16 : index
    %c0_81 = arith.constant 0 : index
    %259 = vector.load %arg8[%c0_80, %c16, %c0_81] : memref<1x81x256xf32, #tpu.memory_space<vmem>>, vector<1x8x256xf32>
    %260 = vector.shape_cast %259 : vector<1x8x256xf32> to vector<8x256xf32>
    %261 = vector.shape_cast %258 : vector<8x256xf32> to vector<1x8x256xf32>
    tpu.vector_store %arg8[%c0_80, %c16, %c0_81], %261 {strides = array<i32>} : memref<1x81x256xf32, #tpu.memory_space<vmem>>, vector<1x8x256xf32>,
    %262 = vector.extract_strided_slice %210 {offsets = [0, 6], sizes = [8, 256], strides = [1, 1]} : vector<8x264xf32> to vector<8x256xf32>
    %263 = arith.mulf %20, %262 : vector<8x256xf32>
    %cst_82 = arith.constant dense<0.000000e+00> : vector<256xf32>
    %264 = vector.multi_reduction <add>, %263, %cst_82 [0] : vector<8x256xf32> to vector<256xf32>
    %265 = vector.shape_cast %264 : vector<256xf32> to vector<1x256xf32>
    %266 = arith.andi %46, %36 : vector<1x256xi1>
    %cst_83 = arith.constant 0.000000e+00 : f32
    %267 = vector.broadcast %cst_83 : f32 to vector<1x256xf32>
    %268 = arith.select %266, %265, %267 : vector<1x256xi1>, vector<1x256xf32>
    %269 = arith.maximumf %257, %268 : vector<1x256xf32>
    %270 = vector.extract_strided_slice %210 {offsets = [0, 7], sizes = [8, 256], strides = [1, 1]} : vector<8x264xf32> to vector<8x256xf32>
    %271 = arith.mulf %20, %270 : vector<8x256xf32>
    %cst_84 = arith.constant dense<0.000000e+00> : vector<256xf32>
    %272 = vector.multi_reduction <add>, %271, %cst_84 [0] : vector<8x256xf32> to vector<256xf32>
    %273 = vector.shape_cast %272 : vector<256xf32> to vector<1x256xf32>
    %274 = arith.andi %46, %38 : vector<1x256xi1>
    %cst_85 = arith.constant 0.000000e+00 : f32
    %275 = vector.broadcast %cst_85 : f32 to vector<1x256xf32>
    %276 = arith.select %274, %273, %275 : vector<1x256xi1>, vector<1x256xf32>
    %277 = arith.maximumf %269, %276 : vector<1x256xf32>
    %278 = vector.extract_strided_slice %210 {offsets = [0, 8], sizes = [8, 256], strides = [1, 1]} : vector<8x264xf32> to vector<8x256xf32>
    %279 = arith.mulf %20, %278 : vector<8x256xf32>
    %cst_86 = arith.constant dense<0.000000e+00> : vector<256xf32>
    %280 = vector.multi_reduction <add>, %279, %cst_86 [0] : vector<8x256xf32> to vector<256xf32>
    %281 = vector.shape_cast %280 : vector<256xf32> to vector<1x256xf32>
    %282 = arith.andi %46, %40 : vector<1x256xi1>
    %cst_87 = arith.constant 0.000000e+00 : f32
    %283 = vector.broadcast %cst_87 : f32 to vector<1x256xf32>
    %284 = arith.select %282, %281, %283 : vector<1x256xi1>, vector<1x256xf32>
    %285 = arith.maximumf %277, %284 : vector<1x256xf32>
    %c0_88 = arith.constant 0 : index
    %c108 = arith.constant 108 : index
    %286 = vector.load %arg9[%c0_88, %c108] : memref<8x512xf32, #tpu.memory_space<vmem>>, vector<8x264xf32>
    %287 = vector.extract_strided_slice %286 {offsets = [0, 0], sizes = [8, 256], strides = [1, 1]} : vector<8x264xf32> to vector<8x256xf32>
    %288 = arith.mulf %20, %287 : vector<8x256xf32>
    %cst_89 = arith.constant dense<0.000000e+00> : vector<256xf32>
    %289 = vector.multi_reduction <add>, %288, %cst_89 [0] : vector<8x256xf32> to vector<256xf32>
    %290 = vector.shape_cast %289 : vector<256xf32> to vector<1x256xf32>
    %291 = arith.andi %48, %26 : vector<1x256xi1>
    %cst_90 = arith.constant 0.000000e+00 : f32
    %292 = vector.broadcast %cst_90 : f32 to vector<1x256xf32>
    %293 = arith.select %291, %290, %292 : vector<1x256xi1>, vector<1x256xf32>
    %294 = arith.maximumf %285, %293 : vector<1x256xf32>
    %295 = vector.extract_strided_slice %286 {offsets = [0, 1], sizes = [8, 256], strides = [1, 1]} : vector<8x264xf32> to vector<8x256xf32>
    %296 = arith.mulf %20, %295 : vector<8x256xf32>
    %cst_91 = arith.constant dense<0.000000e+00> : vector<256xf32>
    %297 = vector.multi_reduction <add>, %296, %cst_91 [0] : vector<8x256xf32> to vector<256xf32>
    %298 = vector.shape_cast %297 : vector<256xf32> to vector<1x256xf32>
    %299 = arith.andi %48, %28 : vector<1x256xi1>
    %cst_92 = arith.constant 0.000000e+00 : f32
    %300 = vector.broadcast %cst_92 : f32 to vector<1x256xf32>
    %301 = arith.select %299, %298, %300 : vector<1x256xi1>, vector<1x256xf32>
    %302 = arith.maximumf %294, %301 : vector<1x256xf32>
    %303 = vector.extract_strided_slice %286 {offsets = [0, 2], sizes = [8, 256], strides = [1, 1]} : vector<8x264xf32> to vector<8x256xf32>
    %304 = arith.mulf %20, %303 : vector<8x256xf32>
    %cst_93 = arith.constant dense<0.000000e+00> : vector<256xf32>
    %305 = vector.multi_reduction <add>, %304, %cst_93 [0] : vector<8x256xf32> to vector<256xf32>
    %306 = vector.shape_cast %305 : vector<256xf32> to vector<1x256xf32>
    %307 = arith.andi %48, %30 : vector<1x256xi1>
    %cst_94 = arith.constant 0.000000e+00 : f32
    %308 = vector.broadcast %cst_94 : f32 to vector<1x256xf32>
    %309 = arith.select %307, %306, %308 : vector<1x256xi1>, vector<1x256xf32>
    %310 = arith.maximumf %302, %309 : vector<1x256xf32>
    %311 = vector.extract_strided_slice %286 {offsets = [0, 3], sizes = [8, 256], strides = [1, 1]} : vector<8x264xf32> to vector<8x256xf32>
    %312 = arith.mulf %20, %311 : vector<8x256xf32>
    %cst_95 = arith.constant dense<0.000000e+00> : vector<256xf32>
    %313 = vector.multi_reduction <add>, %312, %cst_95 [0] : vector<8x256xf32> to vector<256xf32>
    %314 = vector.shape_cast %313 : vector<256xf32> to vector<1x256xf32>
    %315 = arith.andi %48, %32 : vector<1x256xi1>
    %cst_96 = arith.constant 0.000000e+00 : f32
    %316 = vector.broadcast %cst_96 : f32 to vector<1x256xf32>
    %317 = arith.select %315, %314, %316 : vector<1x256xi1>, vector<1x256xf32>
    %318 = arith.maximumf %310, %317 : vector<1x256xf32>
    %319 = vector.extract_strided_slice %286 {offsets = [0, 4], sizes = [8, 256], strides = [1, 1]} : vector<8x264xf32> to vector<8x256xf32>
    %320 = arith.mulf %20, %319 : vector<8x256xf32>
    %cst_97 = arith.constant dense<0.000000e+00> : vector<256xf32>
    %321 = vector.multi_reduction <add>, %320, %cst_97 [0] : vector<8x256xf32> to vector<256xf32>
    %322 = vector.shape_cast %321 : vector<256xf32> to vector<1x256xf32>
    %cst_98 = arith.constant 0.000000e+00 : f32
    %323 = vector.broadcast %cst_98 : f32 to vector<1x256xf32>
    %324 = arith.select %48, %322, %323 : vector<1x256xi1>, vector<1x256xf32>
    %325 = arith.maximumf %318, %324 : vector<1x256xf32>
    %326 = tpu.concatenate %268, %276, %284, %293, %301, %309, %317, %324 in 0 : vector<1x256xf32>, vector<1x256xf32>, vector<1x256xf32>, vector<1x256xf32>, vector<1x256xf32>, vector<1x256xf32>, vector<1x256xf32>, vector<1x256xf32> -> vector<8x256xf32>
    %c0_99 = arith.constant 0 : index
    %c24 = arith.constant 24 : index
    %c0_100 = arith.constant 0 : index
    %327 = vector.load %arg8[%c0_99, %c24, %c0_100] : memref<1x81x256xf32, #tpu.memory_space<vmem>>, vector<1x8x256xf32>
    %328 = vector.shape_cast %327 : vector<1x8x256xf32> to vector<8x256xf32>
    %329 = vector.shape_cast %326 : vector<8x256xf32> to vector<1x8x256xf32>
    tpu.vector_store %arg8[%c0_99, %c24, %c0_100], %329 {strides = array<i32>} : memref<1x81x256xf32, #tpu.memory_space<vmem>>, vector<1x8x256xf32>,
    %330 = vector.extract_strided_slice %286 {offsets = [0, 5], sizes = [8, 256], strides = [1, 1]} : vector<8x264xf32> to vector<8x256xf32>
    %331 = arith.mulf %20, %330 : vector<8x256xf32>
    %cst_101 = arith.constant dense<0.000000e+00> : vector<256xf32>
    %332 = vector.multi_reduction <add>, %331, %cst_101 [0] : vector<8x256xf32> to vector<256xf32>
    %333 = vector.shape_cast %332 : vector<256xf32> to vector<1x256xf32>
    %334 = arith.andi %48, %34 : vector<1x256xi1>
    %cst_102 = arith.constant 0.000000e+00 : f32
    %335 = vector.broadcast %cst_102 : f32 to vector<1x256xf32>
    %336 = arith.select %334, %333, %335 : vector<1x256xi1>, vector<1x256xf32>
    %337 = arith.maximumf %325, %336 : vector<1x256xf32>
    %338 = vector.extract_strided_slice %286 {offsets = [0, 6], sizes = [8, 256], strides = [1, 1]} : vector<8x264xf32> to vector<8x256xf32>
    %339 = arith.mulf %20, %338 : vector<8x256xf32>
    %cst_103 = arith.constant dense<0.000000e+00> : vector<256xf32>
    %340 = vector.multi_reduction <add>, %339, %cst_103 [0] : vector<8x256xf32> to vector<256xf32>
    %341 = vector.shape_cast %340 : vector<256xf32> to vector<1x256xf32>
    %342 = arith.andi %48, %36 : vector<1x256xi1>
    %cst_104 = arith.constant 0.000000e+00 : f32
    %343 = vector.broadcast %cst_104 : f32 to vector<1x256xf32>
    %344 = arith.select %342, %341, %343 : vector<1x256xi1>, vector<1x256xf32>
    %345 = arith.maximumf %337, %344 : vector<1x256xf32>
    %346 = vector.extract_strided_slice %286 {offsets = [0, 7], sizes = [8, 256], strides = [1, 1]} : vector<8x264xf32> to vector<8x256xf32>
    %347 = arith.mulf %20, %346 : vector<8x256xf32>
    %cst_105 = arith.constant dense<0.000000e+00> : vector<256xf32>
    %348 = vector.multi_reduction <add>, %347, %cst_105 [0] : vector<8x256xf32> to vector<256xf32>
    %349 = vector.shape_cast %348 : vector<256xf32> to vector<1x256xf32>
    %350 = arith.andi %48, %38 : vector<1x256xi1>
    %cst_106 = arith.constant 0.000000e+00 : f32
    %351 = vector.broadcast %cst_106 : f32 to vector<1x256xf32>
    %352 = arith.select %350, %349, %351 : vector<1x256xi1>, vector<1x256xf32>
    %353 = arith.maximumf %345, %352 : vector<1x256xf32>
    %354 = vector.extract_strided_slice %286 {offsets = [0, 8], sizes = [8, 256], strides = [1, 1]} : vector<8x264xf32> to vector<8x256xf32>
    %355 = arith.mulf %20, %354 : vector<8x256xf32>
    %cst_107 = arith.constant dense<0.000000e+00> : vector<256xf32>
    %356 = vector.multi_reduction <add>, %355, %cst_107 [0] : vector<8x256xf32> to vector<256xf32>
    %357 = vector.shape_cast %356 : vector<256xf32> to vector<1x256xf32>
    %358 = arith.andi %48, %40 : vector<1x256xi1>
    %cst_108 = arith.constant 0.000000e+00 : f32
    %359 = vector.broadcast %cst_108 : f32 to vector<1x256xf32>
    %360 = arith.select %358, %357, %359 : vector<1x256xi1>, vector<1x256xf32>
    %361 = arith.maximumf %353, %360 : vector<1x256xf32>
    %c0_109 = arith.constant 0 : index
    %c124 = arith.constant 124 : index
    %362 = vector.load %arg9[%c0_109, %c124] : memref<8x512xf32, #tpu.memory_space<vmem>>, vector<8x264xf32>
    %363 = vector.extract_strided_slice %362 {offsets = [0, 0], sizes = [8, 256], strides = [1, 1]} : vector<8x264xf32> to vector<8x256xf32>
    %364 = arith.mulf %20, %363 : vector<8x256xf32>
    %cst_110 = arith.constant dense<0.000000e+00> : vector<256xf32>
    %365 = vector.multi_reduction <add>, %364, %cst_110 [0] : vector<8x256xf32> to vector<256xf32>
    %366 = vector.shape_cast %365 : vector<256xf32> to vector<1x256xf32>
    %cst_111 = arith.constant 0.000000e+00 : f32
    %367 = vector.broadcast %cst_111 : f32 to vector<1x256xf32>
    %368 = arith.select %26, %366, %367 : vector<1x256xi1>, vector<1x256xf32>
    %369 = arith.maximumf %361, %368 : vector<1x256xf32>
    %370 = vector.extract_strided_slice %362 {offsets = [0, 1], sizes = [8, 256], strides = [1, 1]} : vector<8x264xf32> to vector<8x256xf32>
    %371 = arith.mulf %20, %370 : vector<8x256xf32>
    %cst_112 = arith.constant dense<0.000000e+00> : vector<256xf32>
    %372 = vector.multi_reduction <add>, %371, %cst_112 [0] : vector<8x256xf32> to vector<256xf32>
    %373 = vector.shape_cast %372 : vector<256xf32> to vector<1x256xf32>
    %cst_113 = arith.constant 0.000000e+00 : f32
    %374 = vector.broadcast %cst_113 : f32 to vector<1x256xf32>
    %375 = arith.select %28, %373, %374 : vector<1x256xi1>, vector<1x256xf32>
    %376 = arith.maximumf %369, %375 : vector<1x256xf32>
    %377 = vector.extract_strided_slice %362 {offsets = [0, 2], sizes = [8, 256], strides = [1, 1]} : vector<8x264xf32> to vector<8x256xf32>
    %378 = arith.mulf %20, %377 : vector<8x256xf32>
    %cst_114 = arith.constant dense<0.000000e+00> : vector<256xf32>
    %379 = vector.multi_reduction <add>, %378, %cst_114 [0] : vector<8x256xf32> to vector<256xf32>
    %380 = vector.shape_cast %379 : vector<256xf32> to vector<1x256xf32>
    %cst_115 = arith.constant 0.000000e+00 : f32
    %381 = vector.broadcast %cst_115 : f32 to vector<1x256xf32>
    %382 = arith.select %30, %380, %381 : vector<1x256xi1>, vector<1x256xf32>
    %383 = arith.maximumf %376, %382 : vector<1x256xf32>
    %384 = vector.extract_strided_slice %362 {offsets = [0, 3], sizes = [8, 256], strides = [1, 1]} : vector<8x264xf32> to vector<8x256xf32>
    %385 = arith.mulf %20, %384 : vector<8x256xf32>
    %cst_116 = arith.constant dense<0.000000e+00> : vector<256xf32>
    %386 = vector.multi_reduction <add>, %385, %cst_116 [0] : vector<8x256xf32> to vector<256xf32>
    %387 = vector.shape_cast %386 : vector<256xf32> to vector<1x256xf32>
    %cst_117 = arith.constant 0.000000e+00 : f32
    %388 = vector.broadcast %cst_117 : f32 to vector<1x256xf32>
    %389 = arith.select %32, %387, %388 : vector<1x256xi1>, vector<1x256xf32>
    %390 = arith.maximumf %383, %389 : vector<1x256xf32>
    %391 = tpu.concatenate %336, %344, %352, %360, %368, %375, %382, %389 in 0 : vector<1x256xf32>, vector<1x256xf32>, vector<1x256xf32>, vector<1x256xf32>, vector<1x256xf32>, vector<1x256xf32>, vector<1x256xf32>, vector<1x256xf32> -> vector<8x256xf32>
    %c0_118 = arith.constant 0 : index
    %c32 = arith.constant 32 : index
    %c0_119 = arith.constant 0 : index
    %392 = vector.load %arg8[%c0_118, %c32, %c0_119] : memref<1x81x256xf32, #tpu.memory_space<vmem>>, vector<1x8x256xf32>
    %393 = vector.shape_cast %392 : vector<1x8x256xf32> to vector<8x256xf32>
    %394 = vector.shape_cast %391 : vector<8x256xf32> to vector<1x8x256xf32>
    tpu.vector_store %arg8[%c0_118, %c32, %c0_119], %394 {strides = array<i32>} : memref<1x81x256xf32, #tpu.memory_space<vmem>>, vector<1x8x256xf32>,
    %395 = vector.extract_strided_slice %362 {offsets = [0, 4], sizes = [8, 256], strides = [1, 1]} : vector<8x264xf32> to vector<8x256xf32>
    %396 = arith.mulf %20, %395 : vector<8x256xf32>
    %cst_120 = arith.constant dense<0.000000e+00> : vector<256xf32>
    %397 = vector.multi_reduction <add>, %396, %cst_120 [0] : vector<8x256xf32> to vector<256xf32>
    %398 = vector.shape_cast %397 : vector<256xf32> to vector<1x256xf32>
    %399 = arith.maximumf %390, %398 : vector<1x256xf32>
    %400 = vector.extract_strided_slice %362 {offsets = [0, 5], sizes = [8, 256], strides = [1, 1]} : vector<8x264xf32> to vector<8x256xf32>
    %401 = arith.mulf %20, %400 : vector<8x256xf32>
    %cst_121 = arith.constant dense<0.000000e+00> : vector<256xf32>
    %402 = vector.multi_reduction <add>, %401, %cst_121 [0] : vector<8x256xf32> to vector<256xf32>
    %403 = vector.shape_cast %402 : vector<256xf32> to vector<1x256xf32>
    %cst_122 = arith.constant 0.000000e+00 : f32
    %404 = vector.broadcast %cst_122 : f32 to vector<1x256xf32>
    %405 = arith.select %34, %403, %404 : vector<1x256xi1>, vector<1x256xf32>
    %406 = arith.maximumf %399, %405 : vector<1x256xf32>
    %407 = vector.extract_strided_slice %362 {offsets = [0, 6], sizes = [8, 256], strides = [1, 1]} : vector<8x264xf32> to vector<8x256xf32>
    %408 = arith.mulf %20, %407 : vector<8x256xf32>
    %cst_123 = arith.constant dense<0.000000e+00> : vector<256xf32>
    %409 = vector.multi_reduction <add>, %408, %cst_123 [0] : vector<8x256xf32> to vector<256xf32>
    %410 = vector.shape_cast %409 : vector<256xf32> to vector<1x256xf32>
    %cst_124 = arith.constant 0.000000e+00 : f32
    %411 = vector.broadcast %cst_124 : f32 to vector<1x256xf32>
    %412 = arith.select %36, %410, %411 : vector<1x256xi1>, vector<1x256xf32>
    %413 = arith.maximumf %406, %412 : vector<1x256xf32>
    %414 = vector.extract_strided_slice %362 {offsets = [0, 7], sizes = [8, 256], strides = [1, 1]} : vector<8x264xf32> to vector<8x256xf32>
    %415 = arith.mulf %20, %414 : vector<8x256xf32>
    %cst_125 = arith.constant dense<0.000000e+00> : vector<256xf32>
    %416 = vector.multi_reduction <add>, %415, %cst_125 [0] : vector<8x256xf32> to vector<256xf32>
    %417 = vector.shape_cast %416 : vector<256xf32> to vector<1x256xf32>
    %cst_126 = arith.constant 0.000000e+00 : f32
    %418 = vector.broadcast %cst_126 : f32 to vector<1x256xf32>
    %419 = arith.select %38, %417, %418 : vector<1x256xi1>, vector<1x256xf32>
    %420 = arith.maximumf %413, %419 : vector<1x256xf32>
    %421 = vector.extract_strided_slice %362 {offsets = [0, 8], sizes = [8, 256], strides = [1, 1]} : vector<8x264xf32> to vector<8x256xf32>
    %422 = arith.mulf %20, %421 : vector<8x256xf32>
    %cst_127 = arith.constant dense<0.000000e+00> : vector<256xf32>
    %423 = vector.multi_reduction <add>, %422, %cst_127 [0] : vector<8x256xf32> to vector<256xf32>
    %424 = vector.shape_cast %423 : vector<256xf32> to vector<1x256xf32>
    %cst_128 = arith.constant 0.000000e+00 : f32
    %425 = vector.broadcast %cst_128 : f32 to vector<1x256xf32>
    %426 = arith.select %40, %424, %425 : vector<1x256xi1>, vector<1x256xf32>
    %427 = arith.maximumf %420, %426 : vector<1x256xf32>
    %c0_129 = arith.constant 0 : index
    %c140 = arith.constant 140 : index
    %428 = vector.load %arg9[%c0_129, %c140] : memref<8x512xf32, #tpu.memory_space<vmem>>, vector<8x264xf32>
    %429 = vector.extract_strided_slice %428 {offsets = [0, 0], sizes = [8, 256], strides = [1, 1]} : vector<8x264xf32> to vector<8x256xf32>
    %430 = arith.mulf %20, %429 : vector<8x256xf32>
    %cst_130 = arith.constant dense<0.000000e+00> : vector<256xf32>
    %431 = vector.multi_reduction <add>, %430, %cst_130 [0] : vector<8x256xf32> to vector<256xf32>
    %432 = vector.shape_cast %431 : vector<256xf32> to vector<1x256xf32>
    %433 = arith.andi %50, %26 : vector<1x256xi1>
    %cst_131 = arith.constant 0.000000e+00 : f32
    %434 = vector.broadcast %cst_131 : f32 to vector<1x256xf32>
    %435 = arith.select %433, %432, %434 : vector<1x256xi1>, vector<1x256xf32>
    %436 = arith.maximumf %427, %435 : vector<1x256xf32>
    %437 = vector.extract_strided_slice %428 {offsets = [0, 1], sizes = [8, 256], strides = [1, 1]} : vector<8x264xf32> to vector<8x256xf32>
    %438 = arith.mulf %20, %437 : vector<8x256xf32>
    %cst_132 = arith.constant dense<0.000000e+00> : vector<256xf32>
    %439 = vector.multi_reduction <add>, %438, %cst_132 [0] : vector<8x256xf32> to vector<256xf32>
    %440 = vector.shape_cast %439 : vector<256xf32> to vector<1x256xf32>
    %441 = arith.andi %50, %28 : vector<1x256xi1>
    %cst_133 = arith.constant 0.000000e+00 : f32
    %442 = vector.broadcast %cst_133 : f32 to vector<1x256xf32>
    %443 = arith.select %441, %440, %442 : vector<1x256xi1>, vector<1x256xf32>
    %444 = arith.maximumf %436, %443 : vector<1x256xf32>
    %445 = vector.extract_strided_slice %428 {offsets = [0, 2], sizes = [8, 256], strides = [1, 1]} : vector<8x264xf32> to vector<8x256xf32>
    %446 = arith.mulf %20, %445 : vector<8x256xf32>
    %cst_134 = arith.constant dense<0.000000e+00> : vector<256xf32>
    %447 = vector.multi_reduction <add>, %446, %cst_134 [0] : vector<8x256xf32> to vector<256xf32>
    %448 = vector.shape_cast %447 : vector<256xf32> to vector<1x256xf32>
    %449 = arith.andi %50, %30 : vector<1x256xi1>
    %cst_135 = arith.constant 0.000000e+00 : f32
    %450 = vector.broadcast %cst_135 : f32 to vector<1x256xf32>
    %451 = arith.select %449, %448, %450 : vector<1x256xi1>, vector<1x256xf32>
    %452 = arith.maximumf %444, %451 : vector<1x256xf32>
    %453 = tpu.concatenate %398, %405, %412, %419, %426, %435, %443, %451 in 0 : vector<1x256xf32>, vector<1x256xf32>, vector<1x256xf32>, vector<1x256xf32>, vector<1x256xf32>, vector<1x256xf32>, vector<1x256xf32>, vector<1x256xf32> -> vector<8x256xf32>
    %c0_136 = arith.constant 0 : index
    %c40 = arith.constant 40 : index
    %c0_137 = arith.constant 0 : index
    %454 = vector.load %arg8[%c0_136, %c40, %c0_137] : memref<1x81x256xf32, #tpu.memory_space<vmem>>, vector<1x8x256xf32>
    %455 = vector.shape_cast %454 : vector<1x8x256xf32> to vector<8x256xf32>
    %456 = vector.shape_cast %453 : vector<8x256xf32> to vector<1x8x256xf32>
    tpu.vector_store %arg8[%c0_136, %c40, %c0_137], %456 {strides = array<i32>} : memref<1x81x256xf32, #tpu.memory_space<vmem>>, vector<1x8x256xf32>,
    %457 = vector.extract_strided_slice %428 {offsets = [0, 3], sizes = [8, 256], strides = [1, 1]} : vector<8x264xf32> to vector<8x256xf32>
    %458 = arith.mulf %20, %457 : vector<8x256xf32>
    %cst_138 = arith.constant dense<0.000000e+00> : vector<256xf32>
    %459 = vector.multi_reduction <add>, %458, %cst_138 [0] : vector<8x256xf32> to vector<256xf32>
    %460 = vector.shape_cast %459 : vector<256xf32> to vector<1x256xf32>
    %461 = arith.andi %50, %32 : vector<1x256xi1>
    %cst_139 = arith.constant 0.000000e+00 : f32
    %462 = vector.broadcast %cst_139 : f32 to vector<1x256xf32>
    %463 = arith.select %461, %460, %462 : vector<1x256xi1>, vector<1x256xf32>
    %464 = arith.maximumf %452, %463 : vector<1x256xf32>
    %465 = vector.extract_strided_slice %428 {offsets = [0, 4], sizes = [8, 256], strides = [1, 1]} : vector<8x264xf32> to vector<8x256xf32>
    %466 = arith.mulf %20, %465 : vector<8x256xf32>
    %cst_140 = arith.constant dense<0.000000e+00> : vector<256xf32>
    %467 = vector.multi_reduction <add>, %466, %cst_140 [0] : vector<8x256xf32> to vector<256xf32>
    %468 = vector.shape_cast %467 : vector<256xf32> to vector<1x256xf32>
    %cst_141 = arith.constant 0.000000e+00 : f32
    %469 = vector.broadcast %cst_141 : f32 to vector<1x256xf32>
    %470 = arith.select %50, %468, %469 : vector<1x256xi1>, vector<1x256xf32>
    %471 = arith.maximumf %464, %470 : vector<1x256xf32>
    %472 = vector.extract_strided_slice %428 {offsets = [0, 5], sizes = [8, 256], strides = [1, 1]} : vector<8x264xf32> to vector<8x256xf32>
    %473 = arith.mulf %20, %472 : vector<8x256xf32>
    %cst_142 = arith.constant dense<0.000000e+00> : vector<256xf32>
    %474 = vector.multi_reduction <add>, %473, %cst_142 [0] : vector<8x256xf32> to vector<256xf32>
    %475 = vector.shape_cast %474 : vector<256xf32> to vector<1x256xf32>
    %476 = arith.andi %50, %34 : vector<1x256xi1>
    %cst_143 = arith.constant 0.000000e+00 : f32
    %477 = vector.broadcast %cst_143 : f32 to vector<1x256xf32>
    %478 = arith.select %476, %475, %477 : vector<1x256xi1>, vector<1x256xf32>
    %479 = arith.maximumf %471, %478 : vector<1x256xf32>
    %480 = vector.extract_strided_slice %428 {offsets = [0, 6], sizes = [8, 256], strides = [1, 1]} : vector<8x264xf32> to vector<8x256xf32>
    %481 = arith.mulf %20, %480 : vector<8x256xf32>
    %cst_144 = arith.constant dense<0.000000e+00> : vector<256xf32>
    %482 = vector.multi_reduction <add>, %481, %cst_144 [0] : vector<8x256xf32> to vector<256xf32>
    %483 = vector.shape_cast %482 : vector<256xf32> to vector<1x256xf32>
    %484 = arith.andi %50, %36 : vector<1x256xi1>
    %cst_145 = arith.constant 0.000000e+00 : f32
    %485 = vector.broadcast %cst_145 : f32 to vector<1x256xf32>
    %486 = arith.select %484, %483, %485 : vector<1x256xi1>, vector<1x256xf32>
    %487 = arith.maximumf %479, %486 : vector<1x256xf32>
    %488 = vector.extract_strided_slice %428 {offsets = [0, 7], sizes = [8, 256], strides = [1, 1]} : vector<8x264xf32> to vector<8x256xf32>
    %489 = arith.mulf %20, %488 : vector<8x256xf32>
    %cst_146 = arith.constant dense<0.000000e+00> : vector<256xf32>
    %490 = vector.multi_reduction <add>, %489, %cst_146 [0] : vector<8x256xf32> to vector<256xf32>
    %491 = vector.shape_cast %490 : vector<256xf32> to vector<1x256xf32>
    %492 = arith.andi %50, %38 : vector<1x256xi1>
    %cst_147 = arith.constant 0.000000e+00 : f32
    %493 = vector.broadcast %cst_147 : f32 to vector<1x256xf32>
    %494 = arith.select %492, %491, %493 : vector<1x256xi1>, vector<1x256xf32>
    %495 = arith.maximumf %487, %494 : vector<1x256xf32>
    %496 = vector.extract_strided_slice %428 {offsets = [0, 8], sizes = [8, 256], strides = [1, 1]} : vector<8x264xf32> to vector<8x256xf32>
    %497 = arith.mulf %20, %496 : vector<8x256xf32>
    %cst_148 = arith.constant dense<0.000000e+00> : vector<256xf32>
    %498 = vector.multi_reduction <add>, %497, %cst_148 [0] : vector<8x256xf32> to vector<256xf32>
    %499 = vector.shape_cast %498 : vector<256xf32> to vector<1x256xf32>
    %500 = arith.andi %50, %40 : vector<1x256xi1>
    %cst_149 = arith.constant 0.000000e+00 : f32
    %501 = vector.broadcast %cst_149 : f32 to vector<1x256xf32>
    %502 = arith.select %500, %499, %501 : vector<1x256xi1>, vector<1x256xf32>
    %503 = arith.maximumf %495, %502 : vector<1x256xf32>
    %c0_150 = arith.constant 0 : index
    %c156 = arith.constant 156 : index
    %504 = vector.load %arg9[%c0_150, %c156] : memref<8x512xf32, #tpu.memory_space<vmem>>, vector<8x264xf32>
    %505 = vector.extract_strided_slice %504 {offsets = [0, 0], sizes = [8, 256], strides = [1, 1]} : vector<8x264xf32> to vector<8x256xf32>
    %506 = arith.mulf %20, %505 : vector<8x256xf32>
    %cst_151 = arith.constant dense<0.000000e+00> : vector<256xf32>
    %507 = vector.multi_reduction <add>, %506, %cst_151 [0] : vector<8x256xf32> to vector<256xf32>
    %508 = vector.shape_cast %507 : vector<256xf32> to vector<1x256xf32>
    %509 = arith.andi %52, %26 : vector<1x256xi1>
    %cst_152 = arith.constant 0.000000e+00 : f32
    %510 = vector.broadcast %cst_152 : f32 to vector<1x256xf32>
    %511 = arith.select %509, %508, %510 : vector<1x256xi1>, vector<1x256xf32>
    %512 = arith.maximumf %503, %511 : vector<1x256xf32>
    %513 = vector.extract_strided_slice %504 {offsets = [0, 1], sizes = [8, 256], strides = [1, 1]} : vector<8x264xf32> to vector<8x256xf32>
    %514 = arith.mulf %20, %513 : vector<8x256xf32>
    %cst_153 = arith.constant dense<0.000000e+00> : vector<256xf32>
    %515 = vector.multi_reduction <add>, %514, %cst_153 [0] : vector<8x256xf32> to vector<256xf32>
    %516 = vector.shape_cast %515 : vector<256xf32> to vector<1x256xf32>
    %517 = arith.andi %52, %28 : vector<1x256xi1>
    %cst_154 = arith.constant 0.000000e+00 : f32
    %518 = vector.broadcast %cst_154 : f32 to vector<1x256xf32>
    %519 = arith.select %517, %516, %518 : vector<1x256xi1>, vector<1x256xf32>
    %520 = arith.maximumf %512, %519 : vector<1x256xf32>
    %521 = tpu.concatenate %463, %470, %478, %486, %494, %502, %511, %519 in 0 : vector<1x256xf32>, vector<1x256xf32>, vector<1x256xf32>, vector<1x256xf32>, vector<1x256xf32>, vector<1x256xf32>, vector<1x256xf32>, vector<1x256xf32> -> vector<8x256xf32>
    %c0_155 = arith.constant 0 : index
    %c48 = arith.constant 48 : index
    %c0_156 = arith.constant 0 : index
    %522 = vector.load %arg8[%c0_155, %c48, %c0_156] : memref<1x81x256xf32, #tpu.memory_space<vmem>>, vector<1x8x256xf32>
    %523 = vector.shape_cast %522 : vector<1x8x256xf32> to vector<8x256xf32>
    %524 = vector.shape_cast %521 : vector<8x256xf32> to vector<1x8x256xf32>
    tpu.vector_store %arg8[%c0_155, %c48, %c0_156], %524 {strides = array<i32>} : memref<1x81x256xf32, #tpu.memory_space<vmem>>, vector<1x8x256xf32>,
    %525 = vector.extract_strided_slice %504 {offsets = [0, 2], sizes = [8, 256], strides = [1, 1]} : vector<8x264xf32> to vector<8x256xf32>
    %526 = arith.mulf %20, %525 : vector<8x256xf32>
    %cst_157 = arith.constant dense<0.000000e+00> : vector<256xf32>
    %527 = vector.multi_reduction <add>, %526, %cst_157 [0] : vector<8x256xf32> to vector<256xf32>
    %528 = vector.shape_cast %527 : vector<256xf32> to vector<1x256xf32>
    %529 = arith.andi %52, %30 : vector<1x256xi1>
    %cst_158 = arith.constant 0.000000e+00 : f32
    %530 = vector.broadcast %cst_158 : f32 to vector<1x256xf32>
    %531 = arith.select %529, %528, %530 : vector<1x256xi1>, vector<1x256xf32>
    %532 = arith.maximumf %520, %531 : vector<1x256xf32>
    %533 = vector.extract_strided_slice %504 {offsets = [0, 3], sizes = [8, 256], strides = [1, 1]} : vector<8x264xf32> to vector<8x256xf32>
    %534 = arith.mulf %20, %533 : vector<8x256xf32>
    %cst_159 = arith.constant dense<0.000000e+00> : vector<256xf32>
    %535 = vector.multi_reduction <add>, %534, %cst_159 [0] : vector<8x256xf32> to vector<256xf32>
    %536 = vector.shape_cast %535 : vector<256xf32> to vector<1x256xf32>
    %537 = arith.andi %52, %32 : vector<1x256xi1>
    %cst_160 = arith.constant 0.000000e+00 : f32
    %538 = vector.broadcast %cst_160 : f32 to vector<1x256xf32>
    %539 = arith.select %537, %536, %538 : vector<1x256xi1>, vector<1x256xf32>
    %540 = arith.maximumf %532, %539 : vector<1x256xf32>
    %541 = vector.extract_strided_slice %504 {offsets = [0, 4], sizes = [8, 256], strides = [1, 1]} : vector<8x264xf32> to vector<8x256xf32>
    %542 = arith.mulf %20, %541 : vector<8x256xf32>
    %cst_161 = arith.constant dense<0.000000e+00> : vector<256xf32>
    %543 = vector.multi_reduction <add>, %542, %cst_161 [0] : vector<8x256xf32> to vector<256xf32>
    %544 = vector.shape_cast %543 : vector<256xf32> to vector<1x256xf32>
    %cst_162 = arith.constant 0.000000e+00 : f32
    %545 = vector.broadcast %cst_162 : f32 to vector<1x256xf32>
    %546 = arith.select %52, %544, %545 : vector<1x256xi1>, vector<1x256xf32>
    %547 = arith.maximumf %540, %546 : vector<1x256xf32>
    %548 = vector.extract_strided_slice %504 {offsets = [0, 5], sizes = [8, 256], strides = [1, 1]} : vector<8x264xf32> to vector<8x256xf32>
    %549 = arith.mulf %20, %548 : vector<8x256xf32>
    %cst_163 = arith.constant dense<0.000000e+00> : vector<256xf32>
    %550 = vector.multi_reduction <add>, %549, %cst_163 [0] : vector<8x256xf32> to vector<256xf32>
    %551 = vector.shape_cast %550 : vector<256xf32> to vector<1x256xf32>
    %552 = arith.andi %52, %34 : vector<1x256xi1>
    %cst_164 = arith.constant 0.000000e+00 : f32
    %553 = vector.broadcast %cst_164 : f32 to vector<1x256xf32>
    %554 = arith.select %552, %551, %553 : vector<1x256xi1>, vector<1x256xf32>
    %555 = arith.maximumf %547, %554 : vector<1x256xf32>
    %556 = vector.extract_strided_slice %504 {offsets = [0, 6], sizes = [8, 256], strides = [1, 1]} : vector<8x264xf32> to vector<8x256xf32>
    %557 = arith.mulf %20, %556 : vector<8x256xf32>
    %cst_165 = arith.constant dense<0.000000e+00> : vector<256xf32>
    %558 = vector.multi_reduction <add>, %557, %cst_165 [0] : vector<8x256xf32> to vector<256xf32>
    %559 = vector.shape_cast %558 : vector<256xf32> to vector<1x256xf32>
    %560 = arith.andi %52, %36 : vector<1x256xi1>
    %cst_166 = arith.constant 0.000000e+00 : f32
    %561 = vector.broadcast %cst_166 : f32 to vector<1x256xf32>
    %562 = arith.select %560, %559, %561 : vector<1x256xi1>, vector<1x256xf32>
    %563 = arith.maximumf %555, %562 : vector<1x256xf32>
    %564 = vector.extract_strided_slice %504 {offsets = [0, 7], sizes = [8, 256], strides = [1, 1]} : vector<8x264xf32> to vector<8x256xf32>
    %565 = arith.mulf %20, %564 : vector<8x256xf32>
    %cst_167 = arith.constant dense<0.000000e+00> : vector<256xf32>
    %566 = vector.multi_reduction <add>, %565, %cst_167 [0] : vector<8x256xf32> to vector<256xf32>
    %567 = vector.shape_cast %566 : vector<256xf32> to vector<1x256xf32>
    %568 = arith.andi %52, %38 : vector<1x256xi1>
    %cst_168 = arith.constant 0.000000e+00 : f32
    %569 = vector.broadcast %cst_168 : f32 to vector<1x256xf32>
    %570 = arith.select %568, %567, %569 : vector<1x256xi1>, vector<1x256xf32>
    %571 = arith.maximumf %563, %570 : vector<1x256xf32>
    %572 = vector.extract_strided_slice %504 {offsets = [0, 8], sizes = [8, 256], strides = [1, 1]} : vector<8x264xf32> to vector<8x256xf32>
    %573 = arith.mulf %20, %572 : vector<8x256xf32>
    %cst_169 = arith.constant dense<0.000000e+00> : vector<256xf32>
    %574 = vector.multi_reduction <add>, %573, %cst_169 [0] : vector<8x256xf32> to vector<256xf32>
    %575 = vector.shape_cast %574 : vector<256xf32> to vector<1x256xf32>
    %576 = arith.andi %52, %40 : vector<1x256xi1>
    %cst_170 = arith.constant 0.000000e+00 : f32
    %577 = vector.broadcast %cst_170 : f32 to vector<1x256xf32>
    %578 = arith.select %576, %575, %577 : vector<1x256xi1>, vector<1x256xf32>
    %579 = arith.maximumf %571, %578 : vector<1x256xf32>
    %c0_171 = arith.constant 0 : index
    %c172 = arith.constant 172 : index
    %580 = vector.load %arg9[%c0_171, %c172] : memref<8x512xf32, #tpu.memory_space<vmem>>, vector<8x264xf32>
    %581 = vector.extract_strided_slice %580 {offsets = [0, 0], sizes = [8, 256], strides = [1, 1]} : vector<8x264xf32> to vector<8x256xf32>
    %582 = arith.mulf %20, %581 : vector<8x256xf32>
    %cst_172 = arith.constant dense<0.000000e+00> : vector<256xf32>
    %583 = vector.multi_reduction <add>, %582, %cst_172 [0] : vector<8x256xf32> to vector<256xf32>
    %584 = vector.shape_cast %583 : vector<256xf32> to vector<1x256xf32>
    %585 = arith.andi %54, %26 : vector<1x256xi1>
    %cst_173 = arith.constant 0.000000e+00 : f32
    %586 = vector.broadcast %cst_173 : f32 to vector<1x256xf32>
    %587 = arith.select %585, %584, %586 : vector<1x256xi1>, vector<1x256xf32>
    %588 = arith.maximumf %579, %587 : vector<1x256xf32>
    %589 = tpu.concatenate %531, %539, %546, %554, %562, %570, %578, %587 in 0 : vector<1x256xf32>, vector<1x256xf32>, vector<1x256xf32>, vector<1x256xf32>, vector<1x256xf32>, vector<1x256xf32>, vector<1x256xf32>, vector<1x256xf32> -> vector<8x256xf32>
    %c0_174 = arith.constant 0 : index
    %c56 = arith.constant 56 : index
    %c0_175 = arith.constant 0 : index
    %590 = vector.load %arg8[%c0_174, %c56, %c0_175] : memref<1x81x256xf32, #tpu.memory_space<vmem>>, vector<1x8x256xf32>
    %591 = vector.shape_cast %590 : vector<1x8x256xf32> to vector<8x256xf32>
    %592 = vector.shape_cast %589 : vector<8x256xf32> to vector<1x8x256xf32>
    tpu.vector_store %arg8[%c0_174, %c56, %c0_175], %592 {strides = array<i32>} : memref<1x81x256xf32, #tpu.memory_space<vmem>>, vector<1x8x256xf32>,
    %593 = vector.extract_strided_slice %580 {offsets = [0, 1], sizes = [8, 256], strides = [1, 1]} : vector<8x264xf32> to vector<8x256xf32>
    %594 = arith.mulf %20, %593 : vector<8x256xf32>
    %cst_176 = arith.constant dense<0.000000e+00> : vector<256xf32>
    %595 = vector.multi_reduction <add>, %594, %cst_176 [0] : vector<8x256xf32> to vector<256xf32>
    %596 = vector.shape_cast %595 : vector<256xf32> to vector<1x256xf32>
    %597 = arith.andi %54, %28 : vector<1x256xi1>
    %cst_177 = arith.constant 0.000000e+00 : f32
    %598 = vector.broadcast %cst_177 : f32 to vector<1x256xf32>
    %599 = arith.select %597, %596, %598 : vector<1x256xi1>, vector<1x256xf32>
    %600 = arith.maximumf %588, %599 : vector<1x256xf32>
    %601 = vector.extract_strided_slice %580 {offsets = [0, 2], sizes = [8, 256], strides = [1, 1]} : vector<8x264xf32> to vector<8x256xf32>
    %602 = arith.mulf %20, %601 : vector<8x256xf32>
    %cst_178 = arith.constant dense<0.000000e+00> : vector<256xf32>
    %603 = vector.multi_reduction <add>, %602, %cst_178 [0] : vector<8x256xf32> to vector<256xf32>
    %604 = vector.shape_cast %603 : vector<256xf32> to vector<1x256xf32>
    %605 = arith.andi %54, %30 : vector<1x256xi1>
    %cst_179 = arith.constant 0.000000e+00 : f32
    %606 = vector.broadcast %cst_179 : f32 to vector<1x256xf32>
    %607 = arith.select %605, %604, %606 : vector<1x256xi1>, vector<1x256xf32>
    %608 = arith.maximumf %600, %607 : vector<1x256xf32>
    %609 = vector.extract_strided_slice %580 {offsets = [0, 3], sizes = [8, 256], strides = [1, 1]} : vector<8x264xf32> to vector<8x256xf32>
    %610 = arith.mulf %20, %609 : vector<8x256xf32>
    %cst_180 = arith.constant dense<0.000000e+00> : vector<256xf32>
    %611 = vector.multi_reduction <add>, %610, %cst_180 [0] : vector<8x256xf32> to vector<256xf32>
    %612 = vector.shape_cast %611 : vector<256xf32> to vector<1x256xf32>
    %613 = arith.andi %54, %32 : vector<1x256xi1>
    %cst_181 = arith.constant 0.000000e+00 : f32
    %614 = vector.broadcast %cst_181 : f32 to vector<1x256xf32>
    %615 = arith.select %613, %612, %614 : vector<1x256xi1>, vector<1x256xf32>
    %616 = arith.maximumf %608, %615 : vector<1x256xf32>
    %617 = vector.extract_strided_slice %580 {offsets = [0, 4], sizes = [8, 256], strides = [1, 1]} : vector<8x264xf32> to vector<8x256xf32>
    %618 = arith.mulf %20, %617 : vector<8x256xf32>
    %cst_182 = arith.constant dense<0.000000e+00> : vector<256xf32>
    %619 = vector.multi_reduction <add>, %618, %cst_182 [0] : vector<8x256xf32> to vector<256xf32>
    %620 = vector.shape_cast %619 : vector<256xf32> to vector<1x256xf32>
    %cst_183 = arith.constant 0.000000e+00 : f32
    %621 = vector.broadcast %cst_183 : f32 to vector<1x256xf32>
    %622 = arith.select %54, %620, %621 : vector<1x256xi1>, vector<1x256xf32>
    %623 = arith.maximumf %616, %622 : vector<1x256xf32>
    %624 = vector.extract_strided_slice %580 {offsets = [0, 5], sizes = [8, 256], strides = [1, 1]} : vector<8x264xf32> to vector<8x256xf32>
    %625 = arith.mulf %20, %624 : vector<8x256xf32>
    %cst_184 = arith.constant dense<0.000000e+00> : vector<256xf32>
    %626 = vector.multi_reduction <add>, %625, %cst_184 [0] : vector<8x256xf32> to vector<256xf32>
    %627 = vector.shape_cast %626 : vector<256xf32> to vector<1x256xf32>
    %628 = arith.andi %54, %34 : vector<1x256xi1>
    %cst_185 = arith.constant 0.000000e+00 : f32
    %629 = vector.broadcast %cst_185 : f32 to vector<1x256xf32>
    %630 = arith.select %628, %627, %629 : vector<1x256xi1>, vector<1x256xf32>
    %631 = arith.maximumf %623, %630 : vector<1x256xf32>
    %632 = vector.extract_strided_slice %580 {offsets = [0, 6], sizes = [8, 256], strides = [1, 1]} : vector<8x264xf32> to vector<8x256xf32>
    %633 = arith.mulf %20, %632 : vector<8x256xf32>
    %cst_186 = arith.constant dense<0.000000e+00> : vector<256xf32>
    %634 = vector.multi_reduction <add>, %633, %cst_186 [0] : vector<8x256xf32> to vector<256xf32>
    %635 = vector.shape_cast %634 : vector<256xf32> to vector<1x256xf32>
    %636 = arith.andi %54, %36 : vector<1x256xi1>
    %cst_187 = arith.constant 0.000000e+00 : f32
    %637 = vector.broadcast %cst_187 : f32 to vector<1x256xf32>
    %638 = arith.select %636, %635, %637 : vector<1x256xi1>, vector<1x256xf32>
    %639 = arith.maximumf %631, %638 : vector<1x256xf32>
    %640 = vector.extract_strided_slice %580 {offsets = [0, 7], sizes = [8, 256], strides = [1, 1]} : vector<8x264xf32> to vector<8x256xf32>
    %641 = arith.mulf %20, %640 : vector<8x256xf32>
    %cst_188 = arith.constant dense<0.000000e+00> : vector<256xf32>
    %642 = vector.multi_reduction <add>, %641, %cst_188 [0] : vector<8x256xf32> to vector<256xf32>
    %643 = vector.shape_cast %642 : vector<256xf32> to vector<1x256xf32>
    %644 = arith.andi %54, %38 : vector<1x256xi1>
    %cst_189 = arith.constant 0.000000e+00 : f32
    %645 = vector.broadcast %cst_189 : f32 to vector<1x256xf32>
    %646 = arith.select %644, %643, %645 : vector<1x256xi1>, vector<1x256xf32>
    %647 = arith.maximumf %639, %646 : vector<1x256xf32>
    %648 = vector.extract_strided_slice %580 {offsets = [0, 8], sizes = [8, 256], strides = [1, 1]} : vector<8x264xf32> to vector<8x256xf32>
    %649 = arith.mulf %20, %648 : vector<8x256xf32>
    %cst_190 = arith.constant dense<0.000000e+00> : vector<256xf32>
    %650 = vector.multi_reduction <add>, %649, %cst_190 [0] : vector<8x256xf32> to vector<256xf32>
    %651 = vector.shape_cast %650 : vector<256xf32> to vector<1x256xf32>
    %652 = arith.andi %54, %40 : vector<1x256xi1>
    %cst_191 = arith.constant 0.000000e+00 : f32
    %653 = vector.broadcast %cst_191 : f32 to vector<1x256xf32>
    %654 = arith.select %652, %651, %653 : vector<1x256xi1>, vector<1x256xf32>
    %655 = arith.maximumf %647, %654 : vector<1x256xf32>
    %656 = tpu.concatenate %599, %607, %615, %622, %630, %638, %646, %654 in 0 : vector<1x256xf32>, vector<1x256xf32>, vector<1x256xf32>, vector<1x256xf32>, vector<1x256xf32>, vector<1x256xf32>, vector<1x256xf32>, vector<1x256xf32> -> vector<8x256xf32>
    %c0_192 = arith.constant 0 : index
    %c64 = arith.constant 64 : index
    %c0_193 = arith.constant 0 : index
    %657 = vector.load %arg8[%c0_192, %c64, %c0_193] : memref<1x81x256xf32, #tpu.memory_space<vmem>>, vector<1x8x256xf32>
    %658 = vector.shape_cast %657 : vector<1x8x256xf32> to vector<8x256xf32>
    %659 = vector.shape_cast %656 : vector<8x256xf32> to vector<1x8x256xf32>
    tpu.vector_store %arg8[%c0_192, %c64, %c0_193], %659 {strides = array<i32>} : memref<1x81x256xf32, #tpu.memory_space<vmem>>, vector<1x8x256xf32>,
    %c0_194 = arith.constant 0 : index
    %c188 = arith.constant 188 : index
    %660 = vector.load %arg9[%c0_194, %c188] : memref<8x512xf32, #tpu.memory_space<vmem>>, vector<8x264xf32>
    %661 = vector.extract_strided_slice %660 {offsets = [0, 0], sizes = [8, 256], strides = [1, 1]} : vector<8x264xf32> to vector<8x256xf32>
    %662 = arith.mulf %20, %661 : vector<8x256xf32>
    %cst_195 = arith.constant dense<0.000000e+00> : vector<256xf32>
    %663 = vector.multi_reduction <add>, %662, %cst_195 [0] : vector<8x256xf32> to vector<256xf32>
    %664 = vector.shape_cast %663 : vector<256xf32> to vector<1x256xf32>
    %665 = arith.andi %56, %26 : vector<1x256xi1>
    %cst_196 = arith.constant 0.000000e+00 : f32
    %666 = vector.broadcast %cst_196 : f32 to vector<1x256xf32>
    %667 = arith.select %665, %664, %666 : vector<1x256xi1>, vector<1x256xf32>
    %668 = arith.maximumf %655, %667 : vector<1x256xf32>
    %669 = vector.extract_strided_slice %660 {offsets = [0, 1], sizes = [8, 256], strides = [1, 1]} : vector<8x264xf32> to vector<8x256xf32>
    %670 = arith.mulf %20, %669 : vector<8x256xf32>
    %cst_197 = arith.constant dense<0.000000e+00> : vector<256xf32>
    %671 = vector.multi_reduction <add>, %670, %cst_197 [0] : vector<8x256xf32> to vector<256xf32>
    %672 = vector.shape_cast %671 : vector<256xf32> to vector<1x256xf32>
    %673 = arith.andi %56, %28 : vector<1x256xi1>
    %cst_198 = arith.constant 0.000000e+00 : f32
    %674 = vector.broadcast %cst_198 : f32 to vector<1x256xf32>
    %675 = arith.select %673, %672, %674 : vector<1x256xi1>, vector<1x256xf32>
    %676 = arith.maximumf %668, %675 : vector<1x256xf32>
    %677 = vector.extract_strided_slice %660 {offsets = [0, 2], sizes = [8, 256], strides = [1, 1]} : vector<8x264xf32> to vector<8x256xf32>
    %678 = arith.mulf %20, %677 : vector<8x256xf32>
    %cst_199 = arith.constant dense<0.000000e+00> : vector<256xf32>
    %679 = vector.multi_reduction <add>, %678, %cst_199 [0] : vector<8x256xf32> to vector<256xf32>
    %680 = vector.shape_cast %679 : vector<256xf32> to vector<1x256xf32>
    %681 = arith.andi %56, %30 : vector<1x256xi1>
    %cst_200 = arith.constant 0.000000e+00 : f32
    %682 = vector.broadcast %cst_200 : f32 to vector<1x256xf32>
    %683 = arith.select %681, %680, %682 : vector<1x256xi1>, vector<1x256xf32>
    %684 = arith.maximumf %676, %683 : vector<1x256xf32>
    %685 = vector.extract_strided_slice %660 {offsets = [0, 3], sizes = [8, 256], strides = [1, 1]} : vector<8x264xf32> to vector<8x256xf32>
    %686 = arith.mulf %20, %685 : vector<8x256xf32>
    %cst_201 = arith.constant dense<0.000000e+00> : vector<256xf32>
    %687 = vector.multi_reduction <add>, %686, %cst_201 [0] : vector<8x256xf32> to vector<256xf32>
    %688 = vector.shape_cast %687 : vector<256xf32> to vector<1x256xf32>
    %689 = arith.andi %56, %32 : vector<1x256xi1>
    %cst_202 = arith.constant 0.000000e+00 : f32
    %690 = vector.broadcast %cst_202 : f32 to vector<1x256xf32>
    %691 = arith.select %689, %688, %690 : vector<1x256xi1>, vector<1x256xf32>
    %692 = arith.maximumf %684, %691 : vector<1x256xf32>
    %693 = vector.extract_strided_slice %660 {offsets = [0, 4], sizes = [8, 256], strides = [1, 1]} : vector<8x264xf32> to vector<8x256xf32>
    %694 = arith.mulf %20, %693 : vector<8x256xf32>
    %cst_203 = arith.constant dense<0.000000e+00> : vector<256xf32>
    %695 = vector.multi_reduction <add>, %694, %cst_203 [0] : vector<8x256xf32> to vector<256xf32>
    %696 = vector.shape_cast %695 : vector<256xf32> to vector<1x256xf32>
    %cst_204 = arith.constant 0.000000e+00 : f32
    %697 = vector.broadcast %cst_204 : f32 to vector<1x256xf32>
    %698 = arith.select %56, %696, %697 : vector<1x256xi1>, vector<1x256xf32>
    %699 = arith.maximumf %692, %698 : vector<1x256xf32>
    %700 = vector.extract_strided_slice %660 {offsets = [0, 5], sizes = [8, 256], strides = [1, 1]} : vector<8x264xf32> to vector<8x256xf32>
    %701 = arith.mulf %20, %700 : vector<8x256xf32>
    %cst_205 = arith.constant dense<0.000000e+00> : vector<256xf32>
    %702 = vector.multi_reduction <add>, %701, %cst_205 [0] : vector<8x256xf32> to vector<256xf32>
    %703 = vector.shape_cast %702 : vector<256xf32> to vector<1x256xf32>
    %704 = arith.andi %56, %34 : vector<1x256xi1>
    %cst_206 = arith.constant 0.000000e+00 : f32
    %705 = vector.broadcast %cst_206 : f32 to vector<1x256xf32>
    %706 = arith.select %704, %703, %705 : vector<1x256xi1>, vector<1x256xf32>
    %707 = arith.maximumf %699, %706 : vector<1x256xf32>
    %708 = vector.extract_strided_slice %660 {offsets = [0, 6], sizes = [8, 256], strides = [1, 1]} : vector<8x264xf32> to vector<8x256xf32>
    %709 = arith.mulf %20, %708 : vector<8x256xf32>
    %cst_207 = arith.constant dense<0.000000e+00> : vector<256xf32>
    %710 = vector.multi_reduction <add>, %709, %cst_207 [0] : vector<8x256xf32> to vector<256xf32>
    %711 = vector.shape_cast %710 : vector<256xf32> to vector<1x256xf32>
    %712 = arith.andi %56, %36 : vector<1x256xi1>
    %cst_208 = arith.constant 0.000000e+00 : f32
    %713 = vector.broadcast %cst_208 : f32 to vector<1x256xf32>
    %714 = arith.select %712, %711, %713 : vector<1x256xi1>, vector<1x256xf32>
    %715 = arith.maximumf %707, %714 : vector<1x256xf32>
    %716 = vector.extract_strided_slice %660 {offsets = [0, 7], sizes = [8, 256], strides = [1, 1]} : vector<8x264xf32> to vector<8x256xf32>
    %717 = arith.mulf %20, %716 : vector<8x256xf32>
    %cst_209 = arith.constant dense<0.000000e+00> : vector<256xf32>
    %718 = vector.multi_reduction <add>, %717, %cst_209 [0] : vector<8x256xf32> to vector<256xf32>
    %719 = vector.shape_cast %718 : vector<256xf32> to vector<1x256xf32>
    %720 = arith.andi %56, %38 : vector<1x256xi1>
    %cst_210 = arith.constant 0.000000e+00 : f32
    %721 = vector.broadcast %cst_210 : f32 to vector<1x256xf32>
    %722 = arith.select %720, %719, %721 : vector<1x256xi1>, vector<1x256xf32>
    %723 = arith.maximumf %715, %722 : vector<1x256xf32>
    %724 = tpu.concatenate %667, %675, %683, %691, %698, %706, %714, %722 in 0 : vector<1x256xf32>, vector<1x256xf32>, vector<1x256xf32>, vector<1x256xf32>, vector<1x256xf32>, vector<1x256xf32>, vector<1x256xf32>, vector<1x256xf32> -> vector<8x256xf32>
    %c0_211 = arith.constant 0 : index
    %c72 = arith.constant 72 : index
    %c0_212 = arith.constant 0 : index
    %725 = vector.load %arg8[%c0_211, %c72, %c0_212] : memref<1x81x256xf32, #tpu.memory_space<vmem>>, vector<1x8x256xf32>
    %726 = vector.shape_cast %725 : vector<1x8x256xf32> to vector<8x256xf32>
    %727 = vector.shape_cast %724 : vector<8x256xf32> to vector<1x8x256xf32>
    tpu.vector_store %arg8[%c0_211, %c72, %c0_212], %727 {strides = array<i32>} : memref<1x81x256xf32, #tpu.memory_space<vmem>>, vector<1x8x256xf32>,
    %728 = vector.extract_strided_slice %660 {offsets = [0, 8], sizes = [8, 256], strides = [1, 1]} : vector<8x264xf32> to vector<8x256xf32>
    %729 = arith.mulf %20, %728 : vector<8x256xf32>
    %cst_213 = arith.constant dense<0.000000e+00> : vector<256xf32>
    %730 = vector.multi_reduction <add>, %729, %cst_213 [0] : vector<8x256xf32> to vector<256xf32>
    %731 = vector.shape_cast %730 : vector<256xf32> to vector<1x256xf32>
    %732 = arith.andi %56, %40 : vector<1x256xi1>
    %cst_214 = arith.constant 0.000000e+00 : f32
    %733 = vector.broadcast %cst_214 : f32 to vector<1x256xf32>
    %734 = arith.select %732, %731, %733 : vector<1x256xi1>, vector<1x256xf32>
    %735 = arith.maximumf %723, %734 : vector<1x256xf32>
    %c0_215 = arith.constant 0 : index
    %c80 = arith.constant 80 : index
    %c0_216 = arith.constant 0 : index
    %736 = vector.load %arg8[%c0_215, %c80, %c0_216] : memref<1x81x256xf32, #tpu.memory_space<vmem>>, vector<1x1x256xf32>
    %737 = vector.shape_cast %736 : vector<1x1x256xf32> to vector<1x256xf32>
    %738 = vector.shape_cast %734 : vector<1x256xf32> to vector<1x1x256xf32>
    tpu.vector_store %arg8[%c0_215, %c80, %c0_216], %738 {strides = array<i32>} : memref<1x81x256xf32, #tpu.memory_space<vmem>>, vector<1x1x256xf32>,
    %cst_217 = arith.constant 0.000000e+00 : f32
    %739 = vector.broadcast %cst_217 : f32 to vector<1x256xf32>
    %c0_218 = arith.constant 0 : index
    %c0_219 = arith.constant 0 : index
    %c0_220 = arith.constant 0 : index
    %740 = vector.load %arg8[%c0_218, %c0_219, %c0_220] : memref<1x81x256xf32, #tpu.memory_space<vmem>>, vector<1x32x256xf32>
    %741 = vector.shape_cast %740 : vector<1x32x256xf32> to vector<32x256xf32>
    %742 = vector.broadcast %735 : vector<1x256xf32> to vector<32x256xf32>
    %743 = arith.subf %741, %742 : vector<32x256xf32>
    %744 = math.exp %743 : vector<32x256xf32>
    %c0_221 = arith.constant 0 : index
    %c0_222 = arith.constant 0 : index
    %c0_223 = arith.constant 0 : index
    %745 = vector.load %arg8[%c0_221, %c0_222, %c0_223] : memref<1x81x256xf32, #tpu.memory_space<vmem>>, vector<1x32x256xf32>
    %746 = vector.shape_cast %745 : vector<1x32x256xf32> to vector<32x256xf32>
    %747 = vector.shape_cast %744 : vector<32x256xf32> to vector<1x32x256xf32>
    tpu.vector_store %arg8[%c0_221, %c0_222, %c0_223], %747 {strides = array<i32>} : memref<1x81x256xf32, #tpu.memory_space<vmem>>, vector<1x32x256xf32>,
    %cst_224 = arith.constant dense<0.000000e+00> : vector<256xf32>
    %748 = vector.multi_reduction <add>, %744, %cst_224 [0] : vector<32x256xf32> to vector<256xf32>
    %749 = vector.shape_cast %748 : vector<256xf32> to vector<1x256xf32>
    %750 = arith.addf %739, %749 : vector<1x256xf32>
    %c0_225 = arith.constant 0 : index
    %c32_226 = arith.constant 32 : index
    %c0_227 = arith.constant 0 : index
    %751 = vector.load %arg8[%c0_225, %c32_226, %c0_227] : memref<1x81x256xf32, #tpu.memory_space<vmem>>, vector<1x32x256xf32>
    %752 = vector.shape_cast %751 : vector<1x32x256xf32> to vector<32x256xf32>
    %753 = vector.broadcast %735 : vector<1x256xf32> to vector<32x256xf32>
    %754 = arith.subf %752, %753 : vector<32x256xf32>
    %755 = math.exp %754 : vector<32x256xf32>
    %c0_228 = arith.constant 0 : index
    %c32_229 = arith.constant 32 : index
    %c0_230 = arith.constant 0 : index
    %756 = vector.load %arg8[%c0_228, %c32_229, %c0_230] : memref<1x81x256xf32, #tpu.memory_space<vmem>>, vector<1x32x256xf32>
    %757 = vector.shape_cast %756 : vector<1x32x256xf32> to vector<32x256xf32>
    %758 = vector.shape_cast %755 : vector<32x256xf32> to vector<1x32x256xf32>
    tpu.vector_store %arg8[%c0_228, %c32_229, %c0_230], %758 {strides = array<i32>} : memref<1x81x256xf32, #tpu.memory_space<vmem>>, vector<1x32x256xf32>,
    %cst_231 = arith.constant dense<0.000000e+00> : vector<256xf32>
    %759 = vector.multi_reduction <add>, %755, %cst_231 [0] : vector<32x256xf32> to vector<256xf32>
    %760 = vector.shape_cast %759 : vector<256xf32> to vector<1x256xf32>
    %761 = arith.addf %750, %760 : vector<1x256xf32>
    %c0_232 = arith.constant 0 : index
    %c64_233 = arith.constant 64 : index
    %c0_234 = arith.constant 0 : index
    %762 = vector.load %arg8[%c0_232, %c64_233, %c0_234] : memref<1x81x256xf32, #tpu.memory_space<vmem>>, vector<1x17x256xf32>
    %763 = vector.shape_cast %762 : vector<1x17x256xf32> to vector<17x256xf32>
    %764 = vector.broadcast %735 : vector<1x256xf32> to vector<17x256xf32>
    %765 = arith.subf %763, %764 : vector<17x256xf32>
    %766 = math.exp %765 : vector<17x256xf32>
    %c0_235 = arith.constant 0 : index
    %c64_236 = arith.constant 64 : index
    %c0_237 = arith.constant 0 : index
    %767 = vector.load %arg8[%c0_235, %c64_236, %c0_237] : memref<1x81x256xf32, #tpu.memory_space<vmem>>, vector<1x17x256xf32>
    %768 = vector.shape_cast %767 : vector<1x17x256xf32> to vector<17x256xf32>
    %769 = vector.shape_cast %766 : vector<17x256xf32> to vector<1x17x256xf32>
    tpu.vector_store %arg8[%c0_235, %c64_236, %c0_237], %769 {strides = array<i32>} : memref<1x81x256xf32, #tpu.memory_space<vmem>>, vector<1x17x256xf32>,
    %cst_238 = arith.constant dense<0.000000e+00> : vector<256xf32>
    %770 = vector.multi_reduction <add>, %766, %cst_238 [0] : vector<17x256xf32> to vector<256xf32>
    %771 = vector.shape_cast %770 : vector<256xf32> to vector<1x256xf32>
    %772 = arith.addf %761, %771 : vector<1x256xf32>
    %773 = tpu.reciprocal %772 {approx = true} : vector<1x256xf32> -> vector<1x256xf32>
    %774 = arith.mulf %772, %773 : vector<1x256xf32>
    %cst_239 = arith.constant 2.000000e+00 : f32
    %775 = vector.broadcast %cst_239 : f32 to vector<1x256xf32>
    %776 = arith.subf %775, %774 : vector<1x256xf32>
    %777 = arith.mulf %773, %776 : vector<1x256xf32>
    %778 = arith.mulf %772, %777 : vector<1x256xf32>
    %cst_240 = arith.constant 2.000000e+00 : f32
    %779 = vector.broadcast %cst_240 : f32 to vector<1x256xf32>
    %780 = arith.subf %779, %778 : vector<1x256xf32>
    %781 = arith.mulf %777, %780 : vector<1x256xf32>
    %c0_241 = arith.constant 0 : index
    %c0_242 = arith.constant 0 : index
    %c0_243 = arith.constant 0 : index
    %782 = vector.load %arg8[%c0_241, %c0_242, %c0_243] : memref<1x81x256xf32, #tpu.memory_space<vmem>>, vector<1x32x256xf32>
    %783 = vector.shape_cast %782 : vector<1x32x256xf32> to vector<32x256xf32>
    %784 = vector.broadcast %781 : vector<1x256xf32> to vector<32x256xf32>
    %785 = arith.mulf %783, %784 : vector<32x256xf32>
    %c0_244 = arith.constant 0 : index
    %c0_245 = arith.constant 0 : index
    %c0_246 = arith.constant 0 : index
    %786 = vector.load %arg8[%c0_244, %c0_245, %c0_246] : memref<1x81x256xf32, #tpu.memory_space<vmem>>, vector<1x32x256xf32>
    %787 = vector.shape_cast %786 : vector<1x32x256xf32> to vector<32x256xf32>
    %788 = vector.shape_cast %785 : vector<32x256xf32> to vector<1x32x256xf32>
    tpu.vector_store %arg8[%c0_244, %c0_245, %c0_246], %788 {strides = array<i32>} : memref<1x81x256xf32, #tpu.memory_space<vmem>>, vector<1x32x256xf32>,
    %c0_247 = arith.constant 0 : index
    %c32_248 = arith.constant 32 : index
    %c0_249 = arith.constant 0 : index
    %789 = vector.load %arg8[%c0_247, %c32_248, %c0_249] : memref<1x81x256xf32, #tpu.memory_space<vmem>>, vector<1x32x256xf32>
    %790 = vector.shape_cast %789 : vector<1x32x256xf32> to vector<32x256xf32>
    %791 = vector.broadcast %781 : vector<1x256xf32> to vector<32x256xf32>
    %792 = arith.mulf %790, %791 : vector<32x256xf32>
    %c0_250 = arith.constant 0 : index
    %c32_251 = arith.constant 32 : index
    %c0_252 = arith.constant 0 : index
    %793 = vector.load %arg8[%c0_250, %c32_251, %c0_252] : memref<1x81x256xf32, #tpu.memory_space<vmem>>, vector<1x32x256xf32>
    %794 = vector.shape_cast %793 : vector<1x32x256xf32> to vector<32x256xf32>
    %795 = vector.shape_cast %792 : vector<32x256xf32> to vector<1x32x256xf32>
    tpu.vector_store %arg8[%c0_250, %c32_251, %c0_252], %795 {strides = array<i32>} : memref<1x81x256xf32, #tpu.memory_space<vmem>>, vector<1x32x256xf32>,
    %c0_253 = arith.constant 0 : index
    %c64_254 = arith.constant 64 : index
    %c0_255 = arith.constant 0 : index
    %796 = vector.load %arg8[%c0_253, %c64_254, %c0_255] : memref<1x81x256xf32, #tpu.memory_space<vmem>>, vector<1x17x256xf32>
    %797 = vector.shape_cast %796 : vector<1x17x256xf32> to vector<17x256xf32>
    %798 = vector.broadcast %781 : vector<1x256xf32> to vector<17x256xf32>
    %799 = arith.mulf %797, %798 : vector<17x256xf32>
    %c0_256 = arith.constant 0 : index
    %c64_257 = arith.constant 64 : index
    %c0_258 = arith.constant 0 : index
    %800 = vector.load %arg8[%c0_256, %c64_257, %c0_258] : memref<1x81x256xf32, #tpu.memory_space<vmem>>, vector<1x17x256xf32>
    %801 = vector.shape_cast %800 : vector<1x17x256xf32> to vector<17x256xf32>
    %802 = vector.shape_cast %799 : vector<17x256xf32> to vector<1x17x256xf32>
    tpu.vector_store %arg8[%c0_256, %c64_257, %c0_258], %802 {strides = array<i32>} : memref<1x81x256xf32, #tpu.memory_space<vmem>>, vector<1x17x256xf32>,
    return
  }
  func.func @transform_0(%arg0: i32) -> (i32, i32) {
    %c0_i32 = arith.constant 0 : i32
    %c0_i32_0 = arith.constant 0 : i32
    %c0_i32_1 = arith.constant 0 : i32
    return %c0_i32, %c0_i32_0 : i32, i32
  }
  func.func @transform_1(%arg0: i32) -> (i32, i32, i32) {
    %c0_i32 = arith.constant 0 : i32
    %c0_i32_0 = arith.constant 0 : i32
    %c0_i32_1 = arith.constant 0 : i32
    return %arg0, %c0_i32, %c0_i32_0 : i32, i32, i32
  }
  func.func @transform_2(%arg0: i32) -> (i32, i32, i32) {
    %c0_i32 = arith.constant 0 : i32
    %c0_i32_0 = arith.constant 0 : i32
    %c0_i32_1 = arith.constant 0 : i32
    return %arg0, %c0_i32, %c0_i32_0 : i32, i32, i32
  }
  func.func @transform_3(%arg0: i32) -> (i32, i32) {
    %c0_i32 = arith.constant 0 : i32
    %c0_i32_0 = arith.constant 0 : i32
    %c0_i32_1 = arith.constant 0 : i32
    return %c0_i32, %c0_i32_0 : i32, i32
  }
  func.func @transform_4(%arg0: i32) -> (i32, i32) {
    %c0_i32 = arith.constant 0 : i32
    %c0_i32_0 = arith.constant 0 : i32
    %c0_i32_1 = arith.constant 0 : i32
    return %c0_i32, %c0_i32_0 : i32, i32
  }
  func.func @transform_5(%arg0: i32) -> (i32, i32) {
    %c0_i32 = arith.constant 0 : i32
    %c0_i32_0 = arith.constant 0 : i32
    %c0_i32_1 = arith.constant 0 : i32
    return %c0_i32, %c0_i32_0 : i32, i32
  }
  func.func @transform_6(%arg0: i32) -> (i32, i32) {
    %c0_i32 = arith.constant 0 : i32
    %c0_i32_0 = arith.constant 0 : i32
    %c0_i32_1 = arith.constant 0 : i32
    return %c0_i32, %c0_i32_0 : i32, i32
  }
  func.func @transform_7(%arg0: i32) -> (i32, i32, i32) {
    %c0_i32 = arith.constant 0 : i32
    %c0_i32_0 = arith.constant 0 : i32
    %c0_i32_1 = arith.constant 0 : i32
    return %arg0, %c0_i32, %c0_i32_0 : i32, i32, i32
  }
}

</mosaic_0001>

<bundles_post_ra>
// kernel: local_atten.1
= control target key start
LH: loop header
LB: loop body
LE: loop exit
PB: predicated region body
PF: predicated region fallthrough
CT: control target
= control target key end

     0   :  { %s4460_s24 = smov 0   ;;  %s7604_s0 = inlined_call_operand.vmem [shape: s32[1,256], index: 0, kind: input, shape index: {}]   ;;  %s7605_s1 = inlined_call_operand.vmem [shape: f32[2,32,256], index: 1, kind: input, shape index: {}]   ;;  %s7606_s2 = inlined_call_operand.vmem [shape: f32[2,32,256], index: 2, kind: input, shape index: {}]   ;;  %s7607_s3 = inlined_call_operand.vmem [shape: f32[8,32], index: 3, kind: input, shape index: {}]   ;;  %s7608_s4 = inlined_call_operand.vmem [shape: f32[8,1], index: 4, kind: input, shape index: {}]   ;;  %s7609_s5 = inlined_call_operand.vmem [shape: f32[8,32], index: 5, kind: input, shape index: {}]   ;;  %s7610_s6 = inlined_call_operand.vmem [shape: f32[8,1], index: 6, kind: input, shape index: {}]   ;;  %s7611_s7 = inlined_call_operand.vmem [shape: f32[2,81,256], index: 7, kind: output, shape index: {}]  }
   0x1   :  { %7871 = sst [smem:[#allocation69_spill]] %s7605_s1 }
   0x2   :  { %7872 = sst [smem:[#allocation70_spill]] %s7606_s2 }
   0x3   :  { %7873 = sst [smem:[#allocation71_spill]] %s7607_s3 }
   0x4   :  { %7874 = sst [smem:[#allocation72_spill]] %s7608_s4 }
   0x5   :  { %7875 = sst [smem:[#allocation73_spill]] %s7609_s5 }
   0x6   :  { %7876 = sst [smem:[#allocation74_spill]] %s7610_s6 }
   0x7   :  { %7877 = sst [smem:[#allocation75_spill]] %s7611_s7 }
   0x8 LB: > { %7878 = sst [smem:[#allocation3_spill]] %s4344_s24  ;;  %s4173_s25 = sadd.s32 4294967295, %s4344_s24   ;;  %s4344_s24 = sphi %s4460_s24, %s17_s24  }
   0x9   : > { %p4177_p0 = scmp.ge.s32.totalorder %s4344_s24, 1  ;;  %p247_p1 = scmp.lt.s32.totalorder %s4344_s24, 3 }
   0xb   : > { %p248_p2 = pnand %p4177_p0, %p247_p1 }
   0xd   : > { %251 = sbr.rel (%p248_p2) target bundleno = 1001 (0x3e9), region = 48 }
  0x14   : > { %p284_p3 = scmp.lt.s32.totalorder %s4173_s25, 1  ;;  %v7684_v0 = vmov 0.0   ;;  %s7879_s4 = sld [smem:[#allocation72_spill]]  ;;  %v7686_v2 = vmov 0   ;;  %vm7724_vm0 = vcmask 261120   ;;  %vm7696_vm5 = vcmask 547840  }
  0x15   : > { %384 = vmatprep.mubr.f32.mxu0 %v7684_v0  ;;  %475 = vmatprep.mubr.f32.mxu1 %v7684_v0  ;;  %s7672_s28 = smov 68   ;;  %s7881_s6 = sld [smem:[#allocation74_spill]]  ;;  %vm7719_vm6 = vcmask 556032   ;;  %vm7706_vm7 = vcmask 531456   ;;  %vm7718_vm8 = vcmask 539648   ;;  %vm7716_vm10 = vcmask 515072  }
  0x16   : > { %s8634_s25 = smov (!%p284_p3, %s4173_s25), 1  ;;  %4289 = vset.pattern.permute.xlu0 %v7686_v2  ;;  %518 = vrot.lane.b32.xlu1 %v7684_v0, %s7672_s28  ;;  %s7882_s1 = sld [smem:[#allocation69_spill]]  ;;  %vm7717_vm11 = vcmask 523264   ;;  %vm7727_vm15 = vcmask 498688  }
  0x17   : > { %7880 = sst [smem:[#allocation4_spill]] %s8634_s25  ;;  %s4188_s29 = sshll.u32 %s8634_s25, 6 }
  0x18   : > { %s7883_s2 = sld [smem:[#allocation70_spill]]  ;;  %s7666_s15 = smov 67  }
  0x19   : > { %s7668_s16 = smov 66   ;;  %s7662_s17 = smov 65  }
  0x1a   : > { %v310_v1 = vld [vmem:[%s7879_s4] sm:$0xff]  ;;  %558 = vrot.lane.b32.xlu1 %v7684_v0, %s7666_s15  ;;  %s7884_s3 = sld [smem:[#allocation71_spill]]  ;;  %s7885_s5 = sld [smem:[#allocation73_spill]] }
  0x1b   : > { %313 = vperm.xlu0 %4289, %v310_v1   ;;  %v402_v3 = vld [vmem:[%s7881_s6] sm:$0xff]  ;;  %s7664_s22 = smov 64   ;;  %s7658_s23 = smov 63  }
  0x1c   : > { %s288_s11 = scalar_lea.vmem %s7882_s1, %s4188_s29  ;;  %s7660_s26 = smov 62  }
  0x1d   : > { %v303_v4 = vld [vmem:[%s288_s11 + $0x8] sm:$0xff]  ;;  %v305_v5 = vld [vmem:[%s288_s11 + $0x18] sm:$0xff]  ;;  %v302_v9 = vld [vmem:[%s288_s11] sm:$0xff]  ;;  %s7654_s27 = smov 61   ;;  %s7648_s30 = smov 52  }
  0x1e   : > { %s293_s14 = scalar_lea.vmem %s7883_s2, %s4188_s29  ;;  %v4190_v7 = vpack.c.bf16 %v305_v5, %v303_v4  ;;  %v304_v10 = vld [vmem:[%s288_s11 + $0x10] sm:$0xff]  ;;  %v307_v15 = vld [vmem:[%s288_s11 + $0x28] sm:$0xff]  ;;  %v309_v17 = vld [vmem:[%s288_s11 + $0x38] sm:$0xff]  ;;  %642 = vrot.lane.b32.xlu1 %v7684_v0, %s7662_s17  ;;  %s7656_s29 = smov 60  }
  0x1f   : > { %v395_v6 = vld [vmem:[%s293_s14 + $0x8] sm:$0xff]  ;;  %v397_v8 = vld [vmem:[%s293_s14 + $0x18] sm:$0xff]  ;;  %405 = vperm.xlu0 %4289, %v402_v3   ;;  %v4192_v12 = vpack.c.bf16 %v304_v10, %v302_v9  ;;  %v394_v13 = vld [vmem:[%s293_s14] sm:$0xff]  ;;  %v4194_v20 = vpack.c.bf16 %v309_v17, %v307_v15  ;;  %s7652_s8 = smov 51   ;;  %s7649_s9 = smov 50  }
  0x20   : > { %v4198_v11 = vpack.c.bf16 %v397_v8, %v395_v6  ;;  %v396_v14 = vld [vmem:[%s293_s14 + $0x10] sm:$0xff]  ;;  %4191 = vmatprep.subr.bf16.mxu0 %v4190_v7  ;;  %v399_v18 = vld [vmem:[%s293_s14 + $0x28] sm:$0xff]  ;;  %v401_v19 = vld [vmem:[%s293_s14 + $0x38] sm:$0xff]  ;;  %s7651_s10 = smov 49   ;;  %s7612_s12 = smov 47  }
  0x21   : > { %v4200_v16 = vpack.c.bf16 %v396_v14, %v394_v13  ;;  %4193 = vmatpush1.bf16.msra.mxu0 %v4192_v12  ;;  %v4202_v21 = vpack.c.bf16 %v401_v19, %v399_v18  ;;  %v306_v22 = vld [vmem:[%s288_s11 + $0x20] sm:$0xff]  ;;  %v308_v23 = vld [vmem:[%s288_s11 + $0x30] sm:$0xff]  ;;  %s7650_s11 = smov 48   ;;  %s7653_s13 = smov 46   ;;  %v7683_v12 = vlaneseq }
  0x22   : > { %4199 = vmatprep.subr.bf16.mxu1 %v4198_v11  ;;  %v398_v24 = vld [vmem:[%s293_s14 + $0x20] sm:$0xff]  ;;  %v4196_v25 = vpack.c.bf16 %v308_v23, %v306_v22  ;;  %v400_v26 = vld [vmem:[%s293_s14 + $0x30] sm:$0xff]  ;;  %4195 = vmatprep.subr.bf16.mxu0 %v4194_v20  ;;  %s7614_s14 = smov 45   ;;  %s7616_s18 = smov 44  }
  0x23   : > { %4201 = vmatpush1.bf16.msra.mxu1 %v4200_v16  ;;  %600 = vrot.lane.b32.xlu0 %v7684_v0, %s7668_s16  ;;  %v4204_v27 = vpack.c.bf16 %v400_v26, %v398_v24  ;;  %v301_v28 = vld [vmem:[%s7884_s3] sm:$0xff]  ;;  %s7618_s19 = smov 36   ;;  %s7620_s20 = smov 35   ;;  %v4779_v18 = vshrl.u32 %v7683_v12, 7 }
  0x24   : > { %4203 = vmatprep.subr.bf16.mxu1 %v4202_v21  ;;  %v393_v29 = vld [vmem:[%s7885_s5] sm:$0xff]  ;;  %713 = vrot.lane.b32.xlu1 %v7684_v0, %s7658_s23  ;;  %s7622_s21 = smov 34   ;;  %s7904_s1 = smov 3  }
  0x25   : > { %4197 = vmatpush1.bf16.msra.mxu0 %v4196_v25  ;;  %s7905_s2 = smov 4   ;;  %s7909_s3 = smov 67   ;;  %v4774_v16 = vld [vmem:[%s7604_s0] sm:$0x3]  ;;  %7927 = vst [vmem:[#allocation12_spill] sm:$0xff] %v4779_v18  ;;  %v4789_v20 = vsub.s32 0, %v4779_v18 }
  0x26   : > { %s7910_s4 = smov 64   ;;  %s7911_s5 = smov 65   ;;  %7925 = vst [vmem:[#allocation10_spill] sm:$0xff] %v4774_v16  ;;  %vm7691_vm1 = vcmp.ge.s32.totalorder %v4774_v16, 3  ;;  %vm7695_vm2 = vcmp.ge.s32.totalorder %v4774_v16, 4  ;;  %vm7690_vm3 = vcmp.ge.s32.totalorder %v4774_v16, 1 }
  0x27   : > { %4205 = vmatpush1.bf16.msra.mxu1 %v4204_v27  ;;  %684 = vrot.lane.b32.xlu0 %v7684_v0, %s7664_s22  ;;  %s7912_s6 = smov 62   ;;  %s7913_s24 = smov 63   ;;  %7930 = vst [vmem:[#allocation14_spill] sm:$0xff] %v4789_v20  ;;  %v4805_v24 = vsel %vm7691_vm1, 1, %v7686_v2  ;;  %v4813_v26 = vsel %vm7695_vm2, 1, %v7686_v2  ;;  %vm7694_vm4 = vcmp.ge.s32.totalorder %v4774_v16, 2 }
  0x28   : > { %4183 = vmatmul.mubr.msk.f32.vlgmr.msra.gmra.mrb[0].mxu0 %vm7724_vm0, %v301_v28  ;;  %797 = vrot.lane.b32.xlu1 %v7684_v0, %s7654_s27  ;;  %s7915_s7 = smov 60   ;;  %s7916_s25 = smov 61   ;;  %7934 = vst [vmem:[#allocation17_spill] sm:$0xff] %v4805_v24  ;;  %7935 = vst [vmem:[#allocation18_spill] sm:$0xff] %v4813_v26  ;;  %v4817_v27 = vand.u32 127, %v7683_v12  ;;  %v587_v28 = vrot.slane %v4805_v24, %v4789_v20  ;;  %vm7701_vm9 = vcmp.lt.s32.totalorder %v4774_v16, 15 }
  0x29   : > { %vm7702_vm14 = vcmp.lt.s32.totalorder %v4774_v16, 13  ;;  %vm7728_vm1 = vcmask 506880   ;;  %vm7714_vm2 = vcmp.lt.s32.totalorder %v4774_v16, 12 }
  0x2a   : > { %4184 = vmatmul.mubr.msk.f32.vlgmr.msra.gmra.mrb[0].mxu1 %vm7724_vm0, %v393_v29  ;;  %7936 = vst [vmem:[#allocation19_spill] sm:$0xff] %v4817_v27  ;;  %vm496_vm12 = vcmp.ge.s32.totalorder %v4817_v27, 64  ;;  %vm4843_vm13 = vcmp.ne.s32.totalorder %v587_v28, 0 }
  0x2b   : > { %755 = vrot.lane.b32.xlu0 %v7684_v0, %s7660_s26 }
  0x2c   : > { %946 = vrot.lane.b32.xlu1 %v7684_v0, %s7648_s30 }
  0x2f   : > { %898 = vrot.lane.b32.xlu0 %v7684_v0, %s7656_s29 }
  0x30   : > { %1008 = vrot.lane.b32.xlu1 %v7684_v0, %s7649_s9 }
  0x33   : > { %977 = vrot.lane.b32.xlu0 %v7684_v0, %s7652_s8 }
  0x34   : > { %1070 = vrot.lane.b32.xlu1 %v7684_v0, %s7650_s11 }
  0x37   : > { %1039 = vrot.lane.b32.xlu0 %v7684_v0, %s7651_s10 }
  0x38   : > { %1130 = vrot.lane.b32.xlu1 %v7684_v0, %s7653_s13 }
  0x3b   : > { %1099 = vrot.lane.b32.xlu0 %v7684_v0, %s7612_s12  ;;  %s7624_s12 = smov 33  }
  0x3c   : > { %1244 = vrot.lane.b32.xlu1 %v7684_v0, %s7616_s18  ;;  %s7628_s18 = smov 31  }
  0x3f   : > { %1213 = vrot.lane.b32.xlu0 %v7684_v0, %s7614_s14  ;;  %s7626_s14 = smov 32  }
  0x40   : > { %1312 = vrot.lane.b32.xlu1 %v7684_v0, %s7620_s20  ;;  %s7632_s20 = smov 29  }
  0x43   : > { %1281 = vrot.lane.b32.xlu0 %v7684_v0, %s7618_s19  ;;  %s7630_s19 = smov 30  }
  0x44   : > { %1374 = vrot.lane.b32.xlu1 %v7684_v0, %s7624_s12  ;;  %s7636_s12 = smov 20  }
  0x47   : > { %1343 = vrot.lane.b32.xlu0 %v7684_v0, %s7622_s21  ;;  %s7634_s21 = smov 28  }
  0x48   : > { %1433 = vrot.lane.b32.xlu1 %v7684_v0, %s7628_s18  ;;  %s7640_s18 = smov 18  }
  0x4b   : > { %1405 = vrot.lane.b32.xlu0 %v7684_v0, %s7626_s14  ;;  %s7638_s14 = smov 19  }
  0x4c   : > { %1547 = vrot.lane.b32.xlu1 %v7684_v0, %s7632_s20  ;;  %s7644_s20 = smov 16  }
  0x4f   : > { %1516 = vrot.lane.b32.xlu0 %v7684_v0, %s7630_s19  ;;  %s7642_s19 = smov 17  }
  0x50   : > { %1615 = vrot.lane.b32.xlu1 %v7684_v0, %s7636_s12  ;;  %s7678_s12 = smov 14  }
  0x53   : > { %1578 = vrot.lane.b32.xlu0 %v7684_v0, %s7634_s21  ;;  %s7646_s21 = smov 15  }
  0x54   : > { %1677 = vrot.lane.b32.xlu1 %v7684_v0, %s7640_s18  ;;  %s7679_s18 = smov 12  }
  0x57   : > { %1646 = vrot.lane.b32.xlu0 %v7684_v0, %s7638_s14  ;;  %s7680_s14 = smov 13  }
  0x58   : > { %1739 = vrot.lane.b32.xlu1 %v7684_v0, %s7644_s20  ;;  %s7676_s20 = smov 3  }
  0x5b   : > { %1708 = vrot.lane.b32.xlu0 %v7684_v0, %s7642_s19  ;;  %s7674_s19 = smov 4  }
  0x5c   : > { %1851 = vrot.lane.b32.xlu1 %v7684_v0, %s7678_s12 }
  0x5f   : > { %1820 = vrot.lane.b32.xlu0 %v7684_v0, %s7646_s21  ;;  %s7670_s21 = smov 2  }
  0x60   : > { %1913 = vrot.lane.b32.xlu1 %v7684_v0, %s7679_s18 }
  0x63   : > { %1882 = vrot.lane.b32.xlu0 %v7684_v0, %s7680_s14 }
  0x64   : > { %2008 = vrot.lane.b32.xlu1 %v7684_v0, %s7676_s20  ;;  %s7903_s20 = smov 15  }
  0x67   : > { %1951 = vrot.lane.b32.xlu0 %v7684_v0, %s7674_s19  ;;  %s7902_s19 = smov 17  }
  0x6b   : > { %2065 = vrot.lane.b32.xlu0 %v7684_v0, %s7670_s21  ;;  %s7900_s21 = smov 19  }
  0x88   : > { %v4574_v31 = vpop.permute.xlu1 %518 }
  0x8c   : > { %v4591_v38 = vpop.permute.xlu1 %558 }
  0x90   : > { %v4599_v40 = vpop.permute.xlu1 %642 }
  0x96   : > { %v4611_v42 = vpop.permute.xlu1 %713 }
  0x9a   : > { %v4572_v30 = vpop.permute.xlu0 %313  ;;  %v4619_v44 = vpop.permute.xlu1 %797 }
  0x9e   : > { %v4576_v32 = vpop.permute.xlu0 %405  ;;  %v4631_v46 = vpop.permute.xlu1 %946 }
  0xa2   : > { %v4593_v39 = vpop.permute.xlu0 %600  ;;  %v4639_v48 = vpop.permute.xlu1 %1008 }
  0xa6   : > { %v4601_v41 = vpop.permute.xlu0 %684  ;;  %v4651_v50 = vpop.permute.xlu1 %1070 }
  0xaa   : > { %v4613_v43 = vpop.permute.xlu0 %755  ;;  %v4659_v52 = vpop.permute.xlu1 %1130 }
  0xae   : > { %v4621_v45 = vpop.permute.xlu0 %898  ;;  %v4671_v54 = vpop.permute.xlu1 %1244 }
  0xb2   : > { %v4633_v47 = vpop.permute.xlu0 %977  ;;  %v4679_v56 = vpop.permute.xlu1 %1312 }
  0xb6   : > { %v4641_v49 = vpop.permute.xlu0 %1039  ;;  %v4691_v58 = vpop.permute.xlu1 %1374 }
  0xba   : > { %v4653_v51 = vpop.permute.xlu0 %1099  ;;  %v4699_v60 = vpop.permute.xlu1 %1433 }
  0xbe   : > { %v4661_v53 = vpop.permute.xlu0 %1213  ;;  %v4711_v62 = vpop.permute.xlu1 %1547 }
  0xc2   : > { %v4673_v55 = vpop.permute.xlu0 %1281  ;;  %v4723_v3 = vpop.permute.xlu1 %1615 }
  0xc6   : > { %v4681_v57 = vpop.permute.xlu0 %1343  ;;  %v4735_v5 = vpop.permute.xlu1 %1677 }
  0xca   : > { %v4693_v59 = vpop.permute.xlu0 %1405  ;;  %v4743_v7 = vpop.permute.xlu1 %1739 }
  0xce   : > { %v4701_v61 = vpop.permute.xlu0 %1516  ;;  %v4755_v9 = vpop.permute.xlu1 %1851 }
  0xcf   : > { %7919 = vst [vmem:[#allocation6_spill] sm:$0xff] %v4755_v9  ;;  %v7971_v9 = vmov 0 }
  0xd2   : > { %v4713_v63 = vpop.permute.xlu0 %1578  ;;  %v4767_v14 = vpop.permute.xlu1 %1913 }
  0xd3   : > { %7923 = vst [vmem:[#allocation8_spill] sm:$0xff] %v4767_v14  ;;  %v7963_v14 = vmov 0 }
  0xd6   : > { %v4725_v4 = vpop.permute.xlu0 %1646  ;;  %v4798_v22 = vpop.permute.xlu1 %2008 }
  0xd7   : > { %7932 = vst [vmem:[#allocation15_spill] sm:$0xff] %v4798_v22 }
  0xda   : > { %v4737_v6 = vpop.permute.xlu0 %1708 }
  0xde   : > { %v4745_v8 = vpop.permute.xlu0 %1820 }
  0xdf   : > { %7914 = vst [vmem:[#allocation5_spill] sm:$0xff] %v4745_v8 }
  0xe2   : > { %v4757_v10 = vpop.permute.xlu0 %1882 }
  0xe3   : > { %7920 = vst [vmem:[#allocation7_spill] sm:$0xff] %v4757_v10 }
  0xe6   : > { %v4769_v15 = vpop.permute.xlu0 %1951 }
  0xe7   : > { %7924 = vst [vmem:[#allocation9_spill] sm:$0xff] %v4769_v15  ;;  %v7956_v15 = vmov 0 }
  0xea   : > { %v4800_v23 = vpop.permute.xlu0 %2065 }
  0xeb   : > { %7933 = vst [vmem:[#allocation16_spill] sm:$0xff] %v4800_v23 }
  0xfb   : > { %v386_v33 = vpop.f32.mrb[0].mxu0 }
  0xfc   : > { %v4579_v34 = vadd.f32 %v386_v33, %v4572_v30  ;;  %v4583_v36 = vpop.f32.mrb[1].mxu0  ;;  %v4835_v33 = vsel %vm7694_vm4, 1, %v7686_v2  ;;  %vm7715_vm4 = vcmp.lt.s32.totalorder %v4774_v16, 14 }
  0xfd   : > { %v4581_v35 = vpop.f32.mrb[0].mxu1  ;;  %v4717_v1 = vadd.f32 %v4583_v36, %v4572_v30  ;;  %v4828_v30 = vsel %vm7690_vm3, 1, %v7686_v2  ;;  %7938 = vst [vmem:[#allocation21_spill] sm:$0xff] %v4835_v33 }
  0xfe   : > { %v4585_v37 = vpop.f32.mrb[1].mxu1  ;;  %560 = vrot.lane.b32.xlu0 %v4579_v34, %s7666_s15  ;;  %520 = vrot.lane.b32.xlu1 %v4579_v34, %s7672_s28  ;;  %s7898_s15 = smov 28   ;;  %s7901_s28 = smov 16   ;;  %v478_v11 = vadd.f32 %v4581_v35, %v4576_v32  ;;  %7937 = vst [vmem:[#allocation20_spill] sm:$0xff] %v4828_v30  ;;  %v671_v0 = vrot.slane %v4828_v30, %v4789_v20 }
  0xff   : > { %v480_v13 = vadd.f32 %v4585_v37, %v4576_v32  ;;  %v547_v32 = vrot.slane %v4813_v26, %v4789_v20 }
 0x100   : > { %v4776_v17 = vmul.f32 0.125, %v478_v11  ;;  %v7941_v11 = vmov 0 }
 0x101   : > { %v4785_v19 = vmul.f32 0.125, %v480_v13  ;;  %v7942_v11 = vsel %vm4843_vm13, 4294967295, %v7941_v11  ;;  %vm4864_vm3 = vcmp.ne.s32.totalorder %v547_v32, 0  ;;  %v7952_v32 = vmov 0 }
 0x102   : > { %644 = vrot.lane.b32.xlu0 %v4579_v34, %s7662_s17  ;;  %602 = vrot.lane.b32.xlu1 %v4579_v34, %s7668_s16  ;;  %s7896_s17 = smov 30   ;;  %s7899_s16 = smov 18   ;;  %7926 = vst [vmem:[#allocation11_spill] sm:$0xff] %v4776_v17  ;;  %v2213_v21 = vmul.f32 %v4776_v17, %v4579_v34  ;;  %7943 = vst [vmem:[#allocation24_spill] sm:$0xff] %v7942_v11 }
 0x103   : > { %7929 = vst [vmem:[#allocation13_spill] sm:$0xff] %v4785_v19  ;;  %v2214_v25 = vmul.f32 %v4785_v19, %v4717_v1 }
 0x104   : > { %v2215_v29 = vrot.slane %v2213_v21, 4 }
 0x105   : > { %v2221_v35 = vrot.slane %v2214_v25, 4 }
 0x106   : > { %715 = vrot.lane.b32.xlu0 %v4579_v34, %s7658_s23  ;;  %686 = vrot.lane.b32.xlu1 %v4579_v34, %s7664_s22  ;;  %s7894_s23 = smov 32   ;;  %s7897_s22 = smov 20   ;;  %v2216_v2 = vadd.f32 %v2215_v29, %v2213_v21  ;;  %v7947_v21 = vmov 0  }
 0x107   : > { %v4873_v28 = vadd.f32 %v2221_v35, %v2214_v25  ;;  %v4894_v35 = vsel %vm7702_vm14, 1, %v7947_v21  ;;  %vm7730_vm14 = vcmask 1040384  }
 0x108   : > { %7955 = vst [vmem:[#allocation31_spill] sm:$0xff] %v4894_v35  ;;  %v2217_v23 = vrot.slane %v2216_v2, 2 }
 0x109   : > { %7949 = vst [vmem:[#allocation27_spill] sm:$0xff] %v4873_v28 }
 0x10a   : > { %799 = vrot.lane.b32.xlu0 %v4579_v34, %s7654_s27  ;;  %757 = vrot.lane.b32.xlu1 %v4579_v34, %s7660_s26  ;;  %s7892_s27 = smov 34   ;;  %s7895_s26 = smov 29   ;;  %v4931_v16 = vadd.f32 %v2217_v23, %v2216_v2 }
 0x10c   : > { %7962 = vst [vmem:[#allocation36_spill] sm:$0xff] %v4931_v16 }
 0x10e   : > { %948 = vrot.lane.b32.xlu0 %v4579_v34, %s7648_s30  ;;  %900 = vrot.lane.b32.xlu1 %v4579_v34, %s7656_s29  ;;  %s7886_s30 = smov 47   ;;  %s7893_s29 = smov 31  }
 0x112   : > { %1010 = vrot.lane.b32.xlu0 %v4579_v34, %s7649_s9  ;;  %979 = vrot.lane.b32.xlu1 %v4579_v34, %s7652_s8  ;;  %s7887_s9 = smov 44   ;;  %s7890_s8 = smov 36  }
 0x116   : > { %1072 = vrot.lane.b32.xlu0 %v4579_v34, %s7650_s11  ;;  %1041 = vrot.lane.b32.xlu1 %v4579_v34, %s7651_s10  ;;  %s7888_s11 = smov 45   ;;  %s7889_s10 = smov 35  }
 0x11a   : > { %1132 = vrot.lane.b32.xlu0 %v4579_v34, %s7653_s13  ;;  %1101 = vrot.lane.b32.xlu1 %v4579_v34, %s7886_s30  ;;  %s7891_s13 = smov 33  }
 0x11e   : > { %1246 = vrot.lane.b32.xlu0 %v4579_v34, %s7887_s9  ;;  %1215 = vrot.lane.b32.xlu1 %v4579_v34, %s7888_s11 }
 0x122   : > { %1314 = vrot.lane.b32.xlu0 %v4579_v34, %s7889_s10  ;;  %1283 = vrot.lane.b32.xlu1 %v4579_v34, %s7890_s8 }
 0x126   : > { %1376 = vrot.lane.b32.xlu0 %v4579_v34, %s7891_s13  ;;  %1345 = vrot.lane.b32.xlu1 %v4579_v34, %s7892_s27 }
 0x12a   : > { %1435 = vrot.lane.b32.xlu0 %v4579_v34, %s7893_s29  ;;  %1407 = vrot.lane.b32.xlu1 %v4579_v34, %s7894_s23 }
 0x12e   : > { %1549 = vrot.lane.b32.xlu0 %v4579_v34, %s7895_s26  ;;  %1518 = vrot.lane.b32.xlu1 %v4579_v34, %s7896_s17 }
 0x132   : > { %1617 = vrot.lane.b32.xlu0 %v4579_v34, %s7897_s22  ;;  %1580 = vrot.lane.b32.xlu1 %v4579_v34, %s7898_s15 }
 0x136   : > { %1679 = vrot.lane.b32.xlu0 %v4579_v34, %s7899_s16  ;;  %1648 = vrot.lane.b32.xlu1 %v4579_v34, %s7900_s21 }
 0x13a   : > { %1741 = vrot.lane.b32.xlu0 %v4579_v34, %s7901_s28  ;;  %1710 = vrot.lane.b32.xlu1 %v4579_v34, %s7902_s19 }
 0x13e   : > { %1853 = vrot.lane.b32.xlu0 %v4579_v34, %s7678_s12  ;;  %1822 = vrot.lane.b32.xlu1 %v4579_v34, %s7903_s20  ;;  %s7906_s12 = smov 68  }
 0x142   : > { %1915 = vrot.lane.b32.xlu0 %v4579_v34, %s7679_s18  ;;  %1884 = vrot.lane.b32.xlu1 %v4579_v34, %s7680_s14  ;;  %s7907_s18 = smov 2   ;;  %s7908_s14 = smov 66  }
 0x146   : > { %2010 = vrot.lane.b32.xlu0 %v4579_v34, %s7904_s1  ;;  %1953 = vrot.lane.b32.xlu1 %v4579_v34, %s7905_s2 }
 0x14a   : > { %522 = vrot.lane.b32.xlu0 %v4717_v1, %s7906_s12  ;;  %2067 = vrot.lane.b32.xlu1 %v4579_v34, %s7907_s18 }
 0x14e   : > { %604 = vrot.lane.b32.xlu0 %v4717_v1, %s7908_s14  ;;  %562 = vrot.lane.b32.xlu1 %v4717_v1, %s7909_s3 }
 0x152   : > { %688 = vrot.lane.b32.xlu0 %v4717_v1, %s7910_s4  ;;  %646 = vrot.lane.b32.xlu1 %v4717_v1, %s7911_s5  ;;  %s7917_s4 = smov 51   ;;  %s7918_s5 = smov 52  }
 0x156   : > { %759 = vrot.lane.b32.xlu0 %v4717_v1, %s7912_s6  ;;  %717 = vrot.lane.b32.xlu1 %v4717_v1, %s7913_s24  ;;  %s7921_s6 = smov 49  }
 0x15a   : > { %902 = vrot.lane.b32.xlu0 %v4717_v1, %s7915_s7  ;;  %801 = vrot.lane.b32.xlu1 %v4717_v1, %s7916_s25  ;;  %s7922_s7 = smov 50  }
 0x15e   : > { %981 = vrot.lane.b32.xlu0 %v4717_v1, %s7917_s4  ;;  %950 = vrot.lane.b32.xlu1 %v4717_v1, %s7918_s5  ;;  %s4405_s4 = smov 96   ;;  %s4406_s5 = smov 95  }
 0x162   : > { %1043 = vrot.lane.b32.xlu0 %v4717_v1, %s7921_s6  ;;  %1012 = vrot.lane.b32.xlu1 %v4717_v1, %s7922_s7  ;;  %s7928_s6 = smov 48   ;;  %s7931_s7 = smov 46  }
 0x166   : > { %1103 = vrot.lane.b32.xlu0 %v4717_v1, %s7886_s30  ;;  %1074 = vrot.lane.b32.xlu1 %v4717_v1, %s7928_s6  ;;  %s4395_s30 = smov 113   ;;  %s4407_s6 = smov 94  }
 0x16a   : > { %1217 = vrot.lane.b32.xlu0 %v4717_v1, %s7888_s11  ;;  %1134 = vrot.lane.b32.xlu1 %v4717_v1, %s7931_s7  ;;  %s4399_s11 = smov 109   ;;  %s4408_s7 = smov 93  }
 0x16e   : > { %1285 = vrot.lane.b32.xlu0 %v4717_v1, %s7890_s8  ;;  %1248 = vrot.lane.b32.xlu1 %v4717_v1, %s7887_s9  ;;  %s4396_s8 = smov 112   ;;  %s4397_s9 = smov 111  }
 0x170   : > { %v4837_v36 = vpop.permute.xlu0 %560  ;;  %v4839_v37 = vpop.permute.xlu1 %520 }
 0x171   : > { %7939 = vst [vmem:[#allocation22_spill] sm:$0xff] %v4837_v36  ;;  %7940 = vst [vmem:[#allocation23_spill] sm:$0xff] %v4839_v37  ;;  %v565_v13 = vsel %vm7696_vm5, %v4591_v38, %v4837_v36  ;;  %v525_v12 = vsel %vm7719_vm6, %v4574_v31, %v4839_v37  ;;  %v629_v38 = vrot.slane %v4835_v33, %v4789_v20  ;;  %v7944_v31 = vmov 0 }
 0x172   : > { %v569_v24 = vmul.f32 %v565_v13, %v4776_v17  ;;  %v529_v26 = vmul.f32 %v525_v12, %v4776_v17  ;;  %1347 = vrot.lane.b32.xlu0 %v4717_v1, %s7892_s27  ;;  %1316 = vrot.lane.b32.xlu1 %v4717_v1, %s7889_s10  ;;  %v7945_v31 = vsel %vm4864_vm3, 4294967295, %v7944_v31  ;;  %v4871_v12 = vsel %vm7701_vm9, 1, %v7947_v21  ;;  %s4393_s27 = smov 115   ;;  %s4398_s10 = smov 110  }
 0x173   : > { %7946 = vst [vmem:[#allocation25_spill] sm:$0xff] %v7945_v31  ;;  %7948 = vst [vmem:[#allocation26_spill] sm:$0xff] %v4871_v12  ;;  %vm4881_vm5 = vcmp.ne.s32.totalorder %v671_v0, 0  ;;  %vm4897_vm9 = vcmp.ne.s32.totalorder %v629_v38, 0 }
 0x174   : > { %v571_v29 = vrot.slane %v569_v24, 4  ;;  %v531_v13 = vrot.slane %v529_v26, 4  ;;  %v4875_v30 = vpop.permute.xlu0 %644  ;;  %v4877_v36 = vpop.permute.xlu1 %602  ;;  %v7953_v32 = vsel %vm4881_vm5, 4294967295, %v7952_v32  ;;  %v7957_v15 = vsel %vm4897_vm9, 4294967295, %v7956_v15 }
 0x175   : > { %7950 = vst [vmem:[#allocation28_spill] sm:$0xff] %v4875_v30  ;;  %7951 = vst [vmem:[#allocation29_spill] sm:$0xff] %v4877_v36  ;;  %v649_v33 = vsel %vm7706_vm7, %v4599_v40, %v4875_v30  ;;  %v607_v25 = vsel %vm7718_vm8, %v4593_v39, %v4877_v36  ;;  %v742_v39 = vrot.slane %v4871_v12, %v4789_v20  ;;  %vm7729_vm7 = vcmask 424960  }
 0x176   : > { %7954 = vst [vmem:[#allocation30_spill] sm:$0xff] %v7953_v32  ;;  %v572_v19 = vadd.f32 %v571_v29, %v569_v24  ;;  %v532_v37 = vadd.f32 %v531_v13, %v529_v26  ;;  %v653_v0 = vmul.f32 %v649_v33, %v4776_v17  ;;  %7958 = vst [vmem:[#allocation32_spill] sm:$0xff] %v7957_v15  ;;  %1409 = vrot.lane.b32.xlu0 %v4717_v1, %s7894_s23  ;;  %s4391_s23 = smov 124   ;;  %v8109_v32 = vld [vmem:[#allocation12_spill] sm:$0xff] }
 0x177   : > { %v611_v40 = vmul.f32 %v607_v25, %v4776_v17  ;;  %1378 = vrot.lane.b32.xlu1 %v4717_v1, %s7891_s13  ;;  %v4911_v24 = vsel %vm7715_vm4, 1, %v7947_v21  ;;  %v4916_v26 = vsel %vm7714_vm2, 1, %v7947_v21  ;;  %v826_v33 = vrot.slane %v4894_v35, %v4789_v20  ;;  %vm4951_vm4 = vmand %vm496_vm12, %vm4843_vm13  ;;  %s4400_s13 = smov 108  }
 0x178   : > { %7959 = vst [vmem:[#allocation33_spill] sm:$0xff] %v4911_v24  ;;  %v573_v38 = vrot.slane %v572_v19, 2  ;;  %v533_v29 = vrot.slane %v532_v37, 2  ;;  %v655_v13 = vrot.slane %v653_v0, 4  ;;  %v4919_v30 = vpop.permute.xlu0 %715  ;;  %v4921_v12 = vpop.permute.xlu1 %686  ;;  %vm4935_vm2 = vcmp.ne.s32.totalorder %v742_v39, 0  ;;  %vm4963_vm8 = vmand %vm496_vm12, %vm4864_vm3 }
 0x179   : > { %v613_v25 = vrot.slane %v611_v40, 4  ;;  %7960 = vst [vmem:[#allocation34_spill] sm:$0xff] %v4919_v30  ;;  %7961 = vst [vmem:[#allocation35_spill] sm:$0xff] %v4921_v12  ;;  %v720_v36 = vsel %vm7716_vm10, %v4611_v42, %v4919_v30  ;;  %v691_v21 = vsel %vm7717_vm11, %v4601_v41, %v4921_v12  ;;  %v7964_v14 = vsel %vm4935_vm2, 4294967295, %v7963_v14 }
 0x17a   : > { %v574_v28 = vadd.f32 %v573_v38, %v572_v19  ;;  %v534_v18 = vadd.f32 %v533_v29, %v532_v37  ;;  %v656_v22 = vadd.f32 %v655_v13, %v653_v0  ;;  %1520 = vrot.lane.b32.xlu0 %v4717_v1, %s7896_s17  ;;  %7965 = vst [vmem:[#allocation37_spill] sm:$0xff] %v7964_v14  ;;  %vm7732_vm10 = vcmask 1041408   ;;  %s4389_s17 = smov 126  }
 0x17b   : > { %v614_v10 = vadd.f32 %v613_v25, %v611_v40  ;;  %v724_v42 = vmul.f32 %v720_v36, %v4776_v17  ;;  %v695_v41 = vmul.f32 %v691_v21, %v4776_v17  ;;  %1437 = vrot.lane.b32.xlu1 %v4717_v1, %s7893_s29  ;;  %v784_v2 = vrot.slane %v4911_v24, %v4789_v20  ;;  %s4394_s29 = smov 114  }
 0x17c   : > { %v575_v36 = vrot.slane %v574_v28, 1  ;;  %v535_v37 = vrot.slane %v534_v18, 1  ;;  %v657_v0 = vrot.slane %v656_v22, 2  ;;  %v4955_v39 = vpop.permute.xlu0 %799  ;;  %v4957_v38 = vpop.permute.xlu1 %757  ;;  %vm7733_vm11 = vcmask 490496  }
 0x17d   : > { %v615_v40 = vrot.slane %v614_v10, 2  ;;  %7968 = vst [vmem:[#allocation38_spill] sm:$0xff] %v4955_v39  ;;  %v726_v13 = vrot.slane %v724_v42, 4  ;;  %v697_v25 = vrot.slane %v695_v41, 4  ;;  %v804_v21 = vsel %vm7727_vm15, %v4619_v44, %v4955_v39  ;;  %vm4991_vm15 = vmand %vm496_vm12, %vm4881_vm5 }
 0x17e   : > { %v762_v19 = vsel %vm7728_vm1, %v4613_v43, %v4957_v38  ;;  %v576_v35 = vadd.f32 %v575_v36, %v574_v28  ;;  %v536_v30 = vadd.f32 %v535_v37, %v534_v18  ;;  %v658_v12 = vadd.f32 %v657_v0, %v656_v22  ;;  %1582 = vrot.lane.b32.xlu0 %v4717_v1, %s7898_s15  ;;  %s8002_s15 = smov 14  }
 0x17f   : > { %v616_v24 = vadd.f32 %v615_v40, %v614_v10  ;;  %v727_v16 = vadd.f32 %v726_v13, %v724_v42  ;;  %v698_v8 = vadd.f32 %v697_v25, %v695_v41  ;;  %vm4975_vm6 = vcmp.ne.s32.totalorder %v826_v33, 0  ;;  %1551 = vrot.lane.b32.xlu1 %v4717_v1, %s7895_s26  ;;  %s4392_s26 = smov 116  }
 0x180   : > { %v7972_v9 = vsel %vm4975_vm6, 4294967295, %v7971_v9  ;;  %v808_v44 = vmul.f32 %v804_v21, %v4776_v17  ;;  %v766_v39 = vmul.f32 %v762_v19, %v4776_v17  ;;  %v596_v43 = vsel %vm4951_vm4, %v576_v35, 0.0  ;;  %v4999_v42 = vpop.permute.xlu0 %948  ;;  %v5001_v35 = vpop.permute.xlu1 %900  ;;  %vm5007_vm4 = vmand %vm496_vm12, %vm4897_vm9 }
 0x181   : > { %7973 = vst [vmem:[#allocation39_spill] sm:$0xff] %v7972_v9  ;;  %v556_v10 = vsel %vm4963_vm8, %v536_v30, 0.0  ;;  %v659_v22 = vrot.slane %v658_v12, 1  ;;  %v617_v28 = vrot.slane %v616_v24, 1  ;;  %vm4995_vm0 = vcmp.ne.s32.totalorder %v784_v2, 0  ;;  %7979 = vst [vmem:[#allocation41_spill] sm:$0xff] %v4999_v42 }
 0x182   : > { %v7976_v33 = vmov 0  ;;  %v841_v30 = vrot.slane %v596_v43, 7  ;;  %v598_v41 = vmax.f32 %v556_v10, %v596_v43  ;;  %v728_v23 = vrot.slane %v727_v16, 2  ;;  %1650 = vrot.lane.b32.xlu0 %v4717_v1, %s7900_s21  ;;  %s4404_s21 = smov 97  }
 0x183   : > { %v7977_v33 = vsel %vm4995_vm0, 4294967295, %v7976_v33  ;;  %vm7738_vm8 = vcmask 1044480   ;;  %v699_v2 = vrot.slane %v698_v8, 2  ;;  %v660_v36 = vadd.f32 %v659_v22, %v658_v12  ;;  %1619 = vrot.lane.b32.xlu1 %v4717_v1, %s7897_s22  ;;  %s4390_s22 = smov 125  }
 0x184   : > { %7978 = vst [vmem:[#allocation40_spill] sm:$0xff] %v7977_v33  ;;  %v618_v37 = vadd.f32 %v617_v28, %v616_v24  ;;  %v810_v0 = vrot.slane %v808_v44, 4  ;;  %v768_v40 = vrot.slane %v766_v39, 4  ;;  %vm7737_vm1 = vcmask 416768   ;;  %v5023_v28 = vpop.permute.xlu0 %1010 }
 0x185   : > { %v876_v29 = vsel %vm7730_vm14, %v556_v10, %v841_v30  ;;  %v729_v13 = vadd.f32 %v728_v23, %v727_v16  ;;  %v700_v25 = vadd.f32 %v699_v2, %v698_v8  ;;  %v953_v21 = vsel %vm7729_vm7, %v4631_v46, %v4999_v42  ;;  %7982 = vst [vmem:[#allocation42_spill] sm:$0xff] %v5023_v28  ;;  %v5025_v10 = vpop.permute.xlu1 %979  ;;  %vm5031_vm14 = vmand %vm496_vm12, %vm4935_vm2 }
 0x186   : > { %v680_v12 = vsel %vm4991_vm15, %v660_v36, 0.0  ;;  %v638_v24 = vsel %vm5007_vm4, %v618_v37, 0.0  ;;  %v811_v43 = vadd.f32 %v810_v0, %v808_v44  ;;  %v769_v22 = vadd.f32 %v768_v40, %v766_v39  ;;  %7983 = vst [vmem:[#allocation43_spill] sm:$0xff] %v5025_v10  ;;  %1712 = vrot.lane.b32.xlu0 %v4717_v1, %s7902_s19  ;;  %s4402_s19 = smov 99  }
 0x187   : > { %v853_v8 = vrot.slane %v680_v12, 5  ;;  %v640_v16 = vmax.f32 %v598_v41, %v638_v24  ;;  %v847_v30 = vrot.slane %v638_v24, 6  ;;  %v730_v23 = vrot.slane %v729_v13, 1  ;;  %1681 = vrot.lane.b32.xlu1 %v4717_v1, %s7899_s16  ;;  %s8012_s16 = smov 12  }
 0x188   : > { %v701_v18 = vrot.slane %v700_v25, 1  ;;  %v812_v44 = vrot.slane %v811_v43, 2  ;;  %v770_v39 = vrot.slane %v769_v22, 2  ;;  %v957_v19 = vmul.f32 %v953_v21, %v4776_v17  ;;  %v5046_v42 = vpop.permute.xlu0 %1072 }
 0x189   : > { %v879_v41 = vsel %vm7732_vm10, %v876_v29, %v847_v30  ;;  %v731_v2 = vadd.f32 %v730_v23, %v729_v13  ;;  %v682_v36 = vmax.f32 %v640_v16, %v680_v12  ;;  %vm498_vm7 = vcmp.ge.s32.totalorder %v4817_v27, 48  ;;  %7987 = vst [vmem:[#allocation44_spill] sm:$0xff] %v5046_v42  ;;  %v5048_v29 = vpop.permute.xlu1 %1041  ;;  %vm5080_vm10 = vmand %vm496_vm12, %vm4995_vm0 }
 0x18a   : > { %v905_v37 = vsel %vm7733_vm11, %v4621_v45, %v5001_v35  ;;  %vm7986_vm15 = vcmask 1042432   ;;  %v702_v40 = vadd.f32 %v701_v18, %v700_v25  ;;  %v813_v21 = vadd.f32 %v812_v44, %v811_v43  ;;  %7988 = vst [vmem:[#allocation45_spill] sm:$0xff] %v5048_v29  ;;  %1824 = vrot.lane.b32.xlu0 %v4717_v1, %s7903_s20  ;;  %s4403_s20 = smov 98  }
 0x18b   : > { %v882_v0 = vsel %vm7986_vm15, %v879_v41, %v853_v8  ;;  %v771_v24 = vadd.f32 %v770_v39, %v769_v22  ;;  %v751_v13 = vsel %vm5031_vm14, %v731_v2, 0.0  ;;  %v959_v12 = vrot.slane %v957_v19, 4  ;;  %vm5062_vm15 = vmand %vm496_vm12, %vm4975_vm6  ;;  %1743 = vrot.lane.b32.xlu1 %v4717_v1, %s7901_s28  ;;  %s8001_s28 = smov 13  }
 0x18c   : > { %v909_v45 = vmul.f32 %v905_v37, %v4776_v17  ;;  %vm7989_vm11 = vcmask 408576   ;;  %v859_v8 = vrot.slane %v751_v13, 3  ;;  %v709_v25 = vsel %vm496_vm12, %v702_v40, 0.0 }
 0x18d   : > { %v1015_v16 = vsel %vm7989_vm11, %v4639_v48, %v5023_v28  ;;  %v814_v22 = vrot.slane %v813_v21, 1  ;;  %v772_v30 = vrot.slane %v771_v24, 1  ;;  %v7992_v23 = vrot.slane %v4916_v26, %v4789_v20 }
 0x18e   : > { %v7993_v46 = vmov 0  ;;  %vm7739_vm11 = vcmask 384000   ;;  %v711_v48 = vmax.f32 %v682_v36, %v709_v25  ;;  %vm7996_vm4 = vcmask 1043456   ;;  %1886 = vrot.lane.b32.xlu0 %v4717_v1, %s8001_s28  ;;  %s4409_s28 = smov 92  }
 0x18f   : > { %vm5069_vm14 = vcmp.ne.s32.totalorder %v7992_v23, 0  ;;  %v885_v18 = vsel %vm7996_vm4, %v882_v0, %v709_v25  ;;  %v960_v39 = vadd.f32 %v959_v12, %v957_v19  ;;  %v911_v41 = vrot.slane %v909_v45, 4  ;;  %v5088_v0 = vpop.permute.xlu0 %1132  ;;  %v5090_v25 = vpop.permute.xlu1 %1101  ;;  %1855 = vrot.lane.b32.xlu1 %v4717_v1, %s8002_s15  ;;  %s4410_s15 = smov 84  }
 0x190   : > { %v7994_v46 = vsel %vm5069_vm14, 4294967295, %v7993_v46  ;;  %v888_v2 = vsel %vm7738_vm8, %v885_v18, %v859_v8  ;;  %v815_v37 = vadd.f32 %v814_v22, %v813_v21  ;;  %v773_v40 = vadd.f32 %v772_v30, %v771_v24  ;;  %7999 = vst [vmem:[#allocation47_spill] sm:$0xff] %v5088_v0  ;;  %8000 = vst [vmem:[#allocation48_spill] sm:$0xff] %v5090_v25 }
 0x191   : > { %7995 = vst [vmem:[#allocation46_spill] sm:$0xff] %v7994_v46  ;;  %v1019_v36 = vmul.f32 %v1015_v16, %v4776_v17  ;;  %v753_v23 = vmax.f32 %v711_v48, %v751_v13  ;;  %v961_v20 = vrot.slane %v960_v39, 2  ;;  %v912_v28 = vadd.f32 %v911_v41, %v909_v45  ;;  %vm5124_vm8 = vmand %vm498_vm7, %vm4864_vm3 }
 0x192   : > { %v984_v19 = vsel %vm7737_vm1, %v4633_v47, %v5025_v10  ;;  %vm7746_vm4 = vcmask 359424   ;;  %v5097_v12 = vsel %vm5062_vm15, %v815_v37, 0.0  ;;  %v793_v21 = vsel %vm5080_vm10, %v773_v40, 0.0  ;;  %1955 = vrot.lane.b32.xlu0 %v4717_v1, %s7905_s2  ;;  %s4388_s2 = smov 127  }
 0x193   : > { %v1021_v24 = vrot.slane %v1019_v36, 4  ;;  %v988_v16 = vmul.f32 %v984_v19, %v4776_v17  ;;  %v871_v13 = vrot.slane %v5097_v12, 1  ;;  %v795_v45 = vmax.f32 %v753_v23, %v793_v21  ;;  %v5110_v18 = vpop.permute.xlu0 %1246  ;;  %v5112_v44 = vpop.permute.xlu1 %1215  ;;  %1917 = vrot.lane.b32.xlu1 %v4717_v1, %s8012_s16  ;;  %s4411_s16 = smov 83  }
 0x194   : > { %v865_v8 = vrot.slane %v793_v21, 2  ;;  %v962_v22 = vadd.f32 %v961_v20, %v960_v39  ;;  %v913_v47 = vrot.slane %v912_v28, 2  ;;  %vm8003_vm10 = vcmask 392192   ;;  %8004 = vst [vmem:[#allocation49_spill] sm:$0xff] %v5110_v18 }
 0x195   : > { %v1022_v43 = vadd.f32 %v1021_v24, %v1019_v36  ;;  %v990_v30 = vrot.slane %v988_v16, 4  ;;  %v1077_v48 = vsel %vm8003_vm10, %v4651_v50, %v5046_v42  ;;  %vm8005_vm15 = vcmask 1045504  }
 0x196   : > { %v891_v41 = vsel %vm8005_vm15, %v888_v2, %v865_v8  ;;  %v963_v37 = vrot.slane %v962_v22, 1  ;;  %v837_v40 = vmax.f32 %v795_v45, %v5097_v12  ;;  %v1081_v20 = vmul.f32 %v1077_v48, %v4776_v17  ;;  %2069 = vrot.lane.b32.xlu0 %v4717_v1, %s7907_s18  ;;  %s4401_s18 = smov 100  }
 0x197   : > { %vm8006_vm1 = vcmask 1046528   ;;  %v914_v36 = vadd.f32 %v913_v47, %v912_v28  ;;  %v1023_v23 = vrot.slane %v1022_v43, 2  ;;  %v991_v19 = vadd.f32 %v990_v30, %v988_v16  ;;  %v5139_v8 = vpop.permute.xlu0 %1314  ;;  %2012 = vrot.lane.b32.xlu1 %v4717_v1, %s7904_s1  ;;  %s4387_s1 = smov 1  }
 0x198   : > { %v5118_v39 = vsel %vm8006_vm1, %v891_v41, %v871_v13  ;;  %v964_v2 = vadd.f32 %v963_v37, %v962_v22  ;;  %v1083_v12 = vrot.slane %v1081_v20, 4  ;;  %vm8010_vm1 = vcmask 400384   ;;  %v5141_v22 = vpop.permute.xlu1 %1283 }
 0x199   : > { %8007 = vst [vmem:[#allocation50_spill] sm:$0xff] %v5118_v39  ;;  %v1046_v21 = vsel %vm8010_vm1, %v4641_v49, %v5048_v29  ;;  %vm8011_vm10 = vcmask 375808   ;;  %vm7747_vm15 = vcmask 367616   ;;  %v915_v28 = vrot.slane %v914_v36, 1  ;;  %vm5149_vm1 = vmand %vm496_vm12, %vm5069_vm14 }
 0x19a   : > { %v1137_v24 = vsel %vm8011_vm10, %v4659_v52, %v5088_v0  ;;  %v1024_v13 = vadd.f32 %v1023_v23, %v1022_v43  ;;  %v992_v16 = vrot.slane %v991_v19, 2  ;;  %v1050_v45 = vmul.f32 %v1046_v21, %v4776_v17  ;;  %vm5163_vm12 = vmand %vm498_vm7, %vm4897_vm9  ;;  %2124 = vrot.lane.b32.xlu0 %v4579_v34, %s4387_s1 }
 0x19b   : > { %v973_v49 = vsel %vm5124_vm8, %v964_v2, 0.0  ;;  %v1084_v47 = vadd.f32 %v1083_v12, %v1081_v20  ;;  %v1141_v43 = vmul.f32 %v1137_v24, %v4776_v17  ;;  %v1106_v30 = vsel %vm7739_vm11, %v4653_v51, %v5090_v25  ;;  %vm1002_vm8 = vmand %vm498_vm7, %vm4843_vm13 }
 0x19c   : > { %v1163_v48 = vrot.slane %v973_v49, 7  ;;  %v916_v41 = vadd.f32 %v915_v28, %v914_v36  ;;  %v1025_v37 = vrot.slane %v1024_v13, 1  ;;  %v993_v50 = vadd.f32 %v992_v16, %v991_v19  ;;  %v5175_v28 = vpop.permute.xlu0 %1376  ;;  %v5177_v16 = vpop.permute.xlu1 %1345 }
 0x19d   : > { %v1085_v23 = vrot.slane %v1084_v47, 2  ;;  %v1052_v2 = vrot.slane %v1050_v45, 4  ;;  %v1143_v51 = vrot.slane %v1141_v43, 4  ;;  %v1110_v36 = vmul.f32 %v1106_v30, %v4776_v17  ;;  %8017 = vst [vmem:[#allocation51_spill] sm:$0xff] %v5175_v28 }
 0x19e   : > { %v936_v19 = vsel %vm5149_vm1, %v916_v41, 0.0  ;;  %v1026_v12 = vadd.f32 %v1025_v37, %v1024_v13  ;;  %v994_v21 = vrot.slane %v993_v50, 1  ;;  %v1251_v24 = vsel %vm7746_vm4, %v4671_v54, %v5110_v18  ;;  %2230 = vrot.lane.b32.xlu0 %v4579_v34, %s4388_s2 }
 0x19f   : > { %vm7748_vm11 = vcmask 269312   ;;  %v938_v39 = vmax.f32 %v837_v40, %v936_v19  ;;  %vm8018_vm10 = vcmask 1040384   ;;  %v1086_v52 = vadd.f32 %v1085_v23, %v1084_v47 }
 0x1a0   : > { %v1197_v30 = vsel %vm8018_vm10, %v936_v19, %v1163_v48  ;;  %v1053_v13 = vadd.f32 %v1052_v2, %v1050_v45  ;;  %v1035_v41 = vsel %vm5163_vm12, %v1026_v12, 0.0  ;;  %v995_v37 = vadd.f32 %v994_v21, %v993_v50  ;;  %v5189_v47 = vpop.permute.xlu0 %1435  ;;  %v5191_v20 = vpop.permute.xlu1 %1407  ;;  %vm5206_vm10 = vmand %vm498_vm7, %vm4881_vm5 }
 0x1a1   : > { %v1144_v54 = vadd.f32 %v1143_v51, %v1141_v43  ;;  %v1112_v18 = vrot.slane %v1110_v36, 4  ;;  %v1175_v0 = vrot.slane %v1035_v41, 5  ;;  %v975_v40 = vmax.f32 %v938_v39, %v973_v49  ;;  %8020 = vst [vmem:[#allocation52_spill] sm:$0xff] %v5189_v47 }
 0x1a2   : > { %v1087_v42 = vrot.slane %v1086_v52, 1  ;;  %v1054_v48 = vrot.slane %v1053_v13, 2  ;;  %v8019_v19 = vmov 0.0   ;;  %v1004_v25 = vsel %vm1002_vm8, %v995_v37, 0.0 }
 0x1a3   : > { %2122 = vrot.lane.b32.xlu1 %v8019_v19, %s4387_s1  ;;  %v1145_v29 = vrot.slane %v1144_v54, 2  ;;  %v1113_v10 = vadd.f32 %v1112_v18, %v1110_v36  ;;  %v1255_v45 = vmul.f32 %v1251_v24, %v4776_v17  ;;  %v1006_v43 = vmax.f32 %v975_v40, %v1004_v25  ;;  %2234 = vrot.lane.b32.xlu0 %v8019_v19, %s4388_s2 }
 0x1a4   : > { %v1169_v50 = vrot.slane %v1004_v25, 6  ;;  %v1088_v23 = vadd.f32 %v1087_v42, %v1086_v52  ;;  %v1055_v2 = vadd.f32 %v1054_v48, %v1053_v13  ;;  %v1220_v49 = vsel %vm7747_vm15, %v4661_v53, %v5112_v44  ;;  %v5211_v52 = vpop.permute.xlu0 %1549  ;;  %v5213_v13 = vpop.permute.xlu1 %1518 }
 0x1a5   : > { %v1146_v51 = vadd.f32 %v1145_v29, %v1144_v54  ;;  %v1114_v12 = vrot.slane %v1113_v10, 2  ;;  %v1257_v39 = vrot.slane %v1255_v45, 4  ;;  %vm7749_vm1 = vcmask 277504   ;;  %8025 = vst [vmem:[#allocation53_spill] sm:$0xff] %v5211_v52 }
 0x1a6   : > { %vm8021_vm8 = vcmask 1041408   ;;  %v1095_v36 = vsel %vm498_vm7, %v1088_v23, 0.0  ;;  %v1037_v25 = vmax.f32 %v1006_v43, %v1035_v41  ;;  %v1056_v42 = vrot.slane %v1055_v2, 1 }
 0x1a7   : > { %v1199_v18 = vsel %vm8021_vm8, %v1197_v30, %v1169_v50  ;;  %2126 = vrot.lane.b32.xlu1 %v4717_v1, %s4387_s1  ;;  %vm8024_vm12 = vcmask 1042432   ;;  %v1147_v21 = vrot.slane %v1146_v51, 1  ;;  %v1115_v24 = vadd.f32 %v1114_v12, %v1113_v10  ;;  %vm5219_vm8 = vmand %vm498_vm7, %vm4995_vm0  ;;  %2289 = vrot.lane.b32.xlu0 %v4717_v1, %s4389_s17  ;;  %s4412_s1 = smov 82  }
 0x1a8   : > { %v1201_v29 = vsel %vm8024_vm12, %v1199_v18, %v1175_v0  ;;  %v1258_v30 = vadd.f32 %v1257_v39, %v1255_v45  ;;  %v1057_v41 = vadd.f32 %v1056_v42, %v1055_v2  ;;  %v1224_v54 = vmul.f32 %v1220_v49, %v4776_v17  ;;  %v5254_v18 = vpop.permute.xlu0 %1617  ;;  %v5256_v42 = vpop.permute.xlu1 %1580 }
 0x1a9   : > { %vm8028_vm12 = vcmask 285696   ;;  %vm8029_vm4 = vcmask 293888   ;;  %v1148_v40 = vadd.f32 %v1147_v21, %v1146_v51  ;;  %v1116_v48 = vrot.slane %v1115_v24, 1  ;;  %8032 = vst [vmem:[#allocation54_spill] sm:$0xff] %v5254_v18  ;;  %8033 = vst [vmem:[#allocation55_spill] sm:$0xff] %v5256_v42 }
 0x1aa   : > { %v1319_v10 = vsel %vm8028_vm12, %v4679_v56, %v5139_v8  ;;  %v1288_v0 = vsel %vm8029_vm4, %v4673_v55, %v5141_v22  ;;  %v1259_v45 = vrot.slane %v1258_v30, 2  ;;  %v1066_v50 = vsel %vm5206_vm10, %v1057_v41, 0.0  ;;  %vm5239_vm12 = vmand %vm498_vm7, %vm4935_vm2 }
 0x1ab   : > { %v1323_v43 = vmul.f32 %v1319_v10, %v4776_v17  ;;  %v1226_v55 = vrot.slane %v1224_v54, 4  ;;  %vm500_vm4 = vcmp.ge.s32.totalorder %v4817_v27, 32  ;;  %v1292_v23 = vmul.f32 %v1288_v0, %v4776_v17  ;;  %2232 = vrot.lane.b32.xlu1 %v4717_v1, %s4388_s2  ;;  %2344 = vrot.lane.b32.xlu0 %v4579_v34, %s4390_s22  ;;  %s4413_s2 = smov 81  }
 0x1ac   : > { %v1381_v2 = vsel %vm7748_vm11, %v4691_v58, %v5175_v28  ;;  %vm7750_vm15 = vcmask 236544   ;;  %v1068_v51 = vmax.f32 %v1037_v25, %v1066_v50  ;;  %v1181_v12 = vrot.slane %v1066_v50, 4 }
 0x1ad   : > { %v5252_v39 = vsel %vm5219_vm8, %v1148_v40, 0.0  ;;  %v1117_v49 = vadd.f32 %v1116_v48, %v1115_v24  ;;  %v1260_v21 = vadd.f32 %v1259_v45, %v1258_v30  ;;  %v1227_v41 = vadd.f32 %v1226_v55, %v1224_v54  ;;  %v5274_v55 = vpop.permute.xlu0 %1679 }
 0x1ae   : > { %v1193_v53 = vrot.slane %v5252_v39, 1  ;;  %v1325_v58 = vrot.slane %v1323_v43, 4  ;;  %vm8034_vm10 = vcmask 1043456   ;;  %v1097_v0 = vmax.f32 %v1068_v51, %v1095_v36  ;;  %8038 = vst [vmem:[#allocation56_spill] sm:$0xff] %v5274_v55 }
 0x1af   : > { %v1203_v10 = vsel %vm8034_vm10, %v1201_v29, %v1181_v12  ;;  %v1126_v25 = vsel %vm5239_vm12, %v1117_v49, 0.0  ;;  %v1294_v50 = vrot.slane %v1292_v23, 4  ;;  %vm8035_vm8 = vcmask 1044480   ;;  %2287 = vrot.lane.b32.xlu1 %v4579_v34, %s4389_s17  ;;  %vm5269_vm10 = vmand %vm498_vm7, %vm5069_vm14  ;;  %2348 = vrot.lane.b32.xlu0 %v8019_v19, %s4390_s22 }
 0x1b0   : > { %v1205_v24 = vsel %vm8035_vm8, %v1203_v10, %v1095_v36  ;;  %v1187_v37 = vrot.slane %v1126_v25, 2  ;;  %v1261_v40 = vrot.slane %v1260_v21, 1  ;;  %v1228_v48 = vrot.slane %v1227_v41, 2  ;;  %v5276_v36 = vpop.permute.xlu1 %1648 }
 0x1b1   : > { %v1128_v30 = vmax.f32 %v1097_v0, %v1126_v25  ;;  %v1326_v54 = vadd.f32 %v1325_v58, %v1323_v43  ;;  %v1295_v45 = vadd.f32 %v1294_v50, %v1292_v23  ;;  %v1385_v56 = vmul.f32 %v1381_v2, %v4776_v17  ;;  %8039 = vst [vmem:[#allocation57_spill] sm:$0xff] %v5276_v36 }
 0x1b2   : > { %vm8040_vm12 = vcmask 1045504   ;;  %v1262_v12 = vadd.f32 %v1261_v40, %v1260_v21  ;;  %v1229_v49 = vadd.f32 %v1228_v48, %v1227_v41  ;;  %v1350_v10 = vsel %vm7749_vm1, %v4681_v57, %v5177_v16  ;;  %vm5328_vm1 = vmand %vm500_vm4, %vm4864_vm3 }
 0x1b3   : > { %v1207_v51 = vsel %vm8040_vm12, %v1205_v24, %v1187_v37  ;;  %vm8041_vm8 = vcmask 1046528   ;;  %v1159_v43 = vmax.f32 %v1128_v30, %v5252_v39  ;;  %v1327_v23 = vrot.slane %v1326_v54, 2  ;;  %2291 = vrot.lane.b32.xlu1 %v8019_v19, %s4389_s17  ;;  %vm5295_vm12 = vmand %vm498_vm7, %vm4975_vm6  ;;  %v5302_v37 = vpop.permute.xlu0 %1741  ;;  %2403 = vrot.lane.b32.xlu0 %v4717_v1, %s4391_s23  ;;  %s4414_s17 = smov 80  }
 0x1b4   : > { %v5283_v0 = vsel %vm8041_vm8, %v1207_v51, %v1193_v53  ;;  %v1296_v58 = vrot.slane %v1295_v45, 2  ;;  %vm7755_vm11 = vcmask 244736   ;;  %v1271_v2 = vsel %vm5269_vm10, %v1262_v12, 0.0  ;;  %8046 = vst [vmem:[#allocation59_spill] sm:$0xff] %v5302_v37  ;;  %v5304_v40 = vpop.permute.xlu1 %1710  ;;  %vm5311_vm7 = vmand %vm500_vm4, %vm4843_vm13 }
 0x1b5   : > { %8042 = vst [vmem:[#allocation58_spill] sm:$0xff] %v5283_v0  ;;  %v1230_v21 = vrot.slane %v1229_v49, 1  ;;  %v1387_v41 = vrot.slane %v1385_v56, 4  ;;  %v1354_v25 = vmul.f32 %v1350_v10, %v4776_v17  ;;  %v1466_v57 = vrot.slane %v1271_v2, 7  ;;  %8047 = vst [vmem:[#allocation60_spill] sm:$0xff] %v5304_v40 }
 0x1b6   : > { %v1328_v53 = vadd.f32 %v1327_v23, %v1326_v54  ;;  %v1297_v50 = vadd.f32 %v1296_v58, %v1295_v45  ;;  %vm8045_vm10 = vcmask 252928   ;;  %vm7754_vm8 = vcmask 162816  }
 0x1b7   : > { %v1440_v24 = vsel %vm8045_vm10, %v4699_v60, %v5189_v47  ;;  %v1231_v48 = vadd.f32 %v1230_v21, %v1229_v49  ;;  %v1388_v30 = vadd.f32 %v1387_v41, %v1385_v56  ;;  %v1356_v29 = vrot.slane %v1354_v25, 4  ;;  %2346 = vrot.lane.b32.xlu1 %v4717_v1, %s4390_s22  ;;  %v5334_v39 = vpop.permute.xlu0 %1853  ;;  %2464 = vrot.lane.b32.xlu0 %v4579_v34, %s4392_s26  ;;  %s4415_s22 = smov 79  }
 0x1b8   : > { %v1444_v51 = vmul.f32 %v1440_v24, %v4776_v17  ;;  %v1329_v45 = vrot.slane %v1328_v53, 1  ;;  %v1298_v60 = vrot.slane %v1297_v50, 1  ;;  %vm8050_vm10 = vcmask 261120   ;;  %8054 = vst [vmem:[#allocation61_spill] sm:$0xff] %v5334_v39 }
 0x1b9   : > { %v1411_v12 = vsel %vm8050_vm10, %v4693_v59, %v5191_v20  ;;  %v1554_v56 = vsel %vm7750_vm15, %v4711_v62, %v5211_v52  ;;  %v1240_v49 = vsel %vm5295_vm12, %v1231_v48, 0.0  ;;  %v1389_v23 = vrot.slane %v1388_v30, 2  ;;  %v5336_v48 = vpop.permute.xlu1 %1822  ;;  %vm5368_vm12 = vmand %vm500_vm4, %vm4897_vm9 }
 0x1ba   : > { %v1357_v58 = vadd.f32 %v1356_v29, %v1354_v25  ;;  %v1446_v59 = vrot.slane %v1444_v51, 4  ;;  %v1242_v21 = vmax.f32 %v1159_v43, %v1240_v49  ;;  %vm8053_vm10 = vcmask 1040384   ;;  %8055 = vst [vmem:[#allocation62_spill] sm:$0xff] %v5336_v48 }
 0x1bb   : > { %v1500_v62 = vsel %vm8053_vm10, %v1240_v49, %v1466_v57  ;;  %v1330_v41 = vadd.f32 %v1329_v45, %v1328_v53  ;;  %v1299_v24 = vadd.f32 %v1298_v60, %v1297_v50  ;;  %vm7756_vm15 = vcmask 228352   ;;  %2401 = vrot.lane.b32.xlu1 %v4579_v34, %s4391_s23  ;;  %2468 = vrot.lane.b32.xlu0 %v8019_v19, %s4392_s26 }
 0x1bc   : > { %v1390_v0 = vadd.f32 %v1389_v23, %v1388_v30  ;;  %v1358_v52 = vrot.slane %v1357_v58, 2  ;;  %v1447_v47 = vadd.f32 %v1446_v59, %v1444_v51  ;;  %v1415_v28 = vmul.f32 %v1411_v12, %v4776_v17 }
 0x1bd   : > { %v1339_v25 = vsel %vm5311_vm7, %v1330_v41, 0.0  ;;  %v1273_v29 = vmax.f32 %v1242_v21, %v1271_v2  ;;  %v1308_v43 = vsel %vm5328_vm1, %v1299_v24, 0.0  ;;  %v1558_v57 = vmul.f32 %v1554_v56, %v4776_v17  ;;  %vm5352_vm1 = vmand %vm500_vm4, %vm4881_vm5  ;;  %v5356_v56 = vpop.permute.xlu0 %1915 }
 0x1be   : > { %v1478_v53 = vrot.slane %v1339_v25, 5  ;;  %v1472_v50 = vrot.slane %v1308_v43, 6  ;;  %v1391_v30 = vrot.slane %v1390_v0, 1  ;;  %v1359_v45 = vadd.f32 %v1358_v52, %v1357_v58  ;;  %8058 = vst [vmem:[#allocation63_spill] sm:$0xff] %v5356_v56  ;;  %v5358_v52 = vpop.permute.xlu1 %1884 }
 0x1bf   : > { %v1310_v51 = vmax.f32 %v1273_v29, %v1308_v43  ;;  %v1448_v54 = vrot.slane %v1447_v47, 2  ;;  %v1417_v60 = vrot.slane %v1415_v28, 4  ;;  %v1560_v12 = vrot.slane %v1558_v57, 4  ;;  %8059 = vst [vmem:[#allocation64_spill] sm:$0xff] %v5358_v52  ;;  %2405 = vrot.lane.b32.xlu1 %v8019_v19, %s4391_s23  ;;  %2497 = vrot.lane.b32.xlu0 %v4717_v1, %s4393_s27  ;;  %s4416_s23 = smov 78  }
 0x1c0   : > { %vm8060_vm10 = vcmask 1041408   ;;  %v1392_v10 = vadd.f32 %v1391_v30, %v1390_v0  ;;  %v1360_v23 = vrot.slane %v1359_v45, 1  ;;  %v1523_v58 = vsel %vm7755_vm11, %v4701_v61, %v5213_v13 }
 0x1c1   : > { %v1502_v49 = vsel %vm8060_vm10, %v1500_v62, %v1472_v50  ;;  %v1341_v59 = vmax.f32 %v1310_v51, %v1339_v25  ;;  %vm8063_vm7 = vcmask 1042432   ;;  %v1449_v24 = vadd.f32 %v1448_v54, %v1447_v47  ;;  %v5385_v47 = vpop.permute.xlu0 %2010 }
 0x1c2   : > { %v1504_v41 = vsel %vm8063_vm7, %v1502_v49, %v1478_v53  ;;  %v1418_v29 = vadd.f32 %v1417_v60, %v1415_v28  ;;  %v5376_v0 = vsel %vm5352_vm1, %v1392_v10, 0.0  ;;  %v1361_v61 = vadd.f32 %v1360_v23, %v1359_v45  ;;  %8064 = vst [vmem:[#allocation65_spill] sm:$0xff] %v5385_v47  ;;  %v5387_v30 = vpop.permute.xlu1 %1953  ;;  %vm5395_vm1 = vmand %vm500_vm4, %vm4935_vm2 }
 0x1c3   : > { %v1561_v62 = vadd.f32 %v1560_v12, %v1558_v57  ;;  %v1527_v25 = vmul.f32 %v1523_v58, %v4776_v17  ;;  %v1490_v43 = vrot.slane %v5376_v0, 3  ;;  %v1450_v50 = vrot.slane %v1449_v24, 1  ;;  %8065 = vst [vmem:[#allocation66_spill] sm:$0xff] %v5387_v30  ;;  %2466 = vrot.lane.b32.xlu1 %v4717_v1, %s4392_s26  ;;  %2526 = vrot.lane.b32.xlu0 %v4579_v34, %s4394_s29  ;;  %s4418_s26 = smov 77  }
 0x1c4   : > { %v1419_v53 = vrot.slane %v1418_v29, 2  ;;  %v1622_v28 = vsel %vm7754_vm8, %v4723_v3, %v5254_v18  ;;  %v1370_v57 = vsel %vm5368_vm12, %v1361_v61, 0.0  ;;  %vm7757_vm7 = vcmask 130048   ;;  %vm5456_vm12 = vmand %vm500_vm4, %vm4995_vm0 }
 0x1c5   : > { %v1562_v51 = vrot.slane %v1561_v62, 2  ;;  %v1529_v2 = vrot.slane %v1527_v25, 4  ;;  %v1626_v54 = vmul.f32 %v1622_v28, %v4776_v17  ;;  %vm7805_vm10 = vcmask 138240  }
 0x1c6   : > { %v1372_v3 = vmax.f32 %v1341_v59, %v1370_v57  ;;  %v1484_v60 = vrot.slane %v1370_v57, 4  ;;  %v1451_v12 = vadd.f32 %v1450_v50, %v1449_v24  ;;  %v1420_v49 = vadd.f32 %v1419_v53, %v1418_v29 }
 0x1c7   : > { %v1563_v10 = vadd.f32 %v1562_v51, %v1561_v62  ;;  %v1530_v23 = vadd.f32 %v1529_v2, %v1527_v25  ;;  %v1628_v58 = vrot.slane %v1626_v54, 4  ;;  %v1585_v21 = vsel %vm7756_vm15, %v4713_v63, %v5256_v42  ;;  %v5412_v62 = vpop.permute.xlu0 %522  ;;  %v5414_v25 = vpop.permute.xlu1 %2067  ;;  %2495 = vrot.lane.b32.xlu1 %v4579_v34, %s4393_s27  ;;  %2530 = vrot.lane.b32.xlu0 %v8019_v19, %s4394_s29 }
 0x1c8   : > { %vm8068_vm8 = vcmask 1043456   ;;  %v5409_v59 = vsel %vm5395_vm1, %v1451_v12, 0.0  ;;  %v1403_v24 = vmax.f32 %v1372_v3, %v5376_v0  ;;  %v1421_v29 = vrot.slane %v1420_v49, 1  ;;  %8069 = vst [vmem:[#allocation67_spill] sm:$0xff] %v5414_v25 }
 0x1c9   : > { %v1506_v61 = vsel %vm8068_vm8, %v1504_v41, %v1484_v60  ;;  %v1496_v50 = vrot.slane %v5409_v59, 1  ;;  %vm8070_vm11 = vcmask 1044480   ;;  %v1564_v63 = vrot.slane %v1563_v10, 1  ;;  %vm5422_vm8 = vmand %vm500_vm4, %vm4975_vm6 }
 0x1ca   : > { %v1508_v53 = vsel %vm8070_vm11, %v1506_v61, %v1490_v43  ;;  %v1531_v28 = vrot.slane %v1530_v23, 2  ;;  %v1422_v57 = vadd.f32 %v1421_v29, %v1420_v49  ;;  %v1629_v0 = vadd.f32 %v1628_v58, %v1626_v54 }
 0x1cb   : > { %v1589_v45 = vmul.f32 %v1585_v21, %v4776_v17  ;;  %vm8073_vm1 = vcmask 146432   ;;  %v1565_v43 = vadd.f32 %v1564_v63, %v1563_v10  ;;  %vm8074_vm11 = vcmask 154624   ;;  %v5439_v58 = vpop.permute.xlu0 %604  ;;  %v5441_v21 = vpop.permute.xlu1 %562  ;;  %2499 = vrot.lane.b32.xlu1 %v8019_v19, %s4393_s27  ;;  %2593 = vrot.lane.b32.xlu0 %v4717_v1, %s4395_s30  ;;  %s4419_s27 = smov 76  }
 0x1cc   : > { %v1684_v51 = vsel %vm8073_vm1, %v4735_v5, %v5274_v55  ;;  %v1532_v2 = vadd.f32 %v1531_v28, %v1530_v23  ;;  %v1653_v60 = vsel %vm8074_vm11, %v4725_v4, %v5276_v36  ;;  %v1429_v54 = vsel %vm500_vm4, %v1422_v57, 0.0 }
 0x1cd   : > { %v1688_v3 = vmul.f32 %v1684_v51, %v4776_v17  ;;  %v1630_v12 = vrot.slane %v1629_v0, 2  ;;  %v1591_v49 = vrot.slane %v1589_v45, 4  ;;  %v1657_v5 = vmul.f32 %v1653_v60, %v4776_v17 }
 0x1ce   : > { %vm8075_vm1 = vcmask 1045504   ;;  %v5446_v23 = vsel %vm5422_vm8, %v1565_v43, 0.0  ;;  %v1533_v4 = vrot.slane %v1532_v2, 1  ;;  %vm7780_vm11 = vcmask 121856  }
 0x1cf   : > { %v1510_v10 = vsel %vm8075_vm1, %v1508_v53, %v1429_v54  ;;  %vm8076_vm15 = vcmask 1046528   ;;  %v1770_v29 = vrot.slane %v5446_v23, 7  ;;  %v1631_v53 = vadd.f32 %v1630_v12, %v1629_v0  ;;  %v5470_v12 = vpop.permute.xlu1 %646  ;;  %2528 = vrot.lane.b32.xlu1 %v4717_v1, %s4394_s29  ;;  %2624 = vrot.lane.b32.xlu0 %v4717_v1, %s4396_s8 }
 0x1d0   : > { %v5449_v61 = vsel %vm8076_vm15, %v1510_v10, %v1496_v50  ;;  %v1592_v28 = vadd.f32 %v1591_v49, %v1589_v45  ;;  %v1431_v57 = vmax.f32 %v1403_v24, %v1429_v54  ;;  %v1534_v41 = vadd.f32 %v1533_v4, %v1532_v2  ;;  %v5468_v45 = vpop.permute.xlu0 %688 }
 0x1d1   : > { %8077 = vst [vmem:[#allocation68_spill] sm:$0xff] %v5449_v61  ;;  %v1690_v51 = vrot.slane %v1688_v3, 4  ;;  %v1659_v50 = vrot.slane %v1657_v5, 4  ;;  %v1632_v43 = vrot.slane %v1631_v53, 1  ;;  %v1746_v10 = vsel %vm7757_vm7, %v4743_v7, %v5302_v37  ;;  %v8088_v37 = vld [vmem:[#allocation5_spill] sm:$0xff] }
 0x1d2   : > { %v1593_v60 = vrot.slane %v1592_v28, 2  ;;  %v1715_v0 = vsel %vm7805_vm10, %v4737_v6, %v5304_v40  ;;  %v1543_v24 = vsel %vm5456_vm12, %v1534_v41, 0.0  ;;  %v1750_v49 = vmul.f32 %v1746_v10, %v4776_v17 }
 0x1d3   : > { %v1691_v2 = vadd.f32 %v1690_v51, %v1688_v3  ;;  %v1660_v54 = vadd.f32 %v1659_v50, %v1657_v5  ;;  %vm8080_vm15 = vcmask 1040384   ;;  %vm8081_vm8 = vcmp.ge.s32.totalorder %v4817_v27, 16  ;;  %v8084_v50 = vld [vmem:[#allocation6_spill] sm:$0xff]  ;;  %2591 = vrot.lane.b32.xlu1 %v4579_v34, %s4395_s30  ;;  %2622 = vrot.lane.b32.xlu0 %v4579_v34, %s4396_s8 }
 0x1d4   : > { %v1804_v4 = vsel %vm8080_vm15, %v1543_v24, %v1770_v29  ;;  %vm5480_vm1 = vmand %vm8081_vm8, %vm4864_vm3  ;;  %v1633_v6 = vadd.f32 %v1632_v43, %v1631_v53  ;;  %v1594_v61 = vadd.f32 %v1593_v60, %v1592_v28  ;;  %vm7771_vm7 = vcmask 97280   ;;  %v5491_v53 = vpop.permute.xlu0 %759  ;;  %v5493_v28 = vpop.permute.xlu1 %717 }
 0x1d5   : > { %v1692_v63 = vrot.slane %v1691_v2, 2  ;;  %v1661_v3 = vrot.slane %v1660_v54, 2  ;;  %v1752_v5 = vrot.slane %v1750_v49, 4  ;;  %v1719_v41 = vmul.f32 %v1715_v0, %v4776_v17  ;;  %vm5503_vm8 = vmand %vm500_vm4, %vm5069_vm14 }
 0x1d6   : > { %v1462_v29 = vmax.f32 %v1431_v57, %v5409_v59  ;;  %v1595_v51 = vrot.slane %v1594_v61, 1  ;;  %vm8085_vm12 = vcmask 113664   ;;  %vm7772_vm15 = vcmask 105472  }
 0x1d7   : > { %v1858_v10 = vsel %vm8085_vm12, %v8084_v50, %v5334_v39  ;;  %v5497_v43 = vsel %vm5480_vm1, %v1633_v6, 0.0  ;;  %v1693_v57 = vadd.f32 %v1692_v63, %v1691_v2  ;;  %v1662_v60 = vadd.f32 %v1661_v3, %v1660_v54  ;;  %2595 = vrot.lane.b32.xlu1 %v8019_v19, %s4395_s30  ;;  %2653 = vrot.lane.b32.xlu0 %v4717_v1, %s4397_s9 }
 0x1d8   : > { %v1753_v0 = vadd.f32 %v1752_v5, %v1750_v49  ;;  %v1596_v50 = vadd.f32 %v1595_v51, %v1594_v61  ;;  %v1721_v31 = vrot.slane %v1719_v41, 4  ;;  %v1862_v39 = vmul.f32 %v1858_v10, %v4776_v17  ;;  %v5533_v10 = vpop.permute.xlu0 %902 }
 0x1d9   : > { %v1827_v7 = vsel %vm7780_vm11, %v8088_v37, %v5336_v48  ;;  %vm8089_vm4 = vcmp.ge.s32.totalorder %v4817_v27, 16  ;;  %v1694_v2 = vrot.slane %v1693_v57, 1  ;;  %v1663_v61 = vrot.slane %v1662_v60, 1 }
 0x1da   : > { %vm5516_vm1 = vmand %vm8089_vm4, %vm4897_vm9  ;;  %v1754_v54 = vrot.slane %v1753_v0, 2  ;;  %v1831_v49 = vmul.f32 %v1827_v7, %v4776_v17  ;;  %v1782_v37 = vrot.slane %v5497_v43, 5  ;;  %v1605_v63 = vsel %vm5503_vm8, %v1596_v50, 0.0  ;;  %v5535_v7 = vpop.permute.xlu1 %801 }
 0x1db   : > { %vm8092_vm12 = vmmov %vm8089_vm4  ;;  %v1722_v5 = vadd.f32 %v1721_v31, %v1719_v41  ;;  %v1864_v51 = vrot.slane %v1862_v39, 4  ;;  %v1545_v15 = vmax.f32 %v1462_v29, %v1543_v24  ;;  %v1776_v48 = vrot.slane %v1605_v63, 6  ;;  %v8097_v24 = vld [vmem:[#allocation8_spill] sm:$0xff]  ;;  %2626 = vrot.lane.b32.xlu1 %v8019_v19, %s4396_s8  ;;  %2682 = vrot.lane.b32.xlu0 %v4579_v34, %s4398_s10 }
 0x1dc   : > { %vm5529_vm4 = vmand %vm8092_vm12, %vm4843_vm13  ;;  %v1695_v55 = vadd.f32 %v1694_v2, %v1693_v57  ;;  %v1664_v40 = vadd.f32 %v1663_v61, %v1662_v60  ;;  %v1755_v59 = vadd.f32 %v1754_v54, %v1753_v0  ;;  %v1833_v11 = vrot.slane %v1831_v49, 4  ;;  %v8100_v54 = vld [vmem:[#allocation7_spill] sm:$0xff] }
 0x1dd   : > { %v1723_v50 = vrot.slane %v1722_v5, 2  ;;  %v1865_v18 = vadd.f32 %v1864_v51, %v1862_v39  ;;  %vm8095_vm8 = vcmask 1041408   ;;  %v1920_v29 = vsel %vm7771_vm7, %v8097_v24, %v5356_v56 }
 0x1de   : > { %v1806_v36 = vsel %vm8095_vm8, %v1804_v4, %v1776_v48  ;;  %v5541_v31 = vsel %vm5516_vm1, %v1695_v55, 0.0  ;;  %v5545_v41 = vsel %vm5529_vm4, %v1664_v40, 0.0  ;;  %vm8098_vm12 = vcmask 1042432   ;;  %v5554_v4 = vpop.permute.xlu0 %981  ;;  %v5556_v55 = vpop.permute.xlu1 %950 }
 0x1df   : > { %8096 = vst [vmem:[#allocation6_spill] sm:$0xff] %v5541_v31  ;;  %v1794_v39 = vrot.slane %v5541_v31, 3  ;;  %v1808_v57 = vsel %vm8098_vm12, %v1806_v36, %v1782_v37  ;;  %v1788_v48 = vrot.slane %v5545_v41, 4  ;;  %vm7778_vm8 = vcmask 23552   ;;  %2651 = vrot.lane.b32.xlu1 %v4579_v34, %s4397_s9  ;;  %2686 = vrot.lane.b32.xlu0 %v8019_v19, %s4398_s10 }
 0x1e0   : > { %v1756_v60 = vrot.slane %v1755_v59, 1  ;;  %v1724_v40 = vadd.f32 %v1723_v50, %v1722_v5  ;;  %v1866_v0 = vrot.slane %v1865_v18, 2  ;;  %v1834_v6 = vadd.f32 %v1833_v11, %v1831_v49 }
 0x1e1   : > { %vm8099_vm1 = vcmask 1043456   ;;  %v1924_v61 = vmul.f32 %v1920_v29, %v4776_v17  ;;  %v1889_v3 = vsel %vm7772_vm15, %v8100_v54, %v5358_v52  ;;  %vm7779_vm4 = vcmask 31744  }
 0x1e2   : > { %v1810_v2 = vsel %vm8099_vm1, %v1808_v57, %v1788_v48  ;;  %v1576_v36 = vmax.f32 %v1545_v15, %v5446_v23  ;;  %vm8101_vm12 = vcmask 1044480   ;;  %v1725_v51 = vrot.slane %v1724_v40, 1  ;;  %v5576_v15 = vpop.permute.xlu0 %1043  ;;  %v5578_v23 = vpop.permute.xlu1 %1012  ;;  %v8105_v57 = vld [vmem:[#allocation15_spill] sm:$0xff] }
 0x1e3   : > { %v1812_v37 = vsel %vm8101_vm12, %v1810_v2, %v1794_v39  ;;  %v1867_v24 = vadd.f32 %v1866_v0, %v1865_v18  ;;  %vm8102_vm1 = vcmp.ge.s32.totalorder %v4817_v27, 16  ;;  %v1835_v49 = vrot.slane %v1834_v6, 2  ;;  %2655 = vrot.lane.b32.xlu1 %v8019_v19, %s4397_s9  ;;  %2715 = vrot.lane.b32.xlu0 %v4717_v1, %s4399_s11  ;;  %s8581_s9 = sld [smem:[#allocation75_spill]] }
 0x1e4   : > { %vm5571_vm7 = vmand %vm8102_vm1, %vm4881_vm5  ;;  %v1926_v5 = vrot.slane %v1924_v61, 4  ;;  %v1893_v50 = vmul.f32 %v1889_v3, %v4776_v17  ;;  %vm7801_vm15 = vcmask 15360   ;;  %v1757_v18 = vadd.f32 %v1756_v60, %v1755_v59 }
 0x1e5   : > { %v1726_v29 = vadd.f32 %v1725_v51, %v1724_v40  ;;  %v1868_v39 = vrot.slane %v1867_v24, 1  ;;  %v2015_v48 = vsel %vm7778_vm8, %v8105_v57, %v5385_v47  ;;  %vm8106_vm12 = vmmov %vm8102_vm1  ;;  %v1836_v2 = vadd.f32 %v1835_v49, %v1834_v6  ;;  %v8112_v51 = vld [vmem:[#allocation9_spill] sm:$0xff]  ;;  %v8142_v47 = vld [vmem:[#allocation22_spill] sm:$0xff] }
 0x1e6   : > { %vm5587_vm1 = vmand %vm8106_vm12, %vm4995_vm0  ;;  %v1927_v54 = vadd.f32 %v1926_v5, %v1924_v61  ;;  %v1895_v3 = vrot.slane %v1893_v50, 4  ;;  %v5592_v56 = vsub.s32 1, %v8109_v32  ;;  %v1607_v59 = vmax.f32 %v1576_v36, %v1605_v63  ;;  %v5605_v33 = vpop.permute.xlu0 %1103  ;;  %v5607_v63 = vpop.permute.xlu1 %1074 }
 0x1e7   : > { %v5597_v60 = vsel %vm5571_vm7, %v1726_v29, 0.0  ;;  %v1869_v40 = vadd.f32 %v1868_v39, %v1867_v24  ;;  %v1958_v57 = vsel %vm7779_vm4, %v8112_v51, %v5387_v30  ;;  %v1837_v61 = vrot.slane %v1836_v2, 1  ;;  %vm8113_vm7 = vmmov %vm8106_vm12  ;;  %v8117_v29 = vld [vmem:[#allocation23_spill] sm:$0xff]  ;;  %2684 = vrot.lane.b32.xlu1 %v4717_v1, %s4398_s10  ;;  %v8157_v30 = vld [vmem:[#allocation28_spill] sm:$0xff]  ;;  %2744 = vrot.lane.b32.xlu0 %v4579_v34, %s4400_s13 }
 0x1e8   : > { %8110 = vst [vmem:[#allocation5_spill] sm:$0xff] %v5592_v56  ;;  %8111 = vst [vmem:[#allocation8_spill] sm:$0xff] %v5597_v60  ;;  %v1800_v6 = vrot.slane %v5597_v60, 2  ;;  %v1928_v49 = vrot.slane %v1927_v54, 2  ;;  %v2019_v5 = vmul.f32 %v2015_v48, %v4776_v17  ;;  %v5611_v36 = vsel %vm8113_vm7, %v1757_v18, 0.0 }
 0x1e9   : > { %8114 = vst [vmem:[#allocation7_spill] sm:$0xff] %v5611_v36  ;;  %v5615_v24 = vsel %vm5587_vm1, %v1869_v40, 0.0  ;;  %vm8116_vm12 = vmmov %vm8113_vm7  ;;  %v1896_v11 = vadd.f32 %v1895_v3, %v1893_v50  ;;  %vm8118_vm4 = vcmask 556032   ;;  %vm8119_vm11 = vcmask 1045504   ;;  %v8122_v3 = vld [vmem:[#allocation27_spill] sm:$0xff] }
 0x1ea   : > { %8115 = vst [vmem:[#allocation15_spill] sm:$0xff] %v5615_v24  ;;  %vm1845_vm8 = vmand %vm8116_vm12, %vm4935_vm2  ;;  %v526_v39 = vsel %vm8118_vm4, %v8117_v29, %v5412_v62  ;;  %v1814_v48 = vsel %vm8119_vm11, %v1812_v37, %v1800_v6  ;;  %v2181_v51 = vrot.slane %v5615_v24, 7  ;;  %v1838_v18 = vadd.f32 %v1837_v61, %v1836_v2  ;;  %v5641_v29 = vpop.permute.xlu0 %1217  ;;  %v5643_v14 = vpop.permute.xlu1 %1134 }
 0x1eb   : > { %v1962_v60 = vmul.f32 %v1958_v57, %v4776_v17  ;;  %vm8120_vm1 = vcmask 1046528   ;;  %v1929_v40 = vadd.f32 %v1928_v49, %v1927_v54  ;;  %v1897_v50 = vrot.slane %v1896_v11, 2  ;;  %v8126_v57 = vld [vmem:[#allocation13_spill] sm:$0xff]  ;;  %2713 = vrot.lane.b32.xlu1 %v4579_v34, %s4399_s11  ;;  %2748 = vrot.lane.b32.xlu0 %v8019_v19, %s4400_s13 }
 0x1ec   : > { %v5630_v0 = vsel %vm8120_vm1, %v1814_v48, %v5611_v36  ;;  %v8123_v62 = vrot.slane %v8122_v3, 2  ;;  %v5638_v6 = vsel %vm1845_vm8, %v1838_v18, 0.0  ;;  %v2021_v2 = vrot.slane %v2019_v5, 4  ;;  %v8129_v36 = vld [vmem:[#allocation16_spill] sm:$0xff]  ;;  %vm8130_vm8 = vmmov %vm8113_vm7 }
 0x1ed   : > { %8121 = vst [vmem:[#allocation9_spill] sm:$0xff] %v5630_v0  ;;  %8125 = vst [vmem:[#allocation27_spill] sm:$0xff] %v5638_v6  ;;  %v530_v61 = vmul.f32 %v526_v39, %v8126_v57  ;;  %vm8128_vm11 = vcmask 1040384   ;;  %v1930_v49 = vrot.slane %v1929_v40, 1  ;;  %v1898_v24 = vadd.f32 %v1897_v50, %v1896_v11  ;;  %v8133_v0 = vld [vmem:[#allocation18_spill] sm:$0xff] }
 0x1ee   : > { %v5636_v37 = vadd.f32 %v8123_v62, %v8122_v3  ;;  %v2197_v54 = vsel %vm8128_vm11, %v5638_v6, %v2181_v51  ;;  %v2072_v3 = vsel %vm7801_vm15, %v8129_v36, %v5414_v25  ;;  %v1644_v18 = vmax.f32 %v1607_v59, %v5497_v43  ;;  %vm5656_vm4 = vmand %vm8130_vm8, %vm5069_vm14  ;;  %v8134_v36 = vld [vmem:[#allocation21_spill] sm:$0xff]  ;;  %v5680_v32 = vpop.permute.xlu0 %1285  ;;  %v8155_v25 = vld [vmem:[#allocation35_spill] sm:$0xff] }
 0x1ef   : > { %v1964_v62 = vrot.slane %v1962_v60, 4  ;;  %v551_v51 = vrot.slane %v8133_v0, %v5592_v56  ;;  %v537_v6 = vrot.slane %v530_v61, 4  ;;  %v1931_v11 = vadd.f32 %v1930_v49, %v1929_v40  ;;  %v8135_v59 = vld [vmem:[#allocation29_spill] sm:$0xff]  ;;  %vm8137_vm12 = vmmov %vm8130_vm8  ;;  %2717 = vrot.lane.b32.xlu1 %v8019_v19, %s4399_s11  ;;  %2783 = vrot.lane.b32.xlu0 %v4717_v1, %s4401_s18 }
 0x1f0   : > { %8124 = vst [vmem:[#allocation23_spill] sm:$0xff] %v5636_v37  ;;  %v1899_v50 = vrot.slane %v1898_v24, 1  ;;  %v633_v43 = vrot.slane %v8134_v36, %v5592_v56  ;;  %vm8136_vm7 = vcmask 539648   ;;  %vm5673_vm1 = vmand %vm8137_vm12, %vm4975_vm6  ;;  %v2022_v48 = vadd.f32 %v2021_v2, %v2019_v5  ;;  %v8140_v36 = vld [vmem:[#allocation17_spill] sm:$0xff] }
 0x1f1   : > { %v608_v46 = vsel %vm8136_vm7, %v8135_v59, %v5439_v58  ;;  %v538_v40 = vadd.f32 %v537_v6, %v530_v61  ;;  %v2076_v49 = vmul.f32 %v2072_v3, %v4776_v17  ;;  %v591_v37 = vrot.slane %v8140_v36, %v5592_v56  ;;  %v5682_v58 = vpop.permute.xlu1 %1248  ;;  %v8145_v3 = vld [vmem:[#allocation20_spill] sm:$0xff] }
 0x1f2   : > { %v5686_v59 = vsel %vm5656_vm4, %v1931_v11, 0.0  ;;  %v1900_v9 = vadd.f32 %v1899_v50, %v1898_v24  ;;  %v612_v27 = vmul.f32 %v608_v46, %v8126_v57  ;;  %vm8143_vm11 = vcmask 547840   ;;  %v8150_v11 = vld [vmem:[#allocation26_spill] sm:$0xff] }
 0x1f3   : > { %8141 = vst [vmem:[#allocation13_spill] sm:$0xff] %v5686_v59  ;;  %v566_v5 = vsel %vm8143_vm11, %v8142_v47, %v5441_v21  ;;  %v5693_v6 = vmax.f32 %v1644_v18, %v5545_v41  ;;  %v1965_v2 = vadd.f32 %v1964_v62, %v1962_v60  ;;  %v539_v61 = vrot.slane %v538_v40, 2  ;;  %v8149_v18 = vld [vmem:[#allocation33_spill] sm:$0xff]  ;;  %2746 = vrot.lane.b32.xlu1 %v4717_v1, %s4400_s13 }
 0x1f4   : > { %v675_v36 = vrot.slane %v8145_v3, %v5592_v56  ;;  %v2193_v39 = vrot.slane %v5686_v59, 5  ;;  %v5701_v46 = vsel %vm5673_vm1, %v1900_v9, 0.0  ;;  %v619_v24 = vrot.slane %v612_v27, 4  ;;  %v5714_v9 = vpop.permute.xlu0 %1347  ;;  %2812 = vrot.lane.b32.xlu0 %v4579_v34, %s4402_s19 }
 0x1f5   : > { %8144 = vst [vmem:[#allocation16_spill] sm:$0xff] %v5693_v6  ;;  %8146 = vst [vmem:[#allocation18_spill] sm:$0xff] %v5701_v46  ;;  %v570_v47 = vmul.f32 %v566_v5, %v8126_v57  ;;  %v2187_v21 = vrot.slane %v5701_v46, 6  ;;  %v2023_v41 = vrot.slane %v2022_v48, 2  ;;  %vm5706_vm8 = vcmp.ne.s32.totalorder %v633_v43, 0  ;;  %v5716_v0 = vpop.permute.xlu1 %1316 }
 0x1f6   : > { %v788_v62 = vrot.slane %v8149_v18, %v5592_v56  ;;  %vm5718_vm4 = vcmp.ne.s32.totalorder %v551_v51, 0  ;;  %v8151_v5 = vmov 0  ;;  %v540_v3 = vadd.f32 %v539_v61, %v538_v40 }
 0x1f7   : > { %v8152_v5 = vsel %vm5718_vm4, 4294967295, %v8151_v5  ;;  %v2078_v59 = vrot.slane %v2076_v49, 4  ;;  %v620_v43 = vadd.f32 %v619_v24, %v612_v27  ;;  %v577_v46 = vrot.slane %v570_v47, 4  ;;  %2781 = vrot.lane.b32.xlu1 %v4579_v34, %s4401_s18 }
 0x1f8   : > { %8153 = vst [vmem:[#allocation21_spill] sm:$0xff] %v8152_v5  ;;  %vm8154_vm7 = vcmask 1041408   ;;  %vm8156_vm12 = vcmask 523264   ;;  %vm8158_vm1 = vcmask 531456   ;;  %vm8159_vm11 = vcmask 1042432   ;;  %2816 = vrot.lane.b32.xlu0 %v8019_v19, %s4402_s19 }
 0x1f9   : > { %v2199_v18 = vsel %vm8154_vm7, %v2197_v54, %v2187_v21  ;;  %v692_v50 = vsel %vm8156_vm12, %v8155_v25, %v5468_v45  ;;  %v650_v51 = vsel %vm8158_vm1, %v8157_v30, %v5470_v12  ;;  %v1966_v27 = vrot.slane %v1965_v2, 2  ;;  %v5745_v54 = vpop.permute.xlu0 %1409 }
 0x1fa   : > { %v5733_v40 = vsel %vm8159_vm11, %v2199_v18, %v2193_v39  ;;  %v541_v61 = vrot.slane %v540_v3, 1  ;;  %v621_v24 = vrot.slane %v620_v43, 2  ;;  %vm5735_vm15 = vcmp.ne.s32.totalorder %v591_v37, 0 }
 0x1fb   : > { %8160 = vst [vmem:[#allocation29_spill] sm:$0xff] %v5733_v40  ;;  %v8161_v17 = vmov 0  ;;  %v578_v25 = vadd.f32 %v577_v46, %v570_v47  ;;  %v696_v45 = vmul.f32 %v692_v50, %v8126_v57  ;;  %v654_v30 = vmul.f32 %v650_v51, %v8126_v57  ;;  %v5752_v40 = vpop.permute.xlu1 %1378  ;;  %v8167_v51 = vld [vmem:[#allocation34_spill] sm:$0xff]  ;;  %2785 = vrot.lane.b32.xlu1 %v8019_v19, %s4401_s18 }
 0x1fc   : > { %v8162_v17 = vsel %vm5735_vm15, 4294967295, %v8161_v17  ;;  %vm8164_vm7 = vcmask 506880   ;;  %v5747_v39 = vadd.f32 %v2023_v41, %v2022_v48  ;;  %v5749_v21 = vadd.f32 %v2078_v59, %v2076_v49  ;;  %2897 = vrot.lane.b32.xlu0 %v4717_v1, %s4403_s20 }
 0x1fd   : > { %8163 = vst [vmem:[#allocation17_spill] sm:$0xff] %v8162_v17  ;;  %v763_v12 = vsel %vm8164_vm7, %v4957_v38, %v5491_v53  ;;  %v622_v37 = vadd.f32 %v621_v24, %v620_v43  ;;  %v579_v46 = vrot.slane %v578_v25, 2  ;;  %v703_v47 = vrot.slane %v696_v45, 4 }
 0x1fe   : > { %8165 = vst [vmem:[#allocation22_spill] sm:$0xff] %v5747_v39  ;;  %8166 = vst [vmem:[#allocation20_spill] sm:$0xff] %v5749_v21  ;;  %v767_v18 = vmul.f32 %v763_v12, %v8126_v57  ;;  %v661_v50 = vrot.slane %v654_v30, 4  ;;  %vm8168_vm12 = vcmask 515072   ;;  %v5758_v38 = vadd.f32 %v1966_v27, %v1965_v2  ;;  %v5770_v2 = vpop.permute.xlu0 %1520 }
 0x1ff   : > { %v721_v31 = vsel %vm8168_vm12, %v8167_v51, %v5493_v28  ;;  %v542_v53 = vadd.f32 %v541_v61, %v540_v3  ;;  %v623_v48 = vrot.slane %v622_v37, 1  ;;  %vm5760_vm1 = vcmp.ne.s32.totalorder %v675_v36, 0  ;;  %v5776_v51 = vpop.permute.xlu1 %1437  ;;  %2814 = vrot.lane.b32.xlu1 %v4717_v1, %s4402_s19 }
 0x200   : > { %8169 = vst [vmem:[#allocation33_spill] sm:$0xff] %v5758_v38  ;;  %v8170_v49 = vmov 0  ;;  %v774_v59 = vrot.slane %v767_v18, 4  ;;  %v580_v41 = vadd.f32 %v579_v46, %v578_v25  ;;  %v704_v43 = vadd.f32 %v703_v47, %v696_v45  ;;  %2926 = vrot.lane.b32.xlu0 %v4579_v34, %s4404_s21 }
 0x201   : > { %v8171_v49 = vsel %vm5760_vm1, 4294967295, %v8170_v49  ;;  %v662_v24 = vadd.f32 %v661_v50, %v654_v30  ;;  %vm5765_vm11 = vcmp.ne.s32.totalorder %v788_v62, 0  ;;  %v8173_v12 = vmov 0 }
 0x202   : > { %8172 = vst [vmem:[#allocation26_spill] sm:$0xff] %v8171_v49  ;;  %v8174_v12 = vsel %vm5765_vm11, 4294967295, %v8173_v12  ;;  %v725_v28 = vmul.f32 %v721_v31, %v8126_v57  ;;  %v624_v36 = vadd.f32 %v623_v48, %v622_v37  ;;  %v775_v27 = vadd.f32 %v774_v59, %v767_v18 }
 0x203   : > { %8175 = vst [vmem:[#allocation35_spill] sm:$0xff] %v8174_v12  ;;  %vm8176_vm7 = vcmask 490496   ;;  %v581_v25 = vrot.slane %v580_v41, 1  ;;  %v705_v45 = vrot.slane %v704_v43, 2  ;;  %v663_v62 = vrot.slane %v662_v24, 2  ;;  %v5796_v38 = vpop.permute.xlu1 %1551  ;;  %2895 = vrot.lane.b32.xlu1 %v4579_v34, %s4403_s20 }
 0x204   : > { %v906_v61 = vsel %vm8176_vm7, %v5001_v35, %v5533_v10  ;;  %v732_v30 = vrot.slane %v725_v28, 4  ;;  %v639_v31 = vsel %vm5706_vm8, %v624_v36, 0.0  ;;  %v776_v46 = vrot.slane %v775_v27, 2  ;;  %v5794_v36 = vpop.permute.xlu0 %1582  ;;  %8181 = vst [vmem:[#allocation34_spill] sm:$0xff] %v5796_v38  ;;  %2930 = vrot.lane.b32.xlu0 %v8019_v19, %s4404_s21 }
 0x205   : > { %v931_v37 = vrot.slane %v4916_v26, %v5592_v56  ;;  %v910_v18 = vmul.f32 %v906_v61, %v8126_v57  ;;  %v557_v35 = vsel %vm5718_vm4, %v542_v53, 0.0  ;;  %v582_v10 = vadd.f32 %v581_v25, %v580_v41 }
 0x206   : > { %v706_v47 = vadd.f32 %v705_v45, %v704_v43  ;;  %v664_v50 = vadd.f32 %v663_v62, %v662_v24  ;;  %v8177_v48 = vrot.slane %v8150_v11, %v5592_v56  ;;  %v8178_v59 = vmov 0  ;;  %v8182_v24 = vld [vmem:[#allocation38_spill] sm:$0xff] }
 0x207   : > { %v848_v26 = vrot.slane %v639_v31, 6  ;;  %v777_v3 = vadd.f32 %v776_v46, %v775_v27  ;;  %v733_v61 = vadd.f32 %v732_v30, %v725_v28  ;;  %v917_v6 = vrot.slane %v910_v18, 4  ;;  %v5814_v38 = vpop.permute.xlu1 %1619  ;;  %2899 = vrot.lane.b32.xlu1 %v8019_v19, %s4403_s20 }
 0x208   : > { %vm5790_vm12 = vcmp.ne.s32.totalorder %v8177_v48, 0  ;;  %v597_v53 = vsel %vm5735_vm15, %v582_v10, 0.0  ;;  %v707_v41 = vrot.slane %v706_v47, 1  ;;  %v665_v43 = vrot.slane %v664_v50, 1  ;;  %v8187_v48 = vld [vmem:[#allocation31_spill] sm:$0xff]  ;;  %2961 = vrot.lane.b32.xlu0 %v8019_v19, %s4405_s4 }
 0x209   : > { %v8179_v59 = vsel %vm5790_vm12, 4294967295, %v8178_v59  ;;  %vm8183_vm7 = vcmask 498688   ;;  %v599_v25 = vmax.f32 %v557_v35, %v597_v53  ;;  %v842_v45 = vrot.slane %v597_v53, 7 }
 0x20a   : > { %8180 = vst [vmem:[#allocation28_spill] sm:$0xff] %v8179_v59  ;;  %v805_v11 = vsel %vm8183_vm7, %v8182_v24, %v5535_v7  ;;  %v778_v62 = vrot.slane %v777_v3, 1  ;;  %v734_v27 = vrot.slane %v733_v61, 2  ;;  %vm5804_vm10 = vcmp.ne.s32.totalorder %v931_v37, 0  ;;  %v5811_v7 = vpop.permute.xlu0 %1650 }
 0x20b   : > { %v8184_v28 = vmov 0  ;;  %v708_v30 = vadd.f32 %v707_v41, %v706_v47  ;;  %v666_v46 = vadd.f32 %v665_v43, %v664_v50  ;;  %v918_v10 = vadd.f32 %v917_v6, %v910_v18  ;;  %2928 = vrot.lane.b32.xlu1 %v4717_v1, %s4404_s21 }
 0x20c   : > { %v8185_v28 = vsel %vm5804_vm10, 4294967295, %v8184_v28  ;;  %v830_v52 = vrot.slane %v8187_v48, %v5592_v56  ;;  %vm8188_vm7 = vcmask 1040384   ;;  %v641_v21 = vmax.f32 %v599_v25, %v639_v31  ;;  %2986 = vrot.lane.b32.xlu0 %v4579_v34, %s4406_s5 }
 0x20d   : > { %8186 = vst [vmem:[#allocation38_spill] sm:$0xff] %v8185_v28  ;;  %v877_v24 = vsel %vm8188_vm7, %v557_v35, %v842_v45  ;;  %v779_v53 = vadd.f32 %v778_v62, %v777_v3  ;;  %v735_v39 = vadd.f32 %v734_v27, %v733_v61  ;;  %vm8189_vm14 = vcmask 1041408   ;;  %v5835_v27 = vpop.permute.xlu1 %1681 }
 0x20e   : > { %v880_v37 = vsel %vm8189_vm14, %v877_v24, %v848_v26  ;;  %v681_v42 = vsel %vm5760_vm1, %v666_v46, 0.0  ;;  %v919_v47 = vrot.slane %v918_v10, 2  ;;  %v809_v6 = vmul.f32 %v805_v11, %v8126_v57  ;;  %v8190_v26 = vld [vmem:[#allocation43_spill] sm:$0xff]  ;;  %v5827_v25 = vpop.permute.xlu0 %1712 }
 0x20f   : > { %v683_v18 = vmax.f32 %v641_v21, %v681_v42  ;;  %v854_v50 = vrot.slane %v681_v42, 5  ;;  %v794_v35 = vsel %vm5765_vm11, %v779_v53, 0.0  ;;  %v736_v31 = vrot.slane %v735_v39, 1  ;;  %2959 = vrot.lane.b32.xlu1 %v4717_v1, %s4405_s4 }
 0x210   : > { %v866_v3 = vrot.slane %v794_v35, 2  ;;  %v920_v61 = vadd.f32 %v919_v47, %v918_v10  ;;  %v816_v41 = vrot.slane %v809_v6, 4  ;;  %vm8191_vm14 = vcmask 416768   ;;  %2990 = vrot.lane.b32.xlu0 %v8019_v19, %s4406_s5 }
 0x211   : > { %v985_v43 = vsel %vm8191_vm14, %v8190_v26, %v5554_v4  ;;  %vm8192_vm7 = vcmask 1042432   ;;  %v712_v45 = vmax.f32 %v683_v18, %v708_v30  ;;  %v737_v21 = vadd.f32 %v736_v31, %v735_v39  ;;  %v8197_v4 = vld [vmem:[#allocation41_spill] sm:$0xff] }
 0x212   : > { %v883_v11 = vsel %vm8192_vm7, %v880_v37, %v854_v50  ;;  %vm5830_vm6 = vcmp.ne.s32.totalorder %v830_v52, 0  ;;  %v8193_v42 = vmov 0  ;;  %v989_v62 = vmul.f32 %v985_v43, %v8126_v57  ;;  %v8199_v37 = vld [vmem:[#allocation45_spill] sm:$0xff]  ;;  %v8201_v43 = vld [vmem:[#allocation42_spill] sm:$0xff] }
 0x213   : > { %v8194_v42 = vsel %vm5830_vm6, 4294967295, %v8193_v42  ;;  %vm8196_vm0 = vcmask 1043456   ;;  %v921_v10 = vrot.slane %v920_v61, 1  ;;  %v817_v48 = vadd.f32 %v816_v41, %v809_v6  ;;  %2957 = vrot.lane.b32.xlu1 %v4579_v34, %s4405_s4 }
 0x214   : > { %8195 = vst [vmem:[#allocation31_spill] sm:$0xff] %v8194_v42  ;;  %v886_v46 = vsel %vm8196_vm0, %v883_v11, %v708_v30  ;;  %vm8198_vm14 = vcmask 424960   ;;  %v752_v52 = vsel %vm5790_vm12, %v737_v21, 0.0  ;;  %v996_v39 = vrot.slane %v989_v62, 4  ;;  %v5855_v21 = vpop.permute.xlu1 %1743  ;;  %3019 = vrot.lane.b32.xlu0 %v4717_v1, %s4407_s6  ;;  %v8299_v42 = vld [vmem:[#allocation11_spill] sm:$0xff] }
 0x215   : > { %v954_v24 = vsel %vm8198_vm14, %v8197_v4, %v5556_v55  ;;  %vm8200_vm7 = vcmask 400384   ;;  %v754_v30 = vmax.f32 %v712_v45, %v752_v52  ;;  %v860_v6 = vrot.slane %v752_v52, 3  ;;  %v5849_v55 = vpop.permute.xlu0 %1824 }
 0x216   : > { %v958_v53 = vmul.f32 %v954_v24, %v8126_v57  ;;  %v1047_v47 = vsel %vm8200_vm7, %v8199_v37, %v5576_v15  ;;  %v922_v18 = vadd.f32 %v921_v10, %v920_v61  ;;  %v818_v50 = vrot.slane %v817_v48, 2 }
 0x217   : > { %v997_v31 = vadd.f32 %v996_v39, %v989_v62  ;;  %v1051_v26 = vmul.f32 %v1047_v47, %v8126_v57  ;;  %vm8202_vm0 = vcmask 408576   ;;  %vm8203_vm14 = vcmask 1044480   ;;  %2988 = vrot.lane.b32.xlu1 %v4717_v1, %s4406_s5 }
 0x218   : > { %v965_v41 = vrot.slane %v958_v53, 4  ;;  %v1016_v11 = vsel %vm8202_vm0, %v8201_v43, %v5578_v23  ;;  %v889_v15 = vsel %vm8203_vm14, %v886_v46, %v860_v6  ;;  %v5860_v45 = vsel %vm5804_vm10, %v922_v18, 0.0  ;;  %v8205_v46 = vld [vmem:[#allocation48_spill] sm:$0xff]  ;;  %v5875_v18 = vpop.permute.xlu1 %1855  ;;  %3048 = vrot.lane.b32.xlu0 %v4579_v34, %s4408_s7 }
 0x219   : > { %v796_v61 = vmax.f32 %v754_v30, %v794_v35  ;;  %v819_v10 = vadd.f32 %v818_v50, %v817_v48  ;;  %vm8204_vm7 = vcmask 1045504   ;;  %v998_v4 = vrot.slane %v997_v31, 2  ;;  %v8207_v35 = vld [vmem:[#allocation44_spill] sm:$0xff]  ;;  %v5872_v47 = vpop.permute.xlu0 %1886 }
 0x21a   : > { %v892_v62 = vsel %vm8204_vm7, %v889_v15, %v866_v3  ;;  %v966_v24 = vadd.f32 %v965_v41, %v958_v53  ;;  %v1058_v52 = vrot.slane %v1051_v26, 4  ;;  %v1020_v39 = vmul.f32 %v1016_v11, %v8126_v57 }
 0x21b   : > { %v820_v23 = vrot.slane %v819_v10, 1  ;;  %vm8206_vm0 = vcmask 384000   ;;  %vm8208_vm14 = vcmask 392192   ;;  %v999_v30 = vadd.f32 %v998_v4, %v997_v31  ;;  %3017 = vrot.lane.b32.xlu1 %v4579_v34, %s4407_s6 }
 0x21c   : > { %v1107_v37 = vsel %vm8206_vm0, %v8205_v46, %v5605_v33  ;;  %v1078_v48 = vsel %vm8208_vm14, %v8207_v35, %v5607_v63  ;;  %v967_v3 = vrot.slane %v966_v24, 2  ;;  %v1059_v6 = vadd.f32 %v1058_v52, %v1051_v26  ;;  %v5888_v35 = vpop.permute.xlu1 %1917  ;;  %3052 = vrot.lane.b32.xlu0 %v8019_v19, %s4408_s7 }
 0x21d   : > { %v1111_v53 = vmul.f32 %v1107_v37, %v8126_v57  ;;  %v821_v50 = vadd.f32 %v820_v23, %v819_v10  ;;  %v1027_v41 = vrot.slane %v1020_v39, 4  ;;  %v1082_v43 = vmul.f32 %v1078_v48, %v8126_v57  ;;  %v5886_v23 = vpop.permute.xlu0 %1955 }
 0x21e   : > { %vm8209_vm7 = vcmask 367616   ;;  %v1000_v63 = vrot.slane %v999_v30, 1  ;;  %v968_v11 = vadd.f32 %v967_v3, %v966_v24  ;;  %v1060_v15 = vrot.slane %v1059_v6, 2 }
 0x21f   : > { %v1221_v33 = vsel %vm8209_vm7, %v5112_v44, %v5641_v29  ;;  %v1118_v31 = vrot.slane %v1111_v53, 4  ;;  %v836_v26 = vsel %vm5830_vm6, %v821_v50, 0.0  ;;  %v1028_v4 = vadd.f32 %v1027_v41, %v1020_v39  ;;  %3021 = vrot.lane.b32.xlu1 %v8019_v19, %s4407_s6 }
 0x220   : > { %v1089_v10 = vrot.slane %v1082_v43, 4  ;;  %v1225_v52 = vmul.f32 %v1221_v33, %v8126_v57  ;;  %v838_v46 = vmax.f32 %v796_v61, %v836_v26  ;;  %v872_v37 = vrot.slane %v836_v26, 1  ;;  %3081 = vrot.lane.b32.xlu0 %v4717_v1, %s4409_s28 }
 0x221   : > { %v1001_v44 = vadd.f32 %v1000_v63, %v999_v30  ;;  %v969_v29 = vrot.slane %v968_v11, 1  ;;  %v1061_v24 = vadd.f32 %v1060_v15, %v1059_v6  ;;  %v1029_v48 = vrot.slane %v1028_v4, 2 }
 0x222   : > { %v1119_v3 = vadd.f32 %v1118_v31, %v1111_v53  ;;  %v1090_v56 = vadd.f32 %v1089_v10, %v1082_v43  ;;  %vm8210_vm0 = vcmask 1046528   ;;  %v939_v61 = vmax.f32 %v838_v46, %v5860_v45  ;;  %v5898_v53 = vpop.permute.xlu0 %2069  ;;  %v8212_v31 = vld [vmem:[#allocation47_spill] sm:$0xff]  ;;  %v5905_v10 = vpop.permute.xlu1 %2012 }
 0x223   : > { %v5892_v39 = vsel %vm8210_vm0, %v892_v62, %v872_v37  ;;  %v1005_v50 = vsel %vm5735_vm15, %v1001_v44, 0.0  ;;  %v970_v41 = vadd.f32 %v969_v29, %v968_v11  ;;  %v1062_v33 = vrot.slane %v1061_v24, 1  ;;  %3050 = vrot.lane.b32.xlu1 %v4717_v1, %s4408_s7 }
 0x224   : > { %8211 = vst [vmem:[#allocation43_spill] sm:$0xff] %v5892_v39  ;;  %v1170_v30 = vrot.slane %v1005_v50, 6  ;;  %v1030_v6 = vadd.f32 %v1029_v48, %v1028_v4  ;;  %v1120_v63 = vrot.slane %v1119_v3, 2  ;;  %v1091_v15 = vrot.slane %v1090_v56, 2  ;;  %3116 = vrot.lane.b32.xlu0 %v4579_v34, %s4410_s15 }
 0x225   : > { %v974_v43 = vsel %vm5718_vm4, %v970_v41, 0.0  ;;  %v1232_v62 = vrot.slane %v1225_v52, 4  ;;  %vm8213_vm14 = vcmask 375808   ;;  %v1063_v37 = vadd.f32 %v1062_v33, %v1061_v24 }
 0x226   : > { %v1138_v26 = vsel %vm8213_vm14, %v8212_v31, %v5643_v14  ;;  %v976_v11 = vmax.f32 %v939_v61, %v974_v43  ;;  %v1164_v46 = vrot.slane %v974_v43, 7  ;;  %v1031_v44 = vrot.slane %v1030_v6, 1  ;;  %v5914_v24 = vpop.permute.xlu0 %2124 }
 0x227   : > { %v1121_v4 = vadd.f32 %v1120_v63, %v1119_v3  ;;  %v1092_v29 = vadd.f32 %v1091_v15, %v1090_v56  ;;  %v1233_v48 = vadd.f32 %v1232_v62, %v1225_v52  ;;  %v1142_v41 = vmul.f32 %v1138_v26, %v8126_v57  ;;  %v5917_v52 = vpop.permute.xlu1 %2122  ;;  %3079 = vrot.lane.b32.xlu1 %v4579_v34, %s4409_s28 }
 0x228   : > { %vm8214_vm7 = vcmask 1040384   ;;  %v1067_v14 = vsel %vm5760_vm1, %v1063_v37, 0.0  ;;  %v1007_v61 = vmax.f32 %v976_v11, %v1005_v50  ;;  %v1032_v43 = vadd.f32 %v1031_v44, %v1030_v6  ;;  %v8217_v37 = vld [vmem:[#allocation49_spill] sm:$0xff]  ;;  %3120 = vrot.lane.b32.xlu0 %v8019_v19, %s4410_s15 }
 0x229   : > { %v1198_v39 = vsel %vm8214_vm7, %v5860_v45, %v1164_v46  ;;  %v1182_v33 = vrot.slane %v1067_v14, 4  ;;  %vm8215_vm0 = vcmask 1041408   ;;  %v1122_v3 = vrot.slane %v1121_v4, 1 }
 0x22a   : > { %v1200_v31 = vsel %vm8215_vm0, %v1198_v39, %v1170_v30  ;;  %v1093_v56 = vrot.slane %v1092_v29, 1  ;;  %v1036_v63 = vsel %vm5706_vm8, %v1032_v43, 0.0  ;;  %v1234_v15 = vrot.slane %v1233_v48, 2  ;;  %v5930_v43 = vpop.permute.xlu0 %2230 }
 0x22b   : > { %v1149_v62 = vrot.slane %v1142_v41, 4  ;;  %vm8216_vm14 = vcmask 293888   ;;  %v1038_v50 = vmax.f32 %v1007_v61, %v1036_v63  ;;  %v1176_v6 = vrot.slane %v1036_v63, 5  ;;  %3083 = vrot.lane.b32.xlu1 %v8019_v19, %s4409_s28 }
 0x22c   : > { %v1289_v45 = vsel %vm8216_vm14, %v5141_v22, %v5680_v32  ;;  %v1123_v26 = vadd.f32 %v1122_v3, %v1121_v4  ;;  %v1094_v11 = vadd.f32 %v1093_v56, %v1092_v29  ;;  %v1235_v39 = vadd.f32 %v1234_v15, %v1233_v48  ;;  %v5936_v29 = vpop.permute.xlu1 %2126  ;;  %3201 = vrot.lane.b32.xlu0 %v4717_v1, %s4411_s16 }
 0x22d   : > { %v1150_v30 = vadd.f32 %v1149_v62, %v1142_v41  ;;  %v1293_v46 = vmul.f32 %v1289_v45, %v8126_v57  ;;  %vm8218_vm7 = vcmask 359424   ;;  %vm8219_vm0 = vcmask 1042432  }
 0x22e   : > { %v1252_v44 = vsel %vm8218_vm7, %v8217_v37, %v5682_v58  ;;  %v1202_v32 = vsel %vm8219_vm0, %v1200_v31, %v1176_v6  ;;  %v1127_v22 = vsel %vm5790_vm12, %v1123_v26, 0.0  ;;  %v1069_v61 = vmax.f32 %v1038_v50, %v1067_v14  ;;  %v5946_v50 = vpop.permute.xlu0 %2234 }
 0x22f   : > { %v1256_v4 = vmul.f32 %v1252_v44, %v8126_v57  ;;  %v1188_v48 = vrot.slane %v1127_v22, 2  ;;  %vm8220_vm14 = vcmask 1043456   ;;  %v1236_v3 = vrot.slane %v1235_v39, 1  ;;  %3118 = vrot.lane.b32.xlu1 %v4717_v1, %s4410_s15 }
 0x230   : > { %v1204_v41 = vsel %vm8220_vm14, %v1202_v32, %v1182_v33  ;;  %v1151_v56 = vrot.slane %v1150_v30, 2  ;;  %v1098_v58 = vmax.f32 %v1069_v61, %v1094_v11  ;;  %vm8221_vm7 = vcmask 1044480   ;;  %3230 = vrot.lane.b32.xlu0 %v4579_v34, %s4412_s1 }
 0x231   : > { %v1206_v63 = vsel %vm8221_vm7, %v1204_v41, %v1094_v11  ;;  %v1300_v31 = vrot.slane %v1293_v46, 4  ;;  %v1263_v15 = vrot.slane %v1256_v4, 4  ;;  %vm8222_vm0 = vcmask 1045504   ;;  %v5949_v11 = vpop.permute.xlu1 %2232  ;;  %v8226_v41 = vld [vmem:[#allocation51_spill] sm:$0xff] }
 0x232   : > { %v1208_v14 = vsel %vm8222_vm0, %v1206_v63, %v1188_v48  ;;  %v1237_v62 = vadd.f32 %v1236_v3, %v1235_v39  ;;  %v1152_v45 = vadd.f32 %v1151_v56, %v1150_v30  ;;  %vm8223_vm2 = vcmask 277504  }
 0x233   : > { %v1351_v33 = vsel %vm8223_vm2, %v5177_v16, %v5714_v9  ;;  %v1129_v6 = vmax.f32 %v1098_v58, %v1127_v22  ;;  %v1301_v26 = vadd.f32 %v1300_v31, %v1293_v46  ;;  %v1264_v37 = vadd.f32 %v1263_v15, %v1256_v4  ;;  %3199 = vrot.lane.b32.xlu1 %v4579_v34, %s4411_s16 }
 0x234   : > { %v1355_v44 = vmul.f32 %v1351_v33, %v8126_v57  ;;  %v5953_v32 = vsel %vm5830_vm6, %v1237_v62, 0.0  ;;  %v1153_v61 = vrot.slane %v1152_v45, 1  ;;  %vm8224_vm14 = vcmask 285696   ;;  %3234 = vrot.lane.b32.xlu0 %v8019_v19, %s4412_s1 }
 0x235   : > { %v1320_v39 = vsel %vm8224_vm14, %v5139_v8, %v5716_v0  ;;  %vm8225_vm2 = vcmask 261120   ;;  %v1302_v9 = vrot.slane %v1301_v26, 2  ;;  %v1265_v30 = vrot.slane %v1264_v37, 2  ;;  %v5971_v0 = vpop.permute.xlu0 %2289  ;;  %v5973_v63 = vpop.permute.xlu1 %2287 }
 0x236   : > { %v1412_v16 = vsel %vm8225_vm2, %v5191_v20, %v5745_v54  ;;  %v1362_v46 = vrot.slane %v1355_v44, 4  ;;  %v1324_v22 = vmul.f32 %v1320_v39, %v8126_v57  ;;  %v1154_v4 = vadd.f32 %v1153_v61, %v1152_v45 }
 0x237   : > { %v1416_v48 = vmul.f32 %v1412_v16, %v8126_v57  ;;  %vm8227_vm7 = vcmask 269312   ;;  %vm8228_vm0 = vcmask 244736   ;;  %v1303_v54 = vadd.f32 %v1302_v9, %v1301_v26  ;;  %3203 = vrot.lane.b32.xlu1 %v8019_v19, %s4411_s16 }
 0x238   : > { %v1382_v8 = vsel %vm8227_vm7, %v8226_v41, %v5752_v40  ;;  %v1524_v20 = vsel %vm8228_vm0, %v5213_v13, %v5770_v2  ;;  %v1266_v3 = vadd.f32 %v1265_v30, %v1264_v37  ;;  %v1363_v56 = vadd.f32 %v1362_v46, %v1355_v44  ;;  %3263 = vrot.lane.b32.xlu0 %v4717_v1, %s4413_s2 }
 0x239   : > { %v1331_v58 = vrot.slane %v1324_v22, 4  ;;  %v1158_v31 = vsel %vm5765_vm11, %v1154_v4, 0.0  ;;  %v1423_v15 = vrot.slane %v1416_v48, 4  ;;  %v1386_v62 = vmul.f32 %v1382_v8, %v8126_v57  ;;  %v5981_v39 = vpop.permute.xlu0 %2344  ;;  %v5987_v4 = vpop.permute.xlu1 %2291 }
 0x23a   : > { %v1528_v40 = vmul.f32 %v1524_v20, %v8126_v57  ;;  %v1160_v45 = vmax.f32 %v1129_v6, %v1158_v31  ;;  %v1194_v13 = vrot.slane %v1158_v31, 1  ;;  %v1304_v2 = vrot.slane %v1303_v54, 1 }
 0x23b   : > { %v1267_v33 = vrot.slane %v1266_v3, 1  ;;  %v1364_v26 = vrot.slane %v1363_v56, 2  ;;  %v1332_v37 = vadd.f32 %v1331_v58, %v1324_v22  ;;  %v1424_v44 = vadd.f32 %v1423_v15, %v1416_v48  ;;  %3232 = vrot.lane.b32.xlu1 %v4717_v1, %s4412_s1 }
 0x23c   : > { %v1393_v61 = vrot.slane %v1386_v62, 4  ;;  %vm8229_vm14 = vcmask 1046528   ;;  %v1305_v9 = vadd.f32 %v1304_v2, %v1303_v54  ;;  %v1243_v30 = vmax.f32 %v1160_v45, %v5953_v32  ;;  %v8231_v54 = vld [vmem:[#allocation52_spill] sm:$0xff]  ;;  %3294 = vrot.lane.b32.xlu0 %v4717_v1, %s4414_s17 }
 0x23d   : > { %v5984_v16 = vsel %vm8229_vm14, %v1208_v14, %v1194_v13  ;;  %v1268_v46 = vadd.f32 %v1267_v33, %v1266_v3  ;;  %v1365_v6 = vadd.f32 %v1364_v26, %v1363_v56  ;;  %v1333_v41 = vrot.slane %v1332_v37, 2  ;;  %v6000_v26 = vpop.permute.xlu1 %2346 }
 0x23e   : > { %8230 = vst [vmem:[#allocation41_spill] sm:$0xff] %v5984_v16  ;;  %v1425_v8 = vrot.slane %v1424_v44, 2  ;;  %v1394_v20 = vadd.f32 %v1393_v61, %v1386_v62  ;;  %v1309_v22 = vsel %vm5718_vm4, %v1305_v9, 0.0  ;;  %v1535_v48 = vrot.slane %v1528_v40, 4  ;;  %v5998_v62 = vpop.permute.xlu0 %2348 }
 0x23f   : > { %v1272_v14 = vsel %vm5804_vm10, %v1268_v46, 0.0  ;;  %vm8232_vm2 = vcmask 252928   ;;  %v1473_v56 = vrot.slane %v1309_v22, 6  ;;  %v1366_v15 = vrot.slane %v1365_v6, 1  ;;  %3261 = vrot.lane.b32.xlu1 %v4579_v34, %s4413_s2 }
 0x240   : > { %v1441_v3 = vsel %vm8232_vm2, %v8231_v54, %v5776_v51  ;;  %v1274_v58 = vmax.f32 %v1243_v30, %v1272_v14  ;;  %v1467_v31 = vrot.slane %v1272_v14, 7  ;;  %v1334_v45 = vadd.f32 %v1333_v41, %v1332_v37  ;;  %3292 = vrot.lane.b32.xlu0 %v4579_v34, %s4414_s17 }
 0x241   : > { %v1426_v13 = vadd.f32 %v1425_v8, %v1424_v44  ;;  %v1395_v2 = vrot.slane %v1394_v20, 2  ;;  %v1536_v33 = vadd.f32 %v1535_v48, %v1528_v40  ;;  %vm8233_vm7 = vcmask 1040384  }
 0x242   : > { %v1501_v61 = vsel %vm8233_vm7, %v5953_v32, %v1467_v31  ;;  %v1367_v9 = vadd.f32 %v1366_v15, %v1365_v6  ;;  %v1311_v46 = vmax.f32 %v1274_v58, %v1309_v22  ;;  %v1445_v51 = vmul.f32 %v1441_v3, %v8126_v57  ;;  %v8235_v32 = vld [vmem:[#allocation55_spill] sm:$0xff]  ;;  %v6013_v8 = vpop.permute.xlu0 %2403  ;;  %v6015_v58 = vpop.permute.xlu1 %2401 }
 0x243   : > { %vm8234_vm0 = vcmask 1041408   ;;  %v1335_v14 = vrot.slane %v1334_v45, 1  ;;  %v1427_v54 = vrot.slane %v1426_v13, 1  ;;  %v1396_v37 = vadd.f32 %v1395_v2, %v1394_v20  ;;  %v8237_v2 = vld [vmem:[#allocation34_spill] sm:$0xff]  ;;  %3265 = vrot.lane.b32.xlu1 %v8019_v19, %s4413_s2 }
 0x244   : > { %v1503_v30 = vsel %vm8234_vm0, %v1501_v61, %v1473_v56  ;;  %v1371_v40 = vsel %vm5706_vm8, %v1367_v9, 0.0  ;;  %v1537_v44 = vrot.slane %v1536_v33, 2  ;;  %v1452_v41 = vrot.slane %v1445_v51, 4  ;;  %v8238_v61 = vld [vmem:[#allocation53_spill] sm:$0xff]  ;;  %3323 = vrot.lane.b32.xlu0 %v4717_v1, %s4415_s22 }
 0x245   : > { %vm8236_vm14 = vcmask 228352   ;;  %v1485_v22 = vrot.slane %v1371_v40, 4  ;;  %v1336_v48 = vadd.f32 %v1335_v14, %v1334_v45  ;;  %v1428_v3 = vadd.f32 %v1427_v54, %v1426_v13  ;;  %v8240_v13 = vld [vmem:[#allocation57_spill] sm:$0xff] }
 0x246   : > { %v1586_v6 = vsel %vm8236_vm14, %v8235_v32, %v5794_v36  ;;  %v1397_v56 = vrot.slane %v1396_v37, 1  ;;  %v1538_v20 = vadd.f32 %v1537_v44, %v1536_v33  ;;  %v1453_v31 = vadd.f32 %v1452_v41, %v1445_v51  ;;  %v6029_v41 = vpop.permute.xlu0 %2464 }
 0x247   : > { %v1590_v15 = vmul.f32 %v1586_v6, %v8126_v57  ;;  %vm8239_vm2 = vcmask 236544   ;;  %v1340_v36 = vsel %vm5735_vm15, %v1336_v48, 0.0  ;;  %vm8241_vm7 = vcmask 154624   ;;  %8242 = vst [vmem:[#allocation45_spill] sm:$0xff] %v6029_v41  ;;  %3296 = vrot.lane.b32.xlu1 %v8019_v19, %s4414_s17 }
 0x248   : > { %v1555_v9 = vsel %vm8239_vm2, %v8238_v61, %v8237_v2  ;;  %v1398_v32 = vadd.f32 %v1397_v56, %v1396_v37  ;;  %v1654_v14 = vsel %vm8241_vm7, %v8240_v13, %v5811_v7  ;;  %v1342_v33 = vmax.f32 %v1311_v46, %v1340_v36  ;;  %v6034_v56 = vpop.permute.xlu1 %2405  ;;  %3352 = vrot.lane.b32.xlu0 %v4579_v34, %s4416_s23 }
 0x249   : > { %v1559_v45 = vmul.f32 %v1555_v9, %v8126_v57  ;;  %v1479_v51 = vrot.slane %v1340_v36, 5  ;;  %v1539_v54 = vrot.slane %v1538_v20, 1  ;;  %v1454_v44 = vrot.slane %v1453_v31, 2  ;;  %8243 = vst [vmem:[#allocation42_spill] sm:$0xff] %v6034_v56 }
 0x24a   : > { %v1402_v6 = vsel %vm5760_vm1, %v1398_v32, 0.0  ;;  %v1597_v2 = vrot.slane %v1590_v15, 4  ;;  %v1658_v37 = vmul.f32 %v1654_v14, %v8126_v57  ;;  %vm8244_vm0 = vcmask 1042432  }
 0x24b   : > { %v1566_v48 = vrot.slane %v1559_v45, 4  ;;  %v1505_v61 = vsel %vm8244_vm0, %v1503_v30, %v1479_v51  ;;  %v1373_v7 = vmax.f32 %v1342_v33, %v1371_v40  ;;  %v1491_v9 = vrot.slane %v1402_v6, 3  ;;  %v6045_v40 = vpop.permute.xlu0 %2468  ;;  %3321 = vrot.lane.b32.xlu1 %v4579_v34, %s4415_s22 }
 0x24c   : > { %v1540_v13 = vadd.f32 %v1539_v54, %v1538_v20  ;;  %vm8245_vm14 = vcmask 1043456   ;;  %v1455_v36 = vadd.f32 %v1454_v44, %v1453_v31  ;;  %v1598_v16 = vadd.f32 %v1597_v2, %v1590_v15  ;;  %v6048_v31 = vpop.permute.xlu1 %2466  ;;  %v8248_v54 = vld [vmem:[#allocation54_spill] sm:$0xff]  ;;  %3356 = vrot.lane.b32.xlu0 %v8019_v19, %s4416_s23 }
 0x24d   : > { %v1507_v46 = vsel %vm8245_vm14, %v1505_v61, %v1485_v22  ;;  %v1567_v41 = vadd.f32 %v1566_v48, %v1559_v45  ;;  %v1404_v32 = vmax.f32 %v1373_v7, %v1402_v6  ;;  %vm8246_vm2 = vcmask 1044480   ;;  %v8250_v6 = vld [vmem:[#allocation60_spill] sm:$0xff] }
 0x24e   : > { %v1509_v14 = vsel %vm8246_vm2, %v1507_v46, %v1491_v9  ;;  %v6043_v56 = vsel %vm5765_vm11, %v1540_v13, 0.0  ;;  %v1665_v30 = vrot.slane %v1658_v37, 4  ;;  %vm8247_vm7 = vcmask 1045504   ;;  %v8252_v13 = vld [vmem:[#allocation56_spill] sm:$0xff]  ;;  %v8254_v46 = vld [vmem:[#allocation62_spill] sm:$0xff] }
 0x24f   : > { %v1511_v20 = vsel %vm8247_vm7, %v1509_v14, %v1428_v3  ;;  %v1456_v33 = vrot.slane %v1455_v36, 1  ;;  %v1599_v51 = vrot.slane %v1598_v16, 2  ;;  %v1568_v22 = vrot.slane %v1567_v41, 2  ;;  %3325 = vrot.lane.b32.xlu1 %v8019_v19, %s4415_s22 }
 0x250   : > { %v1432_v15 = vmax.f32 %v1404_v32, %v1428_v3  ;;  %v1666_v45 = vadd.f32 %v1665_v30, %v1658_v37  ;;  %vm8249_vm0 = vcmask 162816   ;;  %vm8251_vm14 = vcmask 138240   ;;  %v6066_v32 = vpop.permute.xlu0 %2497  ;;  %v6070_v30 = vpop.permute.xlu1 %2495  ;;  %3385 = vrot.lane.b32.xlu0 %v4717_v1, %s4418_s26 }
 0x251   : > { %v1623_v44 = vsel %vm8249_vm0, %v8248_v54, %v5814_v38  ;;  %v1716_v2 = vsel %vm8251_vm14, %v8250_v6, %v5827_v25  ;;  %v1457_v48 = vadd.f32 %v1456_v33, %v1455_v36  ;;  %v1600_v61 = vadd.f32 %v1599_v51, %v1598_v16  ;;  %8256 = vst [vmem:[#allocation48_spill] sm:$0xff] %v6070_v30 }
 0x252   : > { %v1569_v7 = vadd.f32 %v1568_v22, %v1567_v41  ;;  %v1627_v9 = vmul.f32 %v1623_v44, %v8126_v57  ;;  %v1667_v3 = vrot.slane %v1666_v45, 2  ;;  %v1720_v37 = vmul.f32 %v1716_v2, %v8126_v57 }
 0x253   : > { %vm8253_vm2 = vcmask 146432   ;;  %vm8255_vm7 = vcmask 121856   ;;  %v1461_v16 = vsel %vm5790_vm12, %v1457_v48, 0.0  ;;  %v1601_v41 = vrot.slane %v1600_v61, 1  ;;  %3354 = vrot.lane.b32.xlu1 %v4717_v1, %s4416_s23 }
 0x254   : > { %v1685_v38 = vsel %vm8253_vm2, %v8252_v13, %v5835_v27  ;;  %v1828_v25 = vsel %vm8255_vm7, %v8254_v46, %v5849_v55  ;;  %v1570_v36 = vrot.slane %v1569_v7, 1  ;;  %v1634_v14 = vrot.slane %v1627_v9, 4  ;;  %v6081_v46 = vpop.permute.xlu0 %2526  ;;  %3414 = vrot.lane.b32.xlu0 %v4579_v34, %s4419_s27 }
 0x255   : > { %v1463_v33 = vmax.f32 %v1432_v15, %v1461_v16  ;;  %v1497_v51 = vrot.slane %v1461_v16, 1  ;;  %v1668_v22 = vadd.f32 %v1667_v3, %v1666_v45  ;;  %v1727_v54 = vrot.slane %v1720_v37, 4  ;;  %8259 = vst [vmem:[#allocation47_spill] sm:$0xff] %v6081_v46  ;;  %v6087_v3 = vpop.permute.xlu1 %2499 }
 0x256   : > { %v1602_v27 = vadd.f32 %v1601_v41, %v1600_v61  ;;  %v1571_v44 = vadd.f32 %v1570_v36, %v1569_v7  ;;  %v1635_v6 = vadd.f32 %v1634_v14, %v1627_v9  ;;  %v1689_v55 = vmul.f32 %v1685_v38, %v8126_v57  ;;  %8260 = vst [vmem:[#allocation49_spill] sm:$0xff] %v6087_v3  ;;  %v8261_v38 = vld [vmem:[#allocation22_spill] sm:$0xff] }
 0x257   : > { %vm8257_vm0 = vcmask 1046528   ;;  %v6079_v48 = vmax.f32 %v1463_v33, %v6043_v56  ;;  %v1669_v13 = vrot.slane %v1668_v22, 1  ;;  %v1728_v15 = vadd.f32 %v1727_v54, %v1720_v37  ;;  %v8262_v54 = vld [vmem:[#allocation20_spill] sm:$0xff]  ;;  %3383 = vrot.lane.b32.xlu1 %v4579_v34, %s4418_s26 }
 0x258   : > { %v6076_v2 = vsel %vm8257_vm0, %v1511_v20, %v1497_v51  ;;  %v1606_v45 = vsel %vm5804_vm10, %v1602_v27, 0.0  ;;  %v1575_v61 = vsel %vm5830_vm6, %v1571_v44, 0.0  ;;  %v1636_v7 = vrot.slane %v1635_v6, 2  ;;  %3418 = vrot.lane.b32.xlu0 %v8019_v19, %s4419_s27 }
 0x259   : > { %8258 = vst [vmem:[#allocation44_spill] sm:$0xff] %v6076_v2  ;;  %v1696_v9 = vrot.slane %v1689_v55, 4  ;;  %v1777_v16 = vrot.slane %v1606_v45, 6  ;;  %v1771_v41 = vrot.slane %v1575_v61, 7  ;;  %v1670_v36 = vadd.f32 %v1669_v13, %v1668_v22  ;;  %v8265_v13 = vld [vmem:[#allocation59_spill] sm:$0xff] }
 0x25a   : > { %v1637_v37 = vadd.f32 %v1636_v7, %v1635_v6  ;;  %v1729_v14 = vrot.slane %v1728_v15, 2  ;;  %v1832_v51 = vmul.f32 %v1828_v25, %v8126_v57  ;;  %v8263_v27 = vrot.slane %v8262_v54, 2  ;;  %v6104_v7 = vpop.permute.xlu0 %2530 }
 0x25b   : > { %v1697_v33 = vadd.f32 %v1696_v9, %v1689_v55  ;;  %v1577_v20 = vmax.f32 %v6079_v48, %v1575_v61  ;;  %vm8264_vm14 = vcmask 1040384   ;;  %vm8266_vm2 = vcmask 130048   ;;  %8267 = vst [vmem:[#allocation51_spill] sm:$0xff] %v6104_v7  ;;  %3387 = vrot.lane.b32.xlu1 %v8019_v19, %s4418_s26 }
 0x25c   : > { %v6096_v44 = vadd.f32 %v8263_v27, %v8262_v54  ;;  %v1805_v22 = vsel %vm8264_vm14, %v6043_v56, %v1771_v41  ;;  %v1747_v6 = vsel %vm8266_vm2, %v8265_v13, %v5855_v21  ;;  %v6108_v25 = vsel %vm5735_vm15, %v1670_v36, 0.0  ;;  %v6111_v27 = vpop.permute.xlu1 %2528  ;;  %v8270_v41 = vld [vmem:[#allocation64_spill] sm:$0xff]  ;;  %3505 = vrot.lane.b32.xlu0 %v4717_v1, %s7906_s12 }
 0x25d   : > { %vm8268_vm7 = vcmask 1041408   ;;  %v1638_v9 = vrot.slane %v1637_v37, 1  ;;  %v1730_v54 = vadd.f32 %v1729_v14, %v1728_v15  ;;  %8269 = vst [vmem:[#allocation52_spill] sm:$0xff] %v6111_v27  ;;  %v1698_v48 = vrot.slane %v1697_v33, 2 }
 0x25e   : > { %v1807_v55 = vsel %vm8268_vm7, %v1805_v22, %v1777_v16  ;;  %v1839_v61 = vrot.slane %v1832_v51, 4  ;;  %v1751_v56 = vmul.f32 %v1747_v6, %v8126_v57  ;;  %vm8271_vm0 = vcmask 105472   ;;  %v8272_v16 = vld [vmem:[#allocation61_spill] sm:$0xff]  ;;  %v6124_v7 = vpop.permute.xlu0 %2593 }
 0x25f   : > { %v1890_v21 = vsel %vm8271_vm0, %v8270_v41, %v5872_v47  ;;  %v1639_v13 = vadd.f32 %v1638_v9, %v1637_v37  ;;  %v1731_v36 = vrot.slane %v1730_v54, 1  ;;  %vm8273_vm14 = vcmask 113664   ;;  %8274 = vst [vmem:[#allocation55_spill] sm:$0xff] %v6124_v7  ;;  %3416 = vrot.lane.b32.xlu1 %v4717_v1, %s4419_s27 }
 0x260   : > { %v1894_v2 = vmul.f32 %v1890_v21, %v8126_v57  ;;  %v1859_v15 = vsel %vm8273_vm14, %v8272_v16, %v5875_v18  ;;  %v1699_v14 = vadd.f32 %v1698_v48, %v1697_v33  ;;  %v1840_v22 = vadd.f32 %v1839_v61, %v1832_v51  ;;  %v6131_v21 = vpop.permute.xlu1 %2591  ;;  %v8276_v18 = vld [vmem:[#allocation33_spill] sm:$0xff]  ;;  %3533 = vrot.lane.b32.xlu0 %v4579_v34, %s7909_s3 }
 0x261   : > { %v1758_v6 = vrot.slane %v1751_v56, 4  ;;  %v1863_v17 = vmul.f32 %v1859_v15, %v8126_v57  ;;  %v1789_v47 = vrot.slane %v6108_v25, 4  ;;  %v6129_v37 = vsel %vm5718_vm4, %v1639_v13, 0.0  ;;  %8275 = vst [vmem:[#allocation34_spill] sm:$0xff] %v6131_v21 }
 0x262   : > { %v1732_v9 = vadd.f32 %v1731_v36, %v1730_v54  ;;  %v1901_v41 = vrot.slane %v1894_v2, 4  ;;  %v1968_v16 = vrot.slane %v8276_v18, 1  ;;  %v1783_v33 = vrot.slane %v6129_v37, 5  ;;  %v6145_v46 = vpop.permute.xlu0 %2624 }
 0x263   : > { %v1700_v51 = vrot.slane %v1699_v14, 1  ;;  %v1841_v48 = vrot.slane %v1840_v22, 2  ;;  %v1759_v15 = vadd.f32 %v1758_v6, %v1751_v56  ;;  %v1870_v13 = vrot.slane %v1863_v17, 4  ;;  %3503 = vrot.lane.b32.xlu1 %v4579_v34, %s7906_s12 }
 0x264   : > { %v6138_v61 = vsel %vm5760_vm1, %v1732_v9, 0.0  ;;  %v1902_v7 = vadd.f32 %v1901_v41, %v1894_v2  ;;  %v2082_v54 = vrot.slane %v6096_v44, 1  ;;  %v6142_v36 = vmax.f32 %v1577_v20, %v1606_v45  ;;  %v6148_v30 = vpop.permute.xlu1 %2595  ;;  %v8279_v20 = vld [vmem:[#allocation66_spill] sm:$0xff]  ;;  %3537 = vrot.lane.b32.xlu0 %v8019_v19, %s7909_s3 }
 0x265   : > { %vm8277_vm2 = vcmask 1042432   ;;  %v1701_v5 = vadd.f32 %v1700_v51, %v1699_v14  ;;  %vm8278_vm7 = vcmask 1043456   ;;  %v1842_v3 = vadd.f32 %v1841_v48, %v1840_v22 }
 0x266   : > { %v1809_v21 = vsel %vm8277_vm2, %v1807_v55, %v1783_v33  ;;  %v1760_v49 = vrot.slane %v1759_v15, 2  ;;  %v1903_v9 = vrot.slane %v1902_v7, 2  ;;  %v1801_v2 = vrot.slane %v6138_v61, 2 }
 0x267   : > { %v1811_v27 = vsel %vm8278_vm7, %v1809_v21, %v1789_v47  ;;  %v6153_v56 = vsel %vm5706_vm8, %v1701_v5, 0.0  ;;  %v1871_v45 = vadd.f32 %v1870_v13, %v1863_v17  ;;  %vm8280_vm0 = vcmask 31744   ;;  %v6170_v21 = vpop.permute.xlu0 %2622  ;;  %3507 = vrot.lane.b32.xlu1 %v8019_v19, %s7906_s12  ;;  %s8351_s12 = smov 64  }
 0x268   : > { %v1959_v55 = vsel %vm8280_vm0, %v8279_v20, %v5886_v23  ;;  %v8281_v14 = vrot.slane %v8261_v38, 1  ;;  %v6165_v6 = vadd.f32 %v1968_v16, %v8276_v18  ;;  %v1795_v47 = vrot.slane %v6153_v56, 3  ;;  %v6176_v18 = vpop.permute.xlu1 %2626  ;;  %3565 = vrot.lane.b32.xlu0 %v4717_v1, %s7908_s14 }
 0x269   : > { %v1761_v5 = vadd.f32 %v1760_v49, %v1759_v15  ;;  %v1904_v17 = vadd.f32 %v1903_v9, %v1902_v7  ;;  %v1872_v41 = vrot.slane %v1871_v45, 2  ;;  %v1963_v23 = vmul.f32 %v1959_v55, %v8126_v57  ;;  %8283 = vst [vmem:[#allocation53_spill] sm:$0xff] %v6176_v18 }
 0x26a   : > { %v6162_v22 = vadd.f32 %v8281_v14, %v8261_v38  ;;  %v6173_v33 = vadd.f32 %v2082_v54, %v6096_v44  ;;  %vm8282_vm14 = vcmask 1044480   ;;  %v1843_v51 = vrot.slane %v1842_v3, 1 }
 0x26b   : > { %v1813_v38 = vsel %vm8282_vm14, %v1811_v27, %v1795_v47  ;;  %v1762_v48 = vrot.slane %v1761_v5, 1  ;;  %vm8284_vm2 = vcmask 1045504   ;;  %v1905_v7 = vrot.slane %v1904_v17, 1  ;;  %v8285_v27 = vld [vmem:[#allocation63_spill] sm:$0xff]  ;;  %3535 = vrot.lane.b32.xlu1 %v4717_v1, %s7909_s3  ;;  %s8340_s3 = smov 65  }
 0x26c   : > { %v1815_v16 = vsel %vm8284_vm2, %v1813_v38, %v1801_v2  ;;  %v1873_v15 = vadd.f32 %v1872_v41, %v1871_v45  ;;  %v4417_v44 = vmov 1966171168   ;;  %v1970_v9 = vrot.slane %v1963_v23, 4  ;;  %v8287_v45 = vld [vmem:[#allocation67_spill] sm:$0xff]  ;;  %v6192_v41 = vpop.permute.xlu0 %2653  ;;  %3593 = vrot.lane.b32.xlu0 %v4579_v34, %s8340_s3 }
 0x26d   : > { %v6182_v13 = vadd.f32 %v1762_v48, %v1761_v5  ;;  %v1980_v54 = vunpack.c.l.s4 %v4417_v44  ;;  %vm8286_vm7 = vcmask 97280   ;;  %v1906_v55 = vadd.f32 %v1905_v7, %v1904_v17  ;;  %v6199_v44 = vpop.permute.xlu1 %2651 }
 0x26e   : > { %v1921_v20 = vsel %vm8286_vm7, %v8285_v27, %v5888_v35  ;;  %v1874_v14 = vrot.slane %v1873_v15, 1  ;;  %vm8288_vm0 = vcmask 15360   ;;  %v1844_v5 = vadd.f32 %v1843_v51, %v1842_v3 }
 0x26f   : > { %v1925_v2 = vmul.f32 %v1921_v20, %v8126_v57  ;;  %v2073_v47 = vsel %vm8288_vm0, %v8287_v45, %v5898_v53  ;;  %vm8289_vm14 = vcmask 1046528   ;;  %v1971_v48 = vadd.f32 %v1970_v9, %v1963_v23  ;;  %v8291_v53 = vld [vmem:[#allocation65_spill] sm:$0xff]  ;;  %3563 = vrot.lane.b32.xlu1 %v4579_v34, %s7908_s14 }
 0x270   : > { %v6196_v38 = vsel %vm8289_vm14, %v1815_v16, %v6182_v13  ;;  %v2077_v35 = vmul.f32 %v2073_v47, %v8126_v57  ;;  %v6203_v17 = vsel %vm5830_vm6, %v1906_v55, 0.0  ;;  %v1875_v7 = vadd.f32 %v1874_v14, %v1873_v15  ;;  %v6216_v14 = vpop.permute.xlu0 %2682  ;;  %3597 = vrot.lane.b32.xlu0 %v8019_v19, %s8340_s3 }
 0x271   : > { %8290 = vst [vmem:[#allocation57_spill] sm:$0xff] %v6196_v38  ;;  %v1932_v27 = vrot.slane %v1925_v2, 4  ;;  %vm8292_vm2 = vcmask 23552   ;;  %v2188_v3 = vrot.slane %v6203_v17, 6  ;;  %v1981_v51 = vunpack.c.0.s8 %v1980_v54  ;;  %8293 = vst [vmem:[#allocation54_spill] sm:$0xff] %v6216_v14 }
 0x272   : > { %v2016_v20 = vsel %vm8292_vm2, %v8291_v53, %v5905_v10  ;;  %v1972_v23 = vrot.slane %v1971_v48, 2  ;;  %v2084_v16 = vrot.slane %v2077_v35, 4  ;;  %v6213_v9 = vsel %vm5765_vm11, %v1875_v7, 0.0  ;;  %v6223_v53 = vpop.permute.xlu1 %2655 }
 0x273   : > { %v1933_v55 = vadd.f32 %v1932_v27, %v1925_v2  ;;  %v2020_v15 = vmul.f32 %v2016_v20, %v8126_v57  ;;  %vm2128_vm7 = vcmask 7168   ;;  %v6220_v10 = vsel %vm5790_vm12, %v1844_v5, 0.0  ;;  %8294 = vst [vmem:[#allocation60_spill] sm:$0xff] %v6223_v53  ;;  %v8296_v27 = vld [vmem:[#allocation12_spill] sm:$0xff]  ;;  %3567 = vrot.lane.b32.xlu1 %v8019_v19, %s7908_s14  ;;  %s8374_s14 = smov 62  }
 0x274   : > { %v2182_v54 = vrot.slane %v6213_v9, 7  ;;  %v1973_v45 = vadd.f32 %v1972_v23, %v1971_v48  ;;  %v2085_v47 = vadd.f32 %v2084_v16, %v2077_v35  ;;  %v2129_v2 = vsel %vm2128_vm7, %v5917_v52, %v5914_v24  ;;  %3627 = vrot.lane.b32.xlu0 %v8019_v19, %s8351_s12 }
 0x275   : > { %v1934_v49 = vrot.slane %v1933_v55, 2  ;;  %v2027_v38 = vrot.slane %v2020_v15, 4  ;;  %v2130_v7 = vsel %vm2128_vm7, %v5914_v24, %v5936_v29  ;;  %vm8295_vm0 = vcmask 1040384   ;;  %v6238_v24 = vpop.permute.xlu0 %2686 }
 0x276   : > { %v2198_v5 = vsel %vm8295_vm0, %v6220_v10, %v2182_v54  ;;  %v6233_v20 = vsub.s32 %v1981_v51, %v8296_v27  ;;  %v1974_v48 = vrot.slane %v1973_v45, 1  ;;  %v2086_v35 = vrot.slane %v2085_v47, 2  ;;  %v6241_v54 = vpop.permute.xlu1 %2684 }
 0x277   : > { %vm8298_vm14 = vcmask 1041408   ;;  %v1935_v16 = vadd.f32 %v1934_v49, %v1933_v55  ;;  %v2028_v52 = vadd.f32 %v2027_v38, %v2020_v15  ;;  %v2133_v12 = vmul.f32 %v2129_v2, %v8299_v42  ;;  %3595 = vrot.lane.b32.xlu1 %v4717_v1, %s8340_s3 }
 0x278   : > { %8297 = vst [vmem:[#allocation56_spill] sm:$0xff] %v6233_v20  ;;  %v2200_v23 = vsel %vm8298_vm14, %v2198_v5, %v2188_v3  ;;  %v1975_v29 = vadd.f32 %v1974_v48, %v1973_v45  ;;  %v2087_v59 = vadd.f32 %v2086_v35, %v2085_v47  ;;  %v2134_v14 = vmul.f32 %v2130_v7, %v8126_v57 }
 0x279   : > { %vm2236_vm2 = vcmask 1039360   ;;  %v1936_v51 = vrot.slane %v1935_v16, 1  ;;  %v2029_v27 = vrot.slane %v2028_v52, 2  ;;  %v2135_v53 = vrot.slane %v2133_v12, 4  ;;  %v6251_v7 = vpop.permute.xlu0 %2715  ;;  %3651 = vrot.lane.b32.xlu0 %v4579_v34, %s7913_s24 }
 0x27a   : > { %v2237_v18 = vsel %vm2236_vm2, %v5930_v43, %v5949_v11  ;;  %v1978_v49 = vcombine.low %v6165_v6, %v1975_v29  ;;  %v2088_v38 = vrot.slane %v2087_v59, 1  ;;  %v2141_v3 = vrot.slane %v2134_v14, 4  ;;  %8300 = vst [vmem:[#allocation62_spill] sm:$0xff] %v6251_v7  ;;  %v6255_v35 = vpop.permute.xlu1 %2713 }
 0x27b   : > { %v2238_v55 = vsel %vm2236_vm2, %v5949_v11, %v5946_v50  ;;  %v1937_v15 = vadd.f32 %v1936_v51, %v1935_v16  ;;  %v2030_v45 = vadd.f32 %v2029_v27, %v2028_v52  ;;  %v2136_v47 = vadd.f32 %v2135_v53, %v2133_v12  ;;  %8301 = vst [vmem:[#allocation22_spill] sm:$0xff] %v6255_v35 }
 0x27c   : > { %v2241_v2 = vmul.f32 %v2237_v18, %v8299_v42  ;;  %v1985_v43 = vrot.slane %v1978_v49, %v6233_v20  ;;  %v2089_v5 = vadd.f32 %v2088_v38, %v2087_v59  ;;  %v2142_v48 = vadd.f32 %v2141_v3, %v2134_v14  ;;  %v8304_v3 = vld [vmem:[#allocation10_spill] sm:$0xff]  ;;  %3625 = vrot.lane.b32.xlu1 %v4717_v1, %s8351_s12 }
 0x27d   : > { %v2242_v6 = vmul.f32 %v2238_v55, %v8126_v57  ;;  %v6259_v50 = vsel %vm5804_vm10, %v1937_v15, 0.0  ;;  %v2031_v11 = vrot.slane %v2030_v45, 1  ;;  %v2137_v16 = vrot.slane %v2136_v47, 2  ;;  %v6270_v38 = vpop.permute.xlu0 %2744  ;;  %3655 = vrot.lane.b32.xlu0 %v8019_v19, %s7913_s24 }
 0x27e   : > { %v2243_v52 = vrot.slane %v2241_v2, 4  ;;  %v8302_v12 = vmax.f32 %v6142_v36, %v6129_v37  ;;  %v1992_v59 = vrot.slane %v1985_v43, %v6233_v20  ;;  %v2194_v14 = vrot.slane %v6259_v50, 5  ;;  %8303 = vst [vmem:[#allocation20_spill] sm:$0xff] %v6270_v38  ;;  %v6276_v15 = vpop.permute.xlu1 %2717  ;;  %v8308_v43 = vld [vmem:[#allocation14_spill] sm:$0xff] }
 0x27f   : > { %v2092_v53 = vcombine.low %v6173_v33, %v2089_v5  ;;  %v2032_v29 = vadd.f32 %v2031_v11, %v2030_v45  ;;  %v2138_v51 = vadd.f32 %v2137_v16, %v2136_v47  ;;  %v2143_v27 = vrot.slane %v2142_v48, 2  ;;  %8307 = vst [vmem:[#allocation59_spill] sm:$0xff] %v6276_v15  ;;  %v8309_v5 = vld [vmem:[#allocation5_spill] sm:$0xff] }
 0x280   : > { %v1676_v18 = vmax.f32 %v8302_v12, %v6108_v25  ;;  %v2244_v49 = vadd.f32 %v2243_v52, %v2241_v2  ;;  %vm8305_vm7 = vcmp.ge.s32.totalorder %v8304_v3, 4  ;;  %vm8306_vm0 = vcmask 1042432   ;;  %v8310_v12 = vld [vmem:[#allocation8_spill] sm:$0xff]  ;;  %3623 = vrot.lane.b32.xlu1 %v4579_v34, %s8351_s12 }
 0x281   : > { %v1994_v55 = vsel %vm8305_vm7, %v1992_v59, 0.0  ;;  %v2202_v37 = vsel %vm8306_vm0, %v2200_v23, %v2194_v14  ;;  %v2099_v25 = vrot.slane %v2092_v53, %v6233_v20  ;;  %v2249_v36 = vrot.slane %v2242_v6, 4  ;;  %v8311_v59 = vld [vmem:[#allocation16_spill] sm:$0xff]  ;;  %v8312_v14 = vld [vmem:[#allocation6_spill] sm:$0xff] }
 0x282   : > { %v6279_v33 = vrot.slane %v1994_v55, %v8308_v43  ;;  %v6282_v45 = vrot.slane %v1994_v55, %v8309_v5  ;;  %v2035_v47 = vcombine.low %v6162_v22, %v2032_v29  ;;  %v2139_v2 = vrot.slane %v2138_v51, 1  ;;  %v8314_v29 = vld [vmem:[#allocation29_spill] sm:$0xff] }
 0x283   : > { %v2106_v11 = vrot.slane %v2099_v25, %v6233_v20  ;;  %v2144_v23 = vadd.f32 %v2143_v27, %v2142_v48  ;;  %v2245_v16 = vrot.slane %v2244_v49, 2  ;;  %v2250_v52 = vadd.f32 %v2249_v36, %v2242_v6  ;;  %v6302_v27 = vpop.permute.xlu0 %2748 }
 0x284   : > { %v8313_v53 = vmax.f32 %v8311_v59, %v8312_v14  ;;  %v1707_v22 = vmax.f32 %v1676_v18, %v6153_v56  ;;  %vm8315_vm14 = vcmask 1043456   ;;  %8317 = vst [vmem:[#allocation64_spill] sm:$0xff] %v6302_v27  ;;  %vm8318_vm7 = vcmp.ge.s32.totalorder %v8304_v3, 2  ;;  %3653 = vrot.lane.b32.xlu1 %v4717_v1, %s7913_s24  ;;  %s8368_s24 = smov 60  }
 0x285   : > { %v2203_v28 = vsel %vm8315_vm14, %v8314_v29, %v6279_v33  ;;  %vm8316_vm2 = vmmov %vm8315_vm14  ;;  %v2108_v6 = vsel %vm8318_vm7, %v2106_v11, 0.0  ;;  %v2042_v25 = vrot.slane %v2035_v47, %v6233_v20  ;;  %v2140_v36 = vadd.f32 %v2139_v2, %v2138_v51  ;;  %3795 = vrot.lane.b32.xlu0 %v4717_v1, %s8368_s24 }
 0x286   : > { %v6294_v55 = vmax.f32 %v8313_v53, %v8310_v12  ;;  %v2204_v48 = vsel %vm8316_vm2, %v2202_v37, %v6282_v45  ;;  %v2145_v59 = vrot.slane %v2144_v23, 1  ;;  %v6307_v12 = vpop.permute.xlu1 %2746  ;;  %v6310_v56 = vrot.slane %v2108_v6, %v8308_v43 }
 0x287   : > { %8319 = vst [vmem:[#allocation61_spill] sm:$0xff] %v6307_v12  ;;  %v6313_v18 = vrot.slane %v2108_v6, %v8309_v5  ;;  %v2246_v14 = vadd.f32 %v2245_v16, %v2244_v49  ;;  %v2251_v53 = vrot.slane %v2250_v52, 2  ;;  %v2049_v37 = vrot.slane %v2042_v25, %v6233_v20  ;;  %v6324_v16 = vpop.permute.xlu0 %2783 }
 0x288   : > { %v2146_v11 = vadd.f32 %v2145_v59, %v2144_v23  ;;  %vm2293_vm0 = vcmask 1031168   ;;  %vm2350_vm14 = vcmask 1022976   ;;  %8320 = vst [vmem:[#allocation33_spill] sm:$0xff] %v6324_v16  ;;  %vm8321_vm2 = vcmp.ge.s32.totalorder %v8304_v3, 3  ;;  %3793 = vrot.lane.b32.xlu1 %v4579_v34, %s8368_s24 }
 0x289   : > { %v2247_v51 = vrot.slane %v2246_v14, 1  ;;  %v2252_v47 = vadd.f32 %v2251_v53, %v2250_v52  ;;  %v2294_v2 = vsel %vm2293_vm0, %v5973_v63, %v5971_v0  ;;  %v2295_v49 = vsel %vm2293_vm0, %v5971_v0, %v5987_v4  ;;  %3681 = vrot.lane.b32.xlu0 %v4579_v34, %s8374_s14 }
 0x28a   : > { %v2051_v29 = vsel %vm8321_vm2, %v2049_v37, 0.0  ;;  %v2149_v6 = vcombine.low %v2140_v36, %v2146_v11  ;;  %v2298_v23 = vmul.f32 %v2294_v2, %v8299_v42  ;;  %v2299_v25 = vmul.f32 %v2295_v49, %v8126_v57  ;;  %v6330_v59 = vpop.permute.xlu1 %2781  ;;  %v8325_v2 = vld [vmem:[#allocation23_spill] sm:$0xff] }
 0x28b   : > { %8322 = vst [vmem:[#allocation66_spill] sm:$0xff] %v6330_v59  ;;  %v1738_v52 = vmax.f32 %v1707_v22, %v6138_v61  ;;  %v6334_v53 = vrot.slane %v2051_v29, %v8308_v43  ;;  %v6337_v63 = vrot.slane %v2051_v29, %v8309_v5  ;;  %v2253_v0 = vrot.slane %v2252_v47, 1  ;;  %v6352_v59 = vpop.permute.xlu0 %2812 }
 0x28c   : > { %v2156_v4 = vrot.slane %v2149_v6, %v6233_v20  ;;  %v2248_v36 = vadd.f32 %v2247_v51, %v2246_v14  ;;  %v2300_v37 = vrot.slane %v2298_v23, 4  ;;  %v2306_v11 = vrot.slane %v2299_v25, 4  ;;  %8326 = vst [vmem:[#allocation63_spill] sm:$0xff] %v6352_v59  ;;  %3797 = vrot.lane.b32.xlu1 %v8019_v19, %s8368_s24 }
 0x28d   : > { %vm8323_vm7 = vcmask 1044480   ;;  %v2225_v49 = vrot.slane %v8325_v2, 1  ;;  %v2351_v29 = vsel %vm2350_vm14, %v5981_v39, %v6000_v26  ;;  %vm8327_vm2 = vcmask 1045504   ;;  %3685 = vrot.lane.b32.xlu0 %v8019_v19, %s8374_s14 }
 0x28e   : > { %v2205_v61 = vsel %vm8323_vm7, %v2203_v28, %v6334_v53  ;;  %vm8324_vm0 = vmmov %vm8323_vm7  ;;  %v2163_v6 = vrot.slane %v2156_v4, %v6233_v20  ;;  %v2254_v28 = vadd.f32 %v2253_v0, %v2252_v47  ;;  %v6359_v16 = vpop.permute.xlu1 %2785  ;;  %v1767_v38 = vmax.f32 %v1738_v52, %v6182_v13 }
 0x28f   : > { %v2206_v22 = vsel %vm8324_vm0, %v2204_v48, %v6337_v63  ;;  %v2207_v14 = vsel %vm8327_vm2, %v2205_v61, %v6310_v56  ;;  %vm8328_vm10 = vmmov %vm8327_vm2  ;;  %8329 = vst [vmem:[#allocation67_spill] sm:$0xff] %v6359_v16  ;;  %v8330_v48 = vld [vmem:[#allocation7_spill] sm:$0xff]  ;;  %v2301_v12 = vadd.f32 %v2300_v37, %v2298_v23  ;;  %v2307_v39 = vadd.f32 %v2306_v11, %v2299_v25  ;;  %v6380_v52 = vpop.permute.xlu0 %2816 }
 0x290   : > { %v2208_v51 = vsel %vm8328_vm10, %v2206_v22, %v6313_v18  ;;  %v1766_v27 = vmax.f32 %v6294_v55, %v8330_v48  ;;  %vm8331_vm7 = vcmp.ge.s32.totalorder %v8304_v3, 1  ;;  %v2257_v59 = vcombine.low %v2248_v36, %v2254_v28  ;;  %8332 = vst [vmem:[#allocation65_spill] sm:$0xff] %v6380_v52  ;;  %v8364_v16 = vld [vmem:[#allocation47_spill] sm:$0xff]  ;;  %3683 = vrot.lane.b32.xlu1 %v4717_v1, %s8374_s14 }
 0x291   : > { %v2165_v61 = vsel %vm8331_vm7, %v2163_v6, 0.0  ;;  %v2352_v47 = vsel %vm2350_vm14, %v6000_v26, %v5998_v62  ;;  %v2355_v0 = vmul.f32 %v2351_v29, %v8299_v42  ;;  %v2302_v23 = vrot.slane %v2301_v12, 2  ;;  %v8338_v29 = vld [vmem:[#allocation36_spill] sm:$0xff]  ;;  %3713 = vrot.lane.b32.xlu0 %v4717_v1, %s7916_s25 }
 0x292   : > { %v6375_v13 = vrot.slane %v2165_v61, %v8308_v43  ;;  %v6378_v55 = vrot.slane %v2165_v61, %v8309_v5  ;;  %v2308_v25 = vrot.slane %v2307_v39, 2  ;;  %v2264_v4 = vrot.slane %v2257_v59, %v6233_v20  ;;  %v6384_v26 = vpop.permute.xlu1 %2814 }
 0x293   : > { %v2356_v36 = vmul.f32 %v2352_v47, %v8126_v57  ;;  %v2357_v62 = vrot.slane %v2355_v0, 4  ;;  %vm2407_vm10 = vcmask 1014784   ;;  %8333 = vst [vmem:[#allocation12_spill] sm:$0xff] %v6384_v26  ;;  %v6387_v37 = vadd.f32 %v2225_v49, %v8325_v2 }
 0x294   : > { %vm8334_vm14 = vcmask 1046528   ;;  %v8339_v59 = vrot.slane %v8338_v29, 1  ;;  %v2271_v28 = vrot.slane %v2264_v4, %v6233_v20  ;;  %v2303_v2 = vadd.f32 %v2302_v23, %v2301_v12  ;;  %3711 = vrot.lane.b32.xlu1 %v4579_v34, %s7916_s25 }
 0x295   : > { %v6391_v11 = vsel %vm8334_vm14, %v2207_v14, %v6375_v13  ;;  %vm8336_vm0 = vmmov %vm8334_vm14  ;;  %v2309_v49 = vadd.f32 %v2308_v25, %v2307_v39  ;;  %v2358_v48 = vadd.f32 %v2357_v62, %v2355_v0  ;;  %v8341_v14 = vld [vmem:[#allocation27_spill] sm:$0xff]  ;;  %v2363_v47 = vrot.slane %v2356_v36, 4 }
 0x296   : > { %8335 = vst [vmem:[#allocation11_spill] sm:$0xff] %v6391_v11  ;;  %v6395_v22 = vsel %vm8336_vm0, %v2208_v51, %v6378_v55  ;;  %v6400_v6 = vadd.f32 %v8339_v59, %v8338_v29  ;;  %v6408_v61 = vmax.f32 %v1766_v27, %v8341_v14  ;;  %v6411_v51 = vmax.f32 %v1767_v38, %v6220_v10  ;;  %v6416_v59 = vpop.permute.xlu0 %2897  ;;  %v6420_v25 = vpop.permute.xlu1 %2895  ;;  %v8345_v14 = vld [vmem:[#allocation42_spill] sm:$0xff] }
 0x297   : > { %8337 = vst [vmem:[#allocation10_spill] sm:$0xff] %v6395_v22  ;;  %v2408_v29 = vsel %vm2407_vm10, %v6015_v58, %v6013_v8  ;;  %8342 = vst [vmem:[#allocation5_spill] sm:$0xff] %v6416_v59  ;;  %vm8343_vm2 = vcmp.lt.s32.totalorder %v8304_v3, 15  ;;  %v2304_v39 = vrot.slane %v2303_v2, 1  ;;  %v2310_v0 = vrot.slane %v2309_v49, 1 }
 0x298   : > { %v2273_v12 = vsel %vm8343_vm2, %v2271_v28, 0.0  ;;  %v2359_v23 = vrot.slane %v2358_v48, 2  ;;  %8344 = vst [vmem:[#allocation8_spill] sm:$0xff] %v6420_v25  ;;  %v2364_v38 = vadd.f32 %v2363_v47, %v2356_v36  ;;  %v2412_v4 = vmul.f32 %v2408_v29, %v8299_v42  ;;  %v8352_v25 = vld [vmem:[#allocation45_spill] sm:$0xff]  ;;  %3715 = vrot.lane.b32.xlu1 %v8019_v19, %s7916_s25  ;;  %s8569_s25 = sld [smem:[#allocation4_spill]] }
 0x299   : > { %v6423_v27 = vrot.slane %v2273_v12, %v8308_v43  ;;  %v6426_v10 = vrot.slane %v2273_v12, %v8309_v5  ;;  %v2305_v58 = vadd.f32 %v2304_v39, %v2303_v2  ;;  %v2311_v62 = vadd.f32 %v2310_v0, %v2309_v49  ;;  %v8350_v0 = vld [vmem:[#allocation15_spill] sm:$0xff] }
 0x29a   : > { %v2360_v28 = vadd.f32 %v2359_v23, %v2358_v48  ;;  %v2409_v22 = vsel %vm2407_vm10, %v6013_v8, %v8345_v14  ;;  %vm8346_vm7 = vcmask 1040384   ;;  %v2365_v47 = vrot.slane %v2364_v38, 2  ;;  %v6442_v29 = vpop.permute.xlu0 %2926  ;;  %v6445_v8 = vpop.permute.xlu1 %2899 }
 0x29b   : > { %v2575_v12 = vsel %vm8346_vm7, %v6400_v6, %v6423_v27  ;;  %vm8347_vm14 = vmmov %vm8346_vm7  ;;  %8348 = vst [vmem:[#allocation16_spill] sm:$0xff] %v6442_v29  ;;  %v2314_v2 = vcombine.low %v2305_v58, %v2311_v62  ;;  %v2414_v48 = vrot.slane %v2412_v4, 4  ;;  %v2413_v39 = vmul.f32 %v2409_v22, %v8126_v57 }
 0x29c   : > { %v2576_v36 = vsel %vm8347_vm14, %v6387_v37, %v6426_v10  ;;  %v2361_v49 = vrot.slane %v2360_v28, 1  ;;  %8349 = vst [vmem:[#allocation6_spill] sm:$0xff] %v6445_v8  ;;  %v2366_v14 = vadd.f32 %v2365_v47, %v2364_v38  ;;  %vm2470_vm10 = vcmask 949248  }
 0x29d   : > { %v2321_v29 = vrot.slane %v2314_v2, %v6233_v20  ;;  %v2415_v58 = vadd.f32 %v2414_v48, %v2412_v4  ;;  %v2420_v62 = vrot.slane %v2413_v39, 4  ;;  %v2471_v23 = vsel %vm2470_vm10, %v8352_v25, %v6048_v31  ;;  %v8354_v48 = vld [vmem:[#allocation19_spill] sm:$0xff] }
 0x29e   : > { %v2362_v22 = vadd.f32 %v2361_v49, %v2360_v28  ;;  %v2367_v8 = vrot.slane %v2366_v14, 1  ;;  %v2472_v38 = vsel %vm2470_vm10, %v6048_v31, %v6045_v40  ;;  %v2475_v11 = vmul.f32 %v2471_v23, %v8299_v42  ;;  %v6462_v2 = vpop.permute.xlu1 %2928  ;;  %v6468_v49 = vpop.permute.xlu0 %2930  ;;  %s4206_s29 = smul.u32 176, %s8569_s25 }
 0x29f   : > { %v2328_v47 = vrot.slane %v2321_v29, %v6233_v20  ;;  %v2416_v59 = vrot.slane %v2415_v58, 2  ;;  %v2421_v52 = vadd.f32 %v2420_v62, %v2413_v39  ;;  %8353 = vst [vmem:[#allocation29_spill] sm:$0xff] %v6462_v2  ;;  %v6465_v26 = vadd.s32 128, %v8354_v48  ;;  %8355 = vst [vmem:[#allocation23_spill] sm:$0xff] %v6468_v49  ;;  %v8357_v49 = vld [vmem:[#allocation48_spill] sm:$0xff] }
 0x2a0   : > { %v2368_v4 = vadd.f32 %v2367_v8, %v2366_v14  ;;  %v2476_v28 = vmul.f32 %v2472_v38, %v8126_v57  ;;  %vm2501_vm0 = vcmask 941056   ;;  %vm8356_vm2 = vcmp.lt.s32.totalorder %v8304_v3, 14  ;;  %s7384_s10 = scalar_lea.vmem %s8581_s9, %s4206_s29 }
 0x2a1   : > { %v2330_v40 = vsel %vm8356_vm2, %v2328_v47, 0.0  ;;  %v2417_v31 = vadd.f32 %v2416_v59, %v2415_v58  ;;  %v2422_v25 = vrot.slane %v2421_v52, 2  ;;  %v2477_v29 = vrot.slane %v2475_v11, 4 }
 0x2a2   : > { %v6477_v39 = vrot.slane %v2330_v40, %v8308_v43  ;;  %v6480_v8 = vrot.slane %v2330_v40, %v8309_v5  ;;  %v2371_v23 = vcombine.low %v2362_v22, %v2368_v4  ;;  %v2483_v14 = vrot.slane %v2476_v28, 4  ;;  %v6485_v58 = vpop.permute.xlu1 %2959 }
 0x2a3   : > { %v2418_v62 = vrot.slane %v2417_v31, 1  ;;  %v2423_v38 = vadd.f32 %v2422_v25, %v2421_v52  ;;  %v2478_v48 = vadd.f32 %v2477_v29, %v2475_v11  ;;  %v2502_v59 = vsel %vm2501_vm0, %v8357_v49, %v6066_v32  ;;  %8358 = vst [vmem:[#allocation7_spill] sm:$0xff] %v6485_v58  ;;  %v6502_v29 = vpop.permute.xlu0 %2961  ;;  %v8363_v58 = vld [vmem:[#allocation52_spill] sm:$0xff] }
 0x2a4   : > { %vm8359_vm7 = vcmask 1041408   ;;  %v2378_v40 = vrot.slane %v2371_v23, %v6233_v20  ;;  %vm2532_vm10 = vcmask 932864   ;;  %vm7853_vm2 = vcmp.lt.s32.totalorder %v6465_v26, 240  ;;  %8362 = vst [vmem:[#allocation36_spill] sm:$0xff] %v6502_v29 }
 0x2a5   : > { %v2577_v47 = vsel %vm8359_vm7, %v2575_v12, %v6477_v39  ;;  %vm8360_vm14 = vmmov %vm8359_vm7  ;;  %v2419_v52 = vadd.f32 %v2418_v62, %v2417_v31  ;;  %v2424_v11 = vrot.slane %v2423_v38, 1  ;;  %v2479_v22 = vrot.slane %v2478_v48, 2 }
 0x2a6   : > { %v2578_v2 = vsel %vm8360_vm14, %v2576_v36, %v6480_v8  ;;  %v2385_v4 = vrot.slane %v2378_v40, %v6233_v20  ;;  %v2484_v12 = vadd.f32 %v2483_v14, %v2476_v28  ;;  %v2506_v49 = vmul.f32 %v2502_v59, %v8299_v42  ;;  %v8361_v36 = vld [vmem:[#allocation49_spill] sm:$0xff]  ;;  %v6508_v35 = vpop.permute.xlu1 %2957  ;;  %v8367_v40 = vld [vmem:[#allocation51_spill] sm:$0xff] }
 0x2a7   : > { %v2503_v25 = vsel %vm2501_vm0, %v6066_v32, %v8361_v36  ;;  %v2425_v23 = vadd.f32 %v2424_v11, %v2423_v38  ;;  %v2480_v31 = vadd.f32 %v2479_v22, %v2478_v48  ;;  %v2533_v15 = vsel %vm2532_vm10, %v8364_v16, %v8363_v58  ;;  %8365 = vst [vmem:[#allocation27_spill] sm:$0xff] %v6508_v35 }
 0x2a8   : > { %v2507_v62 = vmul.f32 %v2503_v25, %v8126_v57  ;;  %vm8366_vm7 = vcmp.lt.s32.totalorder %v8304_v3, 13  ;;  %v2485_v14 = vrot.slane %v2484_v12, 2  ;;  %v2508_v59 = vrot.slane %v2506_v49, 4 }
 0x2a9   : > { %v2387_v28 = vsel %vm8366_vm7, %v2385_v4, 0.0  ;;  %v2534_v32 = vsel %vm2532_vm10, %v8363_v58, %v8367_v40  ;;  %v2428_v48 = vcombine.low %v2419_v52, %v2425_v23  ;;  %v2481_v11 = vrot.slane %v2480_v31, 1  ;;  %v8369_v58 = vld [vmem:[#allocation18_spill] sm:$0xff]  ;;  %vm2490_vm10 = vmand %vm7853_vm2, %vm5718_vm4 }
 0x2aa   : > { %v6518_v38 = vrot.slane %v2387_v28, %v8309_v5  ;;  %v6521_v16 = vrot.slane %v2387_v28, %v8308_v43  ;;  %v2486_v22 = vadd.f32 %v2485_v14, %v2484_v12  ;;  %v2509_v4 = vadd.f32 %v2508_v59, %v2506_v49  ;;  %v6535_v49 = vpop.permute.xlu0 %2986  ;;  %v6537_v14 = vpop.permute.xlu1 %2988 }
 0x2ab   : > { %v2514_v36 = vrot.slane %v2507_v62, 4  ;;  %v2537_v25 = vmul.f32 %v2533_v15, %v8299_v42  ;;  %v8370_v40 = vmax.f32 %v6408_v61, %v8350_v0  ;;  %v2435_v29 = vrot.slane %v2428_v48, %v6233_v20  ;;  %8373 = vst [vmem:[#allocation42_spill] sm:$0xff] %v6535_v49 }
 0x2ac   : > { %vm8371_vm0 = vcmask 1042432   ;;  %v2482_v23 = vadd.f32 %v2481_v11, %v2480_v31  ;;  %v2487_v28 = vrot.slane %v2486_v22, 1  ;;  %v2510_v12 = vrot.slane %v2509_v4, 2 }
 0x2ad   : > { %v1911_v35 = vmax.f32 %v8370_v40, %v8369_v58  ;;  %v2580_v52 = vsel %vm8371_vm0, %v2578_v2, %v6518_v38  ;;  %vm8372_vm14 = vmmov %vm8371_vm0  ;;  %v2442_v15 = vrot.slane %v2435_v29, %v6233_v20  ;;  %v2515_v0 = vadd.f32 %v2514_v36, %v2507_v62 }
 0x2ae   : > { %v2579_v7 = vsel %vm8372_vm14, %v2577_v47, %v6521_v16  ;;  %v2538_v2 = vmul.f32 %v2534_v32, %v8126_v57  ;;  %v2539_v31 = vrot.slane %v2537_v25, 4  ;;  %v8376_v47 = vmax.f32 %v6411_v51, %v6213_v9 }
 0x2af   : > { %v2488_v48 = vadd.f32 %v2487_v28, %v2486_v22  ;;  %v6555_v29 = vsel %vm4864_vm3, %v2482_v23, 0.0  ;;  %v2511_v58 = vadd.f32 %v2510_v12, %v2509_v4  ;;  %vm8378_vm7 = vcmp.lt.s32.totalorder %v8304_v3, 12 }
 0x2b0   : > { %v1912_v59 = vmax.f32 %v8376_v47, %v6203_v17  ;;  %v2444_v62 = vsel %vm8378_vm7, %v2442_v15, 0.0  ;;  %v2559_v32 = vrot.slane %v6555_v29, 3  ;;  %v2516_v36 = vrot.slane %v2515_v0, 2  ;;  %v6579_v15 = vpop.permute.xlu0 %2990 }
 0x2b1   : > { %v2540_v40 = vadd.f32 %v2539_v31, %v2537_v25  ;;  %v6561_v20 = vrot.slane %v2444_v62, %v8309_v5  ;;  %v6564_v49 = vrot.slane %v2444_v62, %v8308_v43  ;;  %v6566_v17 = vsel %vm2490_vm10, %v2488_v48, 0.0  ;;  %v8379_v25 = vld [vmem:[#allocation13_spill] sm:$0xff]  ;;  %v6581_v31 = vpop.permute.xlu1 %3017 }
 0x2b2   : > { %v2512_v9 = vrot.slane %v2511_v58, 1  ;;  %v2560_v51 = vrot.slane %v6566_v17, 3  ;;  %v2517_v3 = vadd.f32 %v2516_v36, %v2515_v0  ;;  %v2545_v4 = vrot.slane %v2538_v2, 4 }
 0x2b3   : > { %v2541_v22 = vrot.slane %v2540_v40, 2  ;;  %v1942_v5 = vmax.f32 %v1911_v35, %v8379_v25  ;;  %v1943_v23 = vmax.f32 %v1912_v59, %v6259_v50  ;;  %vm8380_vm0 = vcmask 1043456   ;;  %v8388_v25 = vld [vmem:[#allocation34_spill] sm:$0xff] }
 0x2b4   : > { %v2582_v28 = vsel %vm8380_vm0, %v2580_v52, %v6561_v20  ;;  %vm8381_vm14 = vmmov %vm8380_vm0  ;;  %vm8382_vm10 = vcmask 1044480   ;;  %v2513_v48 = vadd.f32 %v2512_v9, %v2511_v58  ;;  %v2518_v62 = vrot.slane %v2517_v3, 1  ;;  %v6609_v34 = vpop.permute.xlu0 %3019 }
 0x2b5   : > { %v2581_v12 = vsel %vm8381_vm14, %v2579_v7, %v6564_v49  ;;  %vm8383_vm7 = vmmov %vm8382_vm10  ;;  %v2006_v35 = vmax.f32 %v1942_v5, %v6279_v33  ;;  %v2542_v50 = vadd.f32 %v2541_v22, %v2540_v40  ;;  %v2546_v52 = vadd.f32 %v2545_v4, %v2538_v2 }
 0x2b6   : > { %v2583_v0 = vsel %vm8382_vm10, %v2581_v12, %v2559_v32  ;;  %v2584_v47 = vsel %vm8383_vm7, %v2582_v28, %v2560_v51  ;;  %vm2521_vm0 = vmand %vm7853_vm2, %vm5735_vm15  ;;  %v2007_v7 = vmax.f32 %v1943_v23, %v6282_v45  ;;  %v6595_v32 = vsel %vm4843_vm13, %v2513_v48, 0.0 }
 0x2b7   : > { %v2519_v58 = vadd.f32 %v2518_v62, %v2517_v3  ;;  %vm2597_vm14 = vcmask 924672   ;;  %v2063_v33 = vmax.f32 %v2006_v35, %v6334_v53  ;;  %v2565_v9 = vrot.slane %v6595_v32, 2  ;;  %v8387_v3 = vld [vmem:[#allocation55_spill] sm:$0xff]  ;;  %v6611_v53 = vpop.permute.xlu1 %3021 }
 0x2b8   : > { %v2543_v40 = vrot.slane %v2542_v50, 1  ;;  %v2547_v2 = vrot.slane %v2546_v52, 2  ;;  %v2064_v51 = vmax.f32 %v2007_v7, %v6337_v63  ;;  %vm8386_vm10 = vcmask 1045504  }
 0x2b9   : > { %v6602_v1 = vsel %vm2521_vm0, %v2519_v58, 0.0  ;;  %v2585_v45 = vsel %vm8386_vm10, %v2583_v0, %v2565_v9  ;;  %v2598_v5 = vsel %vm2597_vm14, %v8388_v25, %v8387_v3  ;;  %v2120_v63 = vmax.f32 %v2063_v33, %v6310_v56  ;;  %vm8389_vm7 = vmmov %vm8386_vm10 }
 0x2ba   : > { %v2566_v22 = vrot.slane %v6602_v1, 2  ;;  %v2544_v4 = vadd.f32 %v2543_v40, %v2542_v50  ;;  %v2548_v23 = vadd.f32 %v2547_v2, %v2546_v52  ;;  %v2599_v48 = vsel %vm2597_vm14, %v8387_v3, %v6148_v30  ;;  %vm2552_vm0 = vmand %vm7853_vm2, %vm5706_vm8 }
 0x2bb   : > { %v2602_v50 = vmul.f32 %v2598_v5, %v8299_v42  ;;  %v2121_v52 = vmax.f32 %v2064_v51, %v6313_v18  ;;  %v2177_v19 = vmax.f32 %v2120_v63, %v6375_v13  ;;  %vm2657_vm10 = vcmask 908288   ;;  %v6640_v13 = vpop.permute.xlu0 %3048  ;;  %v6642_v58 = vpop.permute.xlu1 %3050 }
 0x2bc   : > { %v2586_v28 = vsel %vm8389_vm7, %v2584_v47, %v2566_v22  ;;  %v6619_v0 = vsel %vm4897_vm9, %v2544_v4, 0.0  ;;  %v2549_v62 = vrot.slane %v2548_v23, 1  ;;  %vm8391_vm7 = vcmask 1046528  }
 0x2bd   : > { %v2571_v35 = vrot.slane %v6619_v0, 1  ;;  %v2603_v30 = vmul.f32 %v2599_v48, %v8126_v57  ;;  %vm2628_vm14 = vcmask 916480   ;;  %v2178_v7 = vmax.f32 %v2121_v52, %v6378_v55  ;;  %v8393_v55 = vld [vmem:[#allocation53_spill] sm:$0xff]  ;;  %v8396_v52 = vld [vmem:[#allocation54_spill] sm:$0xff] }
 0x2be   : > { %v2550_v56 = vadd.f32 %v2549_v62, %v2548_v23  ;;  %v2658_v18 = vsel %vm2657_vm10, %v6199_v44, %v6192_v41  ;;  %v2604_v9 = vrot.slane %v2602_v50, 4  ;;  %v2227_v40 = vmax.f32 %v2177_v19, %v6400_v6  ;;  %v8395_v6 = vld [vmem:[#allocation60_spill] sm:$0xff] }
 0x2bf   : > { %v6633_v47 = vsel %vm8391_vm7, %v2585_v45, %v2571_v35  ;;  %v2629_v51 = vsel %vm2628_vm14, %v6170_v21, %v6145_v46  ;;  %v2610_v45 = vrot.slane %v2603_v30, 4  ;;  %v2630_v22 = vsel %vm2628_vm14, %v6145_v46, %v8393_v55  ;;  %v6663_v46 = vpop.permute.xlu0 %3052  ;;  %v6665_v48 = vpop.permute.xlu1 %3079 }
 0x2c0   : > { %8392 = vst [vmem:[#allocation15_spill] sm:$0xff] %v6633_v47  ;;  %v6644_v33 = vsel %vm2552_vm0, %v2550_v56, 0.0  ;;  %v2662_v44 = vmul.f32 %v2658_v18, %v8299_v42  ;;  %v2228_v4 = vmax.f32 %v2178_v7, %v6387_v37  ;;  %v2605_v25 = vadd.f32 %v2604_v9, %v2602_v50 }
 0x2c1   : > { %v2572_v2 = vrot.slane %v6644_v33, 1  ;;  %v2633_v5 = vmul.f32 %v2629_v51, %v8299_v42  ;;  %v2659_v23 = vsel %vm2657_vm10, %v6192_v41, %v8395_v6  ;;  %vm2688_vm0 = vcmask 900096  }
 0x2c2   : > { %v2285_v21 = vmax.f32 %v2227_v40, %v6423_v27  ;;  %v2634_v63 = vmul.f32 %v2630_v22, %v8126_v57  ;;  %v2611_v37 = vadd.f32 %v2610_v45, %v2603_v30  ;;  %v2664_v62 = vrot.slane %v2662_v44, 4 }
 0x2c3   : > { %v6655_v3 = vsel %vm8391_vm7, %v2586_v28, %v2572_v2  ;;  %v2286_v28 = vmax.f32 %v2228_v4, %v6426_v10  ;;  %v2663_v50 = vmul.f32 %v2659_v23, %v8126_v57  ;;  %v2689_v41 = vsel %vm2688_vm0, %v8396_v52, %v6241_v54  ;;  %v6681_v45 = vpop.permute.xlu0 %3081  ;;  %v8397_v4 = vld [vmem:[#allocation62_spill] sm:$0xff] }
 0x2c4   : > { %8394 = vst [vmem:[#allocation45_spill] sm:$0xff] %v6655_v3  ;;  %v2342_v35 = vmax.f32 %v2285_v21, %v6477_v39  ;;  %v2606_v19 = vrot.slane %v2605_v25, 2  ;;  %v2635_v27 = vrot.slane %v2633_v5, 4  ;;  %v2641_v18 = vrot.slane %v2634_v63, 4 }
 0x2c5   : > { %v2343_v56 = vmax.f32 %v2286_v28, %v6480_v8  ;;  %v2690_v30 = vsel %vm2688_vm0, %v6241_v54, %v6238_v24  ;;  %v2612_v10 = vrot.slane %v2611_v37, 2  ;;  %v2665_v9 = vadd.f32 %v2664_v62, %v2662_v44  ;;  %v6683_v8 = vpop.permute.xlu1 %3083  ;;  %v8398_v24 = vld [vmem:[#allocation22_spill] sm:$0xff]  ;;  %v8399_v62 = vld [vmem:[#allocation59_spill] sm:$0xff]  ;;  %vm2617_vm0 = vmand %vm7853_vm2, %vm5760_vm1 }
 0x2c6   : > { %v2399_v7 = vmax.f32 %v2342_v35, %v6521_v16  ;;  %v2693_v39 = vmul.f32 %v2689_v41, %v8299_v42  ;;  %vm2719_vm10 = vcmask 891904   ;;  %v2670_v51 = vrot.slane %v2663_v50, 4 }
 0x2c7   : > { %v2400_v40 = vmax.f32 %v2343_v56, %v6518_v38  ;;  %v2607_v16 = vadd.f32 %v2606_v19, %v2605_v25  ;;  %v2636_v55 = vadd.f32 %v2635_v27, %v2633_v5  ;;  %v2694_v22 = vmul.f32 %v2690_v30, %v8126_v57 }
 0x2c8   : > { %v2456_v2 = vmax.f32 %v2399_v7, %v6564_v49  ;;  %v2720_v54 = vsel %vm2719_vm10, %v8398_v24, %v8397_v4  ;;  %v2642_v6 = vadd.f32 %v2641_v18, %v2634_v63  ;;  %v2613_v23 = vadd.f32 %v2612_v10, %v2611_v37  ;;  %v6695_v63 = vpop.permute.xlu0 %3116 }
 0x2c9   : > { %v2457_v44 = vmax.f32 %v2400_v40, %v6561_v20  ;;  %v2666_v21 = vrot.slane %v2665_v9, 2  ;;  %v2695_v38 = vrot.slane %v2693_v39, 4  ;;  %v2721_v49 = vsel %vm2719_vm10, %v8397_v4, %v8399_v62  ;;  %v6697_v37 = vpop.permute.xlu1 %3118  ;;  %v8402_v62 = vld [vmem:[#allocation64_spill] sm:$0xff] }
 0x2ca   : > { %v2493_v28 = vmax.f32 %v2456_v2, %v6555_v29  ;;  %v2671_v35 = vadd.f32 %v2670_v51, %v2663_v50  ;;  %v2724_v25 = vmul.f32 %v2720_v54, %v8299_v42  ;;  %v2608_v5 = vrot.slane %v2607_v16, 1  ;;  %v8400_v29 = vld [vmem:[#allocation61_spill] sm:$0xff]  ;;  %v8401_v50 = vld [vmem:[#allocation20_spill] sm:$0xff] }
 0x2cb   : > { %v2637_v52 = vrot.slane %v2636_v55, 2  ;;  %v2701_v41 = vrot.slane %v2694_v22, 4  ;;  %vm2750_vm14 = vcmask 883712   ;;  %v2494_v19 = vmax.f32 %v2457_v44, %v6566_v17 }
 0x2cc   : > { %v2643_v27 = vrot.slane %v2642_v6, 2  ;;  %v2725_v20 = vmul.f32 %v2721_v49, %v8126_v57  ;;  %v2614_v56 = vrot.slane %v2613_v23, 1  ;;  %v2667_v7 = vadd.f32 %v2666_v21, %v2665_v9 }
 0x2cd   : > { %v2696_v18 = vadd.f32 %v2695_v38, %v2693_v39  ;;  %v2751_v30 = vsel %vm2750_vm14, %v8401_v50, %v8400_v29  ;;  %v2672_v10 = vrot.slane %v2671_v35, 2  ;;  %v2726_v40 = vrot.slane %v2724_v25, 4 }
 0x2ce   : > { %v2755_v2 = vmul.f32 %v2751_v30, %v8299_v42  ;;  %v2524_v17 = vmax.f32 %v2493_v28, %v6595_v32  ;;  %v2609_v51 = vadd.f32 %v2608_v5, %v2607_v16  ;;  %v2638_v4 = vadd.f32 %v2637_v52, %v2636_v55  ;;  %v8406_v52 = vld [vmem:[#allocation66_spill] sm:$0xff] }
 0x2cf   : > { %v2702_v24 = vadd.f32 %v2701_v41, %v2694_v22  ;;  %v2644_v54 = vadd.f32 %v2643_v27, %v2642_v6  ;;  %v2732_v44 = vrot.slane %v2725_v20, 4  ;;  %v2752_v9 = vsel %vm2750_vm14, %v8400_v29, %v8402_v62  ;;  %v6713_v22 = vpop.permute.xlu0 %3120  ;;  %v6715_v6 = vpop.permute.xlu1 %3199 }
 0x2d0   : > { %vm2787_vm7 = vcmask 818176   ;;  %v2525_v39 = vmax.f32 %v2494_v19, %v6602_v1  ;;  %v2615_v21 = vadd.f32 %v2614_v56, %v2613_v23  ;;  %v2668_v38 = vrot.slane %v2667_v7, 1  ;;  %8404 = vst [vmem:[#allocation19_spill] sm:$0xff] %v6715_v6  ;;  %v8405_v23 = vld [vmem:[#allocation33_spill] sm:$0xff] }
 0x2d1   : > { %v2697_v49 = vrot.slane %v2696_v18, 2  ;;  %v2555_v50 = vmax.f32 %v2524_v17, %v6619_v0  ;;  %v2673_v32 = vadd.f32 %v2672_v10, %v2671_v35  ;;  %v2727_v16 = vadd.f32 %v2726_v40, %v2724_v25  ;;  %v8408_v40 = vld [vmem:[#allocation67_spill] sm:$0xff] }
 0x2d2   : > { %v2757_v55 = vrot.slane %v2755_v2, 4  ;;  %v2639_v28 = vrot.slane %v2638_v4, 1  ;;  %v2703_v5 = vrot.slane %v2702_v24, 2  ;;  %v2756_v1 = vmul.f32 %v2752_v9, %v8126_v57 }
 0x2d3   : > { %v2788_v0 = vsel %vm2787_vm7, %v8406_v52, %v8405_v23  ;;  %v2618_v19 = vsel %vm4881_vm5, %v2609_v51, 0.0  ;;  %v2645_v27 = vrot.slane %v2644_v54, 1  ;;  %v2733_v56 = vadd.f32 %v2732_v44, %v2725_v20 }
 0x2d4   : > { %v2792_v35 = vmul.f32 %v2788_v0, %v8299_v42  ;;  %v2619_v25 = vsel %vm2617_vm0, %v2615_v21, 0.0  ;;  %v2669_v29 = vadd.f32 %v2668_v38, %v2667_v7  ;;  %v2698_v10 = vadd.f32 %v2697_v49, %v2696_v18  ;;  %v6729_v7 = vpop.permute.xlu0 %3201  ;;  %v6731_v18 = vpop.permute.xlu1 %3203  ;;  %v8411_v0 = vld [vmem:[#allocation12_spill] sm:$0xff] }
 0x2d5   : > { %v2789_v17 = vsel %vm2787_vm7, %v8405_v23, %v8408_v40  ;;  %v2674_v62 = vrot.slane %v2673_v32, 1  ;;  %v2728_v9 = vrot.slane %v2727_v16, 2  ;;  %v2758_v3 = vadd.f32 %v2757_v55, %v2755_v2  ;;  %8409 = vst [vmem:[#allocation48_spill] sm:$0xff] %v6729_v7  ;;  %8410 = vst [vmem:[#allocation49_spill] sm:$0xff] %v6731_v18  ;;  %v8412_v2 = vld [vmem:[#allocation63_spill] sm:$0xff] }
 0x2d6   : > { %vm2818_vm10 = vcmask 809984   ;;  %v2556_v52 = vmax.f32 %v2525_v39, %v6644_v33  ;;  %v2704_v47 = vadd.f32 %v2703_v5, %v2702_v24  ;;  %v2763_v43 = vrot.slane %v2756_v1, 4  ;;  %v8413_v33 = vld [vmem:[#allocation37_spill] sm:$0xff]  ;;  %vm2677_vm7 = vmand %vm7853_vm2, %vm5790_vm12 }
 0x2d7   : > { %v2794_v51 = vrot.slane %v2792_v35, 4  ;;  %v2620_v6 = vmax.f32 %v2555_v50, %v2618_v19  ;;  %v2646_v20 = vadd.f32 %v2645_v27, %v2644_v54  ;;  %v2734_v44 = vrot.slane %v2733_v56, 2  ;;  %vm2739_vm12 = vmand %vm7853_vm2, %vm5830_vm6 }
 0x2d8   : > { %v2793_v21 = vmul.f32 %v2789_v17, %v8126_v57  ;;  %v2621_v38 = vmax.f32 %v2556_v52, %v2619_v25  ;;  %v2640_v49 = vadd.f32 %v2639_v28, %v2638_v4  ;;  %v2699_v23 = vrot.slane %v2698_v10, 1  ;;  %v8416_v4 = vld [vmem:[#allocation65_spill] sm:$0xff] }
 0x2d9   : > { %v2819_v55 = vsel %vm2818_vm10, %v8412_v2, %v8411_v0  ;;  %vm8414_vm14 = vnez %v8413_v33  ;;  %v2675_v39 = vadd.f32 %v2674_v62, %v2673_v32  ;;  %v2729_v50 = vadd.f32 %v2728_v9, %v2727_v16 }
 0x2da   : > { %v2678_v24 = vsel %vm8414_vm14, %v2669_v29, 0.0  ;;  %v2759_v54 = vrot.slane %v2758_v3, 2  ;;  %v2705_v27 = vrot.slane %v2704_v47, 1  ;;  %v2764_v40 = vadd.f32 %v2763_v43, %v2756_v1 }
 0x2db   : > { %v2795_v17 = vadd.f32 %v2794_v51, %v2792_v35  ;;  %v2820_v28 = vsel %vm2818_vm10, %v8411_v0, %v8416_v4  ;;  %v2648_v52 = vsel %vm7853_vm2, %v2646_v20, 0.0  ;;  %v2735_v2 = vadd.f32 %v2734_v44, %v2733_v56  ;;  %v6750_v35 = vpop.permute.xlu0 %3230  ;;  %v6752_v51 = vpop.permute.xlu1 %3232 }
 0x2dc   : > { %v2800_v29 = vrot.slane %v2793_v21, 4  ;;  %v2823_v32 = vmul.f32 %v2819_v55, %v8299_v42  ;;  %v2649_v16 = vmax.f32 %v2620_v6, %v2640_v49  ;;  %vm8417_vm0 = vcmask 1040384   ;;  %8418 = vst [vmem:[#allocation52_spill] sm:$0xff] %v6750_v35  ;;  %8419 = vst [vmem:[#allocation47_spill] sm:$0xff] %v6752_v51 }
 0x2dd   : > { %v2879_v62 = vsel %vm8417_vm0, %v2618_v19, %v2640_v49  ;;  %v2845_v9 = vrot.slane %v2678_v24, 6  ;;  %v2700_v18 = vadd.f32 %v2699_v23, %v2698_v10  ;;  %v2679_v7 = vsel %vm2677_vm7, %v2675_v39, 0.0  ;;  %vm8420_vm10 = vmmov %vm8417_vm0 }
 0x2de   : > { %v2730_v33 = vrot.slane %v2729_v50, 1  ;;  %v2760_v43 = vadd.f32 %v2759_v54, %v2758_v3  ;;  %v2824_v1 = vmul.f32 %v2820_v28, %v8126_v57  ;;  %v2650_v0 = vmax.f32 %v2621_v38, %v2648_v52  ;;  %vm2708_vm0 = vmand %vm7853_vm2, %vm5765_vm11  ;;  %v8423_v54 = vld [vmem:[#allocation40_spill] sm:$0xff] }
 0x2df   : > { %v2706_v20 = vadd.f32 %v2705_v27, %v2704_v47  ;;  %v2765_v56 = vrot.slane %v2764_v40, 2  ;;  %v2796_v44 = vrot.slane %v2795_v17, 2  ;;  %v2880_v55 = vsel %vm8420_vm10, %v2619_v25, %v2648_v52 }
 0x2e0   : > { %v2736_v19 = vrot.slane %v2735_v2, 1  ;;  %v2801_v10 = vadd.f32 %v2800_v29, %v2793_v21  ;;  %v2825_v3 = vrot.slane %v2823_v32, 4  ;;  %v2680_v49 = vmax.f32 %v2649_v16, %v2678_v24  ;;  %v6762_v21 = vpop.permute.xlu0 %3234  ;;  %v6764_v24 = vpop.permute.xlu1 %3261 }
 0x2e1   : > { %vm8422_vm7 = vcmask 1041408   ;;  %v2846_v39 = vrot.slane %v2679_v7, 6  ;;  %vm8424_vm14 = vnez %v8423_v54  ;;  %v2731_v47 = vadd.f32 %v2730_v33, %v2729_v50  ;;  %8425 = vst [vmem:[#allocation51_spill] sm:$0xff] %v6764_v24  ;;  %v8428_v50 = vld [vmem:[#allocation8_spill] sm:$0xff] }
 0x2e2   : > { %v2881_v23 = vsel %vm8422_vm7, %v2879_v62, %v2845_v9  ;;  %v2709_v38 = vsel %vm8424_vm14, %v2700_v18, 0.0  ;;  %v2761_v27 = vrot.slane %v2760_v43, 1  ;;  %v2831_v4 = vrot.slane %v2824_v1, 4  ;;  %v8432_v9 = vld [vmem:[#allocation6_spill] sm:$0xff] }
 0x2e3   : > { %v2681_v25 = vmax.f32 %v2650_v0, %v2679_v7  ;;  %v2710_v28 = vsel %vm2708_vm0, %v2706_v20, 0.0  ;;  %v2766_v52 = vadd.f32 %v2765_v56, %v2764_v40  ;;  %v2797_v35 = vadd.f32 %v2796_v44, %v2795_v17  ;;  %v8427_v7 = vld [vmem:[#allocation5_spill] sm:$0xff]  ;;  %v8430_v17 = vld [vmem:[#allocation39_spill] sm:$0xff] }
 0x2e4   : > { %v2737_v51 = vadd.f32 %v2736_v19, %v2735_v2  ;;  %v2802_v6 = vrot.slane %v2801_v10, 2  ;;  %v2826_v5 = vadd.f32 %v2825_v3, %v2823_v32  ;;  %v2882_v29 = vsel %vm8422_vm7, %v2880_v55, %v2846_v39  ;;  %v8434_v55 = vld [vmem:[#allocation29_spill] sm:$0xff]  ;;  %v8435_v19 = vld [vmem:[#allocation16_spill] sm:$0xff] }
 0x2e5   : > { %v2711_v16 = vmax.f32 %v2680_v49, %v2709_v38  ;;  %v2851_v18 = vrot.slane %v2709_v38, 5  ;;  %vm8429_vm0 = vcmask 801792   ;;  %vm8431_vm14 = vnez %v8430_v17  ;;  %v8440_v17 = vld [vmem:[#allocation23_spill] sm:$0xff] }
 0x2e6   : > { %v2902_v40 = vsel %vm8429_vm0, %v8428_v50, %v8427_v7  ;;  %v2740_v2 = vsel %vm8431_vm14, %v2731_v47, 0.0  ;;  %v2762_v32 = vadd.f32 %v2761_v27, %v2760_v43  ;;  %v2832_v62 = vadd.f32 %v2831_v4, %v2824_v1  ;;  %vm8433_vm7 = vmmov %vm8429_vm0  ;;  %v8438_v50 = vld [vmem:[#allocation46_spill] sm:$0xff] }
 0x2e7   : > { %v2903_v0 = vsel %vm8433_vm7, %v8427_v7, %v8432_v9  ;;  %v2852_v20 = vrot.slane %v2710_v28, 5  ;;  %v2767_v56 = vrot.slane %v2766_v52, 1  ;;  %v2798_v44 = vrot.slane %v2797_v35, 1 }
 0x2e8   : > { %vm8436_vm2 = vcmask 793600   ;;  %v2741_v49 = vsel %vm2739_vm12, %v2737_v51, 0.0  ;;  %v2803_v39 = vadd.f32 %v2802_v6, %v2801_v10  ;;  %v2827_v38 = vrot.slane %v2826_v5, 2  ;;  %v6792_v6 = vpop.permute.xlu0 %3263  ;;  %v6794_v10 = vpop.permute.xlu1 %3265 }
 0x2e9   : > { %v2933_v3 = vsel %vm8436_vm2, %v8435_v19, %v8434_v55  ;;  %v2906_v47 = vmul.f32 %v2902_v40, %v8299_v42  ;;  %v2712_v43 = vmax.f32 %v2681_v25, %v2710_v28  ;;  %vm8437_vm0 = vcmask 1042432   ;;  %vm8441_vm10 = vmmov %vm8436_vm2  ;;  %8442 = vst [vmem:[#allocation18_spill] sm:$0xff] %v6792_v6  ;;  %v8445_v40 = vld [vmem:[#allocation38_spill] sm:$0xff] }
 0x2ea   : > { %v2883_v27 = vsel %vm8437_vm0, %v2881_v23, %v2851_v18  ;;  %v2857_v1 = vrot.slane %v2740_v2, 4  ;;  %v2907_v4 = vmul.f32 %v2903_v0, %v8126_v57  ;;  %vm8439_vm7 = vnez %v8438_v50  ;;  %8443 = vst [vmem:[#allocation21_spill] sm:$0xff] %v6794_v10  ;;  %vm8444_vm12 = vmmov %vm8437_vm0 }
 0x2eb   : > { %v2771_v7 = vsel %vm8439_vm7, %v2762_v32, 0.0  ;;  %v2833_v9 = vrot.slane %v2832_v62, 2  ;;  %v2934_v24 = vsel %vm8441_vm10, %v8434_v55, %v8440_v17  ;;  %v2937_v51 = vmul.f32 %v2933_v3, %v8299_v42 }
 0x2ec   : > { %v2884_v25 = vsel %vm8444_vm12, %v2882_v29, %v2852_v20  ;;  %v2858_v23 = vrot.slane %v2741_v49, 4  ;;  %v2768_v28 = vadd.f32 %v2767_v56, %v2766_v52  ;;  %v2799_v18 = vadd.f32 %v2798_v44, %v2797_v35 }
 0x2ed   : > { %vm8446_vm2 = vnez %v8445_v40  ;;  %vm8447_vm0 = vcmp.lt.s32.totalorder %v6465_v26, 240  ;;  %v2804_v32 = vrot.slane %v2803_v39, 1  ;;  %v2828_v0 = vadd.f32 %v2827_v38, %v2826_v5  ;;  %v8450_v40 = vld [vmem:[#allocation36_spill] sm:$0xff]  ;;  %v8451_v5 = vld [vmem:[#allocation7_spill] sm:$0xff] }
 0x2ee   : > { %vm2770_vm7 = vmand %vm8447_vm0, %vm8446_vm2  ;;  %v2908_v19 = vrot.slane %v2906_v47, 4  ;;  %vm2963_vm10 = vcmask 785408   ;;  %v2742_v17 = vmax.f32 %v2711_v16, %v2740_v2  ;;  %v2863_v55 = vrot.slane %v2771_v7, 3 }
 0x2ef   : > { %v2914_v3 = vrot.slane %v2907_v4, 4  ;;  %v2938_v50 = vmul.f32 %v2934_v24, %v8126_v57  ;;  %vm8448_vm14 = vcmask 1043456   ;;  %v2743_v29 = vmax.f32 %v2712_v43, %v2741_v49  ;;  %v6809_v24 = vpop.permute.xlu0 %3294 }
 0x2f0   : > { %v2885_v10 = vsel %vm8448_vm14, %v2883_v27, %v2857_v1  ;;  %v2834_v20 = vadd.f32 %v2833_v9, %v2832_v62  ;;  %v2939_v52 = vrot.slane %v2937_v51, 4  ;;  %vm8449_vm12 = vmmov %vm8448_vm14  ;;  %v2772_v56 = vsel %vm2770_vm7, %v2768_v28, 0.0  ;;  %v6811_v27 = vpop.permute.xlu1 %3296 }
 0x2f1   : > { %v2886_v35 = vsel %vm8449_vm12, %v2884_v25, %v2858_v23  ;;  %v2808_v44 = vsel %vm4864_vm3, %v2799_v18, 0.0  ;;  %v2965_v38 = vsel %vm2963_vm10, %v8451_v5, %v8450_v40  ;;  %v2805_v16 = vadd.f32 %v2804_v32, %v2803_v39 }
 0x2f2   : > { %v2829_v2 = vrot.slane %v2828_v0, 1  ;;  %v2909_v6 = vadd.f32 %v2908_v19, %v2906_v47  ;;  %vm2992_vm0 = vcmask 777216   ;;  %v2773_v62 = vmax.f32 %v2742_v17, %v2771_v7  ;;  %v8454_v47 = vld [vmem:[#allocation27_spill] sm:$0xff] }
 0x2f3   : > { %vm8452_vm14 = vcmask 1044480   ;;  %vm8453_vm7 = vcmp.lt.s32.totalorder %v6465_v26, 224  ;;  %v2915_v43 = vadd.f32 %v2914_v3, %v2907_v4  ;;  %v2945_v1 = vrot.slane %v2938_v50, 4 }
 0x2f4   : > { %v2887_v49 = vsel %vm8452_vm14, %v2885_v10, %v2863_v55  ;;  %vm2807_vm12 = vmand %vm8453_vm7, %vm5718_vm4  ;;  %v2835_v9 = vrot.slane %v2834_v20, 1  ;;  %v2940_v25 = vadd.f32 %v2939_v52, %v2937_v51  ;;  %v2969_v39 = vmul.f32 %v2965_v38, %v8126_v57  ;;  %v8455_v10 = vld [vmem:[#allocation42_spill] sm:$0xff]  ;;  %v6830_v38 = vpop.permute.xlu0 %3292 }
 0x2f5   : > { %v2964_v23 = vsel %vm2963_vm10, %v8454_v47, %v8451_v5  ;;  %v2774_v28 = vmax.f32 %v2743_v29, %v2772_v56  ;;  %v2864_v18 = vrot.slane %v2772_v56, 3  ;;  %v2869_v7 = vrot.slane %v2808_v44, 2  ;;  %v6832_v47 = vpop.permute.xlu1 %3321 }
 0x2f6   : > { %v2993_v40 = vsel %vm2992_vm0, %v8455_v10, %v6537_v14  ;;  %v2809_v32 = vsel %vm2807_vm12, %v2805_v16, 0.0  ;;  %v2830_v19 = vadd.f32 %v2829_v2, %v2828_v0  ;;  %v2910_v17 = vrot.slane %v2909_v6, 2 }
 0x2f7   : > { %v2994_v4 = vsel %vm2992_vm0, %v6537_v14, %v6579_v15  ;;  %v2916_v51 = vrot.slane %v2915_v43, 2  ;;  %v2946_v55 = vadd.f32 %v2945_v1, %v2938_v50  ;;  %v2968_v3 = vmul.f32 %v2964_v23, %v8299_v42  ;;  %vm8457_vm0 = vmmov %vm8453_vm7 }
 0x2f8   : > { %vm3023_vm14 = vcmask 769024   ;;  %v2836_v52 = vadd.f32 %v2835_v9, %v2834_v20  ;;  %v2941_v29 = vrot.slane %v2940_v25, 2  ;;  %v2976_v56 = vrot.slane %v2969_v39, 4  ;;  %vm2838_vm7 = vmand %vm8457_vm0, %vm5735_vm15 }
 0x2f9   : > { %v2997_v5 = vmul.f32 %v2993_v40, %v8299_v42  ;;  %vm8456_vm10 = vcmask 1044480   ;;  %v6835_v16 = vmax.f32 %v2773_v62, %v2808_v44  ;;  %v2870_v2 = vrot.slane %v2809_v32, 2 }
 0x2fa   : > { %v2888_v0 = vsel %vm8456_vm10, %v2886_v35, %v2864_v18  ;;  %v2998_v14 = vmul.f32 %v2994_v4, %v8126_v57  ;;  %vm8458_vm12 = vcmask 1045504   ;;  %v6845_v50 = vsel %vm4843_vm13, %v2830_v19, 0.0 }
 0x2fb   : > { %v2889_v15 = vsel %vm8458_vm12, %v2887_v49, %v2869_v7  ;;  %v2911_v20 = vadd.f32 %v2910_v17, %v2909_v6  ;;  %v3024_v35 = vsel %vm3023_vm14, %v6581_v31, %v6609_v34  ;;  %v2917_v44 = vadd.f32 %v2916_v51, %v2915_v43  ;;  %vm8459_vm10 = vmmov %vm8458_vm12 }
 0x2fc   : > { %v2947_v62 = vrot.slane %v2946_v55, 2  ;;  %v2970_v1 = vrot.slane %v2968_v3, 4  ;;  %v3025_v9 = vsel %vm3023_vm14, %v6609_v34, %v6611_v53  ;;  %v6853_v23 = vsel %vm2838_vm7, %v2836_v52, 0.0  ;;  %v6863_v53 = vpop.permute.xlu0 %3323 }
 0x2fd   : > { %v2942_v18 = vadd.f32 %v2941_v29, %v2940_v25  ;;  %v2977_v49 = vadd.f32 %v2976_v56, %v2969_v39  ;;  %v2999_v7 = vrot.slane %v2997_v5, 4  ;;  %v6855_v10 = vmax.f32 %v2774_v28, %v2809_v32  ;;  %v6865_v25 = vpop.permute.xlu1 %3325 }
 0x2fe   : > { %v2890_v6 = vsel %vm8459_vm10, %v2888_v0, %v2870_v2  ;;  %v3005_v40 = vrot.slane %v2998_v14, 4  ;;  %v3028_v19 = vmul.f32 %v3024_v35, %v8299_v42  ;;  %v2841_v31 = vmax.f32 %v6835_v16, %v6845_v50 }
 0x2ff   : > { %v2875_v43 = vrot.slane %v6845_v50, 1  ;;  %v2912_v17 = vrot.slane %v2911_v20, 1  ;;  %v3029_v34 = vmul.f32 %v3025_v9, %v8126_v57  ;;  %v2876_v39 = vrot.slane %v6853_v23, 1 }
 0x300   : > { %v2918_v28 = vrot.slane %v2917_v44, 1  ;;  %v2948_v32 = vadd.f32 %v2947_v62, %v2946_v55  ;;  %v2971_v4 = vadd.f32 %v2970_v1, %v2968_v3  ;;  %v2943_v51 = vrot.slane %v2942_v18, 1 }
 0x301   : > { %v2978_v52 = vrot.slane %v2977_v49, 2  ;;  %v3000_v29 = vadd.f32 %v2999_v7, %v2997_v5  ;;  %vm3054_vm14 = vcmask 760832   ;;  %v3006_v56 = vadd.f32 %v3005_v40, %v2998_v14  ;;  %v6885_v1 = vpop.permute.xlu1 %3354 }
 0x302   : > { %v3030_v0 = vrot.slane %v3028_v19, 4  ;;  %v3055_v16 = vsel %vm3054_vm14, %v6640_v13, %v6642_v58  ;;  %v3056_v2 = vsel %vm3054_vm14, %v6642_v58, %v6663_v46  ;;  %v2913_v50 = vadd.f32 %v2912_v17, %v2911_v20  ;;  %v6883_v20 = vpop.permute.xlu0 %3352 }
 0x303   : > { %v3036_v35 = vrot.slane %v3029_v34, 4  ;;  %v3059_v9 = vmul.f32 %v3055_v16, %v8299_v42  ;;  %vm3085_vm0 = vcmask 752640   ;;  %v2842_v55 = vmax.f32 %v6855_v10, %v6853_v23 }
 0x304   : > { %v2919_v3 = vadd.f32 %v2918_v28, %v2917_v44  ;;  %v2949_v62 = vrot.slane %v2948_v32, 1  ;;  %v3060_v5 = vmul.f32 %v3056_v2, %v8126_v57  ;;  %vm8460_vm7 = vcmask 1046528  }
 0x305   : > { %v6877_v14 = vsel %vm8460_vm7, %v2889_v15, %v2875_v43  ;;  %vm8462_vm12 = vcmp.lt.s32.totalorder %v6465_v26, 224  ;;  %v2944_v13 = vadd.f32 %v2943_v51, %v2942_v18  ;;  %v2979_v58 = vadd.f32 %v2978_v52, %v2977_v49  ;;  %vm8463_vm14 = vmmov %vm8460_vm7 }
 0x306   : > { %8461 = vst [vmem:[#allocation25_spill] sm:$0xff] %v6877_v14  ;;  %vm2921_vm10 = vmand %vm8462_vm12, %vm5706_vm8  ;;  %v3001_v46 = vrot.slane %v3000_v29, 2  ;;  %v2972_v23 = vrot.slane %v2971_v4, 2  ;;  %v3007_v44 = vrot.slane %v3006_v56, 2  ;;  %v3031_v7 = vadd.f32 %v3030_v0, %v3028_v19 }
 0x307   : > { %v3086_v15 = vsel %vm3085_vm0, %v6665_v48, %v6681_v45  ;;  %v6891_v10 = vsel %vm8463_vm14, %v2890_v6, %v2876_v39  ;;  %v2922_v40 = vsel %vm4897_vm9, %v2913_v50, 0.0  ;;  %v3037_v18 = vadd.f32 %v3036_v35, %v3029_v34  ;;  %vm8465_vm7 = vmmov %vm8462_vm12  ;;  %v6910_v50 = vpop.permute.xlu0 %3356  ;;  %v6912_v35 = vpop.permute.xlu1 %3383 }
 0x308   : > { %8464 = vst [vmem:[#allocation13_spill] sm:$0xff] %v6891_v10  ;;  %v3061_v49 = vrot.slane %v3059_v9, 4  ;;  %v2923_v43 = vsel %vm2921_vm10, %v2919_v3, 0.0  ;;  %v2950_v17 = vadd.f32 %v2949_v62, %v2948_v32  ;;  %v3067_v28 = vrot.slane %v3060_v5, 4  ;;  %vm6902_vm12 = vmand %vm8465_vm7, %vm5760_vm1 }
 0x309   : > { %v3087_v51 = vsel %vm3085_vm0, %v6681_v45, %v6683_v8  ;;  %v2953_v6 = vsel %vm4881_vm5, %v2944_v13, 0.0  ;;  %v2980_v19 = vrot.slane %v2979_v58, 1  ;;  %v3002_v34 = vadd.f32 %v3001_v46, %v3000_v29  ;;  %vm8468_vm10 = vmmov %vm8465_vm7 }
 0x30a   : > { %v3090_v39 = vmul.f32 %v3086_v15, %v8299_v42  ;;  %v2924_v32 = vmax.f32 %v2841_v31, %v2922_v40  ;;  %v2973_v52 = vadd.f32 %v2972_v23, %v2971_v4  ;;  %v3008_v0 = vadd.f32 %v3007_v44, %v3006_v56 }
 0x30b   : > { %v3032_v16 = vrot.slane %v3031_v7, 2  ;;  %v3038_v45 = vrot.slane %v3037_v18, 2  ;;  %v3062_v8 = vadd.f32 %v3061_v49, %v3059_v9  ;;  %v3091_v2 = vmul.f32 %v3087_v51, %v8126_v57 }
 0x30c   : > { %vm3122_vm0 = vcmask 687104   ;;  %v2925_v3 = vmax.f32 %v2842_v55, %v2923_v43  ;;  %v2954_v62 = vsel %vm6902_vm12, %v2950_v17, 0.0  ;;  %v2955_v29 = vmax.f32 %v2924_v32, %v2953_v6 }
 0x30d   : > { %v3068_v13 = vadd.f32 %v3067_v28, %v3060_v5  ;;  %v2981_v46 = vadd.f32 %v2980_v19, %v2979_v58  ;;  %v3003_v31 = vrot.slane %v3002_v34, 1  ;;  %v3092_v4 = vrot.slane %v3090_v39, 4 }
 0x30e   : > { %v3123_v56 = vsel %vm3122_vm0, %v6695_v63, %v6697_v37  ;;  %v2974_v9 = vrot.slane %v2973_v52, 1  ;;  %v3009_v23 = vrot.slane %v3008_v0, 1  ;;  %v3033_v44 = vadd.f32 %v3032_v16, %v3031_v7  ;;  %v6924_v7 = vpop.permute.xlu0 %3385  ;;  %v6926_v16 = vpop.permute.xlu1 %3387 }
 0x30f   : > { %v3124_v15 = vsel %vm3122_vm0, %v6697_v37, %v6713_v22  ;;  %v3150_v49 = vrot.slane %v2954_v62, 7  ;;  %v3039_v51 = vadd.f32 %v3038_v45, %v3037_v18  ;;  %v3063_v55 = vrot.slane %v3062_v8, 2  ;;  %v8470_v45 = vld [vmem:[#allocation28_spill] sm:$0xff]  ;;  %vm8472_vm0 = vmmov %vm8468_vm10 }
 0x310   : > { %v3098_v10 = vrot.slane %v3091_v2, 4  ;;  %v2956_v48 = vmax.f32 %v2925_v3, %v2954_v62  ;;  %v3149_v17 = vrot.slane %v2953_v6, 7  ;;  %v3069_v32 = vrot.slane %v3068_v13, 2 }
 0x311   : > { %v3127_v5 = vmul.f32 %v3123_v56, %v8299_v42  ;;  %v2983_v58 = vsel %vm8468_vm10, %v2981_v46, 0.0  ;;  %v3004_v28 = vadd.f32 %v3003_v31, %v3002_v34  ;;  %v3093_v63 = vadd.f32 %v3092_v4, %v3090_v39 }
 0x312   : > { %v3128_v19 = vmul.f32 %v3124_v15, %v8126_v57  ;;  %v2975_v37 = vadd.f32 %v2974_v9, %v2973_v52  ;;  %v3010_v22 = vadd.f32 %v3009_v23, %v3008_v0  ;;  %v3034_v18 = vrot.slane %v3033_v44, 1  ;;  %v8474_v52 = vld [vmem:[#allocation37_spill] sm:$0xff]  ;;  %v8477_v23 = vld [vmem:[#allocation19_spill] sm:$0xff] }
 0x313   : > { %vm7859_vm14 = vcmask 678912   ;;  %vm8469_vm7 = vcmask 1040384   ;;  %vm8471_vm12 = vnez %v8470_v45  ;;  %v3040_v3 = vrot.slane %v3039_v51, 1 }
 0x314   : > { %v3184_v6 = vsel %vm8469_vm7, %v2923_v43, %v3150_v49  ;;  %vm3012_vm1 = vmand %vm8472_vm0, %vm8471_vm12  ;;  %v3064_v34 = vadd.f32 %v3063_v55, %v3062_v8  ;;  %v3099_v39 = vadd.f32 %v3098_v10, %v3091_v2  ;;  %v6933_v62 = vmax.f32 %v2956_v48, %v2983_v58  ;;  %v8476_v43 = vld [vmem:[#allocation48_spill] sm:$0xff]  ;;  %v6943_v48 = vpop.permute.xlu0 %3414 }
 0x315   : > { %vm8473_vm10 = vmmov %vm8469_vm7  ;;  %v3070_v31 = vadd.f32 %v3069_v32, %v3068_v13  ;;  %v3129_v4 = vrot.slane %v3127_v5, 4  ;;  %vm8475_vm5 = vnez %v8474_v52  ;;  %v3094_v56 = vrot.slane %v3093_v63, 2 }
 0x316   : > { %v3183_v46 = vsel %vm8473_vm10, %v2922_v40, %v3149_v17  ;;  %v3013_v0 = vsel %vm8475_vm5, %v3004_v28, 0.0  ;;  %v3135_v9 = vrot.slane %v3128_v19, 4  ;;  %v3206_v15 = vsel %vm7859_vm14, %v8477_v23, %v8476_v43  ;;  %v6945_v17 = vpop.permute.xlu1 %3416 }
 0x317   : > { %vm8478_vm7 = vcmask 1041408   ;;  %v2984_v14 = vmax.f32 %v2955_v29, %v2975_v37  ;;  %v3014_v8 = vsel %vm3012_vm1, %v3010_v22, 0.0  ;;  %v3035_v10 = vadd.f32 %v3034_v18, %v3033_v44 }
 0x318   : > { %v3186_v49 = vsel %vm8478_vm7, %v3184_v6, %v2983_v58  ;;  %vm8479_vm0 = vmmov %vm8478_vm7  ;;  %v3041_v55 = vadd.f32 %v3040_v3, %v3039_v51  ;;  %v3065_v40 = vrot.slane %v3064_v34, 1  ;;  %v3100_v13 = vrot.slane %v3099_v39, 2 }
 0x319   : > { %v3185_v2 = vsel %vm8479_vm0, %v3183_v46, %v2975_v37  ;;  %v3015_v32 = vmax.f32 %v2984_v14, %v3013_v0  ;;  %vm8481_vm10 = vcmp.lt.s32.totalorder %v6465_v26, 224  ;;  %v3071_v23 = vrot.slane %v3070_v31, 1  ;;  %v8483_v14 = vld [vmem:[#allocation49_spill] sm:$0xff] }
 0x31a   : > { %vm3043_vm14 = vmand %vm8481_vm10, %vm5765_vm11  ;;  %v3130_v58 = vadd.f32 %v3129_v4, %v3127_v5  ;;  %v3210_v29 = vmul.f32 %v3206_v15, %v8299_v42  ;;  %v3016_v44 = vmax.f32 %v6933_v62, %v3014_v8  ;;  %v3095_v37 = vadd.f32 %v3094_v56, %v3093_v63  ;;  %v8485_v5 = vld [vmem:[#allocation47_spill] sm:$0xff]  ;;  %v8486_v4 = vld [vmem:[#allocation52_spill] sm:$0xff] }
 0x31b   : > { %v3136_v51 = vadd.f32 %v3135_v9, %v3128_v19  ;;  %vm3236_vm1 = vcmask 670720   ;;  %v3155_v22 = vrot.slane %v3013_v0, 5  ;;  %v3156_v18 = vrot.slane %v3014_v8, 5  ;;  %v6972_v8 = vpop.permute.xlu1 %3503 }
 0x31c   : > { %vm8482_vm7 = vnez %v8423_v54  ;;  %vm8484_vm0 = vcmask 678912   ;;  %v3045_v46 = vsel %vm3043_vm14, %v3041_v55, 0.0  ;;  %v3066_v28 = vadd.f32 %v3065_v40, %v3064_v34  ;;  %8490 = vst [vmem:[#allocation17_spill] sm:$0xff] %v6972_v8  ;;  %v8495_v54 = vld [vmem:[#allocation39_spill] sm:$0xff] }
 0x31d   : > { %v3044_v6 = vsel %vm8482_vm7, %v3035_v10, 0.0  ;;  %v3207_v3 = vsel %vm8484_vm0, %v8476_v43, %v8483_v14  ;;  %v3101_v52 = vadd.f32 %v3100_v13, %v3099_v39  ;;  %v3237_v15 = vsel %vm3236_vm1, %v8486_v4, %v8485_v5  ;;  %v6970_v43 = vpop.permute.xlu0 %3418  ;;  %v8494_v4 = vld [vmem:[#allocation51_spill] sm:$0xff] }
 0x31e   : > { %v3072_v62 = vadd.f32 %v3071_v23, %v3070_v31  ;;  %v3131_v63 = vrot.slane %v3130_v58, 2  ;;  %v3212_v19 = vrot.slane %v3210_v29, 4  ;;  %vm3267_vm10 = vcmask 662528  }
 0x31f   : > { %v3161_v0 = vrot.slane %v3044_v6, 4  ;;  %vm8487_vm7 = vcmp.lt.s32.totalorder %v6465_v26, 224  ;;  %v3096_v9 = vrot.slane %v3095_v37, 1  ;;  %v3137_v34 = vrot.slane %v3136_v51, 2 }
 0x320   : > { %vm6965_vm11 = vmand %vm8487_vm7, %vm5830_vm6  ;;  %v3211_v39 = vmul.f32 %v3207_v3, %v8126_v57  ;;  %vm8491_vm14 = vcmask 1042432   ;;  %v3046_v55 = vmax.f32 %v3015_v32, %v3044_v6  ;;  %v3241_v40 = vmul.f32 %v3237_v15, %v8299_v42  ;;  %v8493_v3 = vld [vmem:[#allocation18_spill] sm:$0xff] }
 0x321   : > { %v3187_v31 = vsel %vm8491_vm14, %v3185_v2, %v3155_v22  ;;  %vm8492_vm0 = vmmov %vm8491_vm14  ;;  %v3162_v13 = vrot.slane %v3045_v46, 4  ;;  %v3102_v23 = vrot.slane %v3101_v52, 1  ;;  %v3238_v14 = vsel %vm3236_vm1, %v8485_v5, %v6762_v21  ;;  %v6992_v56 = vpop.permute.xlu0 %3505 }
 0x322   : > { %v3188_v10 = vsel %vm8492_vm0, %v3186_v49, %v3156_v18  ;;  %v3268_v33 = vsel %vm3267_vm10, %v8494_v4, %v8493_v3  ;;  %vm8496_vm6 = vnez %v8495_v54  ;;  %v3076_v49 = vsel %vm6965_vm11, %v3072_v62, 0.0  ;;  %vm8503_vm0 = vmmov %vm8487_vm7 }
 0x323   : > { %v3075_v2 = vsel %vm8496_vm6, %v3066_v28, 0.0  ;;  %v3132_v32 = vadd.f32 %v3131_v63, %v3130_v58  ;;  %v3213_v22 = vadd.f32 %v3212_v19, %v3210_v29  ;;  %vm8497_vm14 = vcmask 1043456   ;;  %v6994_v58 = vpop.permute.xlu1 %3507  ;;  %v8500_v63 = vld [vmem:[#allocation46_spill] sm:$0xff] }
 0x324   : > { %v3189_v18 = vsel %vm8497_vm14, %v3187_v31, %v3161_v0  ;;  %v3097_v6 = vadd.f32 %v3096_v9, %v3095_v37  ;;  %v3138_v15 = vadd.f32 %v3137_v34, %v3136_v51  ;;  %v3218_v45 = vrot.slane %v3211_v39, 4  ;;  %vm8498_vm1 = vmmov %vm8497_vm14  ;;  %v8499_v51 = vld [vmem:[#allocation21_spill] sm:$0xff] }
 0x325   : > { %v3047_v30 = vmax.f32 %v3016_v44, %v3045_v46  ;;  %v3242_v21 = vmul.f32 %v3238_v14, %v8126_v57  ;;  %v3243_v5 = vrot.slane %v3241_v40, 4  ;;  %v3272_v8 = vmul.f32 %v3268_v33, %v8299_v42  ;;  %vm3105_vm14 = vmand %vm8503_vm0, %vm8446_vm2 }
 0x326   : > { %v3190_v4 = vsel %vm8498_vm1, %v3188_v10, %v3162_v13  ;;  %v3077_v54 = vmax.f32 %v3046_v55, %v3075_v2  ;;  %v3167_v28 = vrot.slane %v3075_v2, 3  ;;  %v3168_v41 = vrot.slane %v3076_v49, 3 }
 0x327   : > { %v3103_v29 = vadd.f32 %v3102_v23, %v3101_v52  ;;  %v3133_v62 = vrot.slane %v3132_v32, 1  ;;  %v3214_v37 = vrot.slane %v3213_v22, 2  ;;  %v3269_v44 = vsel %vm3267_vm10, %v8493_v3, %v8499_v51 }
 0x328   : > { %v3078_v46 = vmax.f32 %v3047_v30, %v3076_v49  ;;  %vm8501_vm11 = vnez %v8500_v63  ;;  %v3139_v0 = vrot.slane %v3138_v15, 1  ;;  %v3219_v9 = vadd.f32 %v3218_v45, %v3211_v39 }
 0x329   : > { %v3106_v33 = vsel %vm8501_vm11, %v3097_v6, 0.0  ;;  %v3244_v34 = vadd.f32 %v3243_v5, %v3241_v40  ;;  %v3249_v31 = vrot.slane %v3242_v21, 4  ;;  %v3274_v52 = vrot.slane %v3272_v8, 4  ;;  %v7012_v40 = vpop.permute.xlu0 %3533 }
 0x32a   : > { %vm3298_vm1 = vcmask 654336   ;;  %vm8504_vm7 = vcmask 1044480   ;;  %v3273_v30 = vmul.f32 %v3269_v44, %v8126_v57  ;;  %vm3327_vm10 = vcmask 646144  }
 0x32b   : > { %v3191_v10 = vsel %vm8504_vm7, %v3189_v18, %v3167_v28  ;;  %vm8505_vm6 = vmmov %vm8504_vm7  ;;  %v3173_v13 = vrot.slane %v3106_v33, 2  ;;  %v3107_v23 = vsel %vm3105_vm14, %v3103_v29, 0.0  ;;  %v3134_v14 = vadd.f32 %v3133_v62, %v3132_v32  ;;  %v7014_v18 = vpop.permute.xlu1 %3535 }
 0x32c   : > { %v3192_v55 = vsel %vm8505_vm6, %v3190_v4, %v3168_v41  ;;  %v3215_v3 = vadd.f32 %v3214_v37, %v3213_v22  ;;  %v3140_v2 = vadd.f32 %v3139_v0, %v3138_v15  ;;  %v3220_v49 = vrot.slane %v3219_v9, 2 }
 0x32d   : > { %v3299_v45 = vsel %vm3298_vm1, %v6830_v38, %v6809_v24  ;;  %v3300_v39 = vsel %vm3298_vm1, %v6809_v24, %v6811_v27  ;;  %vm8506_vm6 = vcmp.lt.s32.totalorder %v6465_v26, 208  ;;  %v3245_v41 = vrot.slane %v3244_v34, 2 }
 0x32e   : > { %vm3142_vm7 = vmand %vm8506_vm6, %vm5718_vm4  ;;  %v3250_v32 = vadd.f32 %v3249_v31, %v3242_v21  ;;  %v3275_v22 = vadd.f32 %v3274_v52, %v3272_v8  ;;  %v3328_v6 = vsel %vm3327_vm10, %v6832_v47, %v6863_v53  ;;  %v7023_v38 = vmax.f32 %v3077_v54, %v3106_v33  ;;  %v7042_v52 = vpop.permute.xlu0 %3537 }
 0x32f   : > { %v7025_v15 = vmax.f32 %v3078_v46, %v3107_v23  ;;  %v3174_v24 = vrot.slane %v3107_v23, 2  ;;  %v3280_v27 = vrot.slane %v3273_v30, 4  ;;  %v3143_v5 = vsel %vm4864_vm3, %v3134_v14, 0.0 }
 0x330   : > { %v3216_v4 = vrot.slane %v3215_v3, 1  ;;  %v3303_v28 = vmul.f32 %v3299_v45, %v8299_v42  ;;  %v3304_v29 = vmul.f32 %v3300_v39, %v8126_v57  ;;  %vm8507_vm0 = vcmask 1045504  }
 0x331   : > { %v3193_v8 = vsel %vm8507_vm0, %v3191_v10, %v3173_v13  ;;  %v7032_v21 = vsel %vm3142_vm7, %v3140_v2, 0.0  ;;  %v3221_v62 = vadd.f32 %v3220_v49, %v3219_v9  ;;  %v3332_v54 = vmul.f32 %v3328_v6, %v8299_v42  ;;  %vm8509_vm14 = vmmov %vm8507_vm0  ;;  %v7044_v10 = vpop.permute.xlu1 %3563 }
 0x332   : > { %8508 = vst [vmem:[#allocation24_spill] sm:$0xff] %v7032_v21  ;;  %v3246_v47 = vadd.f32 %v3245_v41, %v3244_v34  ;;  %v3251_v37 = vrot.slane %v3250_v32, 2  ;;  %v3276_v51 = vrot.slane %v3275_v22, 2  ;;  %v3329_v44 = vsel %vm3327_vm10, %v6863_v53, %v6865_v25 }
 0x333   : > { %v7039_v46 = vsel %vm8509_vm14, %v3192_v55, %v3174_v24  ;;  %v3145_v33 = vmax.f32 %v7023_v38, %v3143_v5  ;;  %v3179_v0 = vrot.slane %v3143_v5, 1  ;;  %v3281_v31 = vadd.f32 %v3280_v27, %v3273_v30 }
 0x334   : > { %8510 = vst [vmem:[#allocation55_spill] sm:$0xff] %v7039_v46  ;;  %v3146_v9 = vmax.f32 %v7025_v15, %v7032_v21  ;;  %v3217_v34 = vadd.f32 %v3216_v4, %v3215_v3  ;;  %v3305_v13 = vrot.slane %v3303_v28, 4  ;;  %v3311_v23 = vrot.slane %v3304_v29, 4 }
 0x335   : > { %v3222_v14 = vrot.slane %v3221_v62, 1  ;;  %v3334_v2 = vrot.slane %v3332_v54, 4  ;;  %v3333_v53 = vmul.f32 %v3329_v44, %v8126_v57  ;;  %vm3358_vm1 = vcmask 637952  }
 0x336   : > { %v3247_v25 = vrot.slane %v3246_v47, 1  ;;  %v3252_v55 = vadd.f32 %v3251_v37, %v3250_v32  ;;  %v3277_v49 = vadd.f32 %v3276_v51, %v3275_v22  ;;  %v3359_v30 = vsel %vm3358_vm1, %v6883_v20, %v6885_v1  ;;  %v7056_v22 = vpop.permute.xlu0 %3565  ;;  %v7058_v20 = vpop.permute.xlu1 %3567 }
 0x337   : > { %v3282_v45 = vrot.slane %v3281_v31, 2  ;;  %v3340_v39 = vrot.slane %v3333_v53, 4  ;;  %v3360_v41 = vsel %vm3358_vm1, %v6885_v1, %v6910_v50  ;;  %v3363_v3 = vmul.f32 %v3359_v30, %v8299_v42 }
 0x338   : > { %v3306_v38 = vadd.f32 %v3305_v13, %v3303_v28  ;;  %v3312_v15 = vadd.f32 %v3311_v23, %v3304_v29  ;;  %v3364_v24 = vmul.f32 %v3360_v41, %v8126_v57  ;;  %v3335_v27 = vadd.f32 %v3334_v2, %v3332_v54 }
 0x339   : > { %v3341_v5 = vadd.f32 %v3340_v39, %v3333_v53  ;;  %v3365_v32 = vrot.slane %v3363_v3, 4  ;;  %vm3389_vm10 = vcmask 629760   ;;  %vm8511_vm6 = vcmask 1046528  }
 0x33a   : > { %v7061_v4 = vsel %vm8511_vm6, %v3193_v8, %v3179_v0  ;;  %v3223_v1 = vadd.f32 %v3222_v14, %v3221_v62  ;;  %v3253_v50 = vrot.slane %v3252_v55, 1  ;;  %v3278_v37 = vrot.slane %v3277_v49, 1 }
 0x33b   : > { %8512 = vst [vmem:[#allocation34_spill] sm:$0xff] %v7061_v4  ;;  %v7065_v28 = vsel %vm4843_vm13, %v3217_v34, 0.0  ;;  %vm8513_vm7 = vcmp.lt.s32.totalorder %v6465_v26, 208  ;;  %v3248_v29 = vadd.f32 %v3247_v25, %v3246_v47  ;;  %v3283_v54 = vadd.f32 %v3282_v45, %v3281_v31 }
 0x33c   : > { %vm3225_vm0 = vmand %vm8513_vm7, %vm5735_vm15  ;;  %v3371_v51 = vrot.slane %v3364_v24, 4  ;;  %v3307_v44 = vrot.slane %v3306_v38, 2  ;;  %v3313_v13 = vrot.slane %v3312_v15, 2  ;;  %v3366_v23 = vadd.f32 %v3365_v32, %v3363_v3 }
 0x33d   : > { %v3390_v8 = vsel %vm3389_vm10, %v6912_v35, %v6924_v7  ;;  %v3336_v62 = vrot.slane %v3335_v27, 2  ;;  %v3342_v0 = vrot.slane %v3341_v5, 2  ;;  %v3391_v34 = vsel %vm3389_vm10, %v6924_v7, %v6926_v16  ;;  %vm8514_vm1 = vmmov %vm8513_vm7  ;;  %v7090_v16 = vpop.permute.xlu0 %3593 }
 0x33e   : > { %vm3420_vm14 = vcmask 621568   ;;  %v3228_v14 = vmax.f32 %v3145_v33, %v7065_v28  ;;  %v7078_v2 = vsel %vm3225_vm0, %v3223_v1, 0.0  ;;  %v3254_v47 = vadd.f32 %v3253_v50, %v3252_v55  ;;  %vm3256_vm6 = vmand %vm8514_vm1, %vm5706_vm8  ;;  %v7092_v33 = vpop.permute.xlu1 %3595 }
 0x33f   : > { %v3279_v31 = vadd.f32 %v3278_v37, %v3277_v49  ;;  %v3257_v35 = vsel %vm4897_vm9, %v3248_v29, 0.0  ;;  %v3372_v53 = vadd.f32 %v3371_v51, %v3364_v24  ;;  %v3394_v25 = vmul.f32 %v3390_v8, %v8299_v42  ;;  %v8515_v37 = vld [vmem:[#allocation30_spill] sm:$0xff] }
 0x340   : > { %v3421_v7 = vsel %vm3420_vm14, %v6943_v48, %v6945_v17  ;;  %v3284_v55 = vrot.slane %v3283_v54, 1  ;;  %v3308_v49 = vadd.f32 %v3307_v44, %v3306_v38  ;;  %v3367_v30 = vrot.slane %v3366_v23, 2  ;;  %v8519_v8 = vld [vmem:[#allocation26_spill] sm:$0xff] }
 0x341   : > { %v3395_v45 = vmul.f32 %v3391_v34, %v8126_v57  ;;  %v3229_v39 = vmax.f32 %v3146_v9, %v7078_v2  ;;  %v3314_v41 = vadd.f32 %v3313_v13, %v3312_v15  ;;  %v3337_v3 = vadd.f32 %v3336_v62, %v3335_v27  ;;  %v8517_v9 = vld [vmem:[#allocation17_spill] sm:$0xff]  ;;  %v7114_v34 = vpop.permute.xlu0 %3597 }
 0x342   : > { %v3343_v24 = vadd.f32 %v3342_v0, %v3341_v5  ;;  %v7096_v32 = vsel %vm3256_vm6, %v3254_v47, 0.0  ;;  %v3259_v1 = vmax.f32 %v3228_v14, %v3257_v35  ;;  %v3422_v48 = vsel %vm3420_vm14, %v6945_v17, %v6970_v43  ;;  %vm8521_vm14 = vmmov %vm8514_vm1  ;;  %v7116_v14 = vpop.permute.xlu1 %3625 }
 0x343   : > { %v3425_v50 = vmul.f32 %v3421_v7, %v8299_v42  ;;  %vm8516_vm10 = vnez %v8515_v37  ;;  %v3373_v29 = vrot.slane %v3372_v53, 2  ;;  %v3396_v51 = vrot.slane %v3394_v25, 4  ;;  %v8523_v7 = vld [vmem:[#allocation28_spill] sm:$0xff] }
 0x344   : > { %v7104_v38 = vsel %vm8516_vm10, %v3279_v31, 0.0  ;;  %vm8518_vm7 = vcmask 556032   ;;  %v3285_v27 = vadd.f32 %v3284_v55, %v3283_v54  ;;  %v3309_v5 = vrot.slane %v3308_v49, 1 }
 0x345   : > { %v3509_v15 = vsel %vm8518_vm7, %v8517_v9, %v6992_v56  ;;  %v3368_v44 = vadd.f32 %v3367_v30, %v3366_v23  ;;  %v3402_v13 = vrot.slane %v3395_v45, 4  ;;  %vm8520_vm0 = vnez %v8519_v8  ;;  %vm8524_vm7 = vmmov %vm8521_vm14 }
 0x346   : > { %vm3287_vm1 = vmand %vm8521_vm14, %vm8520_vm0  ;;  %v3315_v17 = vrot.slane %v3314_v41, 1  ;;  %v3338_v43 = vrot.slane %v3337_v3, 1  ;;  %v3344_v62 = vrot.slane %v3343_v24, 1  ;;  %v3426_v0 = vmul.f32 %v3422_v48, %v8126_v57 }
 0x347   : > { %v3260_v47 = vmax.f32 %v3229_v39, %v7096_v32  ;;  %v3447_v54 = vrot.slane %v3257_v35, 7  ;;  %v3427_v31 = vrot.slane %v3425_v50, 4  ;;  %v3513_v23 = vmul.f32 %v3509_v15, %v8299_v42  ;;  %vm3347_vm14 = vmand %vm8524_vm7, %vm8471_vm12 }
 0x348   : > { %v3374_v30 = vadd.f32 %v3373_v29, %v3372_v53  ;;  %v3397_v9 = vadd.f32 %v3396_v51, %v3394_v25  ;;  %v7122_v6 = vsel %vm3287_vm1, %v3285_v27, 0.0  ;;  %v7124_v4 = vadd.f32 %v3309_v5, %v3308_v49 }
 0x349   : > { %v3369_v48 = vrot.slane %v3368_v44, 1  ;;  %v3403_v46 = vadd.f32 %v3402_v13, %v3395_v45  ;;  %v3316_v21 = vadd.f32 %v3315_v17, %v3314_v41  ;;  %v3339_v8 = vadd.f32 %v3338_v43, %v3337_v3 }
 0x34a   : > { %v3345_v37 = vadd.f32 %v3344_v62, %v3343_v24  ;;  %v3433_v39 = vrot.slane %v3426_v0, 4  ;;  %vm8522_vm6 = vcmask 1040384   ;;  %v3290_v15 = vmax.f32 %v3259_v1, %v7104_v38  ;;  %v3628_v24 = vpop.permute.xlu0 %3627 }
 0x34b   : > { %v7128_v35 = vsel %vm8522_vm6, %v7065_v28, %v3447_v54  ;;  %v3428_v53 = vadd.f32 %v3427_v31, %v3425_v50  ;;  %v3515_v25 = vrot.slane %v3513_v23, 4  ;;  %v3291_v49 = vmax.f32 %v3260_v47, %v7122_v6  ;;  %v7139_v28 = vpop.permute.xlu1 %3623  ;;  %vm8526_vm6 = vmmov %vm8524_vm7 }
 0x34c   : > { %v3375_v45 = vrot.slane %v3374_v30, 1  ;;  %v3398_v41 = vrot.slane %v3397_v9, 2  ;;  %vm8525_vm1 = vcmask 556032   ;;  %v3319_v1 = vmax.f32 %v3290_v15, %v7124_v4 }
 0x34d   : > { %v3510_v3 = vsel %vm8525_vm1, %v6992_v56, %v6994_v58  ;;  %v3370_v29 = vadd.f32 %v3369_v48, %v3368_v44  ;;  %v3404_v51 = vrot.slane %v3403_v46, 2  ;;  %v7145_v50 = vsel %vm8526_vm6, %v3316_v21, 0.0 }
 0x34e   : > { %v3514_v27 = vmul.f32 %v3510_v3, %v8126_v57  ;;  %v7149_v13 = vsel %vm8475_vm5, %v3339_v8, 0.0  ;;  %v7151_v17 = vsel %vm3347_vm14, %v3345_v37, 0.0  ;;  %v3434_v56 = vadd.f32 %v3433_v39, %v3426_v0  ;;  %v8530_v8 = vld [vmem:[#allocation35_spill] sm:$0xff]  ;;  %v8535_v0 = vld [vmem:[#allocation40_spill] sm:$0xff]  ;;  %v7177_v15 = vpop.permute.xlu0 %3651 }
 0x34f   : > { %v3429_v58 = vrot.slane %v3428_v53, 2  ;;  %v3516_v43 = vadd.f32 %v3515_v25, %v3513_v23  ;;  %vm8528_vm7 = vcmask 547840   ;;  %v3376_v47 = vadd.f32 %v3375_v45, %v3374_v30  ;;  %v7179_v25 = vpop.permute.xlu1 %3653 }
 0x350   : > { %v3521_v62 = vrot.slane %v3514_v27, 4  ;;  %v3539_v44 = vsel %vm8528_vm7, %v7012_v40, %v7014_v18  ;;  %v3399_v54 = vadd.f32 %v3398_v41, %v3397_v9  ;;  %vm8529_vm1 = vmmov %vm8528_vm7  ;;  %vm8531_vm6 = vnez %v8530_v8 }
 0x351   : > { %v3540_v21 = vsel %vm8529_vm1, %v7014_v18, %v7042_v52  ;;  %v3543_v31 = vmul.f32 %v3539_v44, %v8299_v42  ;;  %vm8532_vm14 = vcmp.lt.s32.totalorder %v6465_v26, 208  ;;  %vm8536_vm12 = vnez %v8535_v0 }
 0x352   : > { %vm7164_vm5 = vmand %vm8532_vm14, %vm8531_vm6  ;;  %v7170_v23 = vsel %vm8536_vm12, %v3370_v29, 0.0  ;;  %v3405_v40 = vadd.f32 %v3404_v51, %v3403_v46  ;;  %v3522_v30 = vadd.f32 %v3521_v62, %v3514_v27  ;;  %v3544_v9 = vmul.f32 %v3540_v21, %v8126_v57 }
 0x353   : > { %v3320_v18 = vmax.f32 %v3291_v49, %v7145_v50  ;;  %v7175_v52 = vmax.f32 %v3319_v1, %v7149_v13  ;;  %v3435_v48 = vrot.slane %v3434_v56, 2  ;;  %v3545_v39 = vrot.slane %v3543_v31, 4 }
 0x354   : > { %v3430_v45 = vadd.f32 %v3429_v58, %v3428_v53  ;;  %v3517_v41 = vrot.slane %v3516_v43, 2  ;;  %v3551_v3 = vrot.slane %v3544_v9, 4  ;;  %vm8537_vm7 = vcmask 539648  }
 0x355   : > { %v3569_v46 = vsel %vm8537_vm7, %v7044_v10, %v7056_v22  ;;  %v7185_v29 = vmax.f32 %v3320_v18, %v7151_v17  ;;  %v7189_v49 = vsel %vm7164_vm5, %v3376_v47, 0.0  ;;  %v3381_v1 = vmax.f32 %v7175_v52, %v7170_v23  ;;  %vm8538_vm1 = vmmov %vm8537_vm7 }
 0x356   : > { %v3400_v51 = vrot.slane %v3399_v54, 1  ;;  %v3406_v27 = vrot.slane %v3405_v40, 1  ;;  %v3523_v62 = vrot.slane %v3522_v30, 2  ;;  %v3546_v53 = vadd.f32 %v3545_v39, %v3543_v31 }
 0x357   : > { %v3552_v58 = vadd.f32 %v3551_v3, %v3544_v9  ;;  %v3436_v44 = vadd.f32 %v3435_v48, %v3434_v56  ;;  %v3573_v21 = vmul.f32 %v3569_v46, %v8299_v42  ;;  %v3570_v10 = vsel %vm8538_vm1, %v7056_v22, %v7058_v20  ;;  %v7205_v9 = vpop.permute.xlu0 %3655  ;;  %v7207_v22 = vpop.permute.xlu1 %3793 }
 0x358   : > { %vm8539_vm14 = vcmask 531456   ;;  %v3431_v37 = vrot.slane %v3430_v45, 1  ;;  %v3518_v18 = vadd.f32 %v3517_v41, %v3516_v43  ;;  %v3547_v55 = vrot.slane %v3546_v53, 2 }
 0x359   : > { %v3599_v47 = vsel %vm8539_vm14, %v7090_v16, %v7092_v33  ;;  %v3574_v52 = vmul.f32 %v3570_v10, %v8126_v57  ;;  %v3553_v0 = vrot.slane %v3552_v58, 2  ;;  %v3575_v8 = vrot.slane %v3573_v21, 4  ;;  %vm8540_vm5 = vmmov %vm8539_vm14  ;;  %v8542_v10 = vld [vmem:[#allocation31_spill] sm:$0xff] }
 0x35a   : > { %v3600_v56 = vsel %vm8540_vm5, %v7092_v33, %v7114_v34  ;;  %v3603_v31 = vmul.f32 %v3599_v47, %v8299_v42  ;;  %v3401_v20 = vadd.f32 %v3400_v51, %v3399_v54  ;;  %v3524_v48 = vadd.f32 %v3523_v62, %v3522_v30 }
 0x35b   : > { %v3581_v16 = vrot.slane %v3574_v52, 4  ;;  %vm8541_vm7 = vcmask 523264   ;;  %v3407_v39 = vadd.f32 %v3406_v27, %v3405_v40  ;;  %v3437_v41 = vrot.slane %v3436_v44, 1 }
 0x35c   : > { %v3630_v43 = vsel %vm8541_vm7, %v7116_v14, %v3628_v24  ;;  %v3576_v3 = vadd.f32 %v3575_v8, %v3573_v21  ;;  %v3604_v46 = vmul.f32 %v3600_v56, %v8126_v57  ;;  %vm8543_vm1 = vnez %v8542_v10  ;;  %v8545_v21 = vld [vmem:[#allocation39_spill] sm:$0xff] }
 0x35d   : > { %vm8544_vm14 = vcmp.lt.s32.totalorder %v6465_v26, 208  ;;  %v3432_v33 = vadd.f32 %v3431_v37, %v3430_v45  ;;  %v3548_v34 = vadd.f32 %v3547_v55, %v3546_v53  ;;  %v3582_v47 = vadd.f32 %v3581_v16, %v3574_v52  ;;  %v7226_v45 = vpop.permute.xlu0 %3795 }
 0x35e   : > { %vm3409_vm5 = vmand %vm8544_vm14, %vm8543_vm1  ;;  %v3605_v5 = vrot.slane %v3603_v31, 4  ;;  %v3519_v54 = vrot.slane %v3518_v18, 1  ;;  %v3554_v30 = vadd.f32 %v3553_v0, %v3552_v58  ;;  %v3577_v51 = vrot.slane %v3576_v3, 2  ;;  %v7228_v0 = vpop.permute.xlu1 %3797 }
 0x35f   : > { %v3634_v62 = vmul.f32 %v3630_v43, %v8126_v57  ;;  %v3382_v24 = vmax.f32 %v7185_v29, %v7189_v49  ;;  %v3525_v8 = vrot.slane %v3524_v48, 1  ;;  %v3583_v40 = vrot.slane %v3582_v47, 2 }
 0x360   : > { %v3611_v27 = vrot.slane %v3604_v46, 4  ;;  %vm8546_vm7 = vnez %v8545_v21  ;;  %v7223_v10 = vsel %vm3409_vm5, %v3407_v39, 0.0  ;;  %v3438_v55 = vadd.f32 %v3437_v41, %v3436_v44  ;;  %vm8548_vm5 = vmmov %vm8544_vm14 }
 0x361   : > { %v7221_v56 = vsel %vm8546_vm7, %v3401_v20, 0.0  ;;  %v7232_v53 = vsel %vm8501_vm11, %v3432_v33, 0.0  ;;  %v3549_v29 = vrot.slane %v3548_v34, 1  ;;  %v3606_v58 = vadd.f32 %v3605_v5, %v3603_v31  ;;  %vm3440_vm7 = vmand %vm8548_vm5, %vm8446_vm2 }
 0x362   : > { %vm8547_vm1 = vcmask 523264   ;;  %v3520_v44 = vadd.f32 %v3519_v54, %v3518_v18  ;;  %v3555_v52 = vrot.slane %v3554_v30, 1  ;;  %v3578_v20 = vadd.f32 %v3577_v51, %v3576_v3  ;;  %v3682_v54 = vpop.permute.xlu0 %3681  ;;  %v3684_v61 = vpop.permute.xlu1 %3683 }
 0x363   : > { %v3629_v37 = vsel %vm8547_vm1, %v7139_v28, %v7116_v14  ;;  %v3641_v16 = vrot.slane %v3634_v62, 4  ;;  %v3412_v43 = vmax.f32 %v3381_v1, %v7221_v56  ;;  %v3526_v39 = vadd.f32 %v3525_v8, %v3524_v48 }
 0x364   : > { %v3584_v41 = vadd.f32 %v3583_v40, %v3582_v47  ;;  %v3612_v33 = vadd.f32 %v3611_v27, %v3604_v46  ;;  %v8549_v5 = vrot.slane %v7096_v32, 7  ;;  %vm8550_vm14 = vcmask 1040384  }
 0x365   : > { %v3454_v14 = vrot.slane %v7122_v6, 6  ;;  %v3413_v28 = vmax.f32 %v3382_v24, %v7223_v10  ;;  %vm8551_vm1 = vcmp.lt.s32.totalorder %v6465_v26, 192  ;;  %v3633_v18 = vmul.f32 %v3629_v37, %v8299_v42 }
 0x366   : > { %v3482_v31 = vsel %vm8550_vm14, %v7078_v2, %v8549_v5  ;;  %vm3528_vm5 = vmand %vm8551_vm1, %vm5718_vm4  ;;  %v7253_v1 = vsel %vm3440_vm7, %v3438_v55, 0.0  ;;  %v3443_v48 = vmax.f32 %v3412_v43, %v7232_v53  ;;  %v3550_v3 = vadd.f32 %v3549_v29, %v3548_v34 }
 0x367   : > { %v3607_v32 = vrot.slane %v3606_v58, 2  ;;  %v7258_v2 = vsel %vm4864_vm3, %v3520_v44, 0.0  ;;  %v3556_v6 = vadd.f32 %v3555_v52, %v3554_v30  ;;  %v3579_v46 = vrot.slane %v3578_v20, 1  ;;  %vm8552_vm4 = vmmov %vm8551_vm1 }
 0x368   : > { %v3642_v47 = vadd.f32 %v3641_v16, %v3634_v62  ;;  %v7260_v51 = vsel %vm3528_vm5, %v3526_v39, 0.0  ;;  %vm3558_vm7 = vmand %vm8552_vm4, %vm5735_vm15  ;;  %v3585_v24 = vrot.slane %v3584_v41, 1  ;;  %v3613_v8 = vrot.slane %v3612_v33, 2 }
 0x369   : > { %v3635_v34 = vrot.slane %v3633_v18, 4  ;;  %v8553_v40 = vrot.slane %v7104_v38, 6  ;;  %vm8554_vm3 = vcmask 1041408   ;;  %v3444_v62 = vmax.f32 %v3413_v28, %v7253_v1 }
 0x36a   : > { %vm8555_vm14 = vmmov %vm8554_vm3  ;;  %vm8556_vm1 = vcmask 515072   ;;  %v3531_v36 = vmax.f32 %v3443_v48, %v7258_v2  ;;  %v7278_v55 = vsel %vm4843_vm13, %v3550_v3, 0.0  ;;  %v3608_v29 = vadd.f32 %v3607_v32, %v3606_v58 }
 0x36b   : > { %v3483_v11 = vsel %vm8554_vm3, %v7128_v35, %v8553_v40  ;;  %v3484_v30 = vsel %vm8555_vm14, %v3482_v31, %v3454_v14  ;;  %v3657_v27 = vsel %vm8556_vm1, %v7177_v15, %v7179_v25  ;;  %vm8557_vm15 = vmmov %vm8556_vm1  ;;  %v7284_v35 = vmax.f32 %v3444_v62, %v7260_v51 }
 0x36c   : > { %v3658_v38 = vsel %vm8557_vm15, %v7179_v25, %v7205_v9  ;;  %v7286_v37 = vsel %vm3558_vm7, %v3556_v6, 0.0  ;;  %v3580_v44 = vadd.f32 %v3579_v46, %v3578_v20  ;;  %v3643_v52 = vrot.slane %v3642_v47, 2  ;;  %vm3588_vm7 = vmand %vm8552_vm4, %vm5706_vm8  ;;  %v3686_v20 = vpop.permute.xlu0 %3685 }
 0x36d   : > { %v3586_v16 = vadd.f32 %v3585_v24, %v3584_v41  ;;  %v3614_v15 = vadd.f32 %v3613_v8, %v3612_v33  ;;  %v3636_v43 = vadd.f32 %v3635_v34, %v3633_v18  ;;  %v3661_v39 = vmul.f32 %v3657_v27, %v8299_v42  ;;  %v3712_v41 = vpop.permute.xlu1 %3711 }
 0x36e   : > { %vm8558_vm13 = vcmask 1042432   ;;  %v3561_v25 = vmax.f32 %v3531_v36, %v7278_v55  ;;  %v3662_v9 = vmul.f32 %v3658_v38, %v8126_v57  ;;  %v3562_v33 = vmax.f32 %v7284_v35, %v7286_v37 }
 0x36f   : > { %v7291_v59 = vsel %vm8558_vm13, %v3483_v11, %v7124_v4  ;;  %vm8559_vm5 = vmmov %vm8558_vm13  ;;  %v3609_v4 = vrot.slane %v3608_v29, 1  ;;  %v3663_v5 = vrot.slane %v3661_v39, 4  ;;  %vm8560_vm3 = vcmask 490496  }
 0x370   : > { %v7295_v58 = vsel %vm8559_vm5, %v3484_v30, %v7145_v50  ;;  %v3799_v50 = vsel %vm8560_vm3, %v7207_v22, %v7226_v45  ;;  %v7310_v31 = vsel %vm4897_vm9, %v3580_v44, 0.0  ;;  %v3644_v60 = vadd.f32 %v3643_v52, %v3642_v47  ;;  %vm8561_vm8 = vmmov %vm8560_vm3  ;;  %v3714_v27 = vpop.permute.xlu0 %3713 }
 0x371   : > { %v3669_v14 = vrot.slane %v3662_v9, 4  ;;  %v3803_v28 = vmul.f32 %v3799_v50, %v8299_v42  ;;  %v7313_v18 = vsel %vm3588_vm7, %v3586_v16, 0.0  ;;  %v3615_v48 = vrot.slane %v3614_v15, 1  ;;  %v3716_v36 = vpop.permute.xlu1 %3715  ;;  %vm8568_vm13 = vmmov %vm8552_vm4 }
 0x372   : > { %v3637_v3 = vrot.slane %v3636_v43, 2  ;;  %v3664_v32 = vadd.f32 %v3663_v5, %v3661_v39  ;;  %v3800_v24 = vsel %vm8561_vm8, %v7226_v45, %v7228_v0  ;;  %vm8562_vm14 = vcmask 506880   ;;  %vm3618_vm5 = vmand %vm8568_vm13, %vm8520_vm0 }
 0x373   : > { %v3670_v6 = vadd.f32 %v3669_v14, %v3662_v9  ;;  %v3805_v46 = vrot.slane %v3803_v28, 4  ;;  %v3687_v22 = vsel %vm8562_vm14, %v3682_v54, %v3684_v61  ;;  %v3610_v12 = vadd.f32 %v3609_v4, %v3608_v29  ;;  %vm8563_vm9 = vmmov %vm8562_vm14  ;;  %v8576_v14 = vld [vmem:[#allocation37_spill] sm:$0xff] }
 0x374   : > { %v3665_v8 = vrot.slane %v3664_v32, 2  ;;  %v3804_v47 = vmul.f32 %v3800_v24, %v8126_v57  ;;  %v3688_v34 = vsel %vm8563_vm9, %v3684_v61, %v3686_v20  ;;  %v3691_v30 = vmul.f32 %v3687_v22, %v8299_v42  ;;  %vm8571_vm0 = vmmov %vm8552_vm4 }
 0x375   : > { %v3671_v40 = vrot.slane %v3670_v6, 2  ;;  %v3806_v11 = vadd.f32 %v3805_v46, %v3803_v28  ;;  %v3692_v62 = vmul.f32 %v3688_v34, %v8126_v57  ;;  %v7324_v38 = vmax.f32 %v3561_v25, %v7310_v31  ;;  %vm8573_vm3 = vmmov %vm8571_vm0 }
 0x376   : > { %v3616_v45 = vadd.f32 %v3615_v48, %v3614_v15  ;;  %v3645_v0 = vrot.slane %v3644_v60, 1  ;;  %v3811_v54 = vrot.slane %v3804_v47, 4  ;;  %v3638_v29 = vadd.f32 %v3637_v3, %v3636_v43  ;;  %vm8579_vm14 = vmmov %vm8571_vm0 }
 0x377   : > { %v3807_v35 = vrot.slane %v3806_v11, 2  ;;  %v3693_v44 = vrot.slane %v3691_v30, 4  ;;  %v3699_v52 = vrot.slane %v3692_v62, 4  ;;  %v3666_v16 = vadd.f32 %v3665_v8, %v3664_v32 }
 0x378   : > { %v3812_v61 = vadd.f32 %v3811_v54, %v3804_v47  ;;  %vm8564_vm1 = vcmask 498688   ;;  %v3672_v20 = vadd.f32 %v3671_v40, %v3670_v6  ;;  %v7330_v25 = vsel %vm8516_vm10, %v3610_v12, 0.0  ;;  %vm8570_vm10 = vmmov %vm8552_vm4 }
 0x379   : > { %v3717_v39 = vsel %vm8564_vm1, %v3712_v41, %v3714_v27  ;;  %vm8565_vm15 = vmmov %vm8564_vm1  ;;  %v3808_v4 = vadd.f32 %v3807_v35, %v3806_v11  ;;  %v3694_v5 = vadd.f32 %v3693_v44, %v3691_v30  ;;  %v3700_v50 = vadd.f32 %v3699_v52, %v3692_v62 }
 0x37a   : > { %v3718_v9 = vsel %vm8565_vm15, %v3714_v27, %v3716_v36  ;;  %v3813_v15 = vrot.slane %v3812_v61, 2  ;;  %v3721_v43 = vmul.f32 %v3717_v39, %v8299_v42  ;;  %v3646_v48 = vadd.f32 %v3645_v0, %v3644_v60  ;;  %vm3818_vm4 = vmand %vm8571_vm0, %vm8446_vm2 }
 0x37b   : > { %v3722_v28 = vmul.f32 %v3718_v9, %v8126_v57  ;;  %v3809_v3 = vrot.slane %v3808_v4, 1  ;;  %v3695_v32 = vrot.slane %v3694_v5, 2  ;;  %v3701_v46 = vrot.slane %v3700_v50, 2  ;;  %vm8588_vm1 = vmmov %vm8571_vm0 }
 0x37c   : > { %v3667_v6 = vrot.slane %v3666_v16, 1  ;;  %v3814_v24 = vadd.f32 %v3813_v15, %v3812_v61  ;;  %v3723_v22 = vrot.slane %v3721_v43, 4  ;;  %v3459_v12 = vrot.slane %v7149_v13, 4 }
 0x37d   : > { %v3729_v8 = vrot.slane %v3722_v28, 4  ;;  %v3592_v47 = vmax.f32 %v3562_v33, %v7313_v18  ;;  %v3639_v42 = vrot.slane %v3638_v29, 1  ;;  %v3673_v34 = vrot.slane %v3672_v20, 1 }
 0x37e   : > { %v3621_v57 = vmax.f32 %v7324_v38, %v7330_v25  ;;  %v3810_v60 = vadd.f32 %v3809_v3, %v3808_v4  ;;  %v3815_v40 = vrot.slane %v3814_v24, 1  ;;  %v3696_v11 = vadd.f32 %v3695_v32, %v3694_v5 }
 0x37f   : > { %v7342_v30 = vsel %vm3618_vm5, %v3616_v45, 0.0  ;;  %v7346_v62 = vsel %vm8570_vm10, %v3646_v48, 0.0  ;;  %v3702_v33 = vadd.f32 %v3701_v46, %v3700_v50  ;;  %v3724_v27 = vadd.f32 %v3723_v22, %v3721_v43 }
 0x380   : > { %v3668_v36 = vadd.f32 %v3667_v6, %v3666_v16  ;;  %v3816_v0 = vadd.f32 %v3815_v40, %v3814_v24  ;;  %v3697_v38 = vrot.slane %v3696_v11, 1  ;;  %v3730_v54 = vadd.f32 %v3729_v8, %v3722_v28 }
 0x381   : > { %v7352_v35 = vadd.f32 %v3639_v42, %v3638_v29  ;;  %v3674_v44 = vadd.f32 %v3673_v34, %v3672_v20  ;;  %v3703_v45 = vrot.slane %v3702_v33, 1  ;;  %v3725_v52 = vrot.slane %v3724_v27, 2 }
 0x382   : > { %vm8572_vm7 = vnez %v8523_v7  ;;  %v3819_v16 = vsel %vm8501_vm11, %v3810_v60, 0.0  ;;  %v3820_v61 = vsel %vm3818_vm4, %v3816_v0, 0.0  ;;  %v3698_v39 = vadd.f32 %v3697_v38, %v3696_v11  ;;  %vm3706_vm11 = vmand %vm8579_vm14, %vm8531_vm6 }
 0x383   : > { %vm7359_vm8 = vmand %vm8573_vm3, %vm8572_vm7  ;;  %v3731_v9 = vrot.slane %v3730_v54, 2  ;;  %v3622_v29 = vmax.f32 %v3592_v47, %v7342_v30  ;;  %v3825_v20 = vcombine.low %v3819_v16, %v3820_v61  ;;  %v3704_v4 = vadd.f32 %v3703_v45, %v3702_v33  ;;  %v8592_v45 = vld [vmem:[#allocation24_spill] sm:$0xff] }
 0x384   : > { %v3726_v5 = vadd.f32 %v3725_v52, %v3724_v27  ;;  %v3460_v50 = vrot.slane %v7151_v17, 4  ;;  %v3465_v7 = vrot.slane %v7170_v23, 3  ;;  %vm8577_vm2 = vnez %v8576_v14  ;;  %v8580_v17 = vld [vmem:[#allocation56_spill] sm:$0xff]  ;;  %v8594_v52 = vld [vmem:[#allocation55_spill] sm:$0xff]  ;;  %v8604_v14 = vld [vmem:[#allocation14_spill] sm:$0xff] }
 0x385   : > { %v3677_v15 = vsel %vm8577_vm2, %v3668_v36, 0.0  ;;  %v3732_v63 = vadd.f32 %v3731_v9, %v3730_v54  ;;  %v3650_v28 = vmax.f32 %v3622_v29, %v7346_v62  ;;  %v3649_v48 = vmax.f32 %v3621_v57, %v7352_v35  ;;  %v8586_v57 = vld [vmem:[#allocation31_spill] sm:$0xff] }
 0x386   : > { %v7378_v3 = vsel %vm7359_vm8, %v3674_v44, 0.0  ;;  %v3832_v32 = vrot.slane %v3825_v20, %v8580_v17  ;;  %v8582_v23 = vlaneseq  ;;  %v3707_v6 = vsel %vm8536_vm12, %v3698_v39, 0.0 }
 0x387   : > { %v3727_v24 = vrot.slane %v3726_v5, 1  ;;  %v3733_v22 = vrot.slane %v3732_v63, 1  ;;  %v3466_v8 = vrot.slane %v7189_v49, 3  ;;  %v3679_v47 = vmax.f32 %v3649_v48, %v3677_v15 }
 0x388   : > { %vm7387_vm9 = vcmp.lt.s32.totalorder %v8582_v23, 256  ;;  %v3839_v42 = vrot.slane %v3832_v32, %v8580_v17  ;;  %v7395_v34 = vsel %vm3706_vm11, %v3704_v4, 0.0  ;;  %vm8587_vm6 = vnez %v8586_v57  ;;  %v8607_v17 = vld [vmem:[#allocation58_spill] sm:$0xff] }
 0x389   : > { %vm3736_vm15 = vmand %vm8588_vm1, %vm8587_vm6  ;;  %v3471_v60 = vrot.slane %v7221_v56, 2  ;;  %v3680_v40 = vmax.f32 %v3650_v28, %v7378_v3  ;;  %v3728_v11 = vadd.f32 %v3727_v24, %v3726_v5  ;;  %v3734_v33 = vadd.f32 %v3733_v22, %v3732_v63  ;;  %v8606_v28 = vld [vmem:[#allocation50_spill] sm:$0xff]  ;;  %v8611_v24 = vld [vmem:[#allocation11_spill] sm:$0xff] }
 0x38a   : > { %v3472_v27 = vrot.slane %v7223_v10, 2  ;;  %v3477_v49 = vrot.slane %v7232_v53, 1  ;;  %v3743_v36 = vrot.slane %v7278_v55, 7  ;;  %4185 = vst.msk [vmem:[%s7384_s10 + $0xa0] ss:$8 sm:$0x3] %vm7387_vm9, %v3839_v42  ;;  %v3709_v0 = vmax.f32 %v3679_v47, %v3707_v6 }
 0x38b   : > { %v3749_v38 = vrot.slane %v7310_v31, 6  ;;  %v3710_v26 = vmax.f32 %v3680_v40, %v7395_v34  ;;  %vm8589_vm12 = vnez %v8545_v21  ;;  %v7413_v54 = vsel %vm3736_vm15, %v3734_v33, 0.0  ;;  %v8615_v33 = vld [vmem:[#allocation34_spill] sm:$0xff] }
 0x38c   : > { %v3737_v56 = vsel %vm8589_vm12, %v3728_v11, 0.0  ;;  %vm8590_vm13 = vcmask 1043456   ;;  %v3755_v55 = vrot.slane %v7330_v25, 5  ;;  %v8593_v31 = vrot.slane %v8592_v45, 1 }
 0x38d   : > { %v3487_v10 = vsel %vm8590_vm13, %v7291_v59, %v3459_v12  ;;  %vm8591_vm5 = vmmov %vm8590_vm13  ;;  %v3739_v44 = vmax.f32 %v3709_v0, %v3737_v56  ;;  %vm8595_vm10 = vcmask 1046528   ;;  %vm8596_vm0 = vcmask 1044480  }
 0x38e   : > { %v3488_v53 = vsel %vm8591_vm5, %v7295_v58, %v3460_v50  ;;  %v7426_v19 = vsel %vm8595_vm10, %v8594_v52, %v8593_v31  ;;  %v3489_v21 = vsel %vm8596_vm0, %v3487_v10, %v3465_v7  ;;  %vm8597_vm4 = vmmov %vm8596_vm0  ;;  %v3740_v13 = vmax.f32 %v3710_v26, %v7413_v54  ;;  %v8620_v31 = vld [vmem:[#allocation43_spill] sm:$0xff] }
 0x38f   : > { %v3490_v39 = vsel %vm8597_vm4, %v3488_v53, %v3466_v8  ;;  %vm8598_vm7 = vcmask 1045504   ;;  %vm8600_vm8 = vcmask 1040384   ;;  %v3821_v25 = vmax.f32 %v3739_v44, %v3819_v16  ;;  %vm8601_vm2 = vmmov %vm8595_vm10  ;;  %v8612_v8 = vld [vmem:[#allocation15_spill] sm:$0xff] }
 0x390   : > { %v3491_v59 = vsel %vm8598_vm7, %v3489_v21, %v3471_v60  ;;  %vm8599_vm3 = vmmov %vm8598_vm7  ;;  %v3777_v58 = vsel %vm8600_vm8, %v7258_v2, %v3743_v36  ;;  %v3478_v9 = vrot.slane %v7253_v1, 1  ;;  %vm8602_vm14 = vcmask 1041408  }
 0x391   : > { %v3492_v12 = vsel %vm8599_vm3, %v3490_v39, %v3472_v27  ;;  %v3493_v29 = vsel %vm8601_vm2, %v3491_v59, %v3477_v49  ;;  %v3779_v20 = vsel %vm8602_vm14, %v3777_v58, %v3749_v38  ;;  %v3761_v4 = vrot.slane %v3677_v15, 3  ;;  %vm8605_vm9 = vmmov %vm8591_vm5  ;;  %v8608_v15 = vld [vmem:[#allocation68_spill] sm:$0xff]  ;;  %v3980_v60 = vld [vmem:[%s7384_s10 + $0xa0] sm:$0x1] }
 0x392   : > { %v3744_v5 = vrot.slane %v7286_v37, 7  ;;  %v3750_v50 = vrot.slane %v7313_v18, 6  ;;  %vm8603_vm11 = vcmask 1042432   ;;  %v3859_v43 = vrot.slane %v3821_v25, %v8604_v14  ;;  %v8609_v37 = vld [vmem:[#allocation9_spill] sm:$0xff]  ;;  %vm8610_vm6 = vmmov %vm8596_vm0  ;;  %v8623_v58 = vld [vmem:[#allocation44_spill] sm:$0xff] }
 0x393   : > { %v3781_v7 = vsel %vm8603_vm11, %v3779_v20, %v3755_v55  ;;  %v3767_v2 = vrot.slane %v3707_v6, 2  ;;  %v3773_v16 = vrot.slane %v3737_v56, 1  ;;  %v3822_v1 = vmax.f32 %v3740_v13, %v3820_v61  ;;  %v8613_v61 = vld [vmem:[#allocation25_spill] sm:$0xff]  ;;  %vm8614_vm1 = vmmov %vm8599_vm3 }
 0x394   : > { %v3783_v63 = vsel %vm8605_vm9, %v3781_v7, %v7352_v35  ;;  %v3864_v48 = vsub.f32 %v8606_v28, %v3859_v43  ;;  %v3866_v32 = vsub.f32 %v8607_v17, %v3859_v43  ;;  %v3868_v23 = vsub.f32 %v8608_v15, %v3859_v43  ;;  %vm8616_vm15 = vmmov %vm8601_vm2  ;;  %v8622_v13 = vld [vmem:[#allocation41_spill] sm:$0xff]  ;;  %v8625_v7 = vld [vmem:[#allocation10_spill] sm:$0xff] }
 0x395   : > { %v3870_v46 = vsub.f32 %v8609_v37, %v3859_v43  ;;  %v3756_v18 = vrot.slane %v7342_v30, 5  ;;  %v3785_v41 = vsel %vm8610_vm6, %v3783_v63, %v3761_v4  ;;  %v3924_v22 = vsub.f32 %v8611_v24, %v3859_v43  ;;  %vm8617_vm12 = vmmov %vm8601_vm2  ;;  %v8624_v20 = vld [vmem:[#allocation57_spill] sm:$0xff] }
 0x396   : > { %v3926_v35 = vsub.f32 %v8612_v8, %v3859_v43  ;;  %v3872_v47 = vmul.f32 1.442695, %v3864_v48  ;;  %v3876_v6 = vmul.f32 1.442695, %v3866_v32  ;;  %v3880_v42 = vmul.f32 1.442695, %v3868_v23  ;;  %vm8618_vm13 = vmmov %vm8600_vm8 }
 0x397   : > { %v3928_v57 = vsub.f32 %v8613_v61, %v3859_v43  ;;  %v3787_v40 = vsel %vm8614_vm1, %v3785_v41, %v3767_v2  ;;  %v3884_v11 = vmul.f32 1.442695, %v3870_v46  ;;  %v3930_v27 = vsub.f32 %v8615_v33, %v3859_v43  ;;  %vm8619_vm5 = vmmov %vm8602_vm14  ;;  %v8627_v63 = vld [vmem:[#allocation45_spill] sm:$0xff] }
 0x398   : > { %v7457_v49 = vrot.slane %v3822_v1, %v8604_v14  ;;  %v3789_v30 = vsel %vm8616_vm15, %v3787_v40, %v3773_v16  ;;  %4290 = vpow2.f32 %v3872_v47  ;;  %v3932_v36 = vmul.f32 1.442695, %v3924_v22  ;;  %vm8621_vm10 = vmmov %vm8603_vm11  ;;  %v8628_v1 = vld [vmem:[#allocation13_spill] sm:$0xff] }
 0x399   : > { %v3982_v0 = vsub.f32 %v3493_v29, %v3859_v43  ;;  %v3494_v38 = vsel %vm8617_vm12, %v3492_v12, %v3478_v9  ;;  %4292 = vpow2.f32 %v3876_v6  ;;  %v3936_v26 = vmul.f32 1.442695, %v3926_v35  ;;  %vm8626_vm0 = vmmov %vm8605_vm9 }
 0x39a   : > { %v3984_v56 = vsub.f32 %v3789_v30, %v3859_v43  ;;  %v3778_v10 = vsel %vm8618_vm13, %v7260_v51, %v3744_v5  ;;  %4294 = vpow2.f32 %v3880_v42  ;;  %v3940_v53 = vmul.f32 1.442695, %v3928_v57  ;;  %vm8629_vm7 = vmmov %vm8614_vm1 }
 0x39b   : > { %v3986_v55 = vsub.f32 %v3980_v60, %v3859_v43  ;;  %v3780_v44 = vsel %vm8619_vm5, %v3778_v10, %v3750_v50  ;;  %4296 = vpow2.f32 %v3884_v11  ;;  %v3944_v45 = vmul.f32 1.442695, %v3930_v27  ;;  %vm8630_vm3 = vmmov %vm8601_vm2 }
 0x39c   : > { %v3865_v52 = vsub.f32 %v8620_v31, %v7457_v49  ;;  %v3782_v21 = vsel %vm8621_vm10, %v3780_v44, %v3756_v18  ;;  %4298 = vpow2.f32 %v3932_v36  ;;  %v3988_v39 = vmul.f32 1.442695, %v3982_v0  ;;  %v3981_v18 = vld [vmem:[%s7384_s10 + $0xa8] sm:$0x1]  ;;  %vm8631_vm2 = vmmov %vm8600_vm8 }
 0x39d   : > { %v3867_v59 = vsub.f32 %v8622_v13, %v7457_v49  ;;  %v3762_v12 = vrot.slane %v7378_v3, 3  ;;  %4300 = vpow2.f32 %v3936_v26  ;;  %v3992_v51 = vmul.f32 1.442695, %v3984_v56 }
 0x39e   : > { %v3869_v25 = vsub.f32 %v8623_v58, %v7457_v49  ;;  %v3768_v9 = vrot.slane %v7395_v34, 2  ;;  %4302 = vpow2.f32 %v3940_v53  ;;  %v3996_v29 = vmul.f32 1.442695, %v3986_v55 }
 0x39f   : > { %v3871_v4 = vsub.f32 %v8624_v20, %v7457_v49  ;;  %4304 = vpow2.f32 %v3944_v45  ;;  %v3774_v5 = vrot.slane %v7413_v54, 1  ;;  %v3874_v50 = vmul.f32 1.442695, %v3865_v52 }
 0x3a0   : > { %v3925_v14 = vsub.f32 %v8625_v7, %v7457_v49  ;;  %v3784_v3 = vsel %vm8626_vm0, %v3782_v21, %v7346_v62  ;;  %4306 = vpow2.f32 %v3988_v39  ;;  %v3878_v43 = vmul.f32 1.442695, %v3867_v59 }
 0x3a1   : > { %v3927_v34 = vsub.f32 %v8627_v63, %v7457_v49  ;;  %v3786_v2 = vsel %vm8597_vm4, %v3784_v3, %v3762_v12  ;;  %4308 = vpow2.f32 %v3992_v51  ;;  %v3882_v16 = vmul.f32 1.442695, %v3869_v25 }
 0x3a2   : > { %v3929_v54 = vsub.f32 %v8628_v1, %v7457_v49  ;;  %v7485_v28 = vpop.eup %4290  ;;  %v3788_v48 = vsel %vm8629_vm7, %v3786_v2, %v3768_v9  ;;  %4310 = vpow2.f32 %v3996_v29  ;;  %v3886_v17 = vmul.f32 1.442695, %v3871_v4 }
 0x3a3   : > { %v3931_v62 = vsub.f32 %v7426_v19, %v7457_v49  ;;  %v7490_v32 = vpop.eup %4292  ;;  %v3790_v15 = vsel %vm8630_vm3, %v3788_v48, %v3774_v5  ;;  %4312 = vpow2.f32 %v3874_v50  ;;  %v3934_v23 = vmul.f32 1.442695, %v3925_v14 }
 0x3a4   : > { %v3983_v37 = vsub.f32 %v3494_v38, %v7457_v49  ;;  %v7494_v46 = vpop.eup %4294  ;;  %v3896_v41 = vadd.f32 %v7490_v32, %v7485_v28  ;;  %4314 = vpow2.f32 %v3878_v43  ;;  %v3938_v24 = vmul.f32 1.442695, %v3927_v34 }
 0x3a5   : > { %v3985_v22 = vsub.f32 %v3790_v15, %v7457_v49  ;;  %v7500_v8 = vpop.eup %4296  ;;  %4316 = vpow2.f32 %v3882_v16  ;;  %v3942_v19 = vmul.f32 1.442695, %v3929_v54  ;;  %v3987_v35 = vsub.f32 %v3981_v18, %v7457_v49 }
 0x3a6   : > { %v7503_v47 = vpop.eup %4298  ;;  %v3897_v6 = vadd.f32 %v7494_v46, %v3896_v41  ;;  %4318 = vpow2.f32 %v3886_v17  ;;  %v3946_v42 = vmul.f32 1.442695, %v3931_v62  ;;  %v3990_v57 = vmul.f32 1.442695, %v3983_v37 }
 0x3a7   : > { %v7506_v61 = vpop.eup %4300  ;;  %4320 = vpow2.f32 %v3934_v23  ;;  %v3994_v33 = vmul.f32 1.442695, %v3985_v22  ;;  %v3998_v49 = vmul.f32 1.442695, %v3987_v35 }
 0x3a8   : > { %v7508_v60 = vpop.eup %4302  ;;  %v3898_v40 = vadd.f32 %v7500_v8, %v3897_v6  ;;  %v3956_v11 = vadd.f32 %v7506_v61, %v7503_v47  ;;  %4322 = vpow2.f32 %v3938_v24 }
 0x3a9   : > { %v7513_v27 = vpop.eup %4304  ;;  %4324 = vpow2.f32 %v3942_v19 }
 0x3aa   : > { %v7515_v30 = vpop.eup %4306  ;;  %v3899_v36 = vrot.slane %v3898_v40, 4  ;;  %v3957_v0 = vadd.f32 %v7508_v60, %v3956_v11  ;;  %4326 = vpow2.f32 %v3946_v42 }
 0x3ab   : > { %v7518_v38 = vpop.eup %4308  ;;  %4328 = vpow2.f32 %v3990_v57 }
 0x3ac   : > { %v4311_v26 = vpop.eup %4310  ;;  %v3900_v56 = vadd.f32 %v3899_v36, %v3898_v40  ;;  %v3958_v10 = vadd.f32 %v7513_v27, %v3957_v0  ;;  %v4006_v53 = vadd.f32 %v7518_v38, %v7515_v30  ;;  %4330 = vpow2.f32 %v3994_v33 }
 0x3ad   : > { %v7523_v55 = vpop.eup %4312  ;;  %4004 = vst [vmem:[%s7384_s10 + $0xa0] sm:$0x1] %v4311_v26  ;;  %v4007_v44 = vsel %vm8600_vm8, %v4311_v26, 0.0  ;;  %4332 = vpow2.f32 %v3998_v49 }
 0x3ae   : > { %v7527_v45 = vpop.eup %4314  ;;  %v3901_v31 = vrot.slane %v3900_v56, 2  ;;  %v3959_v52 = vrot.slane %v3958_v10, 4  ;;  %v4008_v21 = vadd.f32 %v4007_v44, %v4006_v53 }
 0x3af   : > { %v7529_v39 = vpop.eup %4316  ;;  %v3905_v13 = vadd.f32 %v7527_v45, %v7523_v55 }
 0x3b0   : > { %v7533_v59 = vpop.eup %4318  ;;  %v3902_v12 = vadd.f32 %v3901_v31, %v3900_v56  ;;  %v3960_v51 = vadd.f32 %v3959_v52, %v3958_v10  ;;  %v4009_v58 = vrot.slane %v4008_v21, 4 }
 0x3b1   : > { %v7535_v25 = vpop.eup %4320  ;;  %v3906_v9 = vadd.f32 %v7529_v39, %v3905_v13 }
 0x3b2   : > { %v7538_v29 = vpop.eup %4322  ;;  %v3903_v20 = vrot.slane %v3902_v12, 1  ;;  %v3961_v4 = vrot.slane %v3960_v51, 2  ;;  %v4010_v5 = vadd.f32 %v4009_v58, %v4008_v21 }
 0x3b3   : > { %v7540_v50 = vpop.eup %4324  ;;  %v3907_v7 = vadd.f32 %v7533_v59, %v3906_v9  ;;  %v3965_v14 = vadd.f32 %v7538_v29, %v7535_v25 }
 0x3b4   : > { %v7545_v3 = vpop.eup %4326  ;;  %v3962_v43 = vadd.f32 %v3961_v4, %v3960_v51  ;;  %v4011_v63 = vrot.slane %v4010_v5, 2  ;;  %v3904_v54 = vadd.f32 %v3903_v20, %v3902_v12 }
 0x3b5   : > { %v7547_v34 = vpop.eup %4328  ;;  %v3908_v2 = vrot.slane %v3907_v7, 4  ;;  %v3966_v16 = vadd.f32 %v7540_v50, %v3965_v14 }
 0x3b6   : > { %v7550_v1 = vpop.eup %4330  ;;  %v3963_v48 = vrot.slane %v3962_v43, 1  ;;  %v4012_v17 = vadd.f32 %v4011_v63, %v4010_v5 }
 0x3b7   : > { %v4333_v62 = vpop.eup %4332  ;;  %v3909_v15 = vadd.f32 %v3908_v2, %v3907_v7  ;;  %v3967_v23 = vadd.f32 %v7545_v3, %v3966_v16  ;;  %v4015_v37 = vadd.f32 %v7550_v1, %v7547_v34 }
 0x3b8   : > { %v3964_v18 = vadd.f32 %v3963_v48, %v3962_v43  ;;  %v4013_v41 = vrot.slane %v4012_v17, 1  ;;  %4005 = vst [vmem:[%s7384_s10 + $0xa8] sm:$0x1] %v4333_v62  ;;  %v4016_v24 = vsel %vm8631_vm2, %v4333_v62, 0.0 }
 0x3b9   : > { %v3910_v22 = vrot.slane %v3909_v15, 2  ;;  %v3968_v19 = vrot.slane %v3967_v23, 4  ;;  %v4017_v35 = vadd.f32 %v4016_v24, %v4015_v37 }
 0x3ba   : > { %v3974_v6 = vadd.f32 %v3964_v18, %v3904_v54  ;;  %v4014_v42 = vadd.f32 %v4013_v41, %v4012_v17 }
 0x3bb   : > { %v3911_v57 = vadd.f32 %v3910_v22, %v3909_v15  ;;  %v3969_v40 = vadd.f32 %v3968_v19, %v3967_v23  ;;  %v4018_v11 = vrot.slane %v4017_v35, 4 }
 0x3bc   : > { %v4024_v33 = vadd.f32 %v4014_v42, %v3974_v6 }
 0x3bd   : > { %v3912_v49 = vrot.slane %v3911_v57, 1  ;;  %v3970_v36 = vrot.slane %v3969_v40, 2  ;;  %v4019_v0 = vadd.f32 %v4018_v11, %v4017_v35 }
 0x3be   : > { %4334 = vrcp.f32 %v4024_v33 }
 0x3bf   : > { %v3971_v26 = vadd.f32 %v3970_v36, %v3969_v40  ;;  %v4020_v56 = vrot.slane %v4019_v0, 2  ;;  %v3913_v10 = vadd.f32 %v3912_v49, %v3911_v57  ;;  %v4093_v19 = vld [vmem:[%s7384_s10 + $0xa8] sm:$0x1] }
 0x3c1   : > { %v3972_v53 = vrot.slane %v3971_v26, 1  ;;  %v4021_v44 = vadd.f32 %v4020_v56, %v4019_v0 }
 0x3c3   : > { %v3973_v31 = vadd.f32 %v3972_v53, %v3971_v26  ;;  %v4022_v52 = vrot.slane %v4021_v44, 1 }
 0x3c5   : > { %v3975_v21 = vadd.f32 %v3973_v31, %v3913_v10  ;;  %v4023_v13 = vadd.f32 %v4022_v52, %v4021_v44 }
 0x3c7   : > { %v4025_v12 = vadd.f32 %v4023_v13, %v3975_v21 }
 0x3c8   : > { %v4335_v51 = vpop.eup %4334 }
 0x3c9   : > { %v4028_v58 = vmul.f32 %v4335_v51, %v4024_v33  ;;  %4336 = vrcp.f32 %v4025_v12 }
 0x3cb   : > { %v4030_v9 = vsub.f32 2.0, %v4028_v58 }
 0x3cd   : > { %v4032_v20 = vmul.f32 %v4335_v51, %v4030_v9 }
 0x3cf   : > { %v4034_v4 = vmul.f32 %v4032_v20, %v4024_v33 }
 0x3d1   : > { %v4036_v5 = vsub.f32 2.0, %v4034_v4 }
 0x3d3   : > { %v4337_v7 = vpop.eup %4336  ;;  %v4038_v14 = vmul.f32 %v4036_v5, %v4032_v20 }
 0x3d4   : > { %v4029_v43 = vmul.f32 %v4337_v7, %v4025_v12 }
 0x3d5   : > { %v4048_v63 = vmul.f32 %v7485_v28, %v4038_v14  ;;  %v4050_v2 = vmul.f32 %v7490_v32, %v4038_v14  ;;  %v4052_v16 = vmul.f32 %v7494_v46, %v4038_v14  ;;  %v4054_v54 = vmul.f32 %v7500_v8, %v4038_v14  ;;  %v4092_v32 = vld [vmem:[%s7384_s10 + $0xa0] sm:$0x1] }
 0x3d6   : > { %v4072_v48 = vmul.f32 %v7503_v47, %v4038_v14  ;;  %v4074_v17 = vmul.f32 %v7506_v61, %v4038_v14  ;;  %v4076_v62 = vmul.f32 %v7508_v60, %v4038_v14  ;;  %v4078_v28 = vmul.f32 %v7513_v27, %v4038_v14 }
 0x3d7   : > { %4056 = vst [vmem:[%s7384_s10] sm:$0xff] %v4048_v63  ;;  %4058 = vst [vmem:[%s7384_s10 + $0x10] sm:$0xff] %v4050_v2  ;;  %v4094_v46 = vmul.f32 %v7515_v30, %v4038_v14  ;;  %v4096_v8 = vmul.f32 %v7518_v38, %v4038_v14  ;;  %v4098_v47 = vmul.f32 %v4092_v32, %v4038_v14  ;;  %v4031_v15 = vsub.f32 2.0, %v4029_v43 }
 0x3d8   : > { %4060 = vst [vmem:[%s7384_s10 + $0x20] sm:$0xff] %v4052_v16  ;;  %4062 = vst [vmem:[%s7384_s10 + $0x30] sm:$0xff] %v4054_v54 }
 0x3d9   : > { %4080 = vst [vmem:[%s7384_s10 + $0x40] sm:$0xff] %v4072_v48  ;;  %4082 = vst [vmem:[%s7384_s10 + $0x50] sm:$0xff] %v4074_v17  ;;  %v4033_v61 = vmul.f32 %v4337_v7, %v4031_v15 }
 0x3da   : > { %4084 = vst [vmem:[%s7384_s10 + $0x60] sm:$0xff] %v4076_v62  ;;  %4086 = vst [vmem:[%s7384_s10 + $0x70] sm:$0xff] %v4078_v28 }
 0x3db   : > { %4100 = vst [vmem:[%s7384_s10 + $0x80] sm:$0xff] %v4094_v46  ;;  %4102 = vst [vmem:[%s7384_s10 + $0x90] sm:$0xff] %v4096_v8  ;;  %v4035_v60 = vmul.f32 %v4033_v61, %v4025_v12 }
 0x3dc   : > { %4104 = vst [vmem:[%s7384_s10 + $0xa0] sm:$0x1] %v4098_v47 }
 0x3dd   : > { %v4037_v27 = vsub.f32 2.0, %v4035_v60 }
 0x3df   : > { %v4039_v30 = vmul.f32 %v4037_v27, %v4033_v61 }
 0x3e1   : > { %v4049_v38 = vmul.f32 %v7523_v55, %v4039_v30  ;;  %v4051_v23 = vmul.f32 %v7527_v45, %v4039_v30  ;;  %v4053_v37 = vmul.f32 %v7529_v39, %v4039_v30  ;;  %v4055_v18 = vmul.f32 %v7533_v59, %v4039_v30 }
 0x3e2   : > { %v4073_v41 = vmul.f32 %v7535_v25, %v4039_v30  ;;  %v4075_v24 = vmul.f32 %v7538_v29, %v4039_v30  ;;  %v4077_v22 = vmul.f32 %v7540_v50, %v4039_v30  ;;  %v4079_v55 = vmul.f32 %v7545_v3, %v4039_v30 }
 0x3e3   : > { %4057 = vst [vmem:[%s7384_s10 + $0x8] sm:$0xff] %v4049_v38  ;;  %4059 = vst [vmem:[%s7384_s10 + $0x18] sm:$0xff] %v4051_v23  ;;  %v4095_v45 = vmul.f32 %v7547_v34, %v4039_v30  ;;  %v4097_v39 = vmul.f32 %v7550_v1, %v4039_v30  ;;  %v4099_v59 = vmul.f32 %v4093_v19, %v4039_v30 }
 0x3e4   : > { %4061 = vst [vmem:[%s7384_s10 + $0x28] sm:$0xff] %v4053_v37  ;;  %4063 = vst [vmem:[%s7384_s10 + $0x38] sm:$0xff] %v4055_v18 }
 0x3e5   : > { %4081 = vst [vmem:[%s7384_s10 + $0x48] sm:$0xff] %v4073_v41  ;;  %4083 = vst [vmem:[%s7384_s10 + $0x58] sm:$0xff] %v4075_v24 }
 0x3e6   : > { %4085 = vst [vmem:[%s7384_s10 + $0x68] sm:$0xff] %v4077_v22  ;;  %4087 = vst [vmem:[%s7384_s10 + $0x78] sm:$0xff] %v4079_v55 }
 0x3e7   : > { %4101 = vst [vmem:[%s7384_s10 + $0x88] sm:$0xff] %v4095_v45  ;;  %4103 = vst [vmem:[%s7384_s10 + $0x98] sm:$0xff] %v4097_v39 }
 0x3e8   : > { %4105 = vst [vmem:[%s7384_s10 + $0xa8] sm:$0x1] %v4099_v59 }
 0x3e9 PF: > { %s8632_s11 = sld [smem:[#allocation3_spill]] }
 0x3ef   : > { %s17_s24 = sadd.s32 1, %s8632_s11  }
 0x3f0   : > { %p14_p4 = scmp.ge.s32.totalorder %s17_s24, 4  }
 0x3f2   :  { %16 = sbr.rel (!%p14_p4) target bundleno = 8 (0x8), region = 82 }

</bundles_post_ra>
